<compile_context>
chip_gen: v5e
topology: v5e:2x2
jax: 0.10.0
libtpu: 0.0.40
codegen_flags: <defaults>
</compile_context>

<pallas_src>
import jax
import jax.numpy as jnp
from jax.experimental import pallas as pl
from jax.experimental.pallas import tpu as pltpu


def _round_up(x, m):
    return (x + m - 1) // m * m


# ---------------------------------------------------------------------------
# Pallas kernel: 3x3 conv (9 accumulating taps) + BN affine + ReLU, fused
# ---------------------------------------------------------------------------
def _conv3x3_bn_relu_kernel(x_ref, w_ref, scale_ref, shift_ref, o_ref):
    # x_ref:     (1, TH+2, WP+2, Cin)  bf16  spatially padded activation row-tile (halo incl.)
    # w_ref:     (9, Cin, CoutP)       bf16  tap-major weights (tap = dy*3 + dx)
    # scale_ref: (1, CoutP)            f32   gamma * rsqrt(running_var + eps)
    # shift_ref: (1, CoutP)            f32   (conv_bias - running_mean) * scale + beta
    # o_ref:     (1, TH, WP, CoutP)
    th = o_ref.shape[1]
    wp = o_ref.shape[2]
    coutp = o_ref.shape[3]
    cin = x_ref.shape[3]

    acc = jnp.zeros((th * wp, coutp), jnp.float32)
    for dy in range(3):
        for dx in range(3):
            # Shifted tap view of the padded tile; WP is a multiple of 16 so the
            # (TH, WP, Cin) -> (TH*WP, Cin) merge is layout-preserving.
            tap = x_ref[0, dy:dy + th, dx:dx + wp, :]
            tap = tap.reshape(th * wp, cin)
            acc = acc + jnp.dot(tap, w_ref[dy * 3 + dx],
                                preferred_element_type=jnp.float32)

    y = acc * scale_ref[...] + shift_ref[...]      # folded eval-mode BN (+ conv bias)
    y = jnp.maximum(y, 0.0)                        # ReLU on the f32 accumulator
    o_ref[...] = y.reshape(1, th, wp, coutp).astype(o_ref.dtype)


# ---------------------------------------------------------------------------
# Wrapper: tiling, padding, weight/BN folding, pallas_call
# ---------------------------------------------------------------------------
_VMEM_BUDGET_BYTES = 20 * 1024 * 1024   # conservative working-set cap (safe on v5e/v6e/v7x)


def _choose_tile_h(H, WP, Cin, CoutP, in_bytes, out_bytes):
    def vmem_est(th):
        a = 2 * (th + 2) * (WP + 2) * Cin * in_bytes      # double-buffered input tile
        w = 2 * 9 * Cin * CoutP * 2                       # bf16 weights (buffered)
        o = 2 * th * WP * CoutP * out_bytes               # double-buffered output tile
        acc = 2 * th * WP * CoutP * 4                     # f32 accumulator + temps
        return a + w + o + acc

    # Target ~1024 matmul rows per grid step (amortize per-step overhead), clamp to H,
    # then shrink until the estimated working set fits the VMEM budget.
    th = min(H, max(8, (1024 + WP - 1) // WP))
    th = max(1, th)
    while th > 1 and vmem_est(th) > _VMEM_BUDGET_BYTES:
        th -= 1
    return th


def conv3x3_bn_relu(x_nhwc, w_oihw, bias, gamma, beta, run_mean, run_var,
                    *, eps=1e-5, out_dtype=jnp.float32):
    N, H, W, Cin = x_nhwc.shape
    Cout = w_oihw.shape[0]
    CoutP = _round_up(Cout, 128)       # lane-dense output stores / MXU-aligned N dim
    WP = _round_up(W, 16)              # sublane-aligned reshapes (bf16 packing)

    in_bytes = 2                       # bf16 activations
    out_bytes = jnp.dtype(out_dtype).itemsize
    th = _choose_tile_h(H, WP, Cin, CoutP, in_bytes, out_bytes)
    nt = -(-H // th)
    HP = nt * th

    # Pad (1-px conv halo + alignment), cast to bf16.  ~1x XLA copy pass (no 9x im2col).
    xb = x_nhwc.astype(jnp.bfloat16)
    xp = jnp.pad(xb, ((0, 0), (1, 1 + HP - H), (1, 1 + WP - W), (0, 0)))
    # Overlapping row tiles with a 1-row halo on each side, flattened into the grid axis.
    xt = jnp.stack([xp[:, i * th:i * th + th + 2] for i in range(nt)], axis=1)
    xt = xt.reshape(N * nt, th + 2, WP + 2, Cin)

    # Weights: OIHW -> (dy, dx, Cin, Cout) -> (9, Cin, CoutP), tap-major, bf16.
    w_taps = jnp.transpose(w_oihw, (2, 3, 1, 0)).reshape(9, Cin, Cout)
    w_taps = jnp.pad(w_taps, ((0, 0), (0, 0), (0, CoutP - Cout))).astype(jnp.bfloat16)

    # Eval-mode BN + conv bias folded into a per-channel f32 affine.
    scale = gamma * jax.lax.rsqrt(run_var + eps)
    shift = (bias - run_mean) * scale + beta
    scale2 = jnp.pad(scale, (0, CoutP - Cout)).reshape(1, CoutP).astype(jnp.float32)
    shift2 = jnp.pad(shift, (0, CoutP - Cout)).reshape(1, CoutP).astype(jnp.float32)

    flops = 2 * (N * HP * WP) * (9 * Cin) * CoutP
    bytes_accessed = (xt.size * in_bytes + w_taps.size * 2
                      + (N * nt) * th * WP * CoutP * out_bytes)

    out = pl.pallas_call(
        _conv3x3_bn_relu_kernel,
        out_shape=jax.ShapeDtypeStruct((N * nt, th, WP, CoutP), out_dtype),
        grid=(N * nt,),
        in_specs=[
            pl.BlockSpec((1, th + 2, WP + 2, Cin), lambda i: (i, 0, 0, 0)),
            pl.BlockSpec((9, Cin, CoutP), lambda i: (0, 0, 0)),
            pl.BlockSpec((1, CoutP), lambda i: (0, 0)),
            pl.BlockSpec((1, CoutP), lambda i: (0, 0)),
        ],
        out_specs=pl.BlockSpec((1, th, WP, CoutP), lambda i: (i, 0, 0, 0)),
        compiler_params=pltpu.CompilerParams(
            dimension_semantics=("parallel",),
            vmem_limit_bytes=32 * 1024 * 1024,
        ),
        cost_estimate=pl.CostEstimate(
            flops=int(flops), transcendentals=0, bytes_accessed=int(bytes_accessed)),
    )(xt, w_taps, scale2, shift2)

    out = out.reshape(N, HP, WP, CoutP)[:, :H, :W, :Cout]
    return out


def double_conv(x_nchw, p):
    """Forward pass of DoubleConv. Input/output are NCHW like PyTorch."""
    x = jnp.transpose(x_nchw, (0, 2, 3, 1))            # NCHW -> NHWC (channels -> lanes)
    y = conv3x3_bn_relu(x, p["w1"], p["b1"], p["g1"], p["be1"], p["rm1"], p["rv1"],
                        out_dtype=jnp.bfloat16)        # bf16 intermediate activation
    # Dropout(p=0.5): eval-mode identity (see TODO above).
    y = conv3x3_bn_relu(y, p["w2"], p["b2"], p["g2"], p["be2"], p["rm2"], p["rv2"],
                        out_dtype=x_nchw.dtype)
    # Dropout(p=0.5): eval-mode identity.
    return jnp.transpose(y, (0, 3, 1, 2))              # NHWC -> NCHW


# ---------------------------------------------------------------------------
# Pure-JAX reference (for a correctness sanity check)
# ---------------------------------------------------------------------------
def _ref_double_conv(x_nchw, p, eps=1e-5):
    def conv(x, w, b):
        y = jax.lax.conv_general_dilated(
            x, w, window_strides=(1, 1), padding=((1, 1), (1, 1)),
            dimension_numbers=("NCHW", "OIHW", "NCHW"))
        return y + b[None, :, None, None]

    def bn(x, g, be, rm, rv):
        inv = jax.lax.rsqrt(rv + eps)
        return (x - rm[None, :, None, None]) * (g * inv)[None, :, None, None] \
               + be[None, :, None, None]

    y = jax.nn.relu(bn(conv(x_nchw, p["w1"], p["b1"]),
                       p["g1"], p["be1"], p["rm1"], p["rv1"]))
    y = jax.nn.relu(bn(conv(y, p["w2"], p["b2"]),
                       p["g2"], p["be2"], p["rm2"], p["rv2"]))
    return y


def init_params(key, in_channels, out_channels):
    ks = jax.random.split(key, 12)

    def u(k, shape, lo=-0.2, hi=0.2):
        return jax.random.uniform(k, shape, jnp.float32, lo, hi)

    return {
        # first conv + BN
        "w1": u(ks[0], (out_channels, in_channels, 3, 3)),
        "b1": u(ks[1], (out_channels,)),
        "g1": jax.random.uniform(ks[2], (out_channels,), jnp.float32, 0.8, 1.2),
        "be1": u(ks[3], (out_channels,)),
        "rm1": u(ks[4], (out_channels,)),
        "rv1": jax.random.uniform(ks[5], (out_channels,), jnp.float32, 0.5, 1.5),
        # second conv + BN
        "w2": u(ks[6], (out_channels, out_channels, 3, 3)),
        "b2": u(ks[7], (out_channels,)),
        "g2": jax.random.uniform(ks[8], (out_channels,), jnp.float32, 0.8, 1.2),
        "be2": u(ks[9], (out_channels,)),
        "rm2": u(ks[10], (out_channels,)),
        "rv2": jax.random.uniform(ks[11], (out_channels,), jnp.float32, 0.5, 1.5),
    }


if __name__ == "__main__":
    key = jax.random.PRNGKey(0)
    kx, kp = jax.random.split(key)

    N, Cin, Cout, H, W = 2, 4, 8, 16, 16
    x = jax.random.normal(kx, (N, Cin, H, W), jnp.float32)
    params = init_params(kp, Cin, Cout)

    fwd = jax.jit(double_conv)
    out = jax.block_until_ready(fwd(x, params))
    ref = jax.block_until_ready(_ref_double_conv(x, params))

    assert out.shape == (N, Cout, H, W)
    # bf16 operands + bf16 intermediate activation -> ~1% relative error budget.
    if not jnp.allclose(out.astype(jnp.float32), ref, atol=8e-2, rtol=8e-2):
        raise AssertionError(
            f"mismatch vs reference, max abs diff = {jnp.max(jnp.abs(out - ref))}")
    print("KERNEL_OK")
</pallas_src>

<mosaic_0001>
module attributes {stable_mosaic.version = 11 : i64} {
  func.func @_conv3x3_bn_relu_kernel(%arg0: i32, %arg1: memref<1x18x18x4xbf16, #tpu.memory_space<vmem>>, %arg2: memref<9x4x128xbf16, #tpu.memory_space<vmem>>, %arg3: memref<1x128xf32, #tpu.memory_space<vmem>>, %arg4: memref<1x128xf32, #tpu.memory_space<vmem>>, %arg5: memref<1x16x16x128xbf16, #tpu.memory_space<vmem>>) attributes {dimension_semantics = [#tpu.dimension_semantics<parallel>], iteration_bounds = array<i64: 2>, scalar_prefetch = 0 : i64, scratch_operands = 0 : i64, tpu.core_type = #tpu.core_type<tc>, window_params = [{transform_indices = @transform_0, window_bounds = array<i64: 1, 18, 18, 4>}, {pipeline_mode = #tpu.pipeline_mode<synchronous>, transform_indices = @transform_1, window_bounds = array<i64: 9, 4, 128>}, {pipeline_mode = #tpu.pipeline_mode<synchronous>, transform_indices = @transform_2, window_bounds = array<i64: 1, 128>}, {pipeline_mode = #tpu.pipeline_mode<synchronous>, transform_indices = @transform_3, window_bounds = array<i64: 1, 128>}, {transform_indices = @transform_4, window_bounds = array<i64: 1, 16, 16, 128>}]} {
    %cst = arith.constant 0.000000e+00 : f32
    %0 = vector.broadcast %cst : f32 to vector<256x128xf32>
    %c0 = arith.constant 0 : index
    %c0_0 = arith.constant 0 : index
    %c0_1 = arith.constant 0 : index
    %c0_2 = arith.constant 0 : index
    %1 = vector.load %arg1[%c0, %c0_0, %c0_1, %c0_2] : memref<1x18x18x4xbf16, #tpu.memory_space<vmem>>, vector<1x16x16x4xbf16>
    %2 = vector.shape_cast %1 : vector<1x16x16x4xbf16> to vector<16x16x4xbf16>
    %3 = vector.shape_cast %2 : vector<16x16x4xbf16> to vector<256x4xbf16>
    %c0_3 = arith.constant 0 : index
    %c0_4 = arith.constant 0 : index
    %c0_5 = arith.constant 0 : index
    %4 = vector.load %arg2[%c0_3, %c0_4, %c0_5] : memref<9x4x128xbf16, #tpu.memory_space<vmem>>, vector<1x4x128xbf16>
    %5 = vector.shape_cast %4 : vector<1x4x128xbf16> to vector<4x128xbf16>
    %cst_6 = arith.constant dense<0.000000e+00> : vector<256x128xf32>
    %6 = tpu.matmul %3, %5, %cst_6 {dimension_numbers = #tpu.dot_dimension_numbers<[1], [0], [0], [1], [0, 0, 1, 1], [], []>} : vector<256x4xbf16>, vector<4x128xbf16>, vector<256x128xf32> -> vector<256x128xf32>
    %7 = arith.addf %0, %6 : vector<256x128xf32>
    %c0_7 = arith.constant 0 : index
    %c0_8 = arith.constant 0 : index
    %c1 = arith.constant 1 : index
    %c0_9 = arith.constant 0 : index
    %8 = vector.load %arg1[%c0_7, %c0_8, %c1, %c0_9] : memref<1x18x18x4xbf16, #tpu.memory_space<vmem>>, vector<1x16x16x4xbf16>
    %9 = vector.shape_cast %8 : vector<1x16x16x4xbf16> to vector<16x16x4xbf16>
    %10 = vector.shape_cast %9 : vector<16x16x4xbf16> to vector<256x4xbf16>
    %c1_10 = arith.constant 1 : index
    %c0_11 = arith.constant 0 : index
    %c0_12 = arith.constant 0 : index
    %11 = vector.load %arg2[%c1_10, %c0_11, %c0_12] : memref<9x4x128xbf16, #tpu.memory_space<vmem>>, vector<1x4x128xbf16>
    %12 = vector.shape_cast %11 : vector<1x4x128xbf16> to vector<4x128xbf16>
    %cst_13 = arith.constant dense<0.000000e+00> : vector<256x128xf32>
    %13 = tpu.matmul %10, %12, %cst_13 {dimension_numbers = #tpu.dot_dimension_numbers<[1], [0], [0], [1], [0, 0, 1, 1], [], []>} : vector<256x4xbf16>, vector<4x128xbf16>, vector<256x128xf32> -> vector<256x128xf32>
    %14 = arith.addf %7, %13 : vector<256x128xf32>
    %c0_14 = arith.constant 0 : index
    %c0_15 = arith.constant 0 : index
    %c2 = arith.constant 2 : index
    %c0_16 = arith.constant 0 : index
    %15 = vector.load %arg1[%c0_14, %c0_15, %c2, %c0_16] : memref<1x18x18x4xbf16, #tpu.memory_space<vmem>>, vector<1x16x16x4xbf16>
    %16 = vector.shape_cast %15 : vector<1x16x16x4xbf16> to vector<16x16x4xbf16>
    %17 = vector.shape_cast %16 : vector<16x16x4xbf16> to vector<256x4xbf16>
    %c2_17 = arith.constant 2 : index
    %c0_18 = arith.constant 0 : index
    %c0_19 = arith.constant 0 : index
    %18 = vector.load %arg2[%c2_17, %c0_18, %c0_19] : memref<9x4x128xbf16, #tpu.memory_space<vmem>>, vector<1x4x128xbf16>
    %19 = vector.shape_cast %18 : vector<1x4x128xbf16> to vector<4x128xbf16>
    %cst_20 = arith.constant dense<0.000000e+00> : vector<256x128xf32>
    %20 = tpu.matmul %17, %19, %cst_20 {dimension_numbers = #tpu.dot_dimension_numbers<[1], [0], [0], [1], [0, 0, 1, 1], [], []>} : vector<256x4xbf16>, vector<4x128xbf16>, vector<256x128xf32> -> vector<256x128xf32>
    %21 = arith.addf %14, %20 : vector<256x128xf32>
    %c0_21 = arith.constant 0 : index
    %c1_22 = arith.constant 1 : index
    %c0_23 = arith.constant 0 : index
    %c0_24 = arith.constant 0 : index
    %22 = vector.load %arg1[%c0_21, %c1_22, %c0_23, %c0_24] : memref<1x18x18x4xbf16, #tpu.memory_space<vmem>>, vector<1x16x16x4xbf16>
    %23 = vector.shape_cast %22 : vector<1x16x16x4xbf16> to vector<16x16x4xbf16>
    %24 = vector.shape_cast %23 : vector<16x16x4xbf16> to vector<256x4xbf16>
    %c3 = arith.constant 3 : index
    %c0_25 = arith.constant 0 : index
    %c0_26 = arith.constant 0 : index
    %25 = vector.load %arg2[%c3, %c0_25, %c0_26] : memref<9x4x128xbf16, #tpu.memory_space<vmem>>, vector<1x4x128xbf16>
    %26 = vector.shape_cast %25 : vector<1x4x128xbf16> to vector<4x128xbf16>
    %cst_27 = arith.constant dense<0.000000e+00> : vector<256x128xf32>
    %27 = tpu.matmul %24, %26, %cst_27 {dimension_numbers = #tpu.dot_dimension_numbers<[1], [0], [0], [1], [0, 0, 1, 1], [], []>} : vector<256x4xbf16>, vector<4x128xbf16>, vector<256x128xf32> -> vector<256x128xf32>
    %28 = arith.addf %21, %27 : vector<256x128xf32>
    %c0_28 = arith.constant 0 : index
    %c1_29 = arith.constant 1 : index
    %c1_30 = arith.constant 1 : index
    %c0_31 = arith.constant 0 : index
    %29 = vector.load %arg1[%c0_28, %c1_29, %c1_30, %c0_31] : memref<1x18x18x4xbf16, #tpu.memory_space<vmem>>, vector<1x16x16x4xbf16>
    %30 = vector.shape_cast %29 : vector<1x16x16x4xbf16> to vector<16x16x4xbf16>
    %31 = vector.shape_cast %30 : vector<16x16x4xbf16> to vector<256x4xbf16>
    %c4 = arith.constant 4 : index
    %c0_32 = arith.constant 0 : index
    %c0_33 = arith.constant 0 : index
    %32 = vector.load %arg2[%c4, %c0_32, %c0_33] : memref<9x4x128xbf16, #tpu.memory_space<vmem>>, vector<1x4x128xbf16>
    %33 = vector.shape_cast %32 : vector<1x4x128xbf16> to vector<4x128xbf16>
    %cst_34 = arith.constant dense<0.000000e+00> : vector<256x128xf32>
    %34 = tpu.matmul %31, %33, %cst_34 {dimension_numbers = #tpu.dot_dimension_numbers<[1], [0], [0], [1], [0, 0, 1, 1], [], []>} : vector<256x4xbf16>, vector<4x128xbf16>, vector<256x128xf32> -> vector<256x128xf32>
    %35 = arith.addf %28, %34 : vector<256x128xf32>
    %c0_35 = arith.constant 0 : index
    %c1_36 = arith.constant 1 : index
    %c2_37 = arith.constant 2 : index
    %c0_38 = arith.constant 0 : index
    %36 = vector.load %arg1[%c0_35, %c1_36, %c2_37, %c0_38] : memref<1x18x18x4xbf16, #tpu.memory_space<vmem>>, vector<1x16x16x4xbf16>
    %37 = vector.shape_cast %36 : vector<1x16x16x4xbf16> to vector<16x16x4xbf16>
    %38 = vector.shape_cast %37 : vector<16x16x4xbf16> to vector<256x4xbf16>
    %c5 = arith.constant 5 : index
    %c0_39 = arith.constant 0 : index
    %c0_40 = arith.constant 0 : index
    %39 = vector.load %arg2[%c5, %c0_39, %c0_40] : memref<9x4x128xbf16, #tpu.memory_space<vmem>>, vector<1x4x128xbf16>
    %40 = vector.shape_cast %39 : vector<1x4x128xbf16> to vector<4x128xbf16>
    %cst_41 = arith.constant dense<0.000000e+00> : vector<256x128xf32>
    %41 = tpu.matmul %38, %40, %cst_41 {dimension_numbers = #tpu.dot_dimension_numbers<[1], [0], [0], [1], [0, 0, 1, 1], [], []>} : vector<256x4xbf16>, vector<4x128xbf16>, vector<256x128xf32> -> vector<256x128xf32>
    %42 = arith.addf %35, %41 : vector<256x128xf32>
    %c0_42 = arith.constant 0 : index
    %c2_43 = arith.constant 2 : index
    %c0_44 = arith.constant 0 : index
    %c0_45 = arith.constant 0 : index
    %43 = vector.load %arg1[%c0_42, %c2_43, %c0_44, %c0_45] : memref<1x18x18x4xbf16, #tpu.memory_space<vmem>>, vector<1x16x16x4xbf16>
    %44 = vector.shape_cast %43 : vector<1x16x16x4xbf16> to vector<16x16x4xbf16>
    %45 = vector.shape_cast %44 : vector<16x16x4xbf16> to vector<256x4xbf16>
    %c6 = arith.constant 6 : index
    %c0_46 = arith.constant 0 : index
    %c0_47 = arith.constant 0 : index
    %46 = vector.load %arg2[%c6, %c0_46, %c0_47] : memref<9x4x128xbf16, #tpu.memory_space<vmem>>, vector<1x4x128xbf16>
    %47 = vector.shape_cast %46 : vector<1x4x128xbf16> to vector<4x128xbf16>
    %cst_48 = arith.constant dense<0.000000e+00> : vector<256x128xf32>
    %48 = tpu.matmul %45, %47, %cst_48 {dimension_numbers = #tpu.dot_dimension_numbers<[1], [0], [0], [1], [0, 0, 1, 1], [], []>} : vector<256x4xbf16>, vector<4x128xbf16>, vector<256x128xf32> -> vector<256x128xf32>
    %49 = arith.addf %42, %48 : vector<256x128xf32>
    %c0_49 = arith.constant 0 : index
    %c2_50 = arith.constant 2 : index
    %c1_51 = arith.constant 1 : index
    %c0_52 = arith.constant 0 : index
    %50 = vector.load %arg1[%c0_49, %c2_50, %c1_51, %c0_52] : memref<1x18x18x4xbf16, #tpu.memory_space<vmem>>, vector<1x16x16x4xbf16>
    %51 = vector.shape_cast %50 : vector<1x16x16x4xbf16> to vector<16x16x4xbf16>
    %52 = vector.shape_cast %51 : vector<16x16x4xbf16> to vector<256x4xbf16>
    %c7 = arith.constant 7 : index
    %c0_53 = arith.constant 0 : index
    %c0_54 = arith.constant 0 : index
    %53 = vector.load %arg2[%c7, %c0_53, %c0_54] : memref<9x4x128xbf16, #tpu.memory_space<vmem>>, vector<1x4x128xbf16>
    %54 = vector.shape_cast %53 : vector<1x4x128xbf16> to vector<4x128xbf16>
    %cst_55 = arith.constant dense<0.000000e+00> : vector<256x128xf32>
    %55 = tpu.matmul %52, %54, %cst_55 {dimension_numbers = #tpu.dot_dimension_numbers<[1], [0], [0], [1], [0, 0, 1, 1], [], []>} : vector<256x4xbf16>, vector<4x128xbf16>, vector<256x128xf32> -> vector<256x128xf32>
    %56 = arith.addf %49, %55 : vector<256x128xf32>
    %c0_56 = arith.constant 0 : index
    %c2_57 = arith.constant 2 : index
    %c2_58 = arith.constant 2 : index
    %c0_59 = arith.constant 0 : index
    %57 = vector.load %arg1[%c0_56, %c2_57, %c2_58, %c0_59] : memref<1x18x18x4xbf16, #tpu.memory_space<vmem>>, vector<1x16x16x4xbf16>
    %58 = vector.shape_cast %57 : vector<1x16x16x4xbf16> to vector<16x16x4xbf16>
    %59 = vector.shape_cast %58 : vector<16x16x4xbf16> to vector<256x4xbf16>
    %c8 = arith.constant 8 : index
    %c0_60 = arith.constant 0 : index
    %c0_61 = arith.constant 0 : index
    %60 = vector.load %arg2[%c8, %c0_60, %c0_61] : memref<9x4x128xbf16, #tpu.memory_space<vmem>>, vector<1x4x128xbf16>
    %61 = vector.shape_cast %60 : vector<1x4x128xbf16> to vector<4x128xbf16>
    %cst_62 = arith.constant dense<0.000000e+00> : vector<256x128xf32>
    %62 = tpu.matmul %59, %61, %cst_62 {dimension_numbers = #tpu.dot_dimension_numbers<[1], [0], [0], [1], [0, 0, 1, 1], [], []>} : vector<256x4xbf16>, vector<4x128xbf16>, vector<256x128xf32> -> vector<256x128xf32>
    %63 = arith.addf %56, %62 : vector<256x128xf32>
    %c0_63 = arith.constant 0 : index
    %c0_64 = arith.constant 0 : index
    %64 = vector.load %arg3[%c0_63, %c0_64] : memref<1x128xf32, #tpu.memory_space<vmem>>, vector<1x128xf32>
    %65 = vector.broadcast %64 : vector<1x128xf32> to vector<256x128xf32>
    %66 = arith.mulf %63, %65 : vector<256x128xf32>
    %c0_65 = arith.constant 0 : index
    %c0_66 = arith.constant 0 : index
    %67 = vector.load %arg4[%c0_65, %c0_66] : memref<1x128xf32, #tpu.memory_space<vmem>>, vector<1x128xf32>
    %68 = vector.broadcast %67 : vector<1x128xf32> to vector<256x128xf32>
    %69 = arith.addf %66, %68 : vector<256x128xf32>
    %cst_67 = arith.constant 0.000000e+00 : f32
    %70 = vector.broadcast %cst_67 : f32 to vector<256x128xf32>
    %71 = arith.maximumf %69, %70 : vector<256x128xf32>
    %72 = vector.shape_cast %71 : vector<256x128xf32> to vector<1x16x16x128xf32>
    %73 = arith.truncf %72 : vector<1x16x16x128xf32> to vector<1x16x16x128xbf16>
    %c0_68 = arith.constant 0 : index
    %c0_69 = arith.constant 0 : index
    %c0_70 = arith.constant 0 : index
    %c0_71 = arith.constant 0 : index
    %74 = vector.load %arg5[%c0_68, %c0_69, %c0_70, %c0_71] : memref<1x16x16x128xbf16, #tpu.memory_space<vmem>>, vector<1x16x16x128xbf16>
    tpu.vector_store %arg5[%c0_68, %c0_69, %c0_70, %c0_71], %73 {strides = array<i32>} : memref<1x16x16x128xbf16, #tpu.memory_space<vmem>>, vector<1x16x16x128xbf16>,
    return
  }
  func.func @transform_0(%arg0: i32) -> (i32, i32, i32, i32) {
    %c0_i32 = arith.constant 0 : i32
    %c0_i32_0 = arith.constant 0 : i32
    %c0_i32_1 = arith.constant 0 : i32
    %c0_i32_2 = arith.constant 0 : i32
    return %arg0, %c0_i32, %c0_i32_0, %c0_i32_1 : i32, i32, i32, i32
  }
  func.func @transform_1(%arg0: i32) -> (i32, i32, i32) {
    %c0_i32 = arith.constant 0 : i32
    %c0_i32_0 = arith.constant 0 : i32
    %c0_i32_1 = arith.constant 0 : i32
    %c0_i32_2 = arith.constant 0 : i32
    return %c0_i32, %c0_i32_0, %c0_i32_1 : i32, i32, i32
  }
  func.func @transform_2(%arg0: i32) -> (i32, i32) {
    %c0_i32 = arith.constant 0 : i32
    %c0_i32_0 = arith.constant 0 : i32
    %c0_i32_1 = arith.constant 0 : i32
    return %c0_i32, %c0_i32_0 : i32, i32
  }
  func.func @transform_3(%arg0: i32) -> (i32, i32) {
    %c0_i32 = arith.constant 0 : i32
    %c0_i32_0 = arith.constant 0 : i32
    %c0_i32_1 = arith.constant 0 : i32
    return %c0_i32, %c0_i32_0 : i32, i32
  }
  func.func @transform_4(%arg0: i32) -> (i32, i32, i32, i32) {
    %c0_i32 = arith.constant 0 : i32
    %c0_i32_0 = arith.constant 0 : i32
    %c0_i32_1 = arith.constant 0 : i32
    %c0_i32_2 = arith.constant 0 : i32
    return %arg0, %c0_i32, %c0_i32_0, %c0_i32_1 : i32, i32, i32, i32
  }
}

module attributes {stable_mosaic.version = 11 : i64} {
  func.func @_conv3x3_bn_relu_kernel(%arg0: i32, %arg1: memref<1x18x18x8xbf16, #tpu.memory_space<vmem>>, %arg2: memref<9x8x128xbf16, #tpu.memory_space<vmem>>, %arg3: memref<1x128xf32, #tpu.memory_space<vmem>>, %arg4: memref<1x128xf32, #tpu.memory_space<vmem>>, %arg5: memref<1x16x16x128xf32, #tpu.memory_space<vmem>>) attributes {dimension_semantics = [#tpu.dimension_semantics<parallel>], iteration_bounds = array<i64: 2>, scalar_prefetch = 0 : i64, scratch_operands = 0 : i64, tpu.core_type = #tpu.core_type<tc>, window_params = [{transform_indices = @transform_0, window_bounds = array<i64: 1, 18, 18, 8>}, {pipeline_mode = #tpu.pipeline_mode<synchronous>, transform_indices = @transform_1, window_bounds = array<i64: 9, 8, 128>}, {pipeline_mode = #tpu.pipeline_mode<synchronous>, transform_indices = @transform_2, window_bounds = array<i64: 1, 128>}, {pipeline_mode = #tpu.pipeline_mode<synchronous>, transform_indices = @transform_3, window_bounds = array<i64: 1, 128>}, {transform_indices = @transform_4, window_bounds = array<i64: 1, 16, 16, 128>}]} {
    %cst = arith.constant 0.000000e+00 : f32
    %0 = vector.broadcast %cst : f32 to vector<256x128xf32>
    %c0 = arith.constant 0 : index
    %c0_0 = arith.constant 0 : index
    %c0_1 = arith.constant 0 : index
    %c0_2 = arith.constant 0 : index
    %1 = vector.load %arg1[%c0, %c0_0, %c0_1, %c0_2] : memref<1x18x18x8xbf16, #tpu.memory_space<vmem>>, vector<1x16x16x8xbf16>
    %2 = vector.shape_cast %1 : vector<1x16x16x8xbf16> to vector<16x16x8xbf16>
    %3 = vector.shape_cast %2 : vector<16x16x8xbf16> to vector<256x8xbf16>
    %c0_3 = arith.constant 0 : index
    %c0_4 = arith.constant 0 : index
    %c0_5 = arith.constant 0 : index
    %4 = vector.load %arg2[%c0_3, %c0_4, %c0_5] : memref<9x8x128xbf16, #tpu.memory_space<vmem>>, vector<1x8x128xbf16>
    %5 = vector.shape_cast %4 : vector<1x8x128xbf16> to vector<8x128xbf16>
    %cst_6 = arith.constant dense<0.000000e+00> : vector<256x128xf32>
    %6 = tpu.matmul %3, %5, %cst_6 {dimension_numbers = #tpu.dot_dimension_numbers<[1], [0], [0], [1], [0, 0, 1, 1], [], []>} : vector<256x8xbf16>, vector<8x128xbf16>, vector<256x128xf32> -> vector<256x128xf32>
    %7 = arith.addf %0, %6 : vector<256x128xf32>
    %c0_7 = arith.constant 0 : index
    %c0_8 = arith.constant 0 : index
    %c1 = arith.constant 1 : index
    %c0_9 = arith.constant 0 : index
    %8 = vector.load %arg1[%c0_7, %c0_8, %c1, %c0_9] : memref<1x18x18x8xbf16, #tpu.memory_space<vmem>>, vector<1x16x16x8xbf16>
    %9 = vector.shape_cast %8 : vector<1x16x16x8xbf16> to vector<16x16x8xbf16>
    %10 = vector.shape_cast %9 : vector<16x16x8xbf16> to vector<256x8xbf16>
    %c1_10 = arith.constant 1 : index
    %c0_11 = arith.constant 0 : index
    %c0_12 = arith.constant 0 : index
    %11 = vector.load %arg2[%c1_10, %c0_11, %c0_12] : memref<9x8x128xbf16, #tpu.memory_space<vmem>>, vector<1x8x128xbf16>
    %12 = vector.shape_cast %11 : vector<1x8x128xbf16> to vector<8x128xbf16>
    %cst_13 = arith.constant dense<0.000000e+00> : vector<256x128xf32>
    %13 = tpu.matmul %10, %12, %cst_13 {dimension_numbers = #tpu.dot_dimension_numbers<[1], [0], [0], [1], [0, 0, 1, 1], [], []>} : vector<256x8xbf16>, vector<8x128xbf16>, vector<256x128xf32> -> vector<256x128xf32>
    %14 = arith.addf %7, %13 : vector<256x128xf32>
    %c0_14 = arith.constant 0 : index
    %c0_15 = arith.constant 0 : index
    %c2 = arith.constant 2 : index
    %c0_16 = arith.constant 0 : index
    %15 = vector.load %arg1[%c0_14, %c0_15, %c2, %c0_16] : memref<1x18x18x8xbf16, #tpu.memory_space<vmem>>, vector<1x16x16x8xbf16>
    %16 = vector.shape_cast %15 : vector<1x16x16x8xbf16> to vector<16x16x8xbf16>
    %17 = vector.shape_cast %16 : vector<16x16x8xbf16> to vector<256x8xbf16>
    %c2_17 = arith.constant 2 : index
    %c0_18 = arith.constant 0 : index
    %c0_19 = arith.constant 0 : index
    %18 = vector.load %arg2[%c2_17, %c0_18, %c0_19] : memref<9x8x128xbf16, #tpu.memory_space<vmem>>, vector<1x8x128xbf16>
    %19 = vector.shape_cast %18 : vector<1x8x128xbf16> to vector<8x128xbf16>
    %cst_20 = arith.constant dense<0.000000e+00> : vector<256x128xf32>
    %20 = tpu.matmul %17, %19, %cst_20 {dimension_numbers = #tpu.dot_dimension_numbers<[1], [0], [0], [1], [0, 0, 1, 1], [], []>} : vector<256x8xbf16>, vector<8x128xbf16>, vector<256x128xf32> -> vector<256x128xf32>
    %21 = arith.addf %14, %20 : vector<256x128xf32>
    %c0_21 = arith.constant 0 : index
    %c1_22 = arith.constant 1 : index
    %c0_23 = arith.constant 0 : index
    %c0_24 = arith.constant 0 : index
    %22 = vector.load %arg1[%c0_21, %c1_22, %c0_23, %c0_24] : memref<1x18x18x8xbf16, #tpu.memory_space<vmem>>, vector<1x16x16x8xbf16>
    %23 = vector.shape_cast %22 : vector<1x16x16x8xbf16> to vector<16x16x8xbf16>
    %24 = vector.shape_cast %23 : vector<16x16x8xbf16> to vector<256x8xbf16>
    %c3 = arith.constant 3 : index
    %c0_25 = arith.constant 0 : index
    %c0_26 = arith.constant 0 : index
    %25 = vector.load %arg2[%c3, %c0_25, %c0_26] : memref<9x8x128xbf16, #tpu.memory_space<vmem>>, vector<1x8x128xbf16>
    %26 = vector.shape_cast %25 : vector<1x8x128xbf16> to vector<8x128xbf16>
    %cst_27 = arith.constant dense<0.000000e+00> : vector<256x128xf32>
    %27 = tpu.matmul %24, %26, %cst_27 {dimension_numbers = #tpu.dot_dimension_numbers<[1], [0], [0], [1], [0, 0, 1, 1], [], []>} : vector<256x8xbf16>, vector<8x128xbf16>, vector<256x128xf32> -> vector<256x128xf32>
    %28 = arith.addf %21, %27 : vector<256x128xf32>
    %c0_28 = arith.constant 0 : index
    %c1_29 = arith.constant 1 : index
    %c1_30 = arith.constant 1 : index
    %c0_31 = arith.constant 0 : index
    %29 = vector.load %arg1[%c0_28, %c1_29, %c1_30, %c0_31] : memref<1x18x18x8xbf16, #tpu.memory_space<vmem>>, vector<1x16x16x8xbf16>
    %30 = vector.shape_cast %29 : vector<1x16x16x8xbf16> to vector<16x16x8xbf16>
    %31 = vector.shape_cast %30 : vector<16x16x8xbf16> to vector<256x8xbf16>
    %c4 = arith.constant 4 : index
    %c0_32 = arith.constant 0 : index
    %c0_33 = arith.constant 0 : index
    %32 = vector.load %arg2[%c4, %c0_32, %c0_33] : memref<9x8x128xbf16, #tpu.memory_space<vmem>>, vector<1x8x128xbf16>
    %33 = vector.shape_cast %32 : vector<1x8x128xbf16> to vector<8x128xbf16>
    %cst_34 = arith.constant dense<0.000000e+00> : vector<256x128xf32>
    %34 = tpu.matmul %31, %33, %cst_34 {dimension_numbers = #tpu.dot_dimension_numbers<[1], [0], [0], [1], [0, 0, 1, 1], [], []>} : vector<256x8xbf16>, vector<8x128xbf16>, vector<256x128xf32> -> vector<256x128xf32>
    %35 = arith.addf %28, %34 : vector<256x128xf32>
    %c0_35 = arith.constant 0 : index
    %c1_36 = arith.constant 1 : index
    %c2_37 = arith.constant 2 : index
    %c0_38 = arith.constant 0 : index
    %36 = vector.load %arg1[%c0_35, %c1_36, %c2_37, %c0_38] : memref<1x18x18x8xbf16, #tpu.memory_space<vmem>>, vector<1x16x16x8xbf16>
    %37 = vector.shape_cast %36 : vector<1x16x16x8xbf16> to vector<16x16x8xbf16>
    %38 = vector.shape_cast %37 : vector<16x16x8xbf16> to vector<256x8xbf16>
    %c5 = arith.constant 5 : index
    %c0_39 = arith.constant 0 : index
    %c0_40 = arith.constant 0 : index
    %39 = vector.load %arg2[%c5, %c0_39, %c0_40] : memref<9x8x128xbf16, #tpu.memory_space<vmem>>, vector<1x8x128xbf16>
    %40 = vector.shape_cast %39 : vector<1x8x128xbf16> to vector<8x128xbf16>
    %cst_41 = arith.constant dense<0.000000e+00> : vector<256x128xf32>
    %41 = tpu.matmul %38, %40, %cst_41 {dimension_numbers = #tpu.dot_dimension_numbers<[1], [0], [0], [1], [0, 0, 1, 1], [], []>} : vector<256x8xbf16>, vector<8x128xbf16>, vector<256x128xf32> -> vector<256x128xf32>
    %42 = arith.addf %35, %41 : vector<256x128xf32>
    %c0_42 = arith.constant 0 : index
    %c2_43 = arith.constant 2 : index
    %c0_44 = arith.constant 0 : index
    %c0_45 = arith.constant 0 : index
    %43 = vector.load %arg1[%c0_42, %c2_43, %c0_44, %c0_45] : memref<1x18x18x8xbf16, #tpu.memory_space<vmem>>, vector<1x16x16x8xbf16>
    %44 = vector.shape_cast %43 : vector<1x16x16x8xbf16> to vector<16x16x8xbf16>
    %45 = vector.shape_cast %44 : vector<16x16x8xbf16> to vector<256x8xbf16>
    %c6 = arith.constant 6 : index
    %c0_46 = arith.constant 0 : index
    %c0_47 = arith.constant 0 : index
    %46 = vector.load %arg2[%c6, %c0_46, %c0_47] : memref<9x8x128xbf16, #tpu.memory_space<vmem>>, vector<1x8x128xbf16>
    %47 = vector.shape_cast %46 : vector<1x8x128xbf16> to vector<8x128xbf16>
    %cst_48 = arith.constant dense<0.000000e+00> : vector<256x128xf32>
    %48 = tpu.matmul %45, %47, %cst_48 {dimension_numbers = #tpu.dot_dimension_numbers<[1], [0], [0], [1], [0, 0, 1, 1], [], []>} : vector<256x8xbf16>, vector<8x128xbf16>, vector<256x128xf32> -> vector<256x128xf32>
    %49 = arith.addf %42, %48 : vector<256x128xf32>
    %c0_49 = arith.constant 0 : index
    %c2_50 = arith.constant 2 : index
    %c1_51 = arith.constant 1 : index
    %c0_52 = arith.constant 0 : index
    %50 = vector.load %arg1[%c0_49, %c2_50, %c1_51, %c0_52] : memref<1x18x18x8xbf16, #tpu.memory_space<vmem>>, vector<1x16x16x8xbf16>
    %51 = vector.shape_cast %50 : vector<1x16x16x8xbf16> to vector<16x16x8xbf16>
    %52 = vector.shape_cast %51 : vector<16x16x8xbf16> to vector<256x8xbf16>
    %c7 = arith.constant 7 : index
    %c0_53 = arith.constant 0 : index
    %c0_54 = arith.constant 0 : index
    %53 = vector.load %arg2[%c7, %c0_53, %c0_54] : memref<9x8x128xbf16, #tpu.memory_space<vmem>>, vector<1x8x128xbf16>
    %54 = vector.shape_cast %53 : vector<1x8x128xbf16> to vector<8x128xbf16>
    %cst_55 = arith.constant dense<0.000000e+00> : vector<256x128xf32>
    %55 = tpu.matmul %52, %54, %cst_55 {dimension_numbers = #tpu.dot_dimension_numbers<[1], [0], [0], [1], [0, 0, 1, 1], [], []>} : vector<256x8xbf16>, vector<8x128xbf16>, vector<256x128xf32> -> vector<256x128xf32>
    %56 = arith.addf %49, %55 : vector<256x128xf32>
    %c0_56 = arith.constant 0 : index
    %c2_57 = arith.constant 2 : index
    %c2_58 = arith.constant 2 : index
    %c0_59 = arith.constant 0 : index
    %57 = vector.load %arg1[%c0_56, %c2_57, %c2_58, %c0_59] : memref<1x18x18x8xbf16, #tpu.memory_space<vmem>>, vector<1x16x16x8xbf16>
    %58 = vector.shape_cast %57 : vector<1x16x16x8xbf16> to vector<16x16x8xbf16>
    %59 = vector.shape_cast %58 : vector<16x16x8xbf16> to vector<256x8xbf16>
    %c8 = arith.constant 8 : index
    %c0_60 = arith.constant 0 : index
    %c0_61 = arith.constant 0 : index
    %60 = vector.load %arg2[%c8, %c0_60, %c0_61] : memref<9x8x128xbf16, #tpu.memory_space<vmem>>, vector<1x8x128xbf16>
    %61 = vector.shape_cast %60 : vector<1x8x128xbf16> to vector<8x128xbf16>
    %cst_62 = arith.constant dense<0.000000e+00> : vector<256x128xf32>
    %62 = tpu.matmul %59, %61, %cst_62 {dimension_numbers = #tpu.dot_dimension_numbers<[1], [0], [0], [1], [0, 0, 1, 1], [], []>} : vector<256x8xbf16>, vector<8x128xbf16>, vector<256x128xf32> -> vector<256x128xf32>
    %63 = arith.addf %56, %62 : vector<256x128xf32>
    %c0_63 = arith.constant 0 : index
    %c0_64 = arith.constant 0 : index
    %64 = vector.load %arg3[%c0_63, %c0_64] : memref<1x128xf32, #tpu.memory_space<vmem>>, vector<1x128xf32>
    %65 = vector.broadcast %64 : vector<1x128xf32> to vector<256x128xf32>
    %66 = arith.mulf %63, %65 : vector<256x128xf32>
    %c0_65 = arith.constant 0 : index
    %c0_66 = arith.constant 0 : index
    %67 = vector.load %arg4[%c0_65, %c0_66] : memref<1x128xf32, #tpu.memory_space<vmem>>, vector<1x128xf32>
    %68 = vector.broadcast %67 : vector<1x128xf32> to vector<256x128xf32>
    %69 = arith.addf %66, %68 : vector<256x128xf32>
    %cst_67 = arith.constant 0.000000e+00 : f32
    %70 = vector.broadcast %cst_67 : f32 to vector<256x128xf32>
    %71 = arith.maximumf %69, %70 : vector<256x128xf32>
    %72 = vector.shape_cast %71 : vector<256x128xf32> to vector<1x16x16x128xf32>
    %c0_68 = arith.constant 0 : index
    %c0_69 = arith.constant 0 : index
    %c0_70 = arith.constant 0 : index
    %c0_71 = arith.constant 0 : index
    %73 = vector.load %arg5[%c0_68, %c0_69, %c0_70, %c0_71] : memref<1x16x16x128xf32, #tpu.memory_space<vmem>>, vector<1x16x16x128xf32>
    tpu.vector_store %arg5[%c0_68, %c0_69, %c0_70, %c0_71], %72 {strides = array<i32>} : memref<1x16x16x128xf32, #tpu.memory_space<vmem>>, vector<1x16x16x128xf32>,
    return
  }
  func.func @transform_0(%arg0: i32) -> (i32, i32, i32, i32) {
    %c0_i32 = arith.constant 0 : i32
    %c0_i32_0 = arith.constant 0 : i32
    %c0_i32_1 = arith.constant 0 : i32
    %c0_i32_2 = arith.constant 0 : i32
    return %arg0, %c0_i32, %c0_i32_0, %c0_i32_1 : i32, i32, i32, i32
  }
  func.func @transform_1(%arg0: i32) -> (i32, i32, i32) {
    %c0_i32 = arith.constant 0 : i32
    %c0_i32_0 = arith.constant 0 : i32
    %c0_i32_1 = arith.constant 0 : i32
    %c0_i32_2 = arith.constant 0 : i32
    return %c0_i32, %c0_i32_0, %c0_i32_1 : i32, i32, i32
  }
  func.func @transform_2(%arg0: i32) -> (i32, i32) {
    %c0_i32 = arith.constant 0 : i32
    %c0_i32_0 = arith.constant 0 : i32
    %c0_i32_1 = arith.constant 0 : i32
    return %c0_i32, %c0_i32_0 : i32, i32
  }
  func.func @transform_3(%arg0: i32) -> (i32, i32) {
    %c0_i32 = arith.constant 0 : i32
    %c0_i32_0 = arith.constant 0 : i32
    %c0_i32_1 = arith.constant 0 : i32
    return %c0_i32, %c0_i32_0 : i32, i32
  }
  func.func @transform_4(%arg0: i32) -> (i32, i32, i32, i32) {
    %c0_i32 = arith.constant 0 : i32
    %c0_i32_0 = arith.constant 0 : i32
    %c0_i32_1 = arith.constant 0 : i32
    %c0_i32_2 = arith.constant 0 : i32
    return %arg0, %c0_i32, %c0_i32_0, %c0_i32_1 : i32, i32, i32, i32
  }
}

</mosaic_0001>

<bundles_post_ra>
// kernel: double_conv.3
= control target key start
LH: loop header
LB: loop body
LE: loop exit
PB: predicated region body
PF: predicated region fallthrough
CT: control target
= control target key end

     0   :  { %s5043_s15 = smov 0   ;;  %s6490_s0 = inlined_call_operand.vmem [shape: bf16[2,18,18,8], index: 0, kind: input, shape index: {}]   ;;  %s6491_s1 = inlined_call_operand.vmem [shape: bf16[9,8,128], index: 1, kind: input, shape index: {}]   ;;  %s6492_s2 = inlined_call_operand.vmem [shape: f32[1,128], index: 2, kind: input, shape index: {}]   ;;  %s6493_s3 = inlined_call_operand.vmem [shape: f32[1,128], index: 3, kind: input, shape index: {}]   ;;  %s6494_s4 = inlined_call_operand.vmem [shape: f32[2,16,16,128], index: 4, kind: output, shape index: {}]  }
   0x1 LB: > { %s4301_s16 = sadd.s32 4294967295, %s5016_s15   ;;  %p4305_p0 = scmp.ge.s32.totalorder %s5016_s15, 1  ;;  %s5016_s15 = sphi %s5043_s15, %s14_s15  }
   0x2   : > { %p162_p1 = scmp.lt.s32.totalorder %s5016_s15, 3 }
   0x4   : > { %p163_p2 = pnand %p4305_p0, %p162_p1 }
   0x6   : > { %166 = sbr.rel (%p163_p2) target bundleno = 760 (0x2f8), region = 36 }
   0xb   : > { %v4309_v0 = vld [vmem:[%s6491_s1 + $0x4] sm:$0xf]  ;;  %vm734_vm0 = vcmask 1043456   ;;  %p188_p3 = scmp.lt.s32.totalorder %s4301_s16, 1  ;;  %v4422_v2 = vld [vmem:[%s6491_s1 + $0x8] sm:$0xf] }
   0xc   : > { %v736_v1 = vsel %vm734_vm0, %v4309_v0, 0  ;;  %v1309_v3 = vsel %vm734_vm0, %v4422_v2, 0  ;;  %v4471_v4 = vld [vmem:[%s6491_s1 + $0xc] sm:$0xf]  ;;  %v231_v5 = vld [vmem:[%s6491_s1] sm:$0xf] }
   0xd   : > { %4944 = vmatpush.bf16.msra.mxu1 %v736_v1  ;;  %4945 = vmatpush.bf16.msra.mxu2 %v736_v1  ;;  %s6506_s16 = smov (!%p188_p3, %s4301_s16), 1  ;;  %v4600_v6 = vld [vmem:[%s6491_s1 + $0x10] sm:$0xf]  ;;  %v1596_v7 = vsel %vm734_vm0, %v4471_v4, 0  ;;  %v956_v8 = vsel %vm734_vm0, %v231_v5, 0  ;;  %vm685_vm4 = vcmask 64512  }
   0xe   : > { %4946 = vmatpush.bf16.msra.mxu3 %v736_v1  ;;  %745 = vmatpush.bf16.msra.mxu0 %v736_v1  ;;  %s4947_s27 = smul.u32 216, %s6506_s16  ;;  %v2250_v9 = vsel %vm734_vm0, %v4600_v6, 0  ;;  %vm248_vm1 = vsmask.f32 3328  ;;  %vm249_vm2 = vsmask.f32 7440 }
   0xf   : > { %vm5089_vm3 = vmor %vm248_vm1, %vm249_vm2  ;;  %vm1095_vm5 = vcmask 1042432   ;;  %vm1096_vm6 = vcmask 1046532   ;;  %s4895_s19 = sshll.u32 %s6506_s16, 8 }
  0x10   : > { %s5077_s30 = scalar_lea.vmem %s6490_s0, %s4947_s27  ;;  %vm5263_vm7 = vmor %vm1095_vm5, %vm1096_vm6  ;;  %s6148_s22 = scalar_lea.vmem %s6494_s4, %s4895_s19 }
  0x11   : > { %1318 = vmatpush.bf16.msrb.mxu2 %v1309_v3  ;;  %965 = vmatpush.bf16.msrb.mxu1 %v956_v8  ;;  %v207_v10 = vld [vmem:[%s5077_s30 + $0x30] sm:$0xf]  ;;  %v208_v11 = vld [vmem:[%s5077_s30 + $0x34] sm:$0xf]  ;;  %v236_v12 = vld [vmem:[%s5077_s30 + $0x38] sm:$0x1] }
  0x12   : > { %1605 = vmatpush.bf16.msrb.mxu3 %v1596_v7  ;;  %2259 = vmatpush.bf16.msrb.mxu0 %v2250_v9  ;;  %v348_v13 = vshrl.u32 %v207_v10, 16  ;;  %v351_v14 = vshll.u32 %v207_v10, 16  ;;  %v357_v15 = vshll.u32 %v208_v11, 16  ;;  %v361_v16 = vshrl.u32 %v208_v11, 16  ;;  %v215_v17 = vld [vmem:[%s5077_s30 + $0x60] sm:$0xf] }
  0x13   : > { %v367_v18 = vshll.u32 %v236_v12, 16  ;;  %v216_v19 = vld [vmem:[%s5077_s30 + $0x64] sm:$0xf]  ;;  %v240_v20 = vld [vmem:[%s5077_s30 + $0x68] sm:$0x1]  ;;  %v444_v21 = vshrl.u32 %v215_v17, 16 }
  0x14   : > { %v350_v22 = vrot.slane %v348_v13, 4  ;;  %v353_v23 = vrot.slane %v351_v14, 5  ;;  %v359_v24 = vrot.slane %v357_v15, 5  ;;  %v363_v25 = vrot.slane %v361_v16, 4  ;;  %v223_v26 = vld [vmem:[%s5077_s30 + $0x90] sm:$0xf] }
  0x15   : > { %v369_v27 = vrot.slane %v367_v18, 5  ;;  %v446_v28 = vrot.slane %v444_v21, 4  ;;  %v447_v29 = vshll.u32 %v215_v17, 16  ;;  %v453_v30 = vshll.u32 %v216_v19, 16  ;;  %v224_v35 = vld [vmem:[%s5077_s30 + $0x94] sm:$0xf] }
  0x16   : > { %v354_v31 = vor.u32 %v353_v23, %v350_v22  ;;  %v364_v32 = vor.u32 %v363_v25, %v359_v24  ;;  %v457_v33 = vshrl.u32 %v216_v19, 16  ;;  %v463_v34 = vshll.u32 %v240_v20, 16  ;;  %v244_v45 = vld [vmem:[%s5077_s30 + $0x98] sm:$0x1]  ;;  %v199_v61 = vld [vmem:[%s5077_s30] sm:$0xf] }
  0x17   : > { %v449_v37 = vrot.slane %v447_v29, 5  ;;  %v455_v38 = vrot.slane %v453_v30, 5  ;;  %v540_v39 = vshrl.u32 %v223_v26, 16  ;;  %v543_v47 = vshll.u32 %v223_v26, 16  ;;  %v5102_v1 = vld [vmem:[%s5077_s30 + $0x4] sm:$0xf] }
  0x18   : > { %v355_v40 = vrot.slane %v354_v31, 4  ;;  %v365_v41 = vrot.slane %v364_v32, 4  ;;  %v459_v42 = vrot.slane %v457_v33, 4  ;;  %v465_v43 = vrot.slane %v463_v34, 5  ;;  %v5105_v2 = vld [vmem:[%s5077_s30 + $0x8] sm:$0x1] }
  0x19   : > { %v450_v44 = vor.u32 %v449_v37, %v446_v28  ;;  %v542_v46 = vrot.slane %v540_v39, 4  ;;  %v549_v48 = vshll.u32 %v224_v35, 16  ;;  %v553_v52 = vshrl.u32 %v224_v35, 16  ;;  %v209_v19 = vld [vmem:[%s5077_s30 + $0x3c] sm:$0xf] }
  0x1a   : > { %v360_v49 = vsel %vm5089_vm3, %v355_v40, %v359_v24  ;;  %v370_v50 = vsel %vm5089_vm3, %v365_v41, %v369_v27  ;;  %v460_v51 = vor.u32 %v459_v42, %v455_v38  ;;  %v545_v56 = vrot.slane %v543_v47, 5  ;;  %v5117_v20 = vld [vmem:[%s5077_s30 + $0x40] sm:$0xf]  ;;  %v5122_v25 = vld [vmem:[%s5077_s30 + $0x44] sm:$0x1] }
  0x1b   : > { %v645_v53 = vunpack.c.l.b16 %v360_v49  ;;  %v646_v54 = vunpack.c.l.b16 %v370_v50  ;;  %v451_v55 = vrot.slane %v450_v44, 4  ;;  %v551_v58 = vrot.slane %v549_v48, 5  ;;  %v217_v33 = vld [vmem:[%s5077_s30 + $0x6c] sm:$0xf]  ;;  %v241_v47 = vld [vmem:[%s5077_s30 + $0x74] sm:$0x1] }
  0x1c   : > { %v461_v57 = vrot.slane %v460_v51, 4  ;;  %v555_v59 = vrot.slane %v553_v52, 4  ;;  %v559_v60 = vshll.u32 %v244_v45, 16  ;;  %v546_v0 = vor.u32 %v545_v56, %v542_v46 }
  0x1d   : > { %v673_v62 = vpack.c.b16 %v646_v54, %v645_v53  ;;  %v456_v63 = vsel %vm5089_vm3, %v451_v55, %v455_v38  ;;  %v252_v9 = vshrl.u32 %v199_v61, 16  ;;  %v255_v10 = vshll.u32 %v199_v61, 16  ;;  %v225_v61 = vld [vmem:[%s5077_s30 + $0x9c] sm:$0xf] }
  0x1e   : > { %v466_v3 = vsel %vm5089_vm3, %v461_v57, %v465_v43  ;;  %v653_v4 = vunpack.c.l.b16 %v456_v63  ;;  %v556_v5 = vor.u32 %v555_v59, %v551_v58  ;;  %v561_v6 = vrot.slane %v559_v60, 5  ;;  %v218_v43 = vld [vmem:[%s5077_s30 + $0x70] sm:$0xf] }
  0x1f   : > { %4314 = vmatmul.msk.bf16.vlgmr.msra.gmra.mxu1 %vm685_vm4, %v673_v62  ;;  %v654_v7 = vunpack.c.l.b16 %v466_v3  ;;  %v547_v8 = vrot.slane %v546_v0, 4  ;;  %v261_v12 = vshll.u32 %v5102_v1, 16  ;;  %v265_v13 = vshrl.u32 %v5102_v1, 16  ;;  %v226_v3 = vld [vmem:[%s5077_s30 + $0xa0] sm:$0xf] }
  0x20   : > { %v557_v11 = vrot.slane %v556_v5, 4  ;;  %v271_v14 = vshll.u32 %v5105_v2, 16  ;;  %v254_v17 = vrot.slane %v252_v9, 4  ;;  %v257_v18 = vrot.slane %v255_v10, 5 }
  0x21   : > { %v677_v15 = vpack.c.b16 %v654_v7, %v653_v4  ;;  %v552_v16 = vsel %vm5089_vm3, %v547_v8, %v551_v58  ;;  %v263_v23 = vrot.slane %v261_v12, 5  ;;  %v267_v24 = vrot.slane %v265_v13, 4  ;;  %v245_v8 = vld [vmem:[%s5077_s30 + $0xa4] sm:$0x1] }
  0x22   : > { %v562_v21 = vsel %vm5089_vm3, %v557_v11, %v561_v6  ;;  %v661_v22 = vunpack.c.l.b16 %v552_v16  ;;  %v258_v27 = vor.u32 %v257_v18, %v254_v17  ;;  %v273_v28 = vrot.slane %v271_v14, 5 }
  0x23   : > { %4318 = vmatmul.msk.bf16.vlgmr.msra.gmra.mxu2 %vm685_vm4, %v677_v15  ;;  %v662_v26 = vunpack.c.l.b16 %v562_v21  ;;  %v268_v29 = vor.u32 %v267_v24, %v263_v23  ;;  %v372_v30 = vshrl.u32 %v209_v19, 16  ;;  %v375_v31 = vshll.u32 %v209_v19, 16 }
  0x24   : > { %v381_v32 = vshll.u32 %v5117_v20, 16  ;;  %v259_v35 = vrot.slane %v258_v27, 4  ;;  %v385_v37 = vshrl.u32 %v5117_v20, 16  ;;  %v391_v38 = vshll.u32 %v5122_v25, 16 }
  0x25   : > { %v681_v34 = vpack.c.b16 %v662_v26, %v661_v22  ;;  %v269_v39 = vrot.slane %v268_v29, 4  ;;  %v374_v40 = vrot.slane %v372_v30, 4  ;;  %v377_v41 = vrot.slane %v375_v31, 5  ;;  %v201_v22 = vld [vmem:[%s5077_s30 + $0xc] sm:$0xf] }
  0x26   : > { %v383_v42 = vrot.slane %v381_v32, 5  ;;  %v264_v44 = vsel %vm5089_vm3, %v259_v35, %v263_v23  ;;  %v387_v45 = vrot.slane %v385_v37, 4  ;;  %v393_v46 = vrot.slane %v391_v38, 5  ;;  %v5151_v32 = vld [vmem:[%s5077_s30 + $0x14] sm:$0x1] }
  0x27   : > { %4322 = vmatmul.msk.bf16.vlgmr.msra.gmra.mxu3 %vm685_vm4, %v681_v34  ;;  %v468_v48 = vshrl.u32 %v217_v33, 16  ;;  %v274_v49 = vsel %vm5089_vm3, %v269_v39, %v273_v28  ;;  %v637_v50 = vunpack.c.l.b16 %v264_v44  ;;  %v378_v51 = vor.u32 %v377_v41, %v374_v40  ;;  %v5148_v28 = vld [vmem:[%s5077_s30 + $0x10] sm:$0xf] }
  0x28   : > { %v471_v52 = vshll.u32 %v217_v33, 16  ;;  %v638_v53 = vunpack.c.l.b16 %v274_v49  ;;  %v388_v54 = vor.u32 %v387_v45, %v383_v42  ;;  %v477_v56 = vshll.u32 %v218_v43, 16 }
  0x29   : > { %v470_v55 = vrot.slane %v468_v48, 4  ;;  %v379_v57 = vrot.slane %v378_v51, 4  ;;  %v481_v59 = vshrl.u32 %v218_v43, 16  ;;  %v487_v60 = vshll.u32 %v241_v47, 16  ;;  %v5161_v47 = vld [vmem:[%s5077_s30 + $0x4c] sm:$0xf] }
  0x2a   : > { %v473_v58 = vrot.slane %v471_v52, 5  ;;  %v669_v62 = vpack.c.b16 %v638_v53, %v637_v50  ;;  %v389_v63 = vrot.slane %v388_v54, 4  ;;  %v479_v0 = vrot.slane %v477_v56, 5  ;;  %v5166_v56 = vld [vmem:[%s5077_s30 + $0x50] sm:$0x1] }
  0x2b   : > { %v384_v4 = vsel %vm5089_vm3, %v379_v57, %v383_v42  ;;  %v483_v6 = vrot.slane %v481_v59, 4  ;;  %v489_v7 = vrot.slane %v487_v60, 5  ;;  %v564_v11 = vshrl.u32 %v225_v61, 16  ;;  %v211_v42 = vld [vmem:[%s5077_s30 + $0x48] sm:$0xf] }
  0x2c   : > { %v474_v5 = vor.u32 %v473_v58, %v470_v55  ;;  %4310 = vmatmul.msk.bf16.vlgmr.msra.gmra.mxu0 %vm685_vm4, %v669_v62  ;;  %v394_v9 = vsel %vm5089_vm3, %v389_v63, %v393_v46  ;;  %v647_v10 = vunpack.c.l.b16 %v384_v4  ;;  %v567_v12 = vshll.u32 %v225_v61, 16 }
  0x2d   : > { %v648_v13 = vunpack.c.l.b16 %v394_v9  ;;  %v484_v15 = vor.u32 %v483_v6, %v479_v0  ;;  %v573_v16 = vshll.u32 %v226_v3, 16  ;;  %v566_v17 = vrot.slane %v564_v11, 4 }
  0x2e   : > { %v475_v14 = vrot.slane %v474_v5, 4  ;;  %v569_v18 = vrot.slane %v567_v12, 5  ;;  %v577_v19 = vshrl.u32 %v226_v3, 16  ;;  %v583_v21 = vshll.u32 %v245_v8, 16  ;;  %v219_v3 = vld [vmem:[%s5077_s30 + $0x78] sm:$0xf] }
  0x2f   : > { %v674_v23 = vpack.c.b16 %v648_v13, %v647_v10  ;;  %v485_v26 = vrot.slane %v484_v15, 4  ;;  %v575_v27 = vrot.slane %v573_v16, 5  ;;  %v276_v35 = vshrl.u32 %v201_v22, 16  ;;  %v220_v8 = vld [vmem:[%s5077_s30 + $0x7c] sm:$0xf] }
  0x30   : > { %v480_v24 = vsel %vm5089_vm3, %v475_v14, %v479_v0  ;;  %v570_v30 = vor.u32 %v569_v18, %v566_v17  ;;  %v579_v31 = vrot.slane %v577_v19, 4  ;;  %v585_v34 = vrot.slane %v583_v21, 5  ;;  %v242_v16 = vld [vmem:[%s5077_s30 + $0x80] sm:$0x1] }
  0x31   : > { %v655_v29 = vunpack.c.l.b16 %v480_v24  ;;  %4315 = vmatmul.msk.bf16.gmra.mxu1 %vm685_vm4, %v674_v23  ;;  %v490_v33 = vsel %vm5089_vm3, %v485_v26, %v489_v7  ;;  %v279_v37 = vshll.u32 %v201_v22, 16  ;;  %v285_v41 = vshll.u32 %v5148_v28, 16 }
  0x32   : > { %v656_v38 = vunpack.c.l.b16 %v490_v33  ;;  %v571_v39 = vrot.slane %v570_v30, 4  ;;  %v580_v40 = vor.u32 %v579_v31, %v575_v27  ;;  %v278_v43 = vrot.slane %v276_v35, 4 }
  0x33   : > { %v281_v44 = vrot.slane %v279_v37, 5  ;;  %v289_v45 = vshrl.u32 %v5148_v28, 16  ;;  %v295_v46 = vshll.u32 %v5151_v32, 16  ;;  %v287_v51 = vrot.slane %v285_v41, 5 }
  0x34   : > { %v678_v48 = vpack.c.b16 %v656_v38, %v655_v29  ;;  %v576_v49 = vsel %vm5089_vm3, %v571_v39, %v575_v27  ;;  %v581_v50 = vrot.slane %v580_v40, 4  ;;  %v396_v58 = vshrl.u32 %v211_v42, 16  ;;  %v228_v39 = vld [vmem:[%s5077_s30 + $0xac] sm:$0xf]  ;;  %v246_v40 = vld [vmem:[%s5077_s30 + $0xb0] sm:$0x1] }
  0x35   : > { %v663_v52 = vunpack.c.l.b16 %v576_v49  ;;  %v282_v53 = vor.u32 %v281_v44, %v278_v43  ;;  %v291_v54 = vrot.slane %v289_v45, 4  ;;  %v297_v55 = vrot.slane %v295_v46, 5 }
  0x36   : > { %4319 = vmatmul.msk.bf16.gmra.mxu2 %vm685_vm4, %v678_v48  ;;  %v586_v57 = vsel %vm5089_vm3, %v581_v50, %v585_v34  ;;  %v399_v59 = vshll.u32 %v211_v42, 16  ;;  %v405_v60 = vshll.u32 %v5161_v47, 16  ;;  %v409_v0 = vshrl.u32 %v5161_v47, 16  ;;  %v227_v34 = vld [vmem:[%s5077_s30 + $0xa8] sm:$0xf] }
  0x37   : > { %v664_v61 = vunpack.c.l.b16 %v586_v57  ;;  %v283_v62 = vrot.slane %v282_v53, 4  ;;  %v292_v63 = vor.u32 %v291_v54, %v287_v51  ;;  %v398_v4 = vrot.slane %v396_v58, 4 }
  0x38   : > { %v401_v5 = vrot.slane %v399_v59, 5  ;;  %v407_v6 = vrot.slane %v405_v60, 5  ;;  %v415_v7 = vshll.u32 %v5166_v56, 16  ;;  %v411_v12 = vrot.slane %v409_v0, 4  ;;  %v203_v59 = vld [vmem:[%s5077_s30 + $0x18] sm:$0xf] }
  0x39   : > { %v682_v9 = vpack.c.b16 %v664_v61, %v663_v52  ;;  %v288_v10 = vsel %vm5089_vm3, %v283_v62, %v287_v51  ;;  %v293_v11 = vrot.slane %v292_v63, 4  ;;  %v492_v17 = vshrl.u32 %v219_v3, 16  ;;  %v5194_v63 = vld [vmem:[%s5077_s30 + $0x1c] sm:$0xf]  ;;  %v5197_v0 = vld [vmem:[%s5077_s30 + $0x20] sm:$0x1] }
  0x3a   : > { %v639_v13 = vunpack.c.l.b16 %v288_v10  ;;  %v402_v14 = vor.u32 %v401_v5, %v398_v4  ;;  %v417_v15 = vrot.slane %v415_v7, 5  ;;  %v412_v19 = vor.u32 %v411_v12, %v407_v6 }
  0x3b   : > { %4323 = vmatmul.msk.bf16.gmra.mxu3 %vm685_vm4, %v682_v9  ;;  %v298_v18 = vsel %vm5089_vm3, %v293_v11, %v297_v55  ;;  %v495_v21 = vshll.u32 %v219_v3, 16  ;;  %v501_v22 = vshll.u32 %v220_v8, 16  ;;  %v494_v26 = vrot.slane %v492_v17, 4 }
  0x3c   : > { %v640_v23 = vunpack.c.l.b16 %v298_v18  ;;  %v403_v24 = vrot.slane %v402_v14, 4  ;;  %v505_v27 = vshrl.u32 %v220_v8, 16  ;;  %v413_v29 = vrot.slane %v412_v19, 4 }
  0x3d   : > { %v497_v30 = vrot.slane %v495_v21, 5  ;;  %v503_v31 = vrot.slane %v501_v22, 5  ;;  %v511_v33 = vshll.u32 %v242_v16, 16  ;;  %v588_v48 = vshrl.u32 %v227_v34, 16  ;;  %v5207_v21 = vld [vmem:[%s5077_s30 + $0x58] sm:$0xf] }
  0x3e   : > { %v670_v35 = vpack.c.b16 %v640_v23, %v639_v13  ;;  %v408_v37 = vsel %vm5089_vm3, %v403_v24, %v407_v6  ;;  %v507_v38 = vrot.slane %v505_v27, 4  ;;  %v418_v41 = vsel %vm5089_vm3, %v413_v29, %v417_v15  ;;  %v213_v15 = vld [vmem:[%s5077_s30 + $0x54] sm:$0xf]  ;;  %v5212_v27 = vld [vmem:[%s5077_s30 + $0x5c] sm:$0x1] }
  0x3f   : > { %v649_v42 = vunpack.c.l.b16 %v408_v37  ;;  %v498_v43 = vor.u32 %v497_v30, %v494_v26  ;;  %v513_v44 = vrot.slane %v511_v33, 5  ;;  %v650_v45 = vunpack.c.l.b16 %v418_v41 }
  0x40   : > { %4311 = vmatmul.msk.bf16.gmra.mxu0 %vm685_vm4, %v670_v35  ;;  %v508_v46 = vor.u32 %v507_v38, %v503_v31  ;;  %v591_v49 = vshll.u32 %v227_v34, 16  ;;  %v597_v51 = vshll.u32 %v228_v39, 16  ;;  %v601_v52 = vshrl.u32 %v228_v39, 16  ;;  %v221_v39 = vld [vmem:[%s5077_s30 + $0x84] sm:$0xf] }
  0x41   : > { %v499_v50 = vrot.slane %v498_v43, 4  ;;  %v607_v53 = vshll.u32 %v246_v40, 16  ;;  %v675_v54 = vpack.c.b16 %v650_v45, %v649_v42  ;;  %v590_v57 = vrot.slane %v588_v48, 4 }
  0x42   : > { %v509_v55 = vrot.slane %v508_v46, 4  ;;  %v593_v58 = vrot.slane %v591_v49, 5  ;;  %v599_v61 = vrot.slane %v597_v51, 5  ;;  %v603_v62 = vrot.slane %v601_v52, 4  ;;  %v222_v49 = vld [vmem:[%s5077_s30 + $0x88] sm:$0xf] }
  0x43   : > { %v504_v60 = vsel %vm5089_vm3, %v499_v50, %v503_v31  ;;  %4316 = vmatmul.msk.bf16.gmra.mxu1 %vm685_vm4, %v675_v54  ;;  %v609_v6 = vrot.slane %v607_v53, 5  ;;  %v300_v9 = vshrl.u32 %v203_v59, 16  ;;  %v303_v10 = vshll.u32 %v203_v59, 16  ;;  %v243_v53 = vld [vmem:[%s5077_s30 + $0x8c] sm:$0x1] }
  0x44   : > { %v514_v3 = vsel %vm5089_vm3, %v509_v55, %v513_v44  ;;  %v657_v4 = vunpack.c.l.b16 %v504_v60  ;;  %v594_v5 = vor.u32 %v593_v58, %v590_v57  ;;  %v604_v8 = vor.u32 %v603_v62, %v599_v61 }
  0x45   : > { %v658_v7 = vunpack.c.l.b16 %v514_v3  ;;  %v309_v12 = vshll.u32 %v5194_v63, 16  ;;  %v313_v13 = vshrl.u32 %v5194_v63, 16  ;;  %v319_v14 = vshll.u32 %v5197_v0, 16 }
  0x46   : > { %v595_v11 = vrot.slane %v594_v5, 4  ;;  %v605_v17 = vrot.slane %v604_v8, 4  ;;  %v302_v18 = vrot.slane %v300_v9, 4  ;;  %v305_v19 = vrot.slane %v303_v10, 5  ;;  %v229_v8 = vld [vmem:[%s5077_s30 + $0xb4] sm:$0xf] }
  0x47   : > { %v679_v16 = vpack.c.b16 %v658_v7, %v657_v4  ;;  %v311_v23 = vrot.slane %v309_v12, 5  ;;  %v315_v24 = vrot.slane %v313_v13, 4  ;;  %v321_v26 = vrot.slane %v319_v14, 5  ;;  %v230_v12 = vld [vmem:[%s5077_s30 + $0xb8] sm:$0xf] }
  0x48   : > { %v600_v22 = vsel %vm5089_vm3, %v595_v11, %v599_v61  ;;  %v610_v29 = vsel %vm5089_vm3, %v605_v17, %v609_v6  ;;  %v306_v31 = vor.u32 %v305_v19, %v302_v18  ;;  %v420_v33 = vshrl.u32 %v213_v15, 16  ;;  %v247_v17 = vld [vmem:[%s5077_s30 + $0xbc] sm:$0x1] }
  0x49   : > { %4320 = vmatmul.msk.bf16.gmra.mxu2 %vm685_vm4, %v679_v16  ;;  %v665_v30 = vunpack.c.l.b16 %v600_v22  ;;  %v666_v34 = vunpack.c.l.b16 %v610_v29  ;;  %v316_v35 = vor.u32 %v315_v24, %v311_v23  ;;  %v423_v37 = vshll.u32 %v213_v15, 16 }
  0x4a   : > { %v429_v38 = vshll.u32 %v5207_v21, 16  ;;  %v307_v40 = vrot.slane %v306_v31, 4  ;;  %v422_v41 = vrot.slane %v420_v33, 4  ;;  %v433_v42 = vshrl.u32 %v5207_v21, 16 }
  0x4b   : > { %v439_v43 = vshll.u32 %v5212_v27, 16  ;;  %v683_v44 = vpack.c.b16 %v666_v34, %v665_v30  ;;  %v317_v45 = vrot.slane %v316_v35, 4  ;;  %v425_v46 = vrot.slane %v423_v37, 5  ;;  %v205_v37 = vld [vmem:[%s5077_s30 + $0x24] sm:$0xf] }
  0x4c   : > { %v431_v48 = vrot.slane %v429_v38, 5  ;;  %v312_v50 = vsel %vm5089_vm3, %v307_v40, %v311_v23  ;;  %v435_v51 = vrot.slane %v433_v42, 4  ;;  %v516_v54 = vshrl.u32 %v221_v39, 16  ;;  %v5240_v42 = vld [vmem:[%s5077_s30 + $0x28] sm:$0xf] }
  0x4d   : > { %v441_v52 = vrot.slane %v439_v43, 5  ;;  %4324 = vmatmul.msk.bf16.gmra.mxu3 %vm685_vm4, %v683_v44  ;;  %v322_v55 = vsel %vm5089_vm3, %v317_v45, %v321_v26  ;;  %v641_v57 = vunpack.c.l.b16 %v312_v50  ;;  %v426_v58 = vor.u32 %v425_v46, %v422_v41 }
  0x4e   : > { %v519_v59 = vshll.u32 %v221_v39, 16  ;;  %v642_v60 = vunpack.c.l.b16 %v322_v55  ;;  %v436_v61 = vor.u32 %v435_v51, %v431_v48  ;;  %v518_v62 = vrot.slane %v516_v54, 4 }
  0x4f   : > { %v525_v3 = vshll.u32 %v222_v49, 16  ;;  %v427_v4 = vrot.slane %v426_v58, 4  ;;  %v529_v6 = vshrl.u32 %v222_v49, 16  ;;  %v535_v7 = vshll.u32 %v243_v53, 16 }
  0x50   : > { %v521_v5 = vrot.slane %v519_v59, 5  ;;  %v671_v9 = vpack.c.b16 %v642_v60, %v641_v57  ;;  %v437_v10 = vrot.slane %v436_v61, 4  ;;  %v612_v22 = vshrl.u32 %v229_v8, 16  ;;  %v1047_v61 = vld [vmem:[%s5077_s30] sm:$0xe] }
  0x51   : > { %v527_v11 = vrot.slane %v525_v3, 5  ;;  %v432_v13 = vsel %vm5089_vm3, %v427_v4, %v431_v48  ;;  %v531_v15 = vrot.slane %v529_v6, 4  ;;  %v537_v16 = vrot.slane %v535_v7, 5  ;;  %v5244_v48 = vld [vmem:[%s5077_s30 + $0x2c] sm:$0x1] }
  0x52   : > { %v522_v14 = vor.u32 %v521_v5, %v518_v62  ;;  %4312 = vmatmul.msk.bf16.gmra.mxu0 %vm685_vm4, %v671_v9  ;;  %v442_v18 = vsel %vm5089_vm3, %v437_v10, %v441_v52  ;;  %v651_v19 = vunpack.c.l.b16 %v432_v13  ;;  %v615_v23 = vshll.u32 %v229_v8, 16  ;;  %v4552_v6 = vld [vmem:[%s5077_s30 + $0xc] sm:$0xf] }
  0x53   : > { %v652_v24 = vunpack.c.l.b16 %v442_v18  ;;  %v532_v29 = vor.u32 %v531_v15, %v527_v11  ;;  %v621_v30 = vshll.u32 %v230_v12, 16  ;;  %v614_v31 = vrot.slane %v612_v22, 4 }
  0x54   : > { %v523_v26 = vrot.slane %v522_v14, 4  ;;  %v617_v33 = vrot.slane %v615_v23, 5  ;;  %v625_v34 = vshrl.u32 %v230_v12, 16  ;;  %v631_v35 = vshll.u32 %v247_v17, 16  ;;  %v4553_v12 = vld [vmem:[%s5077_s30 + $0x10] sm:$0xf] }
  0x55   : > { %v676_v38 = vpack.c.b16 %v652_v24, %v651_v19  ;;  %v533_v40 = vrot.slane %v532_v29, 4  ;;  %v623_v41 = vrot.slane %v621_v30, 5  ;;  %v1103_v43 = vrot.slane %v5105_v2, 5 }
  0x56   : > { %v528_v39 = vsel %vm5089_vm3, %v523_v26, %v527_v11  ;;  %v618_v45 = vor.u32 %v617_v33, %v614_v31  ;;  %v627_v46 = vrot.slane %v625_v34, 4  ;;  %v633_v50 = vrot.slane %v631_v35, 5  ;;  %v4698_v11 = vld [vmem:[%s6491_s1 + $0x18] sm:$0xf] }
  0x57   : > { %v659_v44 = vunpack.c.l.b16 %v528_v39  ;;  %4317 = vmatmul.msk.bf16.gmra.mxu1 %vm685_vm4, %v676_v38  ;;  %v538_v49 = vsel %vm5089_vm3, %v533_v40, %v537_v16  ;;  %v324_v51 = vshrl.u32 %v205_v37, 16  ;;  %v327_v52 = vshll.u32 %v205_v37, 16  ;;  %v4554_v38 = vld [vmem:[%s5077_s30 + $0x14] sm:$0x1] }
  0x58   : > { %v660_v53 = vunpack.c.l.b16 %v538_v49  ;;  %v619_v54 = vrot.slane %v618_v45, 4  ;;  %v628_v55 = vor.u32 %v627_v46, %v623_v41  ;;  %v333_v2 = vshll.u32 %v5240_v42, 16  ;;  %v4827_v45 = vld [vmem:[%s6491_s1 + $0x1c] sm:$0xf] }
  0x59   : > { %v326_v57 = vrot.slane %v324_v51, 4  ;;  %v329_v58 = vrot.slane %v327_v52, 5  ;;  %v337_v59 = vshrl.u32 %v5240_v42, 16  ;;  %v343_v60 = vshll.u32 %v5244_v48, 16  ;;  %v4896_v51 = vld [vmem:[%s5077_s30] sm:$0xff] }
  0x5a   : > { %v680_v62 = vpack.c.b16 %v660_v53, %v659_v44  ;;  %v624_v3 = vsel %vm5089_vm3, %v619_v54, %v623_v41  ;;  %v629_v4 = vrot.slane %v628_v55, 4  ;;  %v335_v5 = vrot.slane %v333_v2, 5  ;;  %v4876_v2 = vld [vmem:[%s6491_s1 + $0x20] sm:$0xf] }
  0x5b   : > { %v667_v7 = vunpack.c.l.b16 %v624_v3  ;;  %v330_v8 = vor.u32 %v329_v58, %v326_v57  ;;  %v339_v9 = vrot.slane %v337_v59, 4  ;;  %v345_v10 = vrot.slane %v343_v60, 5 }
  0x5c   : > { %4321 = vmatmul.msk.bf16.gmra.mxu2 %vm685_vm4, %v680_v62  ;;  %v634_v13 = vsel %vm5089_vm3, %v629_v4, %v633_v50  ;;  %v4406_v14 = vrot.slane %v1047_v61, 9  ;;  %v1100_v19 = vrot.slane %v5102_v1, 5  ;;  %v2935_v22 = vsel %vm734_vm0, %v4698_v11, 0  ;;  %v4649_v50 = vld [vmem:[%s6491_s1 + $0x14] sm:$0xf] }
  0x5d   : > { %v668_v15 = vunpack.c.l.b16 %v634_v13  ;;  %v331_v16 = vrot.slane %v330_v8, 4  ;;  %v340_v17 = vor.u32 %v339_v9, %v335_v5  ;;  %v1768_v23 = vshrl.u32 %v4552_v6, 16  ;;  %2944 = vmatpush.bf16.msra.mxu2 %v2935_v22  ;;  %v1048_v8 = vld [vmem:[%s5077_s30 + $0xc] sm:$0xe] }
  0x5e   : > { %v1771_v24 = vshll.u32 %v4552_v6, 16  ;;  %v1777_v26 = vshll.u32 %v4553_v12, 16  ;;  %v1101_v33 = vsel %vm5263_vm7, %v4406_v14, %v1100_v19  ;;  %v1102_v35 = vrot.slane %v1100_v19, 4  ;;  %v4556_v6 = vld [vmem:[%s5077_s30 + $0x1c] sm:$0xf] }
  0x5f   : > { %v684_v29 = vpack.c.b16 %v668_v15, %v667_v7  ;;  %v336_v30 = vsel %vm5089_vm3, %v331_v16, %v335_v5  ;;  %v341_v31 = vrot.slane %v340_v17, 4  ;;  %v1212_v37 = vunpack.c.l.b16 %v1101_v33  ;;  %v4555_v5 = vld [vmem:[%s5077_s30 + $0x18] sm:$0xf]  ;;  %v4912_v15 = vld [vmem:[%s5077_s30 + $0xc] sm:$0xff] }
  0x60   : > { %v643_v34 = vunpack.c.l.b16 %v336_v30  ;;  %v1770_v1 = vrot.slane %v1768_v23, 4  ;;  %v1773_v40 = vrot.slane %v1771_v24, 5  ;;  %v1779_v41 = vrot.slane %v1777_v26, 5  ;;  %v4557_v30 = vld [vmem:[%s5077_s30 + $0x20] sm:$0x1] }
  0x61   : > { %4325 = vmatmul.msk.bf16.gmra.mxu3 %vm685_vm4, %v684_v29  ;;  %v346_v39 = vsel %vm5089_vm3, %v341_v31, %v345_v10  ;;  %v1781_v44 = vshrl.u32 %v4553_v12, 16  ;;  %v1104_v49 = vsel %vm5263_vm7, %v1102_v35, %v1103_v43  ;;  %v1787_v55 = vshll.u32 %v4554_v38, 16  ;;  %v4897_v35 = vld [vmem:[%s5077_s30 + $0xc] sm:$0xff] }
  0x62   : > { %v644_v46 = vunpack.c.l.b16 %v346_v39  ;;  %v1213_v52 = vunpack.c.l.b16 %v1104_v49  ;;  %v1774_v53 = vor.u32 %v1773_v40, %v1770_v1  ;;  %v3589_v58 = vsel %vm734_vm0, %v4827_v45, 0 }
  0x63   : > { %v1783_v54 = vrot.slane %v1781_v44, 4  ;;  %3598 = vmatpush.bf16.msra.mxu3 %v3589_v58  ;;  %v2648_v60 = vsel %vm734_vm0, %v4649_v50, 0  ;;  %v3987_v61 = vsel %vm734_vm0, %v4876_v2, 0  ;;  %v1789_v4 = vrot.slane %v1787_v55, 5  ;;  %v1049_v50 = vld [vmem:[%s5077_s30 + $0x18] sm:$0xe] }
  0x64   : > { %v672_v57 = vpack.c.b16 %v644_v46, %v643_v34  ;;  %v1244_v43 = vpack.c.b16 %v1213_v52, %v1212_v37  ;;  %2657 = vmatpush.bf16.msra.mxu1 %v2648_v60  ;;  %v1775_v62 = vrot.slane %v1774_v53, 4  ;;  %3996 = vmatpush.bf16.msra.mxu0 %v3987_v61  ;;  %v1107_v7 = vrot.slane %v5148_v28, 5  ;;  %v4559_v46 = vld [vmem:[%s5077_s30 + $0x28] sm:$0xf] }
  0x65   : > { %v1784_v59 = vor.u32 %v1783_v54, %v1779_v41  ;;  %v1792_v9 = vshrl.u32 %v4555_v5, 16  ;;  %v1795_v10 = vshll.u32 %v4555_v5, 16  ;;  %v1801_v13 = vshll.u32 %v4556_v6, 16 }
  0x66   : > { %4313 = vmatmul.msk.bf16.gmra.mxu0 %vm685_vm4, %v672_v57  ;;  %v1780_v11 = vsel %vm5089_vm3, %v1775_v62, %v1779_v41  ;;  %v1805_v14 = vshrl.u32 %v4556_v6, 16  ;;  %v4407_v16 = vrot.slane %v1048_v8, 9  ;;  %v1109_v17 = vrot.slane %v1107_v7, 4  ;;  %v4558_v41 = vld [vmem:[%s5077_s30 + $0x24] sm:$0xf] }
  0x67   : > { %4390 = vmatmul.msk.bf16.vlgmr.msrb.gmra.mxu1 %vm685_vm4, %v4896_v51  ;;  %v1785_v3 = vrot.slane %v1784_v59, 4  ;;  %v1110_v28 = vrot.slane %v5151_v32, 5  ;;  %v2153_v19 = vunpack.c.l.b16 %v1780_v11  ;;  %v1794_v23 = vrot.slane %v1792_v9, 4  ;;  %v4560_v6 = vld [vmem:[%s5077_s30 + $0x2c] sm:$0x1] }
  0x68   : > { %v1797_v24 = vrot.slane %v1795_v10, 5  ;;  %v1803_v26 = vrot.slane %v1801_v13, 5  ;;  %v1807_v29 = vrot.slane %v1805_v14, 4  ;;  %v1108_v31 = vsel %vm5263_vm7, %v4407_v16, %v1107_v7 }
  0x69   : > { %v1790_v12 = vsel %vm5089_vm3, %v1785_v3, %v1789_v4  ;;  %v1111_v33 = vsel %vm5263_vm7, %v1109_v17, %v1110_v28  ;;  %v1811_v38 = vshll.u32 %v4557_v30, 16  ;;  %v1214_v1 = vunpack.c.l.b16 %v1108_v31 }
  0x6a   : > { %v2154_v22 = vunpack.c.l.b16 %v1790_v12  ;;  %v1798_v32 = vor.u32 %v1797_v24, %v1794_v23  ;;  %v1808_v37 = vor.u32 %v1807_v29, %v1803_v26  ;;  %v1215_v39 = vunpack.c.l.b16 %v1111_v33  ;;  %v4898_v12 = vld [vmem:[%s5077_s30 + $0x18] sm:$0xff]  ;;  %v1050_v29 = vld [vmem:[%s5077_s30 + $0x24] sm:$0xe] }
  0x6b   : > { %v1813_v45 = vrot.slane %v1811_v38, 5  ;;  %v1114_v51 = vrot.slane %v5194_v63, 5  ;;  %v1816_v52 = vshrl.u32 %v4558_v41, 16  ;;  %v1819_v54 = vshll.u32 %v4558_v41, 16 }
  0x6c   : > { %4423 = vmatmul.msk.bf16.vlgmr.msrb.gmra.mxu2 %vm685_vm4, %v1244_v43  ;;  %v2185_v34 = vpack.c.b16 %v2154_v22, %v2153_v19  ;;  %v1799_v40 = vrot.slane %v1798_v32, 4  ;;  %v1809_v44 = vrot.slane %v1808_v37, 4  ;;  %v1245_v49 = vpack.c.b16 %v1215_v39, %v1214_v1  ;;  %v4913_v43 = vld [vmem:[%s5077_s30 + $0x18] sm:$0xff]  ;;  %v4561_v19 = vld [vmem:[%s5077_s30 + $0x30] sm:$0xf]  ;;  %v4914_v32 = vld [vmem:[%s5077_s30 + $0x24] sm:$0xff] }
  0x6d   : > { %v1825_v55 = vshll.u32 %v4559_v46, 16  ;;  %v1829_v2 = vshrl.u32 %v4559_v46, 16  ;;  %v4408_v58 = vrot.slane %v1049_v50, 9  ;;  %v1116_v60 = vrot.slane %v1114_v51, 4  ;;  %v4562_v22 = vld [vmem:[%s5077_s30 + $0x34] sm:$0xf] }
  0x6e   : > { %v1804_v53 = vsel %vm5089_vm3, %v1799_v40, %v1803_v26  ;;  %v1814_v57 = vsel %vm5089_vm3, %v1809_v44, %v1813_v45  ;;  %v1117_v63 = vrot.slane %v5197_v0, 5  ;;  %v1818_v61 = vrot.slane %v1816_v52, 4  ;;  %v4563_v45 = vld [vmem:[%s5077_s30 + $0x38] sm:$0x1] }
  0x6f   : > { %v2155_v59 = vunpack.c.l.b16 %v1804_v53  ;;  %v2156_v62 = vunpack.c.l.b16 %v1814_v57  ;;  %v1821_v3 = vrot.slane %v1819_v54, 5  ;;  %v1827_v4 = vrot.slane %v1825_v55, 5  ;;  %v4565_v57 = vld [vmem:[%s5077_s30 + $0x40] sm:$0xf] }
  0x70   : > { %v1831_v5 = vrot.slane %v1829_v2, 4  ;;  %v1115_v7 = vsel %vm5263_vm7, %v4408_v58, %v1114_v51  ;;  %v1118_v8 = vsel %vm5263_vm7, %v1116_v60, %v1117_v63  ;;  %v1835_v0 = vshll.u32 %v4560_v6, 16  ;;  %v4564_v2 = vld [vmem:[%s5077_s30 + $0x3c] sm:$0xf]  ;;  %v4958_v63 = vld [vmem:[%s5077_s30 + $0x34] sm:$0xf] }
  0x71   : > { %4536 = vmatmul.msk.bf16.vlgmr.msrb.gmra.mxu3 %vm685_vm4, %v4912_v15  ;;  %v2186_v9 = vpack.c.b16 %v2156_v62, %v2155_v59  ;;  %v1822_v10 = vor.u32 %v1821_v3, %v1818_v61  ;;  %v1216_v13 = vunpack.c.l.b16 %v1115_v7  ;;  %v1217_v14 = vunpack.c.l.b16 %v1118_v8  ;;  %v1051_v62 = vld [vmem:[%s5077_s30 + $0x30] sm:$0xe] }
  0x72   : > { %v1832_v11 = vor.u32 %v1831_v5, %v1827_v4  ;;  %v1837_v17 = vrot.slane %v1835_v0, 5  ;;  %v1121_v23 = vrot.slane %v5240_v42, 5  ;;  %v1840_v30 = vshrl.u32 %v4561_v19, 16  ;;  %v4959_v0 = vld [vmem:[%s5077_s30 + $0x38] sm:$0x1] }
  0x73   : > { %v1823_v15 = vrot.slane %v1822_v10, 4  ;;  %v1246_v28 = vpack.c.b16 %v1217_v14, %v1216_v13  ;;  %v1843_v31 = vshll.u32 %v4561_v19, 16  ;;  %v1849_v33 = vshll.u32 %v4562_v22, 16  ;;  %v4915_v13 = vld [vmem:[%s5077_s30 + $0x30] sm:$0xff] }
  0x74   : > { %v1833_v16 = vrot.slane %v1832_v11, 4  ;;  %v1123_v37 = vrot.slane %v1121_v23, 4  ;;  %v1124_v42 = vrot.slane %v5244_v48, 5  ;;  %v1842_v39 = vrot.slane %v1840_v30, 4  ;;  %v4899_v48 = vld [vmem:[%s5077_s30 + $0x24] sm:$0xff] }
  0x75   : > { %v1828_v24 = vsel %vm5089_vm3, %v1823_v15, %v1827_v4  ;;  %v1845_v40 = vrot.slane %v1843_v31, 5  ;;  %v1851_v41 = vrot.slane %v1849_v33, 5  ;;  %v1859_v53 = vshll.u32 %v4563_v45, 16  ;;  %v4900_v33 = vld [vmem:[%s5077_s30 + $0x30] sm:$0xff] }
  0x76   : > { %4601 = vmatmul.msk.bf16.vlgmr.msrb.gmra.mxu0 %vm685_vm4, %v2185_v34  ;;  %v1838_v26 = vsel %vm5089_vm3, %v1833_v16, %v1837_v17  ;;  %v1853_v34 = vshrl.u32 %v4562_v22, 16  ;;  %v2157_v38 = vunpack.c.l.b16 %v1828_v24  ;;  %v1128_v61 = vrot.slane %v4958_v63, 5  ;;  %v4566_v22 = vld [vmem:[%s5077_s30 + $0x44] sm:$0x1] }
  0x77   : > { %4391 = vmatmul.msk.bf16.gmra.mxu1 %vm685_vm4, %v4897_v35  ;;  %v4409_v35 = vrot.slane %v1050_v29, 9  ;;  %v2158_v1 = vunpack.c.l.b16 %v1838_v26  ;;  %v1846_v51 = vor.u32 %v1845_v40, %v1842_v39  ;;  %v1861_v59 = vrot.slane %v1859_v53, 5  ;;  %v4567_v39 = vld [vmem:[%s5077_s30 + $0x48] sm:$0xf]  ;;  %v4568_v40 = vld [vmem:[%s5077_s30 + $0x4c] sm:$0xf] }
  0x78   : > { %v1855_v44 = vrot.slane %v1853_v34, 4  ;;  %v1864_v3 = vshrl.u32 %v4564_v2, 16  ;;  %v1867_v4 = vshll.u32 %v4564_v2, 16  ;;  %v1873_v5 = vshll.u32 %v4565_v57, 16  ;;  %v4916_v2 = vld [vmem:[%s5077_s30 + $0x3c] sm:$0xff] }
  0x79   : > { %v1122_v46 = vsel %vm5263_vm7, %v4409_v35, %v1121_v23  ;;  %v2187_v50 = vpack.c.b16 %v2158_v1, %v2157_v38  ;;  %v1847_v58 = vrot.slane %v1846_v51, 4  ;;  %v1877_v6 = vshrl.u32 %v4565_v57, 16 }
  0x7a   : > { %v1856_v52 = vor.u32 %v1855_v44, %v1851_v41  ;;  %v1218_v54 = vunpack.c.l.b16 %v1122_v46  ;;  %v4410_v10 = vrot.slane %v1051_v62, 9  ;;  %v1130_v11 = vrot.slane %v1128_v61, 4 }
  0x7b   : > { %v1852_v8 = vsel %vm5089_vm3, %v1847_v58, %v1851_v41  ;;  %v1866_v14 = vrot.slane %v1864_v3, 4  ;;  %v1869_v15 = vrot.slane %v1867_v4, 5  ;;  %v1875_v16 = vrot.slane %v1873_v5, 5  ;;  %v4569_v4 = vld [vmem:[%s5077_s30 + $0x50] sm:$0x1] }
  0x7c   : > { %4424 = vmatmul.msk.bf16.gmra.mxu2 %vm685_vm4, %v1245_v49  ;;  %v1125_v49 = vsel %vm5263_vm7, %v1123_v37, %v1124_v42  ;;  %v1879_v17 = vrot.slane %v1877_v6, 4  ;;  %v1129_v23 = vsel %vm5263_vm7, %v4410_v10, %v1128_v61  ;;  %v1883_v30 = vshll.u32 %v4566_v22, 16 }
  0x7d   : > { %v1219_v55 = vunpack.c.l.b16 %v1125_v49  ;;  %v1870_v26 = vor.u32 %v1869_v15, %v1866_v14  ;;  %v1888_v51 = vshrl.u32 %v4567_v39, 16  ;;  %v1897_v53 = vshll.u32 %v4568_v40, 16 }
  0x7e   : > { %v1880_v29 = vor.u32 %v1879_v17, %v1875_v16  ;;  %v1885_v1 = vrot.slane %v1883_v30, 5 }
  0x7f   : > { %v1247_v60 = vpack.c.b16 %v1219_v55, %v1218_v54  ;;  %v1871_v42 = vrot.slane %v1870_v26, 4  ;;  %v1901_v54 = vshrl.u32 %v4568_v40, 16  ;;  %v1899_v62 = vrot.slane %v1897_v53, 5 }
  0x80   : > { %v1881_v38 = vrot.slane %v1880_v29, 4  ;;  %v1142_v26 = vrot.slane %v5161_v47, 5 }
  0x81   : > { %4537 = vmatmul.msk.bf16.gmra.mxu3 %vm685_vm4, %v4913_v43  ;;  %v1857_v43 = vrot.slane %v1856_v52, 4  ;;  %v1876_v45 = vsel %vm5089_vm3, %v1871_v42, %v1875_v16  ;;  %v1891_v52 = vshll.u32 %v4567_v39, 16  ;;  %v1903_v3 = vrot.slane %v1901_v54, 4  ;;  %v4572_v54 = vld [vmem:[%s5077_s30 + $0x5c] sm:$0x1] }
  0x82   : > { %v1886_v46 = vsel %vm5089_vm3, %v1881_v38, %v1885_v1  ;;  %v2161_v55 = vunpack.c.l.b16 %v1876_v45  ;;  %v4917_v1 = vld [vmem:[%s5077_s30 + $0x48] sm:$0xff]  ;;  %v1144_v40 = vrot.slane %v1142_v26, 4 }
  0x83   : > { %v2162_v57 = vunpack.c.l.b16 %v1886_v46  ;;  %v1893_v61 = vrot.slane %v1891_v52, 5  ;;  %v1904_v10 = vor.u32 %v1903_v3, %v1899_v62 }
  0x85   : > { %v1905_v16 = vrot.slane %v1904_v10, 4 }
  0x86   : > { %4602 = vmatmul.msk.bf16.gmra.mxu0 %vm685_vm4, %v2186_v9  ;;  %v1862_v9 = vsel %vm5089_vm3, %v1857_v43, %v1861_v59 }
  0x87   : > { %4392 = vmatmul.msk.bf16.gmra.mxu1 %vm685_vm4, %v4898_v12  ;;  %v1131_v12 = vrot.slane %v4959_v0, 5  ;;  %v2160_v19 = vunpack.c.l.b16 %v1862_v9 }
  0x89   : > { %v1132_v24 = vsel %vm5263_vm7, %v1130_v11, %v1131_v12  ;;  %v1907_v11 = vshll.u32 %v4569_v4, 16  ;;  %v4901_v12 = vld [vmem:[%s5077_s30 + $0x3c] sm:$0xff] }
  0x8a   : > { %v1221_v35 = vunpack.c.l.b16 %v1132_v24  ;;  %v4571_v24 = vld [vmem:[%s5077_s30 + $0x58] sm:$0xf]  ;;  %v4573_v4 = vld [vmem:[%s5077_s30 + $0x60] sm:$0xf] }
  0x8b   : > { %v1909_v17 = vrot.slane %v1907_v11, 5  ;;  %v1925_v42 = vshrl.u32 %v4571_v24, 16 }
  0x8c   : > { %4425 = vmatmul.msk.bf16.gmra.mxu2 %vm685_vm4, %v1246_v28  ;;  %v2159_v28 = vunpack.c.l.b16 %v1852_v8  ;;  %v2189_v8 = vpack.c.b16 %v2162_v57, %v2161_v55 }
  0x8d   : > { %v1910_v30 = vsel %vm5089_vm3, %v1905_v16, %v1909_v17  ;;  %v1927_v52 = vrot.slane %v1925_v42, 4 }
  0x8e   : > { %v2188_v31 = vpack.c.b16 %v2160_v19, %v2159_v28  ;;  %v2164_v46 = vunpack.c.l.b16 %v1910_v30 }
  0x91   : > { %4538 = vmatmul.msk.bf16.gmra.mxu3 %vm685_vm4, %v4914_v32  ;;  %v1220_v32 = vunpack.c.l.b16 %v1129_v23  ;;  %v4570_v23 = vld [vmem:[%s5077_s30 + $0x54] sm:$0xf] }
  0x93   : > { %v1248_v44 = vpack.c.b16 %v1221_v35, %v1220_v32  ;;  %v1915_v32 = vshll.u32 %v4570_v23, 16  ;;  %v1921_v35 = vshll.u32 %v4571_v24, 16 }
  0x96   : > { %4603 = vmatmul.msk.bf16.gmra.mxu0 %vm685_vm4, %v2187_v50  ;;  %v1135_v50 = vrot.slane %v5117_v20, 5  ;;  %v1890_v20 = vrot.slane %v1888_v51, 4  ;;  %v1923_v51 = vrot.slane %v1921_v35, 5  ;;  %v1152_v35 = vrot.slane %v5212_v27, 5 }
  0x97   : > { %4393 = vmatmul.msk.bf16.gmra.mxu1 %vm685_vm4, %v4899_v48  ;;  %v1052_v48 = vld [vmem:[%s5077_s30 + $0x3c] sm:$0xe] }
  0x98   : > { %v4411_v43 = vrot.slane %v1052_v48, 9  ;;  %v1137_v59 = vrot.slane %v1135_v50, 4  ;;  %v1917_v48 = vrot.slane %v1915_v32, 5 }
  0x9a   : > { %v1136_v5 = vsel %vm5263_vm7, %v4411_v43, %v1135_v50  ;;  %v4902_v43 = vld [vmem:[%s5077_s30 + $0x48] sm:$0xff] }
  0x9c   : > { %v5358_v7 = vpop.f32.mrf.mxu1  ;;  %4426 = vmatmul.msk.bf16.gmra.mxu2 %vm685_vm4, %v1247_v60  ;;  %v1138_v60 = vrot.slane %v5122_v25, 5  ;;  %v1894_v25 = vor.u32 %v1893_v61, %v1890_v20  ;;  %v1931_v20 = vshll.u32 %v4572_v54, 16  ;;  %v4903_v54 = vld [vmem:[%s5077_s30 + $0x54] sm:$0xff] }
  0x9e   : > { %v1139_v6 = vsel %vm5263_vm7, %v1137_v59, %v1138_v60  ;;  %v1895_v15 = vrot.slane %v1894_v25, 4  ;;  %v1928_v60 = vor.u32 %v1927_v52, %v1923_v51  ;;  %v1933_v10 = vrot.slane %v1931_v20, 5 }
  0x9f   : > { %v1223_v14 = vunpack.c.l.b16 %v1139_v6 }
  0xa0   : > { %v1900_v29 = vsel %vm5089_vm3, %v1895_v15, %v1899_v62  ;;  %v1929_v25 = vrot.slane %v1928_v60, 4  ;;  %v1149_v15 = vrot.slane %v5207_v21, 5 }
  0xa1   : > { %4539 = vmatmul.msk.bf16.gmra.mxu3 %vm685_vm4, %v4915_v13  ;;  %v1222_v13 = vunpack.c.l.b16 %v1136_v5  ;;  %v2163_v45 = vunpack.c.l.b16 %v1900_v29  ;;  %v4574_v5 = vld [vmem:[%s5077_s30 + $0x64] sm:$0xf] }
  0xa2   : > { %v1949_v16 = vshrl.u32 %v4574_v5, 16  ;;  %v1934_v24 = vsel %vm5089_vm3, %v1929_v25, %v1933_v10  ;;  %v1151_v32 = vrot.slane %v1149_v15, 4  ;;  %v4960_v10 = vld [vmem:[%s5077_s30 + $0x64] sm:$0xf] }
  0xa3   : > { %v1249_v19 = vpack.c.b16 %v1223_v14, %v1222_v13  ;;  %v2190_v57 = vpack.c.b16 %v2164_v46, %v2163_v45  ;;  %v1939_v13 = vshll.u32 %v4573_v4, 16  ;;  %v1945_v14 = vshll.u32 %v4574_v5, 16 }
  0xa4   : > { %v5374_v34 = vpop.f32.mrf.mxu1  ;;  %v1951_v42 = vrot.slane %v1949_v16, 4 }
  0xa5   : > { %v1941_v30 = vrot.slane %v1939_v13, 5  ;;  %v1055_v13 = vld [vmem:[%s5077_s30 + $0x60] sm:$0xe] }
  0xa6   : > { %v5376_v37 = vpop.f32.mrf.mxu2  ;;  %4604 = vmatmul.msk.bf16.gmra.mxu0 %vm685_vm4, %v2188_v31  ;;  %v1053_v31 = vld [vmem:[%s5077_s30 + $0x48] sm:$0xe] }
  0xa7   : > { %4394 = vmatmul.msk.bf16.gmra.mxu1 %vm685_vm4, %v4900_v33  ;;  %v1912_v33 = vshrl.u32 %v4570_v23, 16  ;;  %v4412_v47 = vrot.slane %v1053_v31, 9  ;;  %v1947_v31 = vrot.slane %v1945_v14, 5 }
  0xa9   : > { %v5382_v41 = vpop.f32.mrf.mxu0  ;;  %v1914_v50 = vrot.slane %v1912_v33, 4  ;;  %v4918_v33 = vld [vmem:[%s5077_s30 + $0x54] sm:$0xff]  ;;  %v1952_v27 = vor.u32 %v1951_v42, %v1947_v31 }
  0xaa   : > { %v5388_v49 = vpop.f32.mrf.mxu3 }
  0xab   : > { %v1918_v59 = vor.u32 %v1917_v48, %v1914_v50  ;;  %v1153_v48 = vsel %vm5263_vm7, %v1151_v32, %v1152_v35  ;;  %v1953_v60 = vrot.slane %v1952_v27, 4 }
  0xac   : > { %4427 = vmatmul.msk.bf16.gmra.mxu2 %vm685_vm4, %v1248_v44  ;;  %v1145_v44 = vrot.slane %v5166_v56, 5 }
  0xae   : > { %v5394_v58 = vpop.f32.mrf.mxu1  ;;  %v5397_v63 = vpop.f32.mrf.mxu2  ;;  %v1146_v56 = vsel %vm5263_vm7, %v1144_v40, %v1145_v44  ;;  %v4575_v40 = vld [vmem:[%s5077_s30 + $0x68] sm:$0x1] }
  0xaf   : > { %v1225_v62 = vunpack.c.l.b16 %v1146_v56 }
  0xb1   : > { %4540 = vmatmul.msk.bf16.gmra.mxu3 %vm685_vm4, %v4916_v2  ;;  %v5405_v9 = vpop.f32.mrf.mxu0  ;;  %v1143_v2 = vsel %vm5263_vm7, %v4412_v47, %v1142_v26  ;;  %v2166_v47 = vunpack.c.l.b16 %v1934_v24 }
  0xb2   : > { %v5407_v0 = vpop.f32.mrf.mxu3  ;;  %v1224_v61 = vunpack.c.l.b16 %v1143_v2 }
  0xb4   : > { %v1250_v11 = vpack.c.b16 %v1225_v62, %v1224_v61  ;;  %v4576_v61 = vld [vmem:[%s5077_s30 + $0x6c] sm:$0xf]  ;;  %v4577_v62 = vld [vmem:[%s5077_s30 + $0x70] sm:$0xf] }
  0xb5   : > { %v1960_v14 = vshrl.u32 %v4576_v61, 16  ;;  %v1969_v16 = vshll.u32 %v4577_v62, 16 }
  0xb6   : > { %4605 = vmatmul.msk.bf16.gmra.mxu0 %vm685_vm4, %v2189_v8  ;;  %v5411_v28 = vpop.f32.mrf.mxu1  ;;  %v1919_v8 = vrot.slane %v1918_v59, 4 }
  0xb7   : > { %4395 = vmatmul.msk.bf16.gmra.mxu1 %vm685_vm4, %v4901_v12  ;;  %v1936_v12 = vshrl.u32 %v4573_v4, 16  ;;  %v1962_v35 = vrot.slane %v1960_v14, 4  ;;  %v4580_v14 = vld [vmem:[%s5077_s30 + $0x7c] sm:$0xf] }
  0xb8   : > { %v1924_v23 = vsel %vm5089_vm3, %v1919_v8, %v1923_v51  ;;  %v1955_v51 = vshll.u32 %v4575_v40, 16 }
  0xb9   : > { %v5414_v22 = vpop.f32.mrf.mxu2  ;;  %v1938_v29 = vrot.slane %v1936_v12, 4 }
  0xba   : > { %v1957_v20 = vrot.slane %v1955_v51, 5 }
  0xbb   : > { %v1942_v46 = vor.u32 %v1941_v30, %v1938_v29  ;;  %v4919_v30 = vld [vmem:[%s5077_s30 + $0x60] sm:$0xff] }
  0xbc   : > { %4428 = vmatmul.msk.bf16.gmra.mxu2 %vm685_vm4, %v1249_v19  ;;  %v1054_v19 = vld [vmem:[%s5077_s30 + $0x54] sm:$0xe]  ;;  %v1958_v25 = vsel %vm5089_vm3, %v1953_v60, %v1957_v20 }
  0xbd   : > { %v5424_v38 = vpop.f32.mrf.mxu0  ;;  %v4413_v21 = vrot.slane %v1054_v19, 9  ;;  %v1943_v59 = vrot.slane %v1942_v46, 4  ;;  %v1973_v19 = vshrl.u32 %v4577_v62, 16  ;;  %v4578_v46 = vld [vmem:[%s5077_s30 + $0x74] sm:$0x1] }
  0xbe   : > { %v5428_v39 = vpop.f32.mrf.mxu3 }
  0xbf   : > { %v1150_v50 = vsel %vm5263_vm7, %v4413_v21, %v1149_v15  ;;  %v1948_v8 = vsel %vm5089_vm3, %v1943_v59, %v1947_v31  ;;  %v1963_v15 = vshll.u32 %v4576_v61, 16  ;;  %v4414_v21 = vrot.slane %v1055_v13, 9  ;;  %v4579_v13 = vld [vmem:[%s5077_s30 + $0x78] sm:$0xf] }
  0xc0   : > { %v5431_v53 = vpop.f32.mrf.mxu1  ;;  %v1226_v56 = vunpack.c.l.b16 %v1150_v50  ;;  %v2167_v31 = vunpack.c.l.b16 %v1948_v8 }
  0xc1   : > { %4541 = vmatmul.msk.bf16.gmra.mxu3 %vm685_vm4, %v4917_v1  ;;  %v5435_v55 = vpop.f32.mrf.mxu2  ;;  %v2165_v1 = vunpack.c.l.b16 %v1924_v23  ;;  %v4961_v23 = vld [vmem:[%s5077_s30 + $0x68] sm:$0x1]  ;;  %v1965_v42 = vrot.slane %v1963_v15, 5  ;;  %v4962_v15 = vld [vmem:[%s5077_s30 + $0x70] sm:$0xf] }
  0xc2   : > { %v1159_v24 = vrot.slane %v4961_v23, 5  ;;  %v1056_v23 = vld [vmem:[%s5077_s30 + $0x6c] sm:$0xe] }
  0xc3   : > { %v2191_v52 = vpack.c.b16 %v2166_v47, %v2165_v1  ;;  %v1971_v1 = vrot.slane %v1969_v16, 5  ;;  %v1975_v47 = vrot.slane %v1973_v19, 4  ;;  %v1966_v51 = vor.u32 %v1965_v42, %v1962_v35  ;;  %v4963_v42 = vld [vmem:[%s5077_s30 + $0x74] sm:$0x1] }
  0xc4   : > { %v1163_v16 = vrot.slane %v4962_v15, 5 }
  0xc5   : > { %v5442_v3 = vpop.f32.mrf.mxu0 }
  0xc6   : > { %4606 = vmatmul.msk.bf16.gmra.mxu0 %vm685_vm4, %v2190_v57  ;;  %v5447_v6 = vpop.f32.mrf.mxu3  ;;  %v1227_v57 = vunpack.c.l.b16 %v1153_v48 }
  0xc7   : > { %4396 = vmatmul.msk.bf16.gmra.mxu1 %vm685_vm4, %v4902_v43 }
  0xc8   : > { %v5451_v17 = vpop.f32.mrf.mxu1  ;;  %v1251_v4 = vpack.c.b16 %v1227_v57, %v1226_v56  ;;  %v4904_v57 = vld [vmem:[%s5077_s30 + $0x60] sm:$0xff] }
  0xcc   : > { %v5458_v26 = vpop.f32.mrf.mxu2  ;;  %4429 = vmatmul.msk.bf16.gmra.mxu2 %vm685_vm4, %v1250_v11  ;;  %v1156_v11 = vrot.slane %v4960_v10, 5 }
  0xce   : > { %v1158_v32 = vrot.slane %v1156_v11, 4  ;;  %v1157_v50 = vsel %vm5263_vm7, %v4414_v21, %v1156_v11  ;;  %v1997_v21 = vshrl.u32 %v4580_v14, 16 }
  0xcf   : > { %v5464_v44 = vpop.f32.mrf.mxu0  ;;  %v1228_v20 = vunpack.c.l.b16 %v1157_v50  ;;  %v4415_v50 = vrot.slane %v1056_v23, 9 }
  0xd0   : > { %v5466_v45 = vpop.f32.mrf.mxu3  ;;  %v1160_v48 = vsel %vm5263_vm7, %v1158_v32, %v1159_v24 }
  0xd1   : > { %4542 = vmatmul.msk.bf16.gmra.mxu3 %vm685_vm4, %v4918_v33  ;;  %v2168_v33 = vunpack.c.l.b16 %v1958_v25  ;;  %v1229_v61 = vunpack.c.l.b16 %v1160_v48  ;;  %v1165_v48 = vrot.slane %v1163_v16, 4 }
  0xd3   : > { %v2192_v27 = vpack.c.b16 %v2168_v33, %v2167_v31  ;;  %v1252_v11 = vpack.c.b16 %v1229_v61, %v1228_v20  ;;  %v1987_v31 = vshll.u32 %v4579_v13, 16  ;;  %v1993_v33 = vshll.u32 %v4580_v14, 16 }
  0xd4   : > { %v5474_v2 = vpop.f32.mrf.mxu1  ;;  %v5476_v43 = vpop.f32.mrf.mxu2  ;;  %v1999_v20 = vrot.slane %v1997_v21, 4 }
  0xd6   : > { %4607 = vmatmul.msk.bf16.gmra.mxu0 %vm685_vm4, %v2191_v52  ;;  %v1976_v52 = vor.u32 %v1975_v47, %v1971_v1  ;;  %v1166_v47 = vrot.slane %v4963_v42, 5 }
  0xd7   : > { %4397 = vmatmul.msk.bf16.gmra.mxu1 %vm685_vm4, %v4903_v54  ;;  %v5482_v5 = vpop.f32.mrf.mxu0  ;;  %v1979_v54 = vshll.u32 %v4578_v46, 16  ;;  %v4920_v46 = vld [vmem:[%s5077_s30 + $0x6c] sm:$0xff] }
  0xd8   : > { %v5489_v12 = vpop.f32.mrf.mxu3  ;;  %v1977_v8 = vrot.slane %v1976_v52, 4 }
  0xd9   : > { %v1981_v25 = vrot.slane %v1979_v54, 5 }
  0xdc   : > { %4430 = vmatmul.msk.bf16.gmra.mxu2 %vm685_vm4, %v1251_v4  ;;  %v5494_v29 = vpop.f32.mrf.mxu1  ;;  %v1967_v4 = vrot.slane %v1966_v51, 4 }
  0xde   : > { %v1972_v19 = vsel %vm5089_vm3, %v1967_v4, %v1971_v1  ;;  %v4581_v4 = vld [vmem:[%s5077_s30 + $0x80] sm:$0x1] }
  0xdf   : > { %v5497_v40 = vpop.f32.mrf.mxu2 }
  0xe1   : > { %4543 = vmatmul.msk.bf16.gmra.mxu3 %vm685_vm4, %v4919_v30  ;;  %v1984_v30 = vshrl.u32 %v4579_v13, 16  ;;  %v4905_v13 = vld [vmem:[%s5077_s30 + $0x6c] sm:$0xff] }
  0xe3   : > { %v5505_v56 = vpop.f32.mrf.mxu0  ;;  %v1986_v54 = vrot.slane %v1984_v30, 4 }
  0xe4   : > { %v5508_v59 = vpop.f32.mrf.mxu3  ;;  %v967_v60 = vpop.f32.mrf.mxu1 }
  0xe5   : > { %v968_v62 = vadd.f32 %v967_v60, %v5382_v41  ;;  %v1982_v41 = vsel %vm5089_vm3, %v1977_v8, %v1981_v25  ;;  %v1995_v60 = vrot.slane %v1993_v33, 5  ;;  %v1164_v8 = vsel %vm5263_vm7, %v4415_v50, %v1163_v16 }
  0xe6   : > { %4608 = vmatmul.msk.bf16.gmra.mxu0 %vm685_vm4, %v2192_v27  ;;  %v2169_v27 = vunpack.c.l.b16 %v1972_v19  ;;  %v2170_v51 = vunpack.c.l.b16 %v1982_v41  ;;  %v2003_v19 = vshll.u32 %v4581_v4, 16 }
  0xe7   : > { %v5512_v10 = vpop.f32.mrf.mxu2  ;;  %4398 = vmatmul.msk.bf16.gmra.mxu1 %vm685_vm4, %v4904_v57  ;;  %v1989_v57 = vrot.slane %v1987_v31, 5  ;;  %v2000_v15 = vor.u32 %v1999_v20, %v1995_v60 }
  0xe8   : > { %v2193_v25 = vpack.c.b16 %v2170_v51, %v2169_v27  ;;  %v2005_v42 = vrot.slane %v2003_v19, 5  ;;  %v4583_v27 = vld [vmem:[%s5077_s30 + $0x88] sm:$0xf]  ;;  %v4964_v51 = vld [vmem:[%s5077_s30 + $0x7c] sm:$0xf] }
  0xe9   : > { %v1990_v14 = vor.u32 %v1989_v57, %v1986_v54  ;;  %v1057_v54 = vld [vmem:[%s5077_s30 + $0x78] sm:$0xe] }
  0xeb   : > { %v5523_v24 = vpop.f32.mrf.mxu0  ;;  %v1991_v21 = vrot.slane %v1990_v14, 4 }
  0xec   : > { %v5525_v32 = vpop.f32.mrf.mxu3  ;;  %4431 = vmatmul.msk.bf16.gmra.mxu2 %vm685_vm4, %v1252_v11  ;;  %v969_v35 = vpop.f32.mrf.mxu1 }
  0xed   : > { %v970_v1 = vadd.f32 %v969_v35, %v5405_v9  ;;  %v1167_v9 = vsel %vm5263_vm7, %v1165_v48, %v1166_v47  ;;  %v2001_v35 = vrot.slane %v2000_v15, 4  ;;  %v4582_v47 = vld [vmem:[%s5077_s30 + $0x84] sm:$0xf]  ;;  %v4921_v15 = vld [vmem:[%s5077_s30 + $0x78] sm:$0xff] }
  0xee   : > { %v1231_v30 = vunpack.c.l.b16 %v1167_v9  ;;  %v2011_v57 = vshll.u32 %v4582_v47, 16  ;;  %v2021_v9 = vshrl.u32 %v4583_v27, 16 }
  0xef   : > { %v1320_v52 = vpop.f32.mrf.mxu2  ;;  %v2006_v4 = vsel %vm5089_vm3, %v2001_v35, %v2005_v42 }
  0xf0   : > { %v1400_v61 = vadd.f32 %v1320_v52, %v968_v62  ;;  %v1230_v62 = vunpack.c.l.b16 %v1164_v8  ;;  %v1170_v52 = vrot.slane %v4964_v51, 5  ;;  %v2017_v8 = vshll.u32 %v4583_v27, 16 }
  0xf1   : > { %4544 = vmatmul.msk.bf16.gmra.mxu3 %vm685_vm4, %v4920_v46  ;;  %v2023_v35 = vrot.slane %v2021_v9, 4 }
  0xf2   : > { %v1253_v48 = vpack.c.b16 %v1231_v30, %v1230_v62 }
  0xf3   : > { %v2261_v11 = vpop.f32.mrf.mxu0 }
  0xf4   : > { %v1607_v41 = vpop.f32.mrf.mxu3  ;;  %v972_v23 = vpop.f32.mrf.mxu1 }
  0xf5   : > { %v1687_v31 = vadd.f32 %v1607_v41, %v1400_v61  ;;  %v973_v16 = vadd.f32 %v972_v23, %v5424_v38  ;;  %v2008_v38 = vshrl.u32 %v4582_v47, 16  ;;  %v1996_v61 = vsel %vm5089_vm3, %v1991_v21, %v1995_v60 }
  0xf6   : > { %4609 = vmatmul.msk.bf16.gmra.mxu0 %vm685_vm4, %v2193_v25  ;;  %v4965_v25 = vld [vmem:[%s5077_s30 + $0x80] sm:$0x1]  ;;  %v4416_v41 = vrot.slane %v1057_v54, 9  ;;  %v1172_v23 = vrot.slane %v1170_v52, 4  ;;  %v2171_v62 = vunpack.c.l.b16 %v1996_v61  ;;  %v2172_v60 = vunpack.c.l.b16 %v2006_v4 }
  0xf7   : > { %v1322_v33 = vpop.f32.mrf.mxu2  ;;  %4399 = vmatmul.msk.bf16.gmra.mxu1 %vm685_vm4, %v4905_v13  ;;  %v5542_v46 = vadd.f32 %v2261_v11, %v1687_v31  ;;  %v1173_v11 = vrot.slane %v4965_v25, 5  ;;  %v2010_v30 = vrot.slane %v2008_v38, 4  ;;  %v2013_v31 = vrot.slane %v2011_v57, 5  ;;  %v4906_v38 = vld [vmem:[%s5077_s30 + $0x78] sm:$0xff] }
  0xf8   : > { %v1401_v50 = vadd.f32 %v1322_v33, %v970_v1  ;;  %v2019_v21 = vrot.slane %v2017_v8, 5  ;;  %v2194_v27 = vpack.c.b16 %v2172_v60, %v2171_v62  ;;  %v4586_v62 = vld [vmem:[%s5077_s30 + $0x94] sm:$0xf]  ;;  %v4966_v60 = vld [vmem:[%s5077_s30 + $0x88] sm:$0xf] }
  0xf9   : > { %v2014_v51 = vor.u32 %v2013_v31, %v2010_v30  ;;  %v1177_v30 = vrot.slane %v4966_v60, 5  ;;  %v1058_v31 = vld [vmem:[%s5077_s30 + $0x84] sm:$0xe] }
  0xfa   : > { %v2024_v57 = vor.u32 %v2023_v35, %v2019_v21 }
  0xfb   : > { %v2263_v20 = vpop.f32.mrf.mxu0  ;;  %v2015_v25 = vrot.slane %v2014_v51, 4 }
  0xfc   : > { %v1609_v1 = vpop.f32.mrf.mxu3  ;;  %4432 = vmatmul.msk.bf16.gmra.mxu2 %vm685_vm4, %v1253_v48  ;;  %v974_v13 = vpop.f32.mrf.mxu1  ;;  %v4584_v48 = vld [vmem:[%s5077_s30 + $0x8c] sm:$0x1] }
  0xfd   : > { %v1688_v14 = vadd.f32 %v1609_v1, %v1401_v50  ;;  %v975_v19 = vadd.f32 %v974_v13, %v5442_v3  ;;  %v1171_v50 = vsel %vm5263_vm7, %v4416_v41, %v1170_v52  ;;  %v1174_v3 = vsel %vm5263_vm7, %v1172_v23, %v1173_v11 }
  0xfe   : > { %v2027_v61 = vshll.u32 %v4584_v48, 16  ;;  %v1233_v8 = vunpack.c.l.b16 %v1174_v3  ;;  %v2025_v1 = vrot.slane %v2024_v57, 4  ;;  %v2045_v3 = vshrl.u32 %v4586_v62, 16  ;;  %v4922_v57 = vld [vmem:[%s5077_s30 + $0x84] sm:$0xff] }
  0xff   : > { %v1325_v33 = vpop.f32.mrf.mxu2  ;;  %v5555_v42 = vadd.f32 %v2263_v20, %v1688_v14  ;;  %v4585_v14 = vld [vmem:[%s5077_s30 + $0x90] sm:$0xf] }
 0x100   : > { %v1402_v47 = vadd.f32 %v1325_v33, %v973_v16  ;;  %v1232_v16 = vunpack.c.l.b16 %v1171_v50  ;;  %v2029_v13 = vrot.slane %v2027_v61, 5  ;;  %v2032_v33 = vshrl.u32 %v4585_v14, 16 }
 0x101   : > { %4545 = vmatmul.msk.bf16.gmra.mxu3 %vm685_vm4, %v4921_v15  ;;  %v2035_v48 = vshll.u32 %v4585_v14, 16  ;;  %v2041_v50 = vshll.u32 %v4586_v62, 16  ;;  %v4417_v61 = vrot.slane %v1058_v31, 9 }
 0x102   : > { %v1254_v23 = vpack.c.b16 %v1233_v8, %v1232_v16  ;;  %v2034_v8 = vrot.slane %v2032_v33, 4 }
 0x103   : > { %v2266_v54 = vpop.f32.mrf.mxu0 }
 0x104   : > { %v1612_v4 = vpop.f32.mrf.mxu3  ;;  %v977_v20 = vpop.f32.mrf.mxu1 }
 0x105   : > { %v1689_v9 = vadd.f32 %v1612_v4, %v1402_v47  ;;  %v978_v52 = vadd.f32 %v977_v20, %v5464_v44  ;;  %v2020_v44 = vsel %vm5089_vm3, %v2015_v25, %v2019_v21  ;;  %v2030_v47 = vsel %vm5089_vm3, %v2025_v1, %v2029_v13 }
 0x106   : > { %4610 = vmatmul.msk.bf16.gmra.mxu0 %vm685_vm4, %v2194_v27  ;;  %v4967_v27 = vld [vmem:[%s5077_s30 + $0x8c] sm:$0x1]  ;;  %v1179_v4 = vrot.slane %v1177_v30, 4  ;;  %v2173_v20 = vunpack.c.l.b16 %v2020_v44  ;;  %v2174_v16 = vunpack.c.l.b16 %v2030_v47  ;;  %v2037_v25 = vrot.slane %v2035_v48, 5  ;;  %v4907_v44 = vld [vmem:[%s5077_s30 + $0x84] sm:$0xff] }
 0x107   : > { %v1327_v11 = vpop.f32.mrf.mxu2  ;;  %4400 = vmatmul.msk.bf16.gmra.mxu1 %vm685_vm4, %v4906_v38  ;;  %v5568_v15 = vadd.f32 %v2266_v54, %v1689_v9  ;;  %v1180_v51 = vrot.slane %v4967_v27, 5  ;;  %v2047_v1 = vrot.slane %v2045_v3, 4 }
 0x108   : > { %v1403_v41 = vadd.f32 %v1327_v11, %v975_v19  ;;  %v2043_v11 = vrot.slane %v2041_v50, 5  ;;  %v2195_v62 = vpack.c.b16 %v2174_v16, %v2173_v20  ;;  %v2038_v31 = vor.u32 %v2037_v25, %v2034_v8  ;;  %v4589_v20 = vld [vmem:[%s5077_s30 + $0xa0] sm:$0xf]  ;;  %v4968_v16 = vld [vmem:[%s5077_s30 + $0x94] sm:$0xf] }
 0x109   : > { %v1184_v8 = vrot.slane %v4968_v16, 5 }
 0x10a   : > { %v2048_v33 = vor.u32 %v2047_v1, %v2043_v11 }
 0x10b   : > { %v2268_v35 = vpop.f32.mrf.mxu0 }
 0x10c   : > { %v1614_v19 = vpop.f32.mrf.mxu3  ;;  %4433 = vmatmul.msk.bf16.gmra.mxu2 %vm685_vm4, %v1254_v23  ;;  %v979_v54 = vpop.f32.mrf.mxu1  ;;  %v4587_v23 = vld [vmem:[%s5077_s30 + $0x98] sm:$0x1] }
 0x10d   : > { %v1690_v38 = vadd.f32 %v1614_v19, %v1403_v41  ;;  %v980_v21 = vadd.f32 %v979_v54, %v5482_v5  ;;  %v1178_v41 = vsel %vm5263_vm7, %v4417_v61, %v1177_v30  ;;  %v1181_v5 = vsel %vm5263_vm7, %v1179_v4, %v1180_v51 }
 0x10e   : > { %v2051_v47 = vshll.u32 %v4587_v23, 16  ;;  %v1235_v50 = vunpack.c.l.b16 %v1181_v5  ;;  %v2039_v51 = vrot.slane %v2038_v31, 4  ;;  %v2049_v19 = vrot.slane %v2048_v33, 4  ;;  %v4923_v33 = vld [vmem:[%s5077_s30 + $0x90] sm:$0xff] }
 0x10f   : > { %v1330_v9 = vpop.f32.mrf.mxu2  ;;  %v5581_v13 = vadd.f32 %v2268_v35, %v1690_v38  ;;  %v4588_v38 = vld [vmem:[%s5077_s30 + $0x9c] sm:$0xf]  ;;  %v2069_v5 = vshrl.u32 %v4589_v20, 16 }
 0x110   : > { %v1404_v14 = vadd.f32 %v1330_v9, %v978_v52  ;;  %v1234_v52 = vunpack.c.l.b16 %v1178_v41  ;;  %v2053_v54 = vrot.slane %v2051_v47, 5  ;;  %v1059_v9 = vld [vmem:[%s5077_s30 + $0x90] sm:$0xe]  ;;  %v2059_v25 = vshll.u32 %v4588_v38, 16 }
 0x111   : > { %4546 = vmatmul.msk.bf16.gmra.mxu3 %vm685_vm4, %v4922_v57  ;;  %v2065_v41 = vshll.u32 %v4589_v20, 16 }
 0x112   : > { %v1255_v4 = vpack.c.b16 %v1235_v50, %v1234_v52  ;;  %v2054_v23 = vsel %vm5089_vm3, %v2049_v19, %v2053_v54  ;;  %v2071_v19 = vrot.slane %v2069_v5, 4 }
 0x113   : > { %v2271_v60 = vpop.f32.mrf.mxu0 }
 0x114   : > { %v1617_v48 = vpop.f32.mrf.mxu3  ;;  %v982_v35 = vpop.f32.mrf.mxu1 }
 0x115   : > { %v1691_v3 = vadd.f32 %v1617_v48, %v1404_v14  ;;  %v983_v30 = vadd.f32 %v982_v35, %v5505_v56  ;;  %v2056_v56 = vshrl.u32 %v4588_v38, 16  ;;  %v2044_v14 = vsel %vm5089_vm3, %v2039_v51, %v2043_v11 }
 0x116   : > { %4611 = vmatmul.msk.bf16.gmra.mxu0 %vm685_vm4, %v2195_v62  ;;  %v4969_v62 = vld [vmem:[%s5077_s30 + $0x98] sm:$0x1]  ;;  %v4418_v48 = vrot.slane %v1059_v9, 9  ;;  %v1186_v35 = vrot.slane %v1184_v8, 4  ;;  %v2175_v52 = vunpack.c.l.b16 %v2044_v14  ;;  %v2176_v11 = vunpack.c.l.b16 %v2054_v23 }
 0x117   : > { %v1332_v27 = vpop.f32.mrf.mxu2  ;;  %4401 = vmatmul.msk.bf16.gmra.mxu1 %vm685_vm4, %v4907_v44  ;;  %v5594_v57 = vadd.f32 %v2271_v60, %v1691_v3  ;;  %v1187_v60 = vrot.slane %v4969_v62, 5  ;;  %v2058_v50 = vrot.slane %v2056_v56, 4  ;;  %v2061_v3 = vrot.slane %v2059_v25, 5  ;;  %v4908_v56 = vld [vmem:[%s5077_s30 + $0x90] sm:$0xff] }
 0x118   : > { %v1405_v61 = vadd.f32 %v1332_v27, %v980_v21  ;;  %v2067_v51 = vrot.slane %v2065_v41, 5  ;;  %v2196_v20 = vpack.c.b16 %v2176_v11, %v2175_v52  ;;  %v4592_v11 = vld [vmem:[%s5077_s30 + $0xac] sm:$0xf] }
 0x119   : > { %v2062_v16 = vor.u32 %v2061_v3, %v2058_v50  ;;  %v1060_v50 = vld [vmem:[%s5077_s30 + $0x9c] sm:$0xe] }
 0x11a   : > { %v2072_v25 = vor.u32 %v2071_v19, %v2067_v51 }
 0x11b   : > { %v2273_v1 = vpop.f32.mrf.mxu0 }
 0x11c   : > { %v1619_v21 = vpop.f32.mrf.mxu3  ;;  %4434 = vmatmul.msk.bf16.gmra.mxu2 %vm685_vm4, %v1255_v4  ;;  %v984_v44 = vpop.f32.mrf.mxu1  ;;  %v4590_v4 = vld [vmem:[%s5077_s30 + $0xa4] sm:$0x1] }
 0x11d   : > { %v1692_v31 = vadd.f32 %v1619_v21, %v1405_v61  ;;  %v985_v47 = vadd.f32 %v984_v44, %v5523_v24  ;;  %v1185_v61 = vsel %vm5263_vm7, %v4418_v48, %v1184_v8  ;;  %v1188_v24 = vsel %vm5263_vm7, %v1186_v35, %v1187_v60  ;;  %v4591_v44 = vld [vmem:[%s5077_s30 + $0xa8] sm:$0xf]  ;;  %v4970_v35 = vld [vmem:[%s5077_s30 + $0xa0] sm:$0xf] }
 0x11e   : > { %v2075_v14 = vshll.u32 %v4590_v4, 16  ;;  %v1237_v41 = vunpack.c.l.b16 %v1188_v24  ;;  %v2063_v8 = vrot.slane %v2062_v16, 4  ;;  %v2073_v60 = vrot.slane %v2072_v25, 4 }
 0x11f   : > { %v1335_v27 = vpop.f32.mrf.mxu2  ;;  %v5607_v54 = vadd.f32 %v2273_v1, %v1692_v31  ;;  %v1191_v52 = vrot.slane %v4970_v35, 5  ;;  %v2083_v19 = vshll.u32 %v4591_v44, 16  ;;  %v2093_v24 = vshrl.u32 %v4592_v11, 16 }
 0x120   : > { %v1406_v38 = vadd.f32 %v1335_v27, %v983_v30  ;;  %v1236_v30 = vunpack.c.l.b16 %v1185_v61  ;;  %v2077_v21 = vrot.slane %v2075_v14, 5  ;;  %v2068_v3 = vsel %vm5089_vm3, %v2063_v8, %v2067_v51 }
 0x121   : > { %4547 = vmatmul.msk.bf16.gmra.mxu3 %vm685_vm4, %v4923_v33  ;;  %v2080_v27 = vshrl.u32 %v4591_v44, 16  ;;  %v2089_v61 = vshll.u32 %v4592_v11, 16  ;;  %v1193_v25 = vrot.slane %v1191_v52, 4  ;;  %v2177_v51 = vunpack.c.l.b16 %v2068_v3  ;;  %v4593_v11 = vld [vmem:[%s5077_s30 + $0xb0] sm:$0x1]  ;;  %v4909_v3 = vld [vmem:[%s5077_s30 + $0x9c] sm:$0xff] }
 0x122   : > { %v1256_v48 = vpack.c.b16 %v1237_v41, %v1236_v30  ;;  %v2078_v4 = vsel %vm5089_vm3, %v2073_v60, %v2077_v21  ;;  %v2085_v8 = vrot.slane %v2083_v19, 5  ;;  %v2095_v21 = vrot.slane %v2093_v24, 4 }
 0x123   : > { %v2276_v9 = vpop.f32.mrf.mxu0  ;;  %v2178_v41 = vunpack.c.l.b16 %v2078_v4  ;;  %v2091_v60 = vrot.slane %v2089_v61, 5  ;;  %v2099_v4 = vshll.u32 %v4593_v11, 16 }
 0x124   : > { %v1622_v1 = vpop.f32.mrf.mxu3  ;;  %v987_v23 = vpop.f32.mrf.mxu1 }
 0x125   : > { %v1693_v5 = vadd.f32 %v1622_v1, %v1406_v38  ;;  %v4924_v1 = vld [vmem:[%s5077_s30 + $0x9c] sm:$0xff]  ;;  %v988_v30 = vadd.f32 %v987_v23, %v5358_v7  ;;  %v2197_v7 = vpack.c.b16 %v2178_v41, %v2177_v51  ;;  %v2101_v51 = vrot.slane %v2099_v4, 5 }
 0x126   : > { %4612 = vmatmul.msk.bf16.gmra.mxu0 %vm685_vm4, %v2196_v20  ;;  %v4971_v20 = vld [vmem:[%s5077_s30 + $0xa4] sm:$0x1] }
 0x127   : > { %v1337_v62 = vpop.f32.mrf.mxu2  ;;  %4402 = vmatmul.msk.bf16.gmra.mxu1 %vm685_vm4, %v4908_v56  ;;  %v5619_v31 = vadd.f32 %v2276_v9, %v1693_v5  ;;  %v1194_v16 = vrot.slane %v4971_v20, 5  ;;  %v4419_v56 = vrot.slane %v1060_v50, 9  ;;  %v2082_v5 = vrot.slane %v2080_v27, 4 }
 0x128   : > { %v1407_v33 = vadd.f32 %v1337_v62, %v985_v47 }
 0x129   : > { %v2086_v23 = vor.u32 %v2085_v8, %v2082_v5 }
 0x12b   : > { %v2278_v38 = vpop.f32.mrf.mxu0 }
 0x12c   : > { %v1624_v47 = vpop.f32.mrf.mxu3  ;;  %4435 = vmatmul.msk.bf16.gmra.mxu2 %vm685_vm4, %v1256_v48  ;;  %v989_v9 = vpop.f32.mrf.mxu1  ;;  %v1192_v48 = vsel %vm5263_vm7, %v4419_v56, %v1191_v52  ;;  %v4594_v52 = vld [vmem:[%s5077_s30 + $0xb4] sm:$0xf]  ;;  %v2087_v56 = vrot.slane %v2086_v23, 4 }
 0x12d   : > { %v1694_v14 = vadd.f32 %v1624_v47, %v1407_v33  ;;  %v1195_v33 = vsel %vm5263_vm7, %v1193_v25, %v1194_v16  ;;  %v1238_v27 = vunpack.c.l.b16 %v1192_v48  ;;  %v4595_v47 = vld [vmem:[%s5077_s30 + $0xb8] sm:$0xf]  ;;  %v990_v16 = vadd.f32 %v989_v9, %v5374_v34 }
 0x12e   : > { %v1239_v19 = vunpack.c.l.b16 %v1195_v33  ;;  %v2104_v5 = vshrl.u32 %v4594_v52, 16  ;;  %v2107_v8 = vshll.u32 %v4594_v52, 16  ;;  %v2117_v48 = vshrl.u32 %v4595_v47, 16  ;;  %v1061_v33 = vld [vmem:[%s5077_s30 + $0xa8] sm:$0xe] }
 0x12f   : > { %v1340_v62 = vpop.f32.mrf.mxu2  ;;  %v5632_v44 = vadd.f32 %v2278_v38, %v1694_v14  ;;  %v2096_v38 = vor.u32 %v2095_v21, %v2091_v60  ;;  %v4972_v21 = vld [vmem:[%s5077_s30 + $0xac] sm:$0xf]  ;;  %v2092_v9 = vsel %vm5089_vm3, %v2087_v56, %v2091_v60 }
 0x130   : > { %v1408_v35 = vadd.f32 %v1340_v62, %v988_v30  ;;  %v1257_v14 = vpack.c.b16 %v1239_v19, %v1238_v27  ;;  %v2113_v62 = vshll.u32 %v4595_v47, 16  ;;  %v2106_v27 = vrot.slane %v2104_v5, 4 }
 0x131   : > { %4548 = vmatmul.msk.bf16.gmra.mxu3 %vm685_vm4, %v4924_v1  ;;  %v2097_v1 = vrot.slane %v2096_v38, 4  ;;  %v2109_v19 = vrot.slane %v2107_v8, 5  ;;  %v2119_v47 = vrot.slane %v2117_v48, 4  ;;  %v4910_v48 = vld [vmem:[%s5077_s30 + $0xa8] sm:$0xff] }
 0x132   : > { %v2115_v38 = vrot.slane %v2113_v62, 5 }
 0x133   : > { %v2281_v50 = vpop.f32.mrf.mxu0  ;;  %v2102_v11 = vsel %vm5089_vm3, %v2097_v1, %v2101_v51 }
 0x134   : > { %v1627_v61 = vpop.f32.mrf.mxu3  ;;  %v992_v24 = vpop.f32.mrf.mxu1  ;;  %v2180_v56 = vunpack.c.l.b16 %v2102_v11  ;;  %v2120_v8 = vor.u32 %v2119_v47, %v2115_v38 }
 0x135   : > { %v1695_v20 = vadd.f32 %v1627_v61, %v1408_v35  ;;  %v1198_v35 = vrot.slane %v4972_v21, 5  ;;  %v4925_v61 = vld [vmem:[%s5077_s30 + $0xa8] sm:$0xff]  ;;  %v993_v60 = vadd.f32 %v992_v24, %v5394_v58 }
 0x136   : > { %4613 = vmatmul.msk.bf16.gmra.mxu0 %vm685_vm4, %v2197_v7  ;;  %v4973_v7 = vld [vmem:[%s5077_s30 + $0xb0] sm:$0x1] }
 0x137   : > { %v1342_v25 = vpop.f32.mrf.mxu2  ;;  %4403 = vmatmul.msk.bf16.gmra.mxu1 %vm685_vm4, %v4909_v3  ;;  %v5646_v30 = vadd.f32 %v2281_v50, %v1695_v20  ;;  %v1201_v23 = vrot.slane %v4973_v7, 5  ;;  %v4420_v20 = vrot.slane %v1061_v33, 9  ;;  %v1200_v52 = vrot.slane %v1198_v35, 4 }
 0x138   : > { %v1409_v41 = vadd.f32 %v1342_v25, %v990_v16  ;;  %v2179_v16 = vunpack.c.l.b16 %v2092_v9  ;;  %v4596_v25 = vld [vmem:[%s5077_s30 + $0xbc] sm:$0x1] }
 0x139   : > { %v1202_v5 = vsel %vm5263_vm7, %v1200_v52, %v1201_v23  ;;  %v2123_v58 = vshll.u32 %v4596_v25, 16  ;;  %v4598_v52 = vld [vmem:[%s5077_s30 + $0xc4] sm:$0xf] }
 0x13a   : > { %v2198_v24 = vpack.c.b16 %v2180_v56, %v2179_v16  ;;  %v1241_v11 = vunpack.c.l.b16 %v1202_v5  ;;  %v1062_v16 = vld [vmem:[%s5077_s30 + $0xb4] sm:$0xe]  ;;  %v4975_v56 = vld [vmem:[%s5077_s30 + $0xb8] sm:$0xf]  ;;  %v2141_v5 = vshrl.u32 %v4598_v52, 16 }
 0x13b   : > { %v2283_v34 = vpop.f32.mrf.mxu0  ;;  %v1205_v25 = vrot.slane %v4975_v56, 5 }
 0x13c   : > { %v1629_v50 = vpop.f32.mrf.mxu3  ;;  %4436 = vmatmul.msk.bf16.gmra.mxu2 %vm685_vm4, %v1257_v14  ;;  %v994_v3 = vpop.f32.mrf.mxu1  ;;  %v2110_v14 = vor.u32 %v2109_v19, %v2106_v27  ;;  %v2125_v27 = vrot.slane %v2123_v58, 5  ;;  %v4597_v19 = vld [vmem:[%s5077_s30 + $0xc0] sm:$0xf]  ;;  %v4976_v58 = vld [vmem:[%s5077_s30 + $0x14] sm:$0x1] }
 0x13d   : > { %v1696_v4 = vadd.f32 %v1629_v50, %v1409_v41  ;;  %v1199_v41 = vsel %vm5263_vm7, %v4420_v20, %v1198_v35  ;;  %v2121_v35 = vrot.slane %v2120_v8, 4  ;;  %v995_v23 = vadd.f32 %v994_v3, %v5411_v28 }
 0x13e   : > { %v1240_v9 = vunpack.c.l.b16 %v1199_v41  ;;  %v2111_v50 = vrot.slane %v2110_v14, 4  ;;  %v2128_v3 = vshrl.u32 %v4597_v19, 16  ;;  %v2131_v14 = vshll.u32 %v4597_v19, 16  ;;  %v4926_v19 = vld [vmem:[%s5077_s30 + $0xb4] sm:$0xff] }
 0x13f   : > { %v1345_v1 = vpop.f32.mrf.mxu2  ;;  %v5659_v51 = vadd.f32 %v2283_v34, %v1696_v4  ;;  %v4974_v4 = vld [vmem:[%s5077_s30 + $0x10] sm:$0xf]  ;;  %v2126_v28 = vsel %vm5089_vm3, %v2121_v35, %v2125_v27  ;;  %v2137_v41 = vshll.u32 %v4598_v52, 16  ;;  %v1207_v35 = vrot.slane %v1205_v25, 4  ;;  %v4617_v27 = vld [vmem:[%s5077_s30 + $0xc] sm:$0xe] }
 0x140   : > { %v1410_v21 = vadd.f32 %v1345_v1, %v993_v60  ;;  %v1258_v60 = vpack.c.b16 %v1241_v11, %v1240_v9  ;;  %v4977_v9 = vld [vmem:[%s5077_s30 + $0xbc] sm:$0x1]  ;;  %v4633_v52 = vrot.slane %v4617_v27, 9 }
 0x141   : > { %4549 = vmatmul.msk.bf16.gmra.mxu3 %vm685_vm4, %v4925_v61  ;;  %v2439_v61 = vrot.slane %v4974_v4, 5  ;;  %v2130_v4 = vrot.slane %v2128_v3, 4 }
 0x143   : > { %v2286_v62 = vpop.f32.mrf.mxu0  ;;  %v2441_v8 = vrot.slane %v2439_v61, 4 }
 0x144   : > { %v1632_v33 = vpop.f32.mrf.mxu3  ;;  %v997_v34 = vpop.f32.mrf.mxu1 }
 0x145   : > { %v1697_v7 = vadd.f32 %v1632_v33, %v1410_v21  ;;  %v2116_v21 = vsel %vm5089_vm3, %v2111_v50, %v2115_v38  ;;  %v4421_v33 = vrot.slane %v1062_v16, 9  ;;  %v998_v56 = vadd.f32 %v997_v34, %v5431_v53 }
 0x146   : > { %4614 = vmatmul.msk.bf16.gmra.mxu0 %vm685_vm4, %v2198_v24  ;;  %v2442_v24 = vrot.slane %v4976_v58, 5  ;;  %v2181_v38 = vunpack.c.l.b16 %v2116_v21  ;;  %v2139_v16 = vrot.slane %v2137_v41, 5  ;;  %v2143_v58 = vrot.slane %v2141_v5, 4  ;;  %v4599_v21 = vld [vmem:[%s5077_s30 + $0xc8] sm:$0x1] }
 0x147   : > { %v1347_v20 = vpop.f32.mrf.mxu2  ;;  %4404 = vmatmul.msk.bf16.gmra.mxu1 %vm685_vm4, %v4910_v48  ;;  %v5675_v1 = vadd.f32 %v2286_v62, %v1697_v7  ;;  %v1208_v62 = vrot.slane %v4977_v9, 5  ;;  %v2182_v7 = vunpack.c.l.b16 %v2126_v28  ;;  %v2440_v28 = vsel %vm5263_vm7, %v4633_v52, %v2439_v61  ;;  %v4779_v41 = vld [vmem:[%s5077_s30 + $0x18] sm:$0xf] }
 0x148   : > { %v1411_v47 = vadd.f32 %v1347_v20, %v995_v23  ;;  %v2133_v20 = vrot.slane %v2131_v14, 5  ;;  %v2551_v53 = vunpack.c.l.b16 %v2440_v28  ;;  %v2147_v27 = vshll.u32 %v4599_v21, 16 }
 0x149   : > { %v1209_v14 = vsel %vm5263_vm7, %v1207_v35, %v1208_v62  ;;  %v2199_v5 = vpack.c.b16 %v2182_v7, %v2181_v38  ;;  %v3107_v62 = vshrl.u32 %v4779_v41, 16  ;;  %v3110_v35 = vshll.u32 %v4779_v41, 16 }
 0x14b   : > { %v2288_v48 = vpop.f32.mrf.mxu0  ;;  %v3109_v21 = vrot.slane %v3107_v62, 4 }
 0x14c   : > { %v1634_v11 = vpop.f32.mrf.mxu3  ;;  %4437 = vmatmul.msk.bf16.gmra.mxu2 %vm685_vm4, %v1258_v60  ;;  %v999_v50 = vpop.f32.mrf.mxu1  ;;  %v1206_v60 = vsel %vm5263_vm7, %v4421_v33, %v1205_v25  ;;  %v5699_v25 = vld [vmem:[%s5077_s30 + $0x1c] sm:$0xf]  ;;  %v2144_v33 = vor.u32 %v2143_v58, %v2139_v16 }
 0x14d   : > { %v1698_v23 = vadd.f32 %v1634_v11, %v1411_v47  ;;  %v2443_v47 = vsel %vm5263_vm7, %v2441_v8, %v2442_v24  ;;  %v2134_v11 = vor.u32 %v2133_v20, %v2130_v4  ;;  %v4911_v24 = vld [vmem:[%s5077_s30 + $0xb4] sm:$0xff]  ;;  %v3120_v38 = vshrl.u32 %v5699_v25, 16 }
 0x14e   : > { %v2552_v34 = vunpack.c.l.b16 %v2443_v47  ;;  %v1000_v4 = vadd.f32 %v999_v50, %v5451_v17 }
 0x14f   : > { %v1350_v9 = vpop.f32.mrf.mxu2  ;;  %v5703_v52 = vadd.f32 %v2288_v48, %v1698_v23  ;;  %v2135_v48 = vrot.slane %v2134_v11, 4  ;;  %v2145_v23 = vrot.slane %v2144_v33, 4  ;;  %v3122_v41 = vrot.slane %v3120_v38, 4 }
 0x150   : > { %v1412_v3 = vadd.f32 %v1350_v9, %v998_v56  ;;  %v5701_v61 = vpack.c.b16 %v2552_v34, %v2551_v53  ;;  %v1242_v56 = vunpack.c.l.b16 %v1206_v60  ;;  %v1243_v9 = vunpack.c.l.b16 %v1209_v14 }
 0x151   : > { %4550 = vmatmul.msk.bf16.gmra.mxu3 %vm685_vm4, %v4926_v19  ;;  %6499 = vst [vmem:[#allocation2_spill] sm:$0xff] %v5703_v52  ;;  %v3116_v19 = vshll.u32 %v5699_v25, 16  ;;  %v2149_v60 = vrot.slane %v2147_v27, 5  ;;  %v3112_v14 = vrot.slane %v3110_v35, 5  ;;  %v2140_v17 = vsel %vm5089_vm3, %v2135_v48, %v2139_v16  ;;  %v4844_v48 = vld [vmem:[%s5077_s30 + $0x18] sm:$0xe] }
 0x152   : > { %v1259_v58 = vpack.c.b16 %v1243_v9, %v1242_v56  ;;  %v4927_v9 = vld [vmem:[%s5077_s30 + $0xc0] sm:$0xff]  ;;  %v2183_v16 = vunpack.c.l.b16 %v2140_v17 }
 0x153   : > { %v2291_v8 = vpop.f32.mrf.mxu0  ;;  %v3118_v34 = vrot.slane %v3116_v19, 5  ;;  %v2150_v50 = vsel %vm5089_vm3, %v2145_v23, %v2149_v60  ;;  %v3113_v27 = vor.u32 %v3112_v14, %v3109_v21  ;;  %v4782_v23 = vld [vmem:[%s5077_s30 + $0x24] sm:$0xf]  ;;  %v5729_v60 = vld [vmem:[%s5077_s30 + $0x28] sm:$0xf] }
 0x154   : > { %v1637_v28 = vpop.f32.mrf.mxu3  ;;  %v1002_v47 = vpop.f32.mrf.mxu1  ;;  %v2184_v35 = vunpack.c.l.b16 %v2150_v50 }
 0x155   : > { %v1699_v7 = vadd.f32 %v1637_v28, %v1412_v3  ;;  %v5714_v3 = vld [vmem:[%s5077_s30 + $0x20] sm:$0x1]  ;;  %v1003_v62 = vadd.f32 %v1002_v47, %v5474_v2  ;;  %v3114_v38 = vrot.slane %v3113_v27, 4  ;;  %v4978_v47 = vld [vmem:[%s5077_s30 + $0x1c] sm:$0xf] }
 0x156   : > { %4615 = vmatmul.msk.bf16.gmra.mxu0 %vm685_vm4, %v2199_v5  ;;  %v2446_v14 = vrot.slane %v4978_v47, 5  ;;  %v4618_v27 = vld [vmem:[%s5077_s30 + $0x18] sm:$0xe] }
 0x157   : > { %v1352_v20 = vpop.f32.mrf.mxu2  ;;  %4405 = vmatmul.msk.bf16.gmra.mxu1 %vm685_vm4, %v4911_v24  ;;  %v5711_v52 = vadd.f32 %v2291_v8, %v1699_v7  ;;  %v3123_v24 = vor.u32 %v3122_v41, %v3118_v34  ;;  %v3126_v8 = vshll.u32 %v5714_v3, 16  ;;  %v3119_v17 = vsel %vm5089_vm3, %v3114_v38, %v3118_v34 }
 0x158   : > { %v1413_v53 = vadd.f32 %v1352_v20, %v1000_v4  ;;  %v2200_v20 = vpack.c.b16 %v2184_v35, %v2183_v16  ;;  %v3781_v34 = vrot.slane %v5714_v3, 5  ;;  %v4979_v16 = vld [vmem:[%s5077_s30 + $0x20] sm:$0x1]  ;;  %v4634_v38 = vrot.slane %v4618_v27, 9 }
 0x159   : > { %v3124_v7 = vrot.slane %v3123_v24, 4  ;;  %v3128_v4 = vrot.slane %v3126_v8, 5  ;;  %v3131_v24 = vshrl.u32 %v4782_v23, 16  ;;  %v3134_v8 = vshll.u32 %v4782_v23, 16 }
 0x15a   : > { %v2449_v35 = vrot.slane %v4979_v16, 5  ;;  %v2447_v27 = vsel %vm5263_vm7, %v4634_v38, %v2446_v14  ;;  %v4785_v38 = vld [vmem:[%s5077_s30 + $0x30] sm:$0xf] }
 0x15b   : > { %v2293_v5 = vpop.f32.mrf.mxu0  ;;  %v3129_v50 = vsel %vm5089_vm3, %v3124_v7, %v3128_v4  ;;  %v2448_v7 = vrot.slane %v2446_v14, 4  ;;  %v3136_v3 = vrot.slane %v3134_v8, 5 }
 0x15c   : > { %v1639_v11 = vpop.f32.mrf.mxu3  ;;  %4438 = vmatmul.msk.bf16.gmra.mxu2 %vm685_vm4, %v1259_v58  ;;  %v1004_v33 = vpop.f32.mrf.mxu1  ;;  %v3778_v58 = vrot.slane %v5699_v25, 5  ;;  %v3493_v23 = vunpack.c.l.b16 %v3129_v50 }
 0x15d   : > { %v1700_v56 = vadd.f32 %v1639_v11, %v1413_v53  ;;  %v4860_v11 = vrot.slane %v4844_v48, 9  ;;  %v4928_v48 = vld [vmem:[%s5077_s30 + $0x18] sm:$0xff]  ;;  %v2450_v50 = vsel %vm5263_vm7, %v2448_v7, %v2449_v35  ;;  %v5769_v7 = vld [vmem:[%s5077_s30 + $0x34] sm:$0xf] }
 0x15f   : > { %v1355_v28 = vpop.f32.mrf.mxu2  ;;  %v5731_v21 = vadd.f32 %v2293_v5, %v1700_v56  ;;  %v3140_v5 = vshll.u32 %v5729_v60, 16  ;;  %v3144_v56 = vshrl.u32 %v5729_v60, 16 }
 0x160   : > { %v1414_v19 = vadd.f32 %v1355_v28, %v1003_v62  ;;  %v3780_v62 = vrot.slane %v3778_v58, 4 }
 0x161   : > { %4551 = vmatmul.msk.bf16.gmra.mxu3 %vm685_vm4, %v4927_v9  ;;  %v1005_v9 = vadd.f32 %v1004_v33, %v5494_v29  ;;  %v3133_v33 = vrot.slane %v3131_v24, 4  ;;  %v5752_v47 = vrot.slane %v3140_v5, 5 }
 0x163   : > { %v2296_v2 = vpop.f32.mrf.mxu0  ;;  %v3137_v5 = vor.u32 %v3136_v3, %v3133_v33  ;;  %v4845_v33 = vld [vmem:[%s5077_s30 + $0x24] sm:$0xe] }
 0x164   : > { %v1642_v53 = vpop.f32.mrf.mxu3  ;;  %v1007_v41 = vpop.f32.mrf.mxu1 }
 0x165   : > { %v1701_v25 = vadd.f32 %v1642_v53, %v1414_v19  ;;  %v3492_v19 = vunpack.c.l.b16 %v3119_v17  ;;  %v3146_v53 = vrot.slane %v3144_v56, 4  ;;  %v1008_v14 = vadd.f32 %v1007_v41, %v5376_v37 }
 0x166   : > { %4616 = vmatmul.msk.bf16.gmra.mxu0 %vm685_vm4, %v2200_v20  ;;  %v3779_v20 = vsel %vm5263_vm7, %v4860_v11, %v3778_v58  ;;  %v3785_v37 = vrot.slane %v5729_v60, 5 }
 0x167   : > { %v1357_v28 = vpop.f32.mrf.mxu2  ;;  %4650 = vmatmul.msk.bf16.vlgmr.msra.gmra.mxu1 %vm685_vm4, %v5701_v61  ;;  %v5750_v29 = vadd.f32 %v2296_v2, %v1701_v25  ;;  %v3782_v61 = vsel %vm5263_vm7, %v3780_v62, %v3781_v34  ;;  %v3524_v2 = vpack.c.b16 %v3493_v23, %v3492_v19  ;;  %v3890_v11 = vunpack.c.l.b16 %v3779_v20 }
 0x168   : > { %v1415_v4 = vadd.f32 %v1357_v28, %v1005_v9  ;;  %v5761_v9 = vld [vmem:[%s5077_s30 + $0x2c] sm:$0x1]  ;;  %v3891_v8 = vunpack.c.l.b16 %v3782_v61  ;;  %v3147_v56 = vor.u32 %v3146_v53, %v5752_v47  ;;  %v2553_v62 = vunpack.c.l.b16 %v2447_v27 }
 0x169   : > { %v2554_v34 = vunpack.c.l.b16 %v2450_v50  ;;  %v3150_v16 = vshll.u32 %v5761_v9, 16  ;;  %v3155_v53 = vshrl.u32 %v4785_v38, 16  ;;  %v3158_v61 = vshll.u32 %v4785_v38, 16 }
 0x16a   : > { %v3922_v19 = vpack.c.b16 %v3891_v8, %v3890_v11  ;;  %v3164_v27 = vshll.u32 %v5769_v7, 16  ;;  %v3168_v50 = vshrl.u32 %v5769_v7, 16  ;;  %v4980_v11 = vld [vmem:[%s5077_s30 + $0x28] sm:$0xf]  ;;  %v3788_v60 = vrot.slane %v5761_v9, 5 }
 0x16b   : > { %v2298_v17 = vpop.f32.mrf.mxu0  ;;  %v2584_v23 = vpack.c.b16 %v2554_v34, %v2553_v62  ;;  %v3152_v20 = vrot.slane %v3150_v16, 5  ;;  %v2453_v8 = vrot.slane %v4980_v11, 5  ;;  %v4861_v62 = vrot.slane %v4845_v33, 9  ;;  %v4929_v11 = vld [vmem:[%s5077_s30 + $0x24] sm:$0xff] }
 0x16c   : > { %v1644_v58 = vpop.f32.mrf.mxu3  ;;  %4763 = vmatmul.msk.bf16.vlgmr.msra.gmra.mxu2 %vm685_vm4, %v4928_v48  ;;  %v1009_v24 = vpop.f32.mrf.mxu1  ;;  %v3148_v48 = vrot.slane %v3147_v56, 4  ;;  %v3160_v33 = vrot.slane %v3158_v61, 5  ;;  %v5790_v9 = vrot.slane %v3164_v27, 5 }
 0x16d   : > { %v1702_v25 = vadd.f32 %v1644_v58, %v1415_v4  ;;  %v3138_v4 = vrot.slane %v3137_v5, 4  ;;  %v4981_v5 = vld [vmem:[%s5077_s30 + $0x2c] sm:$0x1] }
 0x16e   : > { %v2456_v56 = vrot.slane %v4981_v5, 5  ;;  %v3153_v16 = vsel %vm5089_vm3, %v3148_v48, %v3152_v20  ;;  %v3786_v20 = vsel %vm5263_vm7, %v4861_v62, %v3785_v37 }
 0x16f   : > { %v1360_v35 = vpop.f32.mrf.mxu2  ;;  %v5774_v41 = vadd.f32 %v2298_v17, %v1702_v25  ;;  %v4619_v17 = vld [vmem:[%s5077_s30 + $0x24] sm:$0xe]  ;;  %v1010_v25 = vadd.f32 %v1009_v24, %v5397_v63  ;;  %v3143_v34 = vsel %vm5089_vm3, %v3138_v4, %v5752_v47  ;;  %v2455_v24 = vrot.slane %v2453_v8, 4 }
 0x170   : > { %v1416_v28 = vadd.f32 %v1360_v35, %v1008_v14  ;;  %v3787_v35 = vrot.slane %v3785_v37, 4  ;;  %v4635_v63 = vrot.slane %v4619_v17, 9  ;;  %v3494_v47 = vunpack.c.l.b16 %v3143_v34 }
 0x171   : > { %4828 = vmatmul.msk.bf16.vlgmr.msra.gmra.mxu3 %vm685_vm4, %v3524_v2  ;;  %6500 = vst [vmem:[#allocation3_spill] sm:$0xff] %v5774_v41  ;;  %v3495_v4 = vunpack.c.l.b16 %v3153_v16  ;;  %v5796_v41 = vld [vmem:[%s5077_s30 + $0x38] sm:$0x1] }
 0x172   : > { %v3174_v37 = vshll.u32 %v5796_v41, 16 }
 0x173   : > { %v2301_v3 = vpop.f32.mrf.mxu0  ;;  %v3525_v17 = vpack.c.b16 %v3495_v4, %v3494_v47  ;;  %v4982_v4 = vld [vmem:[%s5077_s30 + $0x34] sm:$0xf] }
 0x174   : > { %v1647_v58 = vpop.f32.mrf.mxu3  ;;  %v1012_v2 = vpop.f32.mrf.mxu1 }
 0x175   : > { %v1703_v14 = vadd.f32 %v1647_v58, %v1416_v28  ;;  %v3157_v28 = vrot.slane %v3155_v53, 4  ;;  %v3170_v58 = vrot.slane %v3168_v50, 4  ;;  %v2457_v50 = vsel %vm5263_vm7, %v2455_v24, %v2456_v56  ;;  %v5815_v24 = vld [vmem:[%s5077_s30 + $0x40] sm:$0xf] }
 0x176   : > { %4877 = vmatmul.msk.bf16.vlgmr.msra.gmra.mxu0 %vm685_vm4, %v3922_v19 }
 0x177   : > { %v1362_v38 = vpop.f32.mrf.mxu2  ;;  %4651 = vmatmul.msk.bf16.gmra.mxu1 %vm685_vm4, %v2584_v23  ;;  %v5793_v5 = vadd.f32 %v2301_v3, %v1703_v14  ;;  %v3789_v23 = vsel %vm5263_vm7, %v3787_v35, %v3788_v60  ;;  %v3161_v53 = vor.u32 %v3160_v33, %v3157_v28  ;;  %v2454_v3 = vsel %vm5263_vm7, %v4635_v63, %v2453_v8 }
 0x178   : > { %v1417_v19 = vadd.f32 %v1362_v38, %v1010_v25  ;;  %v3171_v14 = vor.u32 %v3170_v58, %v5790_v9  ;;  %v1013_v60 = vadd.f32 %v1012_v2, %v5414_v22  ;;  %v3892_v25 = vunpack.c.l.b16 %v3786_v20  ;;  %v4846_v58 = vld [vmem:[%s5077_s30 + $0x30] sm:$0xe] }
 0x179   : > { %v3893_v34 = vunpack.c.l.b16 %v3789_v23  ;;  %v2555_v35 = vunpack.c.l.b16 %v2454_v3  ;;  %v2556_v8 = vunpack.c.l.b16 %v2457_v50  ;;  %v3162_v28 = vrot.slane %v3161_v53, 4 }
 0x17a   : > { %v3172_v56 = vrot.slane %v3171_v14, 4  ;;  %v3176_v33 = vrot.slane %v3174_v37, 5  ;;  %v3792_v63 = vrot.slane %v5769_v7, 5  ;;  %v2460_v20 = vrot.slane %v4982_v4, 5  ;;  %v4620_v7 = vld [vmem:[%s5077_s30 + $0x30] sm:$0xe] }
 0x17b   : > { %v2303_v48 = vpop.f32.mrf.mxu0  ;;  %v2585_v47 = vpack.c.b16 %v2556_v8, %v2555_v35  ;;  %v4862_v50 = vrot.slane %v4846_v58, 9 }
 0x17c   : > { %v1649_v61 = vpop.f32.mrf.mxu3  ;;  %4764 = vmatmul.msk.bf16.gmra.mxu2 %vm685_vm4, %v4929_v11  ;;  %v1014_v27 = vpop.f32.mrf.mxu1  ;;  %v4788_v11 = vld [vmem:[%s5077_s30 + $0x3c] sm:$0xf]  ;;  %v3177_v3 = vsel %vm5089_vm3, %v3172_v56, %v3176_v33  ;;  %v4930_v33 = vld [vmem:[%s5077_s30 + $0x30] sm:$0xff] }
 0x17d   : > { %v1704_v62 = vadd.f32 %v1649_v61, %v1417_v19  ;;  %v3923_v19 = vpack.c.b16 %v3893_v34, %v3892_v25  ;;  %v3167_v61 = vsel %vm5089_vm3, %v3162_v28, %v5790_v9  ;;  %v3179_v14 = vshrl.u32 %v4788_v11, 16  ;;  %v4983_v34 = vld [vmem:[%s5077_s30 + $0x38] sm:$0x1] }
 0x17e   : > { %v3794_v25 = vrot.slane %v3792_v63, 4  ;;  %v3795_v9 = vrot.slane %v5796_v41, 5  ;;  %v3496_v8 = vunpack.c.l.b16 %v3167_v61  ;;  %v2462_v28 = vrot.slane %v2460_v20, 4 }
 0x17f   : > { %v1365_v16 = vpop.f32.mrf.mxu2  ;;  %v5817_v22 = vadd.f32 %v2303_v48, %v1704_v62  ;;  %v3182_v48 = vshll.u32 %v4788_v11, 16  ;;  %v3188_v62 = vshll.u32 %v5815_v24, 16  ;;  %v3497_v58 = vunpack.c.l.b16 %v3177_v3 }
 0x180   : > { %v1418_v38 = vadd.f32 %v1365_v16, %v1013_v60  ;;  %v1015_v60 = vadd.f32 %v1014_v27, %v5435_v55  ;;  %v2463_v16 = vrot.slane %v4983_v34, 5  ;;  %v3793_v11 = vsel %vm5263_vm7, %v4862_v50, %v3792_v63 }
 0x181   : > { %4829 = vmatmul.msk.bf16.gmra.mxu3 %vm685_vm4, %v3525_v17  ;;  %v3192_v17 = vshrl.u32 %v5815_v24, 16  ;;  %v3181_v55 = vrot.slane %v3179_v14, 4  ;;  %v3184_v27 = vrot.slane %v3182_v48, 5  ;;  %v5838_v41 = vrot.slane %v3188_v62, 5 }
 0x182   : > { %v2464_v3 = vsel %vm5263_vm7, %v2462_v28, %v2463_v16  ;;  %v3894_v50 = vunpack.c.l.b16 %v3793_v11  ;;  %v4847_v11 = vld [vmem:[%s5077_s30 + $0x3c] sm:$0xe] }
 0x183   : > { %v2306_v2 = vpop.f32.mrf.mxu0  ;;  %v3194_v4 = vrot.slane %v3192_v17, 4  ;;  %v3185_v62 = vor.u32 %v3184_v27, %v3181_v55 }
 0x184   : > { %v1652_v23 = vpop.f32.mrf.mxu3  ;;  %v1017_v53 = vpop.f32.mrf.mxu1 }
 0x185   : > { %v1705_v37 = vadd.f32 %v1652_v23, %v1418_v38  ;;  %v4636_v38 = vrot.slane %v4620_v7, 9  ;;  %v5847_v7 = vld [vmem:[%s5077_s30 + $0x44] sm:$0x1]  ;;  %v3195_v17 = vor.u32 %v3194_v4, %v5838_v41  ;;  %v3186_v28 = vrot.slane %v3185_v62, 4 }
 0x186   : > { %4878 = vmatmul.msk.bf16.gmra.mxu0 %vm685_vm4, %v3923_v19 }
 0x187   : > { %v1367_v35 = vpop.f32.mrf.mxu2  ;;  %4652 = vmatmul.msk.bf16.gmra.mxu1 %vm685_vm4, %v2585_v47  ;;  %v5836_v19 = vadd.f32 %v2306_v2, %v1705_v37  ;;  %v3796_v47 = vsel %vm5263_vm7, %v3794_v25, %v3795_v9  ;;  %v2461_v61 = vsel %vm5263_vm7, %v4636_v38, %v2460_v20  ;;  %v3526_v2 = vpack.c.b16 %v3497_v58, %v3496_v8  ;;  %v5855_v38 = vld [vmem:[%s5077_s30 + $0x4c] sm:$0xf] }
 0x188   : > { %v1419_v56 = vadd.f32 %v1367_v35, %v1015_v60  ;;  %v3895_v48 = vunpack.c.l.b16 %v3796_v47  ;;  %v1018_v20 = vadd.f32 %v1017_v53, %v5458_v26  ;;  %v2557_v60 = vunpack.c.l.b16 %v2461_v61  ;;  %v4791_v35 = vld [vmem:[%s5077_s30 + $0x48] sm:$0xf] }
 0x189   : > { %v2558_v25 = vunpack.c.l.b16 %v2464_v3  ;;  %v3198_v9 = vshll.u32 %v5847_v7, 16  ;;  %v3799_v26 = vrot.slane %v5815_v24, 5  ;;  %v3203_v27 = vshrl.u32 %v4791_v35, 16 }
 0x18a   : > { %v3924_v8 = vpack.c.b16 %v3895_v48, %v3894_v50  ;;  %v3206_v4 = vshll.u32 %v4791_v35, 16  ;;  %v3212_v47 = vshll.u32 %v5855_v38, 16  ;;  %v3216_v61 = vshrl.u32 %v5855_v38, 16  ;;  %v4985_v48 = vld [vmem:[%s5077_s30 + $0x44] sm:$0x1] }
 0x18b   : > { %v2308_v23 = vpop.f32.mrf.mxu0  ;;  %v3200_v58 = vrot.slane %v3198_v9, 5  ;;  %v2470_v62 = vrot.slane %v4985_v48, 5  ;;  %v3802_v24 = vrot.slane %v5847_v7, 5  ;;  %v3801_v9 = vrot.slane %v3799_v26, 4  ;;  %v5882_v48 = vld [vmem:[%s5077_s30 + $0x50] sm:$0x1] }
 0x18c   : > { %v1654_v63 = vpop.f32.mrf.mxu3  ;;  %4765 = vmatmul.msk.bf16.gmra.mxu2 %vm685_vm4, %v4930_v33  ;;  %v1019_v14 = vpop.f32.mrf.mxu1  ;;  %v2586_v33 = vpack.c.b16 %v2558_v25, %v2557_v60  ;;  %v3191_v60 = vsel %vm5089_vm3, %v3186_v28, %v5838_v41  ;;  %v3208_v35 = vrot.slane %v3206_v4, 5  ;;  %v5876_v7 = vrot.slane %v3212_v47, 5 }
 0x18d   : > { %v1706_v37 = vadd.f32 %v1654_v63, %v1419_v56  ;;  %v3196_v56 = vrot.slane %v3195_v17, 4  ;;  %v3498_v41 = vunpack.c.l.b16 %v3191_v60 }
 0x18f   : > { %v1370_v34 = vpop.f32.mrf.mxu2  ;;  %v5860_v53 = vadd.f32 %v2308_v23, %v1706_v37  ;;  %v4621_v23 = vld [vmem:[%s5077_s30 + $0x3c] sm:$0xe]  ;;  %v1020_v37 = vadd.f32 %v1019_v14, %v5476_v43  ;;  %v3201_v25 = vsel %vm5089_vm3, %v3196_v56, %v3200_v58 }
 0x190   : > { %v1420_v16 = vadd.f32 %v1370_v34, %v1018_v20  ;;  %v4863_v20 = vrot.slane %v4847_v11, 9  ;;  %v3218_v11 = vrot.slane %v3216_v61, 4  ;;  %v4637_v43 = vrot.slane %v4621_v23, 9 }
 0x191   : > { %4830 = vmatmul.msk.bf16.gmra.mxu3 %vm685_vm4, %v3526_v2  ;;  %v4984_v2 = vld [vmem:[%s5077_s30 + $0x40] sm:$0xf]  ;;  %v3499_v28 = vunpack.c.l.b16 %v3201_v25 }
 0x192   : > { %v2467_v50 = vrot.slane %v4984_v2, 5  ;;  %v3800_v58 = vsel %vm5263_vm7, %v4863_v20, %v3799_v26  ;;  %v3222_v26 = vshll.u32 %v5882_v48, 16 }
 0x193   : > { %v2311_v55 = vpop.f32.mrf.mxu0  ;;  %v3527_v23 = vpack.c.b16 %v3499_v28, %v3498_v41  ;;  %v4986_v28 = vld [vmem:[%s5077_s30 + $0x4c] sm:$0xf] }
 0x194   : > { %v1657_v3 = vpop.f32.mrf.mxu3  ;;  %v1022_v63 = vpop.f32.mrf.mxu1  ;;  %v2469_v14 = vrot.slane %v2467_v50, 4 }
 0x195   : > { %v1707_v17 = vadd.f32 %v1657_v3, %v1420_v16  ;;  %v3205_v16 = vrot.slane %v3203_v27, 4  ;;  %v4931_v3 = vld [vmem:[%s5077_s30 + $0x3c] sm:$0xff] }
 0x196   : > { %4879 = vmatmul.msk.bf16.gmra.mxu0 %vm685_vm4, %v3924_v8  ;;  %v2471_v61 = vsel %vm5263_vm7, %v2469_v14, %v2470_v62  ;;  %v5901_v14 = vld [vmem:[%s5077_s30 + $0x58] sm:$0xf] }
 0x197   : > { %v1372_v34 = vpop.f32.mrf.mxu2  ;;  %4653 = vmatmul.msk.bf16.gmra.mxu1 %vm685_vm4, %v2586_v33  ;;  %v5879_v2 = vadd.f32 %v2311_v55, %v1707_v17  ;;  %v3803_v33 = vsel %vm5263_vm7, %v3801_v9, %v3802_v24  ;;  %v3209_v27 = vor.u32 %v3208_v35, %v3205_v16  ;;  %v2468_v55 = vsel %vm5263_vm7, %v4637_v43, %v2467_v50 }
 0x198   : > { %v1421_v8 = vadd.f32 %v1372_v34, %v1020_v37  ;;  %v3219_v17 = vor.u32 %v3218_v11, %v5876_v7  ;;  %v1023_v24 = vadd.f32 %v1022_v63, %v5497_v40  ;;  %v3896_v37 = vunpack.c.l.b16 %v3800_v58  ;;  %v4848_v11 = vld [vmem:[%s5077_s30 + $0x48] sm:$0xe] }
 0x199   : > { %v3897_v60 = vunpack.c.l.b16 %v3803_v33  ;;  %v2559_v9 = vunpack.c.l.b16 %v2468_v55  ;;  %v2560_v50 = vunpack.c.l.b16 %v2471_v61  ;;  %v3210_v16 = vrot.slane %v3209_v27, 4 }
 0x19a   : > { %v3220_v62 = vrot.slane %v3219_v17, 4  ;;  %v3224_v35 = vrot.slane %v3222_v26, 5  ;;  %v3806_v43 = vrot.slane %v5855_v38, 5  ;;  %v2474_v58 = vrot.slane %v4986_v28, 5  ;;  %v4622_v38 = vld [vmem:[%s5077_s30 + $0x48] sm:$0xe] }
 0x19b   : > { %v2313_v56 = vpop.f32.mrf.mxu0  ;;  %v2587_v41 = vpack.c.b16 %v2560_v50, %v2559_v9  ;;  %v4864_v61 = vrot.slane %v4848_v11, 9 }
 0x19c   : > { %v1659_v4 = vpop.f32.mrf.mxu3  ;;  %4766 = vmatmul.msk.bf16.gmra.mxu2 %vm685_vm4, %v4931_v3  ;;  %v1024_v47 = vpop.f32.mrf.mxu1  ;;  %v4794_v3 = vld [vmem:[%s5077_s30 + $0x54] sm:$0xf]  ;;  %v3225_v55 = vsel %vm5089_vm3, %v3220_v62, %v3224_v35  ;;  %v4932_v35 = vld [vmem:[%s5077_s30 + $0x48] sm:$0xff] }
 0x19d   : > { %v1708_v20 = vadd.f32 %v1659_v4, %v1421_v8  ;;  %v3925_v8 = vpack.c.b16 %v3897_v60, %v3896_v37  ;;  %v3215_v4 = vsel %vm5089_vm3, %v3210_v16, %v5876_v7  ;;  %v3227_v17 = vshrl.u32 %v4794_v3, 16  ;;  %v4987_v60 = vld [vmem:[%s5077_s30 + $0x50] sm:$0x1] }
 0x19e   : > { %v3808_v37 = vrot.slane %v3806_v43, 4  ;;  %v3809_v7 = vrot.slane %v5882_v48, 5  ;;  %v3500_v50 = vunpack.c.l.b16 %v3215_v4  ;;  %v2476_v16 = vrot.slane %v2474_v58, 4 }
 0x19f   : > { %v1375_v25 = vpop.f32.mrf.mxu2  ;;  %v5903_v40 = vadd.f32 %v2313_v56, %v1708_v20  ;;  %v3230_v56 = vshll.u32 %v4794_v3, 16  ;;  %v3236_v20 = vshll.u32 %v5901_v14, 16  ;;  %v3501_v11 = vunpack.c.l.b16 %v3225_v55 }
 0x1a0   : > { %v1422_v34 = vadd.f32 %v1375_v25, %v1023_v24  ;;  %v1025_v24 = vadd.f32 %v1024_v47, %v5512_v10  ;;  %v2477_v25 = vrot.slane %v4987_v60, 5  ;;  %v3807_v3 = vsel %vm5263_vm7, %v4864_v61, %v3806_v43 }
 0x1a1   : > { %4831 = vmatmul.msk.bf16.gmra.mxu3 %vm685_vm4, %v3527_v23  ;;  %v3240_v23 = vshrl.u32 %v5901_v14, 16  ;;  %v3229_v10 = vrot.slane %v3227_v17, 4  ;;  %v3232_v47 = vrot.slane %v3230_v56, 5  ;;  %v5924_v48 = vrot.slane %v3236_v20, 5 }
 0x1a2   : > { %v2478_v55 = vsel %vm5263_vm7, %v2476_v16, %v2477_v25  ;;  %v3898_v61 = vunpack.c.l.b16 %v3807_v3  ;;  %v4849_v3 = vld [vmem:[%s5077_s30 + $0x54] sm:$0xe] }
 0x1a3   : > { %v2316_v63 = vpop.f32.mrf.mxu0  ;;  %v3242_v28 = vrot.slane %v3240_v23, 4  ;;  %v3233_v20 = vor.u32 %v3232_v47, %v3229_v10 }
 0x1a4   : > { %v1662_v33 = vpop.f32.mrf.mxu3  ;;  %v1027_v27 = vpop.f32.mrf.mxu1 }
 0x1a5   : > { %v1709_v26 = vadd.f32 %v1662_v33, %v1422_v34  ;;  %v4638_v34 = vrot.slane %v4622_v38, 9  ;;  %v5933_v38 = vld [vmem:[%s5077_s30 + $0x5c] sm:$0x1]  ;;  %v3243_v23 = vor.u32 %v3242_v28, %v5924_v48  ;;  %v3234_v16 = vrot.slane %v3233_v20, 4 }
 0x1a6   : > { %4880 = vmatmul.msk.bf16.gmra.mxu0 %vm685_vm4, %v3925_v8 }
 0x1a7   : > { %v1377_v9 = vpop.f32.mrf.mxu2  ;;  %4654 = vmatmul.msk.bf16.gmra.mxu1 %vm685_vm4, %v2587_v41  ;;  %v5922_v8 = vadd.f32 %v2316_v63, %v1709_v26  ;;  %v3810_v41 = vsel %vm5263_vm7, %v3808_v37, %v3809_v7  ;;  %v2475_v4 = vsel %vm5263_vm7, %v4638_v34, %v2474_v58  ;;  %v3528_v63 = vpack.c.b16 %v3501_v11, %v3500_v50  ;;  %v5941_v34 = vld [vmem:[%s5077_s30 + $0x64] sm:$0xf] }
 0x1a8   : > { %v1423_v62 = vadd.f32 %v1377_v9, %v1025_v24  ;;  %v3899_v56 = vunpack.c.l.b16 %v3810_v41  ;;  %v1028_v58 = vadd.f32 %v1027_v27, %v5388_v49  ;;  %v2561_v24 = vunpack.c.l.b16 %v2475_v4  ;;  %v4797_v9 = vld [vmem:[%s5077_s30 + $0x60] sm:$0xf] }
 0x1a9   : > { %v2562_v37 = vunpack.c.l.b16 %v2478_v55  ;;  %v3246_v7 = vshll.u32 %v5933_v38, 16  ;;  %v3813_v49 = vrot.slane %v5901_v14, 5  ;;  %v3251_v47 = vshrl.u32 %v4797_v9, 16 }
 0x1aa   : > { %v3926_v50 = vpack.c.b16 %v3899_v56, %v3898_v61  ;;  %v3254_v28 = vshll.u32 %v4797_v9, 16  ;;  %v3260_v41 = vshll.u32 %v5941_v34, 16  ;;  %v3264_v4 = vshrl.u32 %v5941_v34, 16  ;;  %v4989_v56 = vld [vmem:[%s5077_s30 + $0x5c] sm:$0x1] }
 0x1ab   : > { %v2318_v33 = vpop.f32.mrf.mxu0  ;;  %v3248_v11 = vrot.slane %v3246_v7, 5  ;;  %v2484_v20 = vrot.slane %v4989_v56, 5  ;;  %v3816_v14 = vrot.slane %v5933_v38, 5  ;;  %v3815_v7 = vrot.slane %v3813_v49, 4 }
 0x1ac   : > { %v1664_v43 = vpop.f32.mrf.mxu3  ;;  %4767 = vmatmul.msk.bf16.gmra.mxu2 %vm685_vm4, %v4932_v35  ;;  %v1029_v17 = vpop.f32.mrf.mxu1  ;;  %v2588_v35 = vpack.c.b16 %v2562_v37, %v2561_v24  ;;  %v3239_v24 = vsel %vm5089_vm3, %v3234_v16, %v5924_v48  ;;  %v3256_v9 = vrot.slane %v3254_v28, 5  ;;  %v3262_v38 = vrot.slane %v3260_v41, 5  ;;  %v5966_v16 = vld [vmem:[%s5077_s30 + $0x68] sm:$0x1] }
 0x1ad   : > { %v1710_v26 = vadd.f32 %v1664_v43, %v1423_v62  ;;  %v3244_v62 = vrot.slane %v3243_v23, 4  ;;  %v3502_v56 = vunpack.c.l.b16 %v3239_v24 }
 0x1af   : > { %v1380_v60 = vpop.f32.mrf.mxu2  ;;  %v5946_v27 = vadd.f32 %v2318_v33, %v1710_v26  ;;  %v4623_v33 = vld [vmem:[%s5077_s30 + $0x54] sm:$0xe]  ;;  %v1030_v26 = vadd.f32 %v1029_v17, %v5407_v0  ;;  %v3249_v37 = vsel %vm5089_vm3, %v3244_v62, %v3248_v11 }
 0x1b0   : > { %v1424_v25 = vadd.f32 %v1380_v60, %v1028_v58  ;;  %v4865_v58 = vrot.slane %v4849_v3, 9  ;;  %v3266_v3 = vrot.slane %v3264_v4, 4  ;;  %v3503_v48 = vunpack.c.l.b16 %v3249_v37 }
 0x1b1   : > { %4832 = vmatmul.msk.bf16.gmra.mxu3 %vm685_vm4, %v3528_v63  ;;  %6501 = vst [vmem:[#allocation4_spill] sm:$0xff] %v5946_v27  ;;  %v4988_v63 = vld [vmem:[%s5077_s30 + $0x58] sm:$0xf] }
 0x1b2   : > { %v2481_v61 = vrot.slane %v4988_v63, 5  ;;  %v4639_v63 = vrot.slane %v4623_v33, 9  ;;  %v3814_v62 = vsel %vm5263_vm7, %v4865_v58, %v3813_v49  ;;  %v3267_v4 = vor.u32 %v3266_v3, %v3262_v38 }
 0x1b3   : > { %v2321_v10 = vpop.f32.mrf.mxu0  ;;  %v3529_v58 = vpack.c.b16 %v3503_v48, %v3502_v56  ;;  %v3900_v33 = vunpack.c.l.b16 %v3814_v62 }
 0x1b4   : > { %v1667_v55 = vpop.f32.mrf.mxu3  ;;  %v1032_v43 = vpop.f32.mrf.mxu1  ;;  %v2483_v0 = vrot.slane %v2481_v61, 4 }
 0x1b5   : > { %v1711_v23 = vadd.f32 %v1667_v55, %v1424_v25  ;;  %v3253_v25 = vrot.slane %v3251_v47, 4 }
 0x1b6   : > { %4881 = vmatmul.msk.bf16.gmra.mxu0 %vm685_vm4, %v3926_v50  ;;  %v4933_v50 = vld [vmem:[%s5077_s30 + $0x54] sm:$0xff]  ;;  %v2485_v41 = vsel %vm5263_vm7, %v2483_v0, %v2484_v20  ;;  %v3820_v0 = vrot.slane %v5941_v34, 5  ;;  %v4991_v34 = vld [vmem:[%s5077_s30 + $0x68] sm:$0x1] }
 0x1b7   : > { %v1382_v60 = vpop.f32.mrf.mxu2  ;;  %4655 = vmatmul.msk.bf16.gmra.mxu1 %vm685_vm4, %v2588_v35  ;;  %v5963_v17 = vadd.f32 %v2321_v10, %v1711_v23  ;;  %v3817_v35 = vsel %vm5263_vm7, %v3815_v7, %v3816_v14  ;;  %v3257_v11 = vor.u32 %v3256_v9, %v3253_v25  ;;  %v2482_v10 = vsel %vm5263_vm7, %v4639_v63, %v2481_v61  ;;  %v4800_v9 = vld [vmem:[%s5077_s30 + $0x6c] sm:$0xf]  ;;  %v4850_v63 = vld [vmem:[%s5077_s30 + $0x60] sm:$0xe] }
 0x1b8   : > { %v1425_v55 = vadd.f32 %v1382_v60, %v1030_v26  ;;  %v3270_v23 = vshll.u32 %v5966_v16, 16  ;;  %v1033_v14 = vadd.f32 %v1032_v43, %v5428_v39  ;;  %v3901_v26 = vunpack.c.l.b16 %v3817_v35 }
 0x1b9   : > { %v2563_v37 = vunpack.c.l.b16 %v2482_v10  ;;  %v2564_v7 = vunpack.c.l.b16 %v2485_v41  ;;  %v3258_v61 = vrot.slane %v3257_v11, 4  ;;  %v3268_v25 = vrot.slane %v3267_v4, 4  ;;  %v4990_v11 = vld [vmem:[%s5077_s30 + $0x64] sm:$0xf] }
 0x1ba   : > { %v3272_v20 = vrot.slane %v3270_v23, 5  ;;  %v3927_v3 = vpack.c.b16 %v3901_v26, %v3900_v33  ;;  %v3275_v10 = vshrl.u32 %v4800_v9, 16  ;;  %v3278_v4 = vshll.u32 %v4800_v9, 16 }
 0x1bb   : > { %v2323_v27 = vpop.f32.mrf.mxu0  ;;  %v2589_v43 = vpack.c.b16 %v2564_v7, %v2563_v37  ;;  %v3263_v62 = vsel %vm5089_vm3, %v3258_v61, %v3262_v38  ;;  %v3822_v37 = vrot.slane %v3820_v0, 4  ;;  %v3823_v7 = vrot.slane %v5966_v16, 5  ;;  %v4934_v61 = vld [vmem:[%s5077_s30 + $0x60] sm:$0xff] }
 0x1bc   : > { %v1669_v47 = vpop.f32.mrf.mxu3  ;;  %4768 = vmatmul.msk.bf16.gmra.mxu2 %vm685_vm4, %v4933_v50  ;;  %v1034_v28 = vpop.f32.mrf.mxu1  ;;  %v3273_v35 = vsel %vm5089_vm3, %v3268_v25, %v3272_v20  ;;  %v3504_v26 = vunpack.c.l.b16 %v3263_v62 }
 0x1bd   : > { %v1712_v49 = vadd.f32 %v1669_v47, %v1425_v55  ;;  %v5982_v55 = vld [vmem:[%s5077_s30 + $0x70] sm:$0xf]  ;;  %v2488_v47 = vrot.slane %v4990_v11, 5  ;;  %v1035_v38 = vadd.f32 %v1034_v28, %v5447_v6  ;;  %v6007_v28 = vld [vmem:[%s5077_s30 + $0x74] sm:$0x1]  ;;  %v3824_v16 = vsel %vm5263_vm7, %v3822_v37, %v3823_v7 }
 0x1be   : > { %v3284_v23 = vshll.u32 %v5982_v55, 16 }
 0x1bf   : > { %v1385_v24 = vpop.f32.mrf.mxu2  ;;  %v5984_v50 = vadd.f32 %v2323_v27, %v1712_v49  ;;  %v4624_v27 = vld [vmem:[%s5077_s30 + $0x60] sm:$0xe]  ;;  %v3288_v49 = vshrl.u32 %v5982_v55, 16  ;;  %v2490_v20 = vrot.slane %v2488_v47, 4 }
 0x1c0   : > { %v1426_v60 = vadd.f32 %v1385_v24, %v1033_v14  ;;  %v4866_v14 = vrot.slane %v4850_v63, 9  ;;  %v3505_v24 = vunpack.c.l.b16 %v3273_v35  ;;  %v4640_v25 = vrot.slane %v4624_v27, 9 }
 0x1c1   : > { %4833 = vmatmul.msk.bf16.gmra.mxu3 %vm685_vm4, %v3529_v58  ;;  %v2491_v58 = vrot.slane %v4991_v34, 5  ;;  %v6004_v11 = vrot.slane %v3284_v23, 5  ;;  %v3290_v6 = vrot.slane %v3288_v49, 4  ;;  %v3294_v23 = vshll.u32 %v6007_v28, 16 }
 0x1c3   : > { %v2326_v39 = vpop.f32.mrf.mxu0  ;;  %v3296_v7 = vrot.slane %v3294_v23, 5 }
 0x1c4   : > { %v1672_v56 = vpop.f32.mrf.mxu3  ;;  %v1037_v48 = vpop.f32.mrf.mxu1 }
 0x1c5   : > { %v1713_v41 = vadd.f32 %v1672_v56, %v1426_v60  ;;  %v3277_v56 = vrot.slane %v3275_v10, 4  ;;  %v2489_v10 = vsel %vm5263_vm7, %v4640_v25, %v2488_v47  ;;  %v1038_v49 = vadd.f32 %v1037_v48, %v5466_v45  ;;  %v4803_v47 = vld [vmem:[%s5077_s30 + $0x78] sm:$0xf] }
 0x1c6   : > { %4882 = vmatmul.msk.bf16.gmra.mxu0 %vm685_vm4, %v3927_v3  ;;  %v3280_v3 = vrot.slane %v3278_v4, 5  ;;  %v3827_v25 = vrot.slane %v5982_v55, 5 }
 0x1c7   : > { %v1387_v33 = vpop.f32.mrf.mxu2  ;;  %4656 = vmatmul.msk.bf16.gmra.mxu1 %vm685_vm4, %v2589_v43  ;;  %v6002_v9 = vadd.f32 %v2326_v39, %v1713_v41  ;;  %v3821_v43 = vsel %vm5263_vm7, %v4866_v14, %v3820_v0  ;;  %v3530_v39 = vpack.c.b16 %v3505_v24, %v3504_v26  ;;  %v2492_v41 = vsel %vm5263_vm7, %v2490_v20, %v2491_v58 }
 0x1c8   : > { %v1427_v60 = vadd.f32 %v1387_v33, %v1035_v38  ;;  %v3281_v4 = vor.u32 %v3280_v3, %v3277_v56  ;;  %v3291_v0 = vor.u32 %v3290_v6, %v6004_v11  ;;  %v3902_v34 = vunpack.c.l.b16 %v3821_v43  ;;  %v6028_v56 = vld [vmem:[%s5077_s30 + $0x7c] sm:$0xf] }
 0x1c9   : > { %v3903_v38 = vunpack.c.l.b16 %v3824_v16  ;;  %v2565_v33 = vunpack.c.l.b16 %v2489_v10  ;;  %v2566_v26 = vunpack.c.l.b16 %v2492_v41  ;;  %v3299_v3 = vshrl.u32 %v4803_v47, 16  ;;  %v4992_v10 = vld [vmem:[%s5077_s30 + $0x70] sm:$0xf] }
 0x1ca   : > { %v3282_v58 = vrot.slane %v3281_v4, 4  ;;  %v3292_v37 = vrot.slane %v3291_v0, 4  ;;  %v3302_v6 = vshll.u32 %v4803_v47, 16  ;;  %v2495_v41 = vrot.slane %v4992_v10, 5 }
 0x1cb   : > { %v2328_v63 = vpop.f32.mrf.mxu0  ;;  %v2590_v20 = vpack.c.b16 %v2566_v26, %v2565_v33  ;;  %v3829_v23 = vrot.slane %v3827_v25, 4 }
 0x1cc   : > { %v1674_v62 = vpop.f32.mrf.mxu3  ;;  %4769 = vmatmul.msk.bf16.gmra.mxu2 %vm685_vm4, %v4934_v61  ;;  %v1039_v35 = vpop.f32.mrf.mxu1  ;;  %v3928_v61 = vpack.c.b16 %v3903_v38, %v3902_v34  ;;  %v3287_v55 = vsel %vm5089_vm3, %v3282_v58, %v6004_v11  ;;  %v3312_v34 = vshrl.u32 %v6028_v56, 16  ;;  %v3301_v11 = vrot.slane %v3299_v3, 4  ;;  %v6052_v3 = vld [vmem:[%s5077_s30 + $0x80] sm:$0x1] }
 0x1cd   : > { %v1714_v27 = vadd.f32 %v1674_v62, %v1427_v60  ;;  %v4851_v60 = vld [vmem:[%s5077_s30 + $0x6c] sm:$0xe]  ;;  %v1040_v0 = vadd.f32 %v1039_v35, %v5489_v12  ;;  %v3304_v33 = vrot.slane %v3302_v6, 5  ;;  %v2497_v47 = vrot.slane %v2495_v41, 4 }
 0x1ce   : > { %v4867_v62 = vrot.slane %v4851_v60, 9  ;;  %v3506_v12 = vunpack.c.l.b16 %v3287_v55 }
 0x1cf   : > { %v1390_v14 = vpop.f32.mrf.mxu2  ;;  %v6025_v45 = vadd.f32 %v2328_v63, %v1714_v27  ;;  %v3297_v63 = vsel %vm5089_vm3, %v3292_v37, %v3296_v7  ;;  %v3830_v27 = vrot.slane %v6007_v28, 5  ;;  %v4993_v28 = vld [vmem:[%s5077_s30 + $0x74] sm:$0x1]  ;;  %v3305_v6 = vor.u32 %v3304_v33, %v3301_v11  ;;  %v4852_v33 = vld [vmem:[%s5077_s30 + $0x78] sm:$0xe] }
 0x1d0   : > { %v1428_v24 = vadd.f32 %v1390_v14, %v1038_v49  ;;  %v3308_v49 = vshll.u32 %v6028_v56, 16  ;;  %v2498_v58 = vrot.slane %v4993_v28, 5  ;;  %v3507_v35 = vunpack.c.l.b16 %v3297_v63  ;;  %v6066_v28 = vld [vmem:[%s5077_s30 + $0x88] sm:$0xf] }
 0x1d1   : > { %4834 = vmatmul.msk.bf16.gmra.mxu3 %vm685_vm4, %v3530_v39  ;;  %v4625_v39 = vld [vmem:[%s5077_s30 + $0x6c] sm:$0xe]  ;;  %v3828_v7 = vsel %vm5263_vm7, %v4867_v62, %v3827_v25  ;;  %v3831_v60 = vsel %vm5263_vm7, %v3829_v23, %v3830_v27  ;;  %v3318_v23 = vshll.u32 %v6052_v3, 16  ;;  %v3306_v11 = vrot.slane %v3305_v6, 4 }
 0x1d2   : > { %v4641_v14 = vrot.slane %v4625_v39, 9  ;;  %v2499_v25 = vsel %vm5263_vm7, %v2497_v47, %v2498_v58  ;;  %v3904_v55 = vunpack.c.l.b16 %v3828_v7  ;;  %v3905_v63 = vunpack.c.l.b16 %v3831_v60 }
 0x1d3   : > { %v2331_v48 = vpop.f32.mrf.mxu0 }
 0x1d4   : > { %v1677_v43 = vpop.f32.mrf.mxu3  ;;  %v1042_v16 = vpop.f32.mrf.mxu1  ;;  %v2496_v10 = vsel %vm5263_vm7, %v4641_v14, %v2495_v41  ;;  %v4806_v41 = vld [vmem:[%s5077_s30 + $0x84] sm:$0xf]  ;;  %v3929_v14 = vpack.c.b16 %v3905_v63, %v3904_v55 }
 0x1d5   : > { %v1715_v4 = vadd.f32 %v1677_v43, %v1428_v24  ;;  %v4935_v24 = vld [vmem:[%s5077_s30 + $0x6c] sm:$0xff]  ;;  %v1043_v27 = vadd.f32 %v1042_v16, %v5508_v59  ;;  %v3320_v59 = vrot.slane %v3318_v23, 5  ;;  %v4868_v16 = vrot.slane %v4852_v33, 9  ;;  %v4936_v33 = vld [vmem:[%s5077_s30 + $0x78] sm:$0xff] }
 0x1d6   : > { %4883 = vmatmul.msk.bf16.gmra.mxu0 %vm685_vm4, %v3928_v61  ;;  %v3310_v61 = vrot.slane %v3308_v49, 5  ;;  %v3323_v60 = vshrl.u32 %v4806_v41, 16 }
 0x1d7   : > { %v1392_v38 = vpop.f32.mrf.mxu2  ;;  %4657 = vmatmul.msk.bf16.gmra.mxu1 %vm685_vm4, %v2590_v20  ;;  %v6045_v37 = vadd.f32 %v2331_v48, %v1715_v4  ;;  %v3314_v20 = vrot.slane %v3312_v34, 4  ;;  %v3531_v4 = vpack.c.b16 %v3507_v35, %v3506_v12  ;;  %v2567_v34 = vunpack.c.l.b16 %v2496_v10 }
 0x1d8   : > { %v1429_v26 = vadd.f32 %v1392_v38, %v1040_v0  ;;  %v2568_v38 = vunpack.c.l.b16 %v2499_v25  ;;  %v3311_v7 = vsel %vm5089_vm3, %v3306_v11, %v3310_v61  ;;  %v3837_v10 = vrot.slane %v6052_v3, 5  ;;  %v4626_v25 = vld [vmem:[%s5077_s30 + $0x78] sm:$0xe] }
 0x1d9   : > { %v3315_v0 = vor.u32 %v3314_v20, %v3310_v61  ;;  %v3326_v20 = vshll.u32 %v4806_v41, 16  ;;  %v4995_v41 = vld [vmem:[%s5077_s30 + $0x80] sm:$0x1] }
 0x1da   : > { %v2591_v35 = vpack.c.b16 %v2568_v38, %v2567_v34  ;;  %v3325_v34 = vrot.slane %v3323_v60, 4 }
 0x1db   : > { %v2333_v43 = vpop.f32.mrf.mxu0  ;;  %v3316_v47 = vrot.slane %v3315_v0, 4  ;;  %v3508_v0 = vunpack.c.l.b16 %v3311_v7  ;;  %v3328_v38 = vrot.slane %v3326_v20, 5  ;;  %v4808_v7 = vld [vmem:[%s5077_s30 + $0x8c] sm:$0x1] }
 0x1dc   : > { %v1679_v39 = vpop.f32.mrf.mxu3  ;;  %4770 = vmatmul.msk.bf16.gmra.mxu2 %vm685_vm4, %v4935_v24  ;;  %v1044_v48 = vpop.f32.mrf.mxu1 }
 0x1dd   : > { %v1716_v62 = vadd.f32 %v1679_v39, %v1429_v26  ;;  %v3834_v26 = vrot.slane %v6028_v56, 5  ;;  %v4994_v56 = vld [vmem:[%s5077_s30 + $0x7c] sm:$0xf]  ;;  %v1045_v61 = vadd.f32 %v1044_v48, %v5525_v32 }
 0x1df   : > { %v1395_v49 = vpop.f32.mrf.mxu2  ;;  %v6068_v58 = vadd.f32 %v2333_v43, %v1716_v62  ;;  %v3836_v63 = vrot.slane %v3834_v26, 4  ;;  %v3332_v43 = vshll.u32 %v6066_v28, 16  ;;  %v3336_v62 = vshrl.u32 %v6066_v28, 16 }
 0x1e0   : > { %v1430_v24 = vadd.f32 %v1395_v49, %v1043_v27  ;;  %v3321_v27 = vsel %vm5089_vm3, %v3316_v47, %v3320_v59  ;;  %v3835_v23 = vsel %vm5263_vm7, %v4868_v16, %v3834_v26  ;;  %v4642_v49 = vrot.slane %v4626_v25, 9 }
 0x1e1   : > { %4835 = vmatmul.msk.bf16.gmra.mxu3 %vm685_vm4, %v3531_v4  ;;  %v2502_v4 = vrot.slane %v4994_v56, 5  ;;  %v3509_v48 = vunpack.c.l.b16 %v3321_v27  ;;  %v3838_v47 = vsel %vm5263_vm7, %v3836_v63, %v3837_v10  ;;  %v6090_v59 = vrot.slane %v3332_v43, 5 }
 0x1e2   : > { %v3906_v16 = vunpack.c.l.b16 %v3835_v23  ;;  %v3907_v20 = vunpack.c.l.b16 %v3838_v47  ;;  %v3329_v25 = vor.u32 %v3328_v38, %v3325_v34  ;;  %v3342_v43 = vshll.u32 %v4808_v7, 16  ;;  %v6104_v47 = vld [vmem:[%s5077_s30 + $0x94] sm:$0xf] }
 0x1e3   : > { %v2336_v12 = vpop.f32.mrf.mxu0 }
 0x1e4   : > { %v1682_v6 = vpop.f32.mrf.mxu3  ;;  %v2659_v39 = vpop.f32.mrf.mxu1  ;;  %v3344_v38 = vrot.slane %v3342_v43, 5 }
 0x1e5   : > { %v1717_v55 = vadd.f32 %v1682_v6, %v1430_v24  ;;  %v2504_v24 = vrot.slane %v2502_v4, 4  ;;  %v2739_v27 = vadd.f32 %v2659_v39, %v5542_v46 }
 0x1e6   : > { %4884 = vmatmul.msk.bf16.gmra.mxu0 %vm685_vm4, %v3929_v14  ;;  %v2505_v14 = vrot.slane %v4995_v41, 5  ;;  %v4809_v41 = vld [vmem:[%s5077_s30 + $0x90] sm:$0xf] }
 0x1e7   : > { %v1397_v3 = vpop.f32.mrf.mxu2  ;;  %4658 = vmatmul.msk.bf16.gmra.mxu1 %vm685_vm4, %v2591_v35  ;;  %v6086_v32 = vadd.f32 %v2336_v12, %v1717_v55  ;;  %v3338_v35 = vrot.slane %v3336_v62, 4  ;;  %v2503_v12 = vsel %vm5263_vm7, %v4642_v49, %v2502_v4  ;;  %v3532_v55 = vpack.c.b16 %v3509_v48, %v3508_v0  ;;  %v4853_v62 = vld [vmem:[%s5077_s30 + $0x84] sm:$0xe] }
 0x1e8   : > { %v1431_v11 = vadd.f32 %v1397_v3, %v1045_v61  ;;  %v2506_v10 = vsel %vm5263_vm7, %v2504_v24, %v2505_v14  ;;  %v3841_v61 = vrot.slane %v6066_v28, 5  ;;  %v2569_v23 = vunpack.c.l.b16 %v2503_v12  ;;  %v4996_v12 = vld [vmem:[%s5077_s30 + $0x88] sm:$0xf] }
 0x1e9   : > { %v3339_v63 = vor.u32 %v3338_v35, %v6090_v59  ;;  %v3930_v4 = vpack.c.b16 %v3907_v20, %v3906_v16  ;;  %v3330_v49 = vrot.slane %v3329_v25, 4  ;;  %v3844_v28 = vrot.slane %v4808_v7, 5  ;;  %v6115_v7 = vld [vmem:[%s6492_s2] ss:$0 sm:$0xff] }
 0x1ea   : > { %v3843_v24 = vrot.slane %v3841_v61, 4  ;;  %v3347_v14 = vshrl.u32 %v4809_v41, 16  ;;  %v3350_v35 = vshll.u32 %v4809_v41, 16  ;;  %v3356_v16 = vshll.u32 %v6104_v47, 16 }
 0x1eb   : > { %v2338_v26 = vpop.f32.mrf.mxu0  ;;  %v3340_v34 = vrot.slane %v3339_v63, 4  ;;  %v3360_v25 = vshrl.u32 %v6104_v47, 16 }
 0x1ec   : > { %v1684_v60 = vpop.f32.mrf.mxu3  ;;  %4771 = vmatmul.msk.bf16.gmra.mxu2 %vm685_vm4, %v4936_v33  ;;  %v2661_v6 = vpop.f32.mrf.mxu1  ;;  %v2570_v33 = vunpack.c.l.b16 %v2506_v10  ;;  %v2509_v10 = vrot.slane %v4996_v12, 5  ;;  %v3352_v41 = vrot.slane %v3350_v35, 5 }
 0x1ed   : > { %v1718_v56 = vadd.f32 %v1684_v60, %v1431_v11  ;;  %v4869_v11 = vrot.slane %v4853_v62, 9  ;;  %v3345_v63 = vsel %vm5089_vm3, %v3340_v34, %v3344_v38  ;;  %v3845_v62 = vsel %vm5263_vm7, %v3843_v24, %v3844_v28  ;;  %v4997_v34 = vld [vmem:[%s5077_s30 + $0x8c] sm:$0x1] }
 0x1ee   : > { %v2592_v48 = vpack.c.b16 %v2570_v33, %v2569_v23  ;;  %v2740_v23 = vadd.f32 %v2661_v6, %v5555_v42  ;;  %v2512_v38 = vrot.slane %v4997_v34, 5  ;;  %v6142_v42 = vld [vmem:[%s5077_s30 + $0x98] sm:$0x1] }
 0x1ef   : > { %v2946_v3 = vpop.f32.mrf.mxu2  ;;  %v6107_v46 = vadd.f32 %v2338_v26, %v1718_v56  ;;  %v3335_v26 = vsel %vm5089_vm3, %v3330_v49, %v6090_v59  ;;  %v4627_v56 = vld [vmem:[%s5077_s30 + $0x84] sm:$0xe]  ;;  %v3842_v43 = vsel %vm5263_vm7, %v4869_v11, %v3841_v61  ;;  %v6131_v59 = vld [vmem:[%s6493_s3] ss:$0 sm:$0xff]  ;;  %v3362_v11 = vrot.slane %v3360_v25, 4 }
 0x1f0   : > { %v3026_v0 = vadd.f32 %v2946_v3, %v2739_v27  ;;  %v3349_v27 = vrot.slane %v3347_v14, 4  ;;  %v4937_v61 = vld [vmem:[%s5077_s30 + $0x84] sm:$0xff]  ;;  %v4643_v49 = vrot.slane %v4627_v56, 9  ;;  %v3510_v14 = vunpack.c.l.b16 %v3335_v26 }
 0x1f1   : > { %4836 = vmatmul.msk.bf16.gmra.mxu3 %vm685_vm4, %v3532_v55  ;;  %v3908_v35 = vunpack.c.l.b16 %v3842_v43 }
 0x1f2   : > { %v2510_v25 = vsel %vm5263_vm7, %v4643_v49, %v2509_v10  ;;  %v3353_v26 = vor.u32 %v3352_v41, %v3349_v27  ;;  %v6161_v49 = vld [vmem:[%s5077_s30 + $0xa0] sm:$0xf] }
 0x1f3   : > { %v3998_v39 = vpop.f32.mrf.mxu0  ;;  %v2571_v34 = vunpack.c.l.b16 %v2510_v25 }
 0x1f4   : > { %v3600_v60 = vpop.f32.mrf.mxu3  ;;  %v2664_v20 = vpop.f32.mrf.mxu1  ;;  %v3354_v27 = vrot.slane %v3353_v26, 4 }
 0x1f5   : > { %v3680_v55 = vadd.f32 %v3600_v60, %v3026_v0  ;;  %v2511_v0 = vrot.slane %v2509_v10, 4  ;;  %v4812_v10 = vld [vmem:[%s5077_s30 + $0x9c] sm:$0xf] }
 0x1f6   : > { %4885 = vmatmul.msk.bf16.gmra.mxu0 %vm685_vm4, %v3930_v4  ;;  %v6135_v4 = vrot.slane %v3356_v16, 5  ;;  %v3909_v16 = vunpack.c.l.b16 %v3845_v62 }
 0x1f7   : > { %v4078_v3 = vadd.f32 %v3998_v39, %v3680_v55  ;;  %v2948_v33 = vpop.f32.mrf.mxu2  ;;  %4659 = vmatmul.msk.bf16.gmra.mxu1 %vm685_vm4, %v2592_v48  ;;  %v3511_v39 = vunpack.c.l.b16 %v3345_v63  ;;  %v2513_v55 = vsel %vm5263_vm7, %v2511_v0, %v2512_v38 }
 0x1f8   : > { %v3027_v28 = vadd.f32 %v2948_v33, %v2740_v23  ;;  %v3363_v56 = vor.u32 %v3362_v11, %v6135_v4  ;;  %v2741_v33 = vadd.f32 %v2664_v20, %v5568_v15  ;;  %v3931_v0 = vpack.c.b16 %v3909_v16, %v3908_v35 }
 0x1f9   : > { %v4114_v24 = vmul.f32 %v6115_v7, %v4078_v3  ;;  %v3533_v62 = vpack.c.b16 %v3511_v39, %v3510_v14  ;;  %v3366_v3 = vshll.u32 %v6142_v42, 16  ;;  %v4854_v14 = vld [vmem:[%s5077_s30 + $0x90] sm:$0xe]  ;;  %v3848_v15 = vrot.slane %v6104_v47, 5 }
 0x1fa   : > { %v3364_v41 = vrot.slane %v3363_v56, 4  ;;  %v3371_v20 = vshrl.u32 %v4812_v10, 16  ;;  %v3374_v39 = vshll.u32 %v4812_v10, 16  ;;  %v3359_v26 = vsel %vm5089_vm3, %v3354_v27, %v6135_v4 }
 0x1fb   : > { %v4150_v6 = vadd.f32 %v6131_v59, %v4114_v24  ;;  %v4000_v48 = vpop.f32.mrf.mxu0  ;;  %v2572_v24 = vunpack.c.l.b16 %v2513_v55  ;;  %v4870_v56 = vrot.slane %v4854_v14, 9  ;;  %v3851_v47 = vrot.slane %v6142_v42, 5  ;;  %v6185_v14 = vld [vmem:[%s5077_s30 + $0xa4] sm:$0x1] }
 0x1fc   : > { %v3602_v60 = vpop.f32.mrf.mxu3  ;;  %4772 = vmatmul.msk.bf16.gmra.mxu2 %vm685_vm4, %v4937_v61  ;;  %v2666_v12 = vpop.f32.mrf.mxu1 }
 0x1fd   : > { %v4182_v63 = vmax.f32 %v4150_v6, 0.0  ;;  %v3681_v43 = vadd.f32 %v3602_v60, %v3027_v28  ;;  %v3368_v28 = vrot.slane %v3366_v3, 5  ;;  %v3380_v6 = vshll.u32 %v6161_v49, 16 }
 0x1fe   : > { %v2593_v60 = vpack.c.b16 %v2572_v24, %v2571_v34  ;;  %v3373_v34 = vrot.slane %v3371_v20, 4  ;;  %v3376_v24 = vrot.slane %v3374_v39, 5  ;;  %v2742_v27 = vadd.f32 %v2666_v12, %v5581_v13 }
 0x1ff   : > { %4214 = vst [vmem:[%s6148_s22] sm:$0xff] %v4182_v63  ;;  %v4079_v23 = vadd.f32 %v4000_v48, %v3681_v43  ;;  %v2951_v61 = vpop.f32.mrf.mxu2  ;;  %v3384_v48 = vshrl.u32 %v6161_v49, 16  ;;  %v4628_v63 = vld [vmem:[%s5077_s30 + $0x90] sm:$0xe]  ;;  %v4998_v43 = vld [vmem:[%s5077_s30 + $0x94] sm:$0xf]  ;;  %v6179_v4 = vrot.slane %v3380_v6, 5 }
 0x200   : > { %v3028_v11 = vadd.f32 %v2951_v61, %v2741_v33  ;;  %v3369_v33 = vsel %vm5089_vm3, %v3364_v41, %v3368_v28  ;;  %v3850_v61 = vrot.slane %v3848_v15, 4  ;;  %v4938_v41 = vld [vmem:[%s5077_s30 + $0x90] sm:$0xff]  ;;  %v3512_v28 = vunpack.c.l.b16 %v3359_v26 }
 0x201   : > { %v4115_v38 = vmul.f32 %v6115_v7, %v4079_v23  ;;  %4837 = vmatmul.msk.bf16.gmra.mxu3 %vm685_vm4, %v3533_v62  ;;  %v2516_v62 = vrot.slane %v4998_v43, 5  ;;  %v3386_v10 = vrot.slane %v3384_v48, 4  ;;  %v3513_v6 = vunpack.c.l.b16 %v3369_v33 }
 0x202   : > { %v3849_v48 = vsel %vm5263_vm7, %v4870_v56, %v3848_v15  ;;  %v3852_v13 = vsel %vm5263_vm7, %v3850_v61, %v3851_v47  ;;  %v3377_v12 = vor.u32 %v3376_v24, %v3373_v34 }
 0x203   : > { %v4151_v35 = vadd.f32 %v6131_v59, %v4115_v38  ;;  %v4003_v16 = vpop.f32.mrf.mxu0  ;;  %v3534_v61 = vpack.c.b16 %v3513_v6, %v3512_v28  ;;  %v3911_v34 = vunpack.c.l.b16 %v3852_v13 }
 0x204   : > { %v3605_v25 = vpop.f32.mrf.mxu3  ;;  %v2669_v55 = vpop.f32.mrf.mxu1 }
 0x205   : > { %v4183_v3 = vmax.f32 %v4151_v35, 0.0  ;;  %v3682_v23 = vadd.f32 %v3605_v25, %v3028_v11  ;;  %v4644_v11 = vrot.slane %v4628_v63, 9  ;;  %v2518_v35 = vrot.slane %v2516_v62, 4  ;;  %v4999_v25 = vld [vmem:[%s5077_s30 + $0x98] sm:$0x1] }
 0x206   : > { %4886 = vmatmul.msk.bf16.gmra.mxu0 %vm685_vm4, %v3931_v0  ;;  %v2519_v0 = vrot.slane %v4999_v25, 5  ;;  %v4855_v25 = vld [vmem:[%s5077_s30 + $0x9c] sm:$0xe] }
 0x207   : > { %4215 = vst [vmem:[%s6148_s22 + $0x8] sm:$0xff] %v4183_v3  ;;  %v4080_v42 = vadd.f32 %v4003_v16, %v3682_v23  ;;  %v2953_v38 = vpop.f32.mrf.mxu2  ;;  %4660 = vmatmul.msk.bf16.gmra.mxu1 %vm685_vm4, %v2593_v60  ;;  %v3387_v16 = vor.u32 %v3386_v10, %v6179_v4  ;;  %v3390_v60 = vshll.u32 %v6185_v14, 16  ;;  %v2517_v43 = vsel %vm5263_vm7, %v4644_v11, %v2516_v62 }
 0x208   : > { %v3029_v39 = vadd.f32 %v2953_v38, %v2742_v27  ;;  %v3910_v23 = vunpack.c.l.b16 %v3849_v48  ;;  %v2520_v56 = vsel %vm5263_vm7, %v2518_v35, %v2519_v0  ;;  %v2573_v24 = vunpack.c.l.b16 %v2517_v43  ;;  %v4815_v35 = vld [vmem:[%s5077_s30 + $0xa8] sm:$0xf] }
 0x209   : > { %v4116_v20 = vmul.f32 %v6115_v7, %v4080_v42  ;;  %v3378_v10 = vrot.slane %v3377_v12, 4  ;;  %v3388_v42 = vrot.slane %v3387_v16, 4  ;;  %v3392_v27 = vrot.slane %v3390_v60, 5 }
 0x20a   : > { %v2743_v38 = vadd.f32 %v2669_v55, %v5594_v57  ;;  %v3932_v28 = vpack.c.b16 %v3911_v34, %v3910_v23  ;;  %v4871_v55 = vrot.slane %v4855_v25, 9  ;;  %v3858_v48 = vrot.slane %v6185_v14, 5 }
 0x20b   : > { %v4152_v26 = vadd.f32 %v6131_v59, %v4116_v20  ;;  %v4005_v63 = vpop.f32.mrf.mxu0  ;;  %v3855_v20 = vrot.slane %v6161_v49, 5  ;;  %v3383_v6 = vsel %vm5089_vm3, %v3378_v10, %v6179_v4  ;;  %v3393_v57 = vsel %vm5089_vm3, %v3388_v42, %v3392_v27  ;;  %v6216_v49 = vld [vmem:[%s5077_s30 + $0xac] sm:$0xf] }
 0x20c   : > { %v3607_v3 = vpop.f32.mrf.mxu3  ;;  %4773 = vmatmul.msk.bf16.gmra.mxu2 %vm685_vm4, %v4938_v41  ;;  %v2671_v15 = vpop.f32.mrf.mxu1  ;;  %v2574_v41 = vunpack.c.l.b16 %v2520_v56  ;;  %v3398_v23 = vshll.u32 %v4815_v35, 16  ;;  %v3404_v14 = vshll.u32 %v6216_v49, 16  ;;  %v3514_v34 = vunpack.c.l.b16 %v3383_v6 }
 0x20d   : > { %v4184_v47 = vmax.f32 %v4152_v26, 0.0  ;;  %v3683_v33 = vadd.f32 %v3607_v3, %v3029_v39  ;;  %v3857_v60 = vrot.slane %v3855_v20, 4  ;;  %v3395_v26 = vshrl.u32 %v4815_v35, 16  ;;  %v5000_v3 = vld [vmem:[%s5077_s30 + $0xa0] sm:$0xf] }
 0x20e   : > { %v2594_v16 = vpack.c.b16 %v2574_v41, %v2573_v24  ;;  %v2523_v4 = vrot.slane %v5000_v3, 5  ;;  %v3515_v24 = vunpack.c.l.b16 %v3393_v57  ;;  %v3856_v10 = vsel %vm5263_vm7, %v4871_v55, %v3855_v20  ;;  %v4939_v41 = vld [vmem:[%s5077_s30 + $0x9c] sm:$0xff] }
 0x20f   : > { %4216 = vst [vmem:[%s6148_s22 + $0x10] sm:$0xff] %v4184_v47  ;;  %v4081_v62 = vadd.f32 %v4005_v63, %v3683_v33  ;;  %v2956_v11 = vpop.f32.mrf.mxu2  ;;  %v4629_v33 = vld [vmem:[%s5077_s30 + $0x9c] sm:$0xe]  ;;  %v2744_v27 = vadd.f32 %v2671_v15, %v5607_v54  ;;  %v6234_v57 = vrot.slane %v3404_v14, 5  ;;  %v6237_v54 = vld [vmem:[%s5077_s30 + $0xb0] sm:$0x1] }
 0x210   : > { %v3030_v39 = vadd.f32 %v2956_v11, %v2743_v38  ;;  %v3859_v38 = vsel %vm5263_vm7, %v3857_v60, %v3858_v48  ;;  %v3397_v11 = vrot.slane %v3395_v26, 4  ;;  %v4645_v25 = vrot.slane %v4629_v33, 9 }
 0x211   : > { %v4117_v0 = vmul.f32 %v6115_v7, %v4081_v62  ;;  %4838 = vmatmul.msk.bf16.gmra.mxu3 %vm685_vm4, %v3534_v61  ;;  %v3408_v61 = vshrl.u32 %v6216_v49, 16  ;;  %v2525_v35 = vrot.slane %v2523_v4, 4  ;;  %v3535_v48 = vpack.c.b16 %v3515_v24, %v3514_v34 }
 0x212   : > { %v3913_v60 = vunpack.c.l.b16 %v3859_v38  ;;  %v3414_v14 = vshll.u32 %v6237_v54, 16 }
 0x213   : > { %v4153_v13 = vadd.f32 %v6131_v59, %v4117_v0  ;;  %v4008_v12 = vpop.f32.mrf.mxu0  ;;  %v5001_v0 = vld [vmem:[%s5077_s30 + $0xa4] sm:$0x1]  ;;  %v3410_v55 = vrot.slane %v3408_v61, 4 }
 0x214   : > { %v3610_v63 = vpop.f32.mrf.mxu3  ;;  %v2674_v43 = vpop.f32.mrf.mxu1 }
 0x215   : > { %v4185_v56 = vmax.f32 %v4153_v13, 0.0  ;;  %v3684_v47 = vadd.f32 %v3610_v63, %v3030_v39  ;;  %v3400_v39 = vrot.slane %v3398_v23, 5  ;;  %v2524_v63 = vsel %vm5263_vm7, %v4645_v25, %v2523_v4  ;;  %v6251_v4 = vld [vmem:[%s5077_s30 + $0xb8] sm:$0xf] }
 0x216   : > { %4887 = vmatmul.msk.bf16.gmra.mxu0 %vm685_vm4, %v3932_v28  ;;  %v2526_v28 = vrot.slane %v5001_v0, 5  ;;  %v3411_v33 = vor.u32 %v3410_v55, %v6234_v57  ;;  %v2745_v34 = vadd.f32 %v2674_v43, %v5619_v31  ;;  %v4856_v0 = vld [vmem:[%s5077_s30 + $0xa8] sm:$0xe]  ;;  %v3428_v31 = vshll.u32 %v6251_v4, 16 }
 0x217   : > { %4217 = vst [vmem:[%s6148_s22 + $0x18] sm:$0xff] %v4185_v56  ;;  %v4082_v42 = vadd.f32 %v4008_v12, %v3684_v47  ;;  %v2958_v62 = vpop.f32.mrf.mxu2  ;;  %4661 = vmatmul.msk.bf16.gmra.mxu1 %vm685_vm4, %v2594_v16  ;;  %v3912_v12 = vunpack.c.l.b16 %v3856_v10  ;;  %v3401_v23 = vor.u32 %v3400_v39, %v3397_v11  ;;  %v2575_v10 = vunpack.c.l.b16 %v2524_v63 }
 0x218   : > { %v3031_v6 = vadd.f32 %v2958_v62, %v2744_v27  ;;  %v2527_v3 = vsel %vm5263_vm7, %v2525_v35, %v2526_v28  ;;  %v4818_v27 = vld [vmem:[%s5077_s30 + $0xb4] sm:$0xf]  ;;  %v3412_v25 = vrot.slane %v3411_v33, 4  ;;  %v3416_v35 = vrot.slane %v3414_v14, 5 }
 0x219   : > { %v4118_v20 = vmul.f32 %v6115_v7, %v4082_v42  ;;  %v2576_v42 = vunpack.c.l.b16 %v2527_v3  ;;  %v3933_v62 = vpack.c.b16 %v3913_v60, %v3912_v12  ;;  %v3402_v38 = vrot.slane %v3401_v23, 4 }
 0x21a   : > { %v3419_v28 = vshrl.u32 %v4818_v27, 16  ;;  %v3422_v39 = vshll.u32 %v4818_v27, 16  ;;  %v3432_v43 = vshrl.u32 %v6251_v4, 16  ;;  %v4872_v12 = vrot.slane %v4856_v0, 9  ;;  %v6275_v27 = vld [vmem:[%s5077_s30 + $0xbc] sm:$0x1] }
 0x21b   : > { %v4154_v15 = vadd.f32 %v6131_v59, %v4118_v20  ;;  %v4010_v13 = vpop.f32.mrf.mxu0  ;;  %v2595_v55 = vpack.c.b16 %v2576_v42, %v2575_v10  ;;  %v3407_v23 = vsel %vm5089_vm3, %v3402_v38, %v6234_v57  ;;  %v6268_v14 = vrot.slane %v3428_v31, 5  ;;  %v4940_v38 = vld [vmem:[%s5077_s30 + $0xa8] sm:$0xff] }
 0x21c   : > { %v3612_v16 = vpop.f32.mrf.mxu3  ;;  %4774 = vmatmul.msk.bf16.gmra.mxu2 %vm685_vm4, %v4939_v41  ;;  %v2676_v26 = vpop.f32.mrf.mxu1  ;;  %v3424_v33 = vrot.slane %v3422_v39, 5  ;;  %v3865_v42 = vrot.slane %v6237_v54, 5  ;;  %v3438_v54 = vshll.u32 %v6275_v27, 16 }
 0x21d   : > { %v4186_v56 = vmax.f32 %v4154_v15, 0.0  ;;  %v3685_v47 = vadd.f32 %v3612_v16, %v3031_v6  ;;  %v3862_v15 = vrot.slane %v6216_v49, 5  ;;  %v5002_v16 = vld [vmem:[%s5077_s30 + $0xac] sm:$0xf]  ;;  %v3421_v49 = vrot.slane %v3419_v28, 4 }
 0x21e   : > { %v2530_v60 = vrot.slane %v5002_v16, 5  ;;  %v3516_v28 = vunpack.c.l.b16 %v3407_v23 }
 0x21f   : > { %4218 = vst [vmem:[%s6148_s22 + $0x20] sm:$0xff] %v4186_v56  ;;  %v4083_v61 = vadd.f32 %v4010_v13, %v3685_v47  ;;  %v2961_v24 = vpop.f32.mrf.mxu2  ;;  %v3417_v56 = vsel %vm5089_vm3, %v3412_v25, %v3416_v35  ;;  %v4630_v47 = vld [vmem:[%s5077_s30 + $0xa8] sm:$0xe]  ;;  %v3864_v57 = vrot.slane %v3862_v15, 4 }
 0x220   : > { %v3032_v41 = vadd.f32 %v2961_v24, %v2745_v34  ;;  %v2746_v24 = vadd.f32 %v2676_v26, %v5632_v44  ;;  %v3517_v39 = vunpack.c.l.b16 %v3417_v56  ;;  %v3863_v44 = vsel %vm5263_vm7, %v4872_v12, %v3862_v15 }
 0x221   : > { %v4119_v11 = vmul.f32 %v6115_v7, %v4083_v61  ;;  %4839 = vmatmul.msk.bf16.gmra.mxu3 %vm685_vm4, %v3535_v48  ;;  %v3434_v61 = vrot.slane %v3432_v43, 4  ;;  %v3425_v26 = vor.u32 %v3424_v33, %v3421_v49  ;;  %v3914_v23 = vunpack.c.l.b16 %v3863_v44 }
 0x222   : > { %v3440_v33 = vrot.slane %v3438_v54, 5 }
 0x223   : > { %v4155_v20 = vadd.f32 %v6131_v59, %v4119_v11  ;;  %v4013_v6 = vpop.f32.mrf.mxu0  ;;  %v2532_v11 = vrot.slane %v2530_v60, 4  ;;  %v3435_v31 = vor.u32 %v3434_v61, %v6268_v14 }
 0x224   : > { %v3615_v13 = vpop.f32.mrf.mxu3  ;;  %v2679_v48 = vpop.f32.mrf.mxu1 }
 0x225   : > { %v4187_v63 = vmax.f32 %v4155_v20, 0.0  ;;  %v3686_v3 = vadd.f32 %v3615_v13, %v3032_v41  ;;  %v5003_v41 = vld [vmem:[%s5077_s30 + $0xb0] sm:$0x1]  ;;  %v3436_v49 = vrot.slane %v3435_v31, 4  ;;  %v5004_v31 = vld [vmem:[%s5077_s30 + $0xb8] sm:$0xf] }
 0x226   : > { %4888 = vmatmul.msk.bf16.gmra.mxu0 %vm685_vm4, %v3933_v62  ;;  %v4646_v62 = vrot.slane %v4630_v47, 9  ;;  %v2533_v25 = vrot.slane %v5003_v41, 5  ;;  %v3426_v47 = vrot.slane %v3425_v26, 4  ;;  %v2537_v54 = vrot.slane %v5004_v31, 5 }
 0x227   : > { %4219 = vst [vmem:[%s6148_s22 + $0x28] sm:$0xff] %v4187_v63  ;;  %v4084_v34 = vadd.f32 %v4013_v6, %v3686_v3  ;;  %v2963_v10 = vpop.f32.mrf.mxu2  ;;  %4662 = vmatmul.msk.bf16.gmra.mxu1 %vm685_vm4, %v2595_v55  ;;  %v3866_v6 = vsel %vm5263_vm7, %v3864_v57, %v3865_v42  ;;  %v3536_v3 = vpack.c.b16 %v3517_v39, %v3516_v28  ;;  %v4821_v57 = vld [vmem:[%s5077_s30 + $0xc0] sm:$0xf]  ;;  %v3869_v28 = vrot.slane %v6251_v4, 5 }
 0x228   : > { %v3033_v0 = vadd.f32 %v2963_v10, %v2746_v24  ;;  %v2531_v16 = vsel %vm5263_vm7, %v4646_v62, %v2530_v60  ;;  %v2534_v15 = vsel %vm5263_vm7, %v2532_v11, %v2533_v25  ;;  %v3915_v56 = vunpack.c.l.b16 %v3866_v6  ;;  %v4631_v6 = vld [vmem:[%s5077_s30 + $0xb4] sm:$0xe] }
 0x229   : > { %v4120_v35 = vmul.f32 %v6115_v7, %v4084_v34  ;;  %v2747_v34 = vadd.f32 %v2679_v48, %v5646_v30  ;;  %v2577_v60 = vunpack.c.l.b16 %v2531_v16  ;;  %v2578_v10 = vunpack.c.l.b16 %v2534_v15  ;;  %v6303_v30 = vld [vmem:[%s5077_s30 + $0xc4] sm:$0xf] }
 0x22a   : > { %v3934_v62 = vpack.c.b16 %v3915_v56, %v3914_v23  ;;  %v3431_v11 = vsel %vm5089_vm3, %v3426_v47, %v6268_v14  ;;  %v3441_v41 = vsel %vm5089_vm3, %v3436_v49, %v3440_v33  ;;  %v3443_v39 = vshrl.u32 %v4821_v57, 16  ;;  %v4941_v33 = vld [vmem:[%s5077_s30 + $0xb4] sm:$0xff] }
 0x22b   : > { %v4156_v43 = vadd.f32 %v6131_v59, %v4120_v35  ;;  %v4015_v20 = vpop.f32.mrf.mxu0  ;;  %v2596_v35 = vpack.c.b16 %v2578_v10, %v2577_v60  ;;  %v3446_v14 = vshll.u32 %v4821_v57, 16  ;;  %v3456_v16 = vshrl.u32 %v6303_v30, 16 }
 0x22c   : > { %v3617_v55 = vpop.f32.mrf.mxu3  ;;  %4775 = vmatmul.msk.bf16.gmra.mxu2 %vm685_vm4, %v4940_v38  ;;  %v2681_v13 = vpop.f32.mrf.mxu1  ;;  %v3518_v15 = vunpack.c.l.b16 %v3431_v11  ;;  %v3519_v4 = vunpack.c.l.b16 %v3441_v41  ;;  %v3871_v47 = vrot.slane %v3869_v28, 4  ;;  %v3445_v49 = vrot.slane %v3443_v39, 4 }
 0x22d   : > { %v4188_v12 = vmax.f32 %v4156_v43, 0.0  ;;  %v3687_v63 = vadd.f32 %v3617_v55, %v3033_v0  ;;  %v4857_v0 = vld [vmem:[%s5077_s30 + $0xb4] sm:$0xe]  ;;  %v3452_v55 = vshll.u32 %v6303_v30, 16  ;;  %v2748_v23 = vadd.f32 %v2681_v13, %v5659_v51 }
 0x22e   : > { %v3448_v10 = vrot.slane %v3446_v14, 5 }
 0x22f   : > { %4220 = vst [vmem:[%s6148_s22 + $0x30] sm:$0xff] %v4188_v12  ;;  %v4085_v61 = vadd.f32 %v4015_v20, %v3687_v63  ;;  %v2966_v24 = vpop.f32.mrf.mxu2  ;;  %v4873_v12 = vrot.slane %v4857_v0, 9  ;;  %v3872_v63 = vrot.slane %v6275_v27, 5  ;;  %v6320_v27 = vrot.slane %v3452_v55, 5 }
 0x230   : > { %v3034_v38 = vadd.f32 %v2966_v24, %v2747_v34  ;;  %v2539_v34 = vrot.slane %v2537_v54, 4  ;;  %v5005_v24 = vld [vmem:[%s5077_s30 + $0xbc] sm:$0x1] }
 0x231   : > { %v4121_v42 = vmul.f32 %v6115_v7, %v4085_v61  ;;  %4840 = vmatmul.msk.bf16.gmra.mxu3 %vm685_vm4, %v3536_v3  ;;  %v4647_v61 = vrot.slane %v4631_v6, 9  ;;  %v2540_v60 = vrot.slane %v5005_v24, 5  ;;  %v3870_v11 = vsel %vm5263_vm7, %v4873_v12, %v3869_v28  ;;  %v6346_v24 = vld [vmem:[%s5077_s30 + $0xd0] sm:$0xf] }
 0x232   : > { %v3873_v41 = vsel %vm5263_vm7, %v3871_v47, %v3872_v63  ;;  %v4858_v47 = vld [vmem:[%s5077_s30 + $0xc0] sm:$0xe] }
 0x233   : > { %v4157_v48 = vadd.f32 %v6131_v59, %v4121_v42  ;;  %v4018_v25 = vpop.f32.mrf.mxu0  ;;  %v2538_v0 = vsel %vm5263_vm7, %v4647_v61, %v2537_v54  ;;  %v2541_v39 = vsel %vm5263_vm7, %v2539_v34, %v2540_v60  ;;  %v3917_v6 = vunpack.c.l.b16 %v3873_v41  ;;  %v4824_v34 = vld [vmem:[%s5077_s30 + $0xcc] sm:$0xf] }
 0x234   : > { %v3620_v44 = vpop.f32.mrf.mxu3  ;;  %v2684_v26 = vpop.f32.mrf.mxu1  ;;  %v2579_v54 = vunpack.c.l.b16 %v2538_v0  ;;  %v3876_v61 = vrot.slane %v6303_v30, 5  ;;  %v4632_v30 = vld [vmem:[%s5077_s30 + $0xc0] sm:$0xe]  ;;  %v3476_v0 = vshll.u32 %v6346_v24, 16 }
 0x235   : > { %v4189_v43 = vmax.f32 %v4157_v48, 0.0  ;;  %v3688_v20 = vadd.f32 %v3620_v44, %v3034_v38  ;;  %v3458_v38 = vrot.slane %v3456_v16, 4  ;;  %v3449_v44 = vor.u32 %v3448_v10, %v3445_v49 }
 0x236   : > { %4889 = vmatmul.msk.bf16.gmra.mxu0 %vm685_vm4, %v3934_v62  ;;  %v6323_v62 = vld [vmem:[%s5077_s30 + $0xc8] sm:$0x1]  ;;  %v2749_v16 = vadd.f32 %v2684_v26, %v5675_v1 }
 0x237   : > { %4221 = vst [vmem:[%s6148_s22 + $0x38] sm:$0xff] %v4189_v43  ;;  %v4086_v3 = vadd.f32 %v4018_v25, %v3688_v20  ;;  %v2968_v56 = vpop.f32.mrf.mxu2  ;;  %4663 = vmatmul.msk.bf16.gmra.mxu1 %vm685_vm4, %v2596_v35  ;;  %v3537_v25 = vpack.c.b16 %v3519_v4, %v3518_v15  ;;  %v3459_v43 = vor.u32 %v3458_v38, %v6320_v27  ;;  %v3462_v28 = vshll.u32 %v6323_v62, 16 }
 0x238   : > { %v3035_v42 = vadd.f32 %v2968_v56, %v2748_v23  ;;  %v3916_v20 = vunpack.c.l.b16 %v3870_v11  ;;  %v2580_v4 = vunpack.c.l.b16 %v2541_v39  ;;  %v3450_v12 = vrot.slane %v3449_v44, 4 }
 0x239   : > { %v4122_v57 = vmul.f32 %v6115_v7, %v4086_v3  ;;  %v3460_v23 = vrot.slane %v3459_v43, 4  ;;  %v3464_v56 = vrot.slane %v3462_v28, 5  ;;  %v3480_v39 = vshrl.u32 %v6346_v24, 16 }
 0x23a   : > { %v3935_v49 = vpack.c.b16 %v3917_v6, %v3916_v20  ;;  %v2597_v26 = vpack.c.b16 %v2580_v4, %v2579_v54  ;;  %v3455_v11 = vsel %vm5089_vm3, %v3450_v12, %v6320_v27  ;;  %v3878_v27 = vrot.slane %v3876_v61, 4  ;;  %v4942_v20 = vld [vmem:[%s5077_s30 + $0xc0] sm:$0xff] }
 0x23b   : > { %v4158_v51 = vadd.f32 %v6131_v59, %v4122_v57  ;;  %v4020_v13 = vpop.f32.mrf.mxu0  ;;  %v4874_v57 = vrot.slane %v4858_v47, 9  ;;  %v3465_v41 = vsel %vm5089_vm3, %v3460_v23, %v3464_v56  ;;  %v3879_v28 = vrot.slane %v6323_v62, 5 }
 0x23c   : > { %v3622_v48 = vpop.f32.mrf.mxu3  ;;  %4776 = vmatmul.msk.bf16.gmra.mxu2 %vm685_vm4, %v4941_v33  ;;  %v2686_v35 = vpop.f32.mrf.mxu1  ;;  %v3520_v6 = vunpack.c.l.b16 %v3455_v11  ;;  %v3478_v56 = vrot.slane %v3476_v0, 5  ;;  %v3482_v47 = vrot.slane %v3480_v39, 4 }
 0x23d   : > { %v4190_v31 = vmax.f32 %v4158_v51, 0.0  ;;  %v3689_v14 = vadd.f32 %v3622_v48, %v3035_v42  ;;  %v5006_v42 = vld [vmem:[%s5077_s30 + $0xc4] sm:$0xf]  ;;  %v3467_v48 = vshrl.u32 %v4824_v34, 16 }
 0x23e   : > { %v2544_v38 = vrot.slane %v5006_v42, 5 }
 0x23f   : > { %4222 = vst [vmem:[%s6148_s22 + $0x40] sm:$0xff] %v4190_v31  ;;  %v4087_v55 = vadd.f32 %v4020_v13, %v3689_v14  ;;  %v2971_v15 = vpop.f32.mrf.mxu2  ;;  %v6502_v31 = vld [vmem:[#allocation2_spill] sm:$0xff] }
 0x240   : > { %v3036_v3 = vadd.f32 %v2971_v15, %v2749_v16  ;;  %v2750_v14 = vadd.f32 %v2686_v35, %v6502_v31  ;;  %v2546_v16 = vrot.slane %v2544_v38, 4  ;;  %v5007_v15 = vld [vmem:[%s5077_s30 + $0xc8] sm:$0x1]  ;;  %v3877_v35 = vsel %vm5263_vm7, %v4874_v57, %v3876_v61 }
 0x241   : > { %v4123_v63 = vmul.f32 %v6115_v7, %v4087_v55  ;;  %4841 = vmatmul.msk.bf16.gmra.mxu3 %vm685_vm4, %v3537_v25  ;;  %v3470_v25 = vshll.u32 %v4824_v34, 16  ;;  %v4648_v55 = vrot.slane %v4632_v30, 9  ;;  %v2547_v54 = vrot.slane %v5007_v15, 5  ;;  %v4859_v15 = vld [vmem:[%s5077_s30 + $0xcc] sm:$0xe] }
 0x242   : > { %v3483_v30 = vor.u32 %v3482_v47, %v3478_v56 }
 0x243   : > { %v4159_v33 = vadd.f32 %v6131_v59, %v4123_v63  ;;  %v4023_v1 = vpop.f32.mrf.mxu0  ;;  %v3521_v63 = vunpack.c.l.b16 %v3465_v41  ;;  %v3472_v23 = vrot.slane %v3470_v25, 5  ;;  %v2548_v61 = vsel %vm5263_vm7, %v2546_v16, %v2547_v54 }
 0x244   : > { %v3625_v60 = vpop.f32.mrf.mxu3  ;;  %v2689_v10 = vpop.f32.mrf.mxu1  ;;  %v2582_v31 = vunpack.c.l.b16 %v2548_v61 }
 0x245   : > { %v4191_v51 = vmax.f32 %v4159_v33, 0.0  ;;  %v3690_v13 = vadd.f32 %v3625_v60, %v3036_v3  ;;  %v3469_v3 = vrot.slane %v3467_v48, 4  ;;  %v3880_v33 = vsel %vm5263_vm7, %v3878_v27, %v3879_v28 }
 0x246   : > { %4890 = vmatmul.msk.bf16.gmra.mxu0 %vm685_vm4, %v3935_v49  ;;  %v2545_v60 = vsel %vm5263_vm7, %v4648_v55, %v2544_v38  ;;  %v3919_v11 = vunpack.c.l.b16 %v3880_v33  ;;  %v2751_v0 = vadd.f32 %v2689_v10, %v5711_v52  ;;  %v3484_v28 = vrot.slane %v3483_v30, 4  ;;  %v4943_v33 = vld [vmem:[%s5077_s30 + $0xcc] sm:$0xff] }
 0x247   : > { %4223 = vst [vmem:[%s6148_s22 + $0x48] sm:$0xff] %v4191_v51  ;;  %v4088_v44 = vadd.f32 %v4023_v1, %v3690_v13  ;;  %v2973_v43 = vpop.f32.mrf.mxu2  ;;  %4664 = vmatmul.msk.bf16.gmra.mxu1 %vm685_vm4, %v2597_v26  ;;  %v4826_v1 = vld [vmem:[%s5077_s30 + $0xd4] sm:$0x1]  ;;  %v3538_v51 = vpack.c.b16 %v3521_v63, %v3520_v6  ;;  %v3918_v13 = vunpack.c.l.b16 %v3877_v35  ;;  %v3473_v41 = vor.u32 %v3472_v23, %v3469_v3 }
 0x248   : > { %v3037_v12 = vadd.f32 %v2973_v43, %v2750_v14  ;;  %v3486_v48 = vshll.u32 %v4826_v1, 16  ;;  %v3883_v52 = vrot.slane %v6346_v24, 5  ;;  %v4875_v3 = vrot.slane %v4859_v15, 9 }
 0x249   : > { %v4124_v4 = vmul.f32 %v6115_v7, %v4088_v44  ;;  %v2581_v44 = vunpack.c.l.b16 %v2545_v60  ;;  %v3936_v43 = vpack.c.b16 %v3919_v11, %v3918_v13  ;;  %v3474_v27 = vrot.slane %v3473_v41, 4 }
 0x24a   : > { %v3885_v24 = vrot.slane %v3883_v52, 4 }
 0x24b   : > { %v4160_v62 = vadd.f32 %v6131_v59, %v4124_v4  ;;  %v4025_v49 = vpop.f32.mrf.mxu0  ;;  %v2598_v16 = vpack.c.b16 %v2582_v31, %v2581_v44  ;;  %v3479_v63 = vsel %vm5089_vm3, %v3474_v27, %v3478_v56 }
 0x24c   : > { %v3627_v26 = vpop.f32.mrf.mxu3  ;;  %4777 = vmatmul.msk.bf16.gmra.mxu2 %vm685_vm4, %v4942_v20  ;;  %v2691_v34 = vpop.f32.mrf.mxu1  ;;  %v3488_v20 = vrot.slane %v3486_v48, 5  ;;  %v3522_v61 = vunpack.c.l.b16 %v3479_v63 }
 0x24d   : > { %v4192_v57 = vmax.f32 %v4160_v62, 0.0  ;;  %v3691_v42 = vadd.f32 %v3627_v26, %v3037_v12  ;;  %v2752_v47 = vadd.f32 %v2691_v34, %v5731_v21 }
 0x24e   : > { %v3489_v35 = vsel %vm5089_vm3, %v3484_v28, %v3488_v20 }
 0x24f   : > { %4224 = vst [vmem:[%s6148_s22 + $0x50] sm:$0xff] %v4192_v57  ;;  %v4089_v25 = vadd.f32 %v4025_v49, %v3691_v42  ;;  %v2976_v39 = vpop.f32.mrf.mxu2  ;;  %v3886_v49 = vrot.slane %v4826_v1, 5  ;;  %v3523_v56 = vunpack.c.l.b16 %v3489_v35  ;;  %v3884_v42 = vsel %vm5263_vm7, %v4875_v3, %v3883_v52 }
 0x250   : > { %v3038_v14 = vadd.f32 %v2976_v39, %v2751_v0  ;;  %v3920_v41 = vunpack.c.l.b16 %v3884_v42 }
 0x251   : > { %v4125_v38 = vmul.f32 %v6115_v7, %v4089_v25  ;;  %4842 = vmatmul.msk.bf16.gmra.mxu3 %vm685_vm4, %v3538_v51  ;;  %v3887_v21 = vsel %vm5263_vm7, %v3885_v24, %v3886_v49  ;;  %v3539_v11 = vpack.c.b16 %v3523_v56, %v3522_v61 }
 0x252   : > { %v3921_v30 = vunpack.c.l.b16 %v3887_v21 }
 0x253   : > { %v4161_v6 = vadd.f32 %v6131_v59, %v4125_v38  ;;  %v4028_v55 = vpop.f32.mrf.mxu0 }
 0x254   : > { %v3630_v10 = vpop.f32.mrf.mxu3  ;;  %v2694_v54 = vpop.f32.mrf.mxu1  ;;  %v3937_v44 = vpack.c.b16 %v3921_v30, %v3920_v41 }
 0x255   : > { %v4193_v4 = vmax.f32 %v4161_v6, 0.0  ;;  %v3692_v12 = vadd.f32 %v3630_v10, %v3038_v14  ;;  %v2753_v25 = vadd.f32 %v2694_v54, %v5750_v29  ;;  %v6503_v29 = vld [vmem:[#allocation3_spill] sm:$0xff] }
 0x256   : > { %4891 = vmatmul.msk.bf16.gmra.mxu0 %vm685_vm4, %v3936_v43 }
 0x257   : > { %4225 = vst [vmem:[%s6148_s22 + $0x58] sm:$0xff] %v4193_v4  ;;  %v4090_v23 = vadd.f32 %v4028_v55, %v3692_v12  ;;  %v2978_v62 = vpop.f32.mrf.mxu2  ;;  %4665 = vmatmul.msk.bf16.gmra.mxu1 %vm685_vm4, %v2598_v16 }
 0x258   : > { %v3039_v60 = vadd.f32 %v2978_v62, %v2752_v47 }
 0x259   : > { %v4126_v26 = vmul.f32 %v6115_v7, %v4090_v23 }
 0x25b   : > { %v4162_v36 = vadd.f32 %v6131_v59, %v4126_v26  ;;  %v4030_v57 = vpop.f32.mrf.mxu0 }
 0x25c   : > { %v3632_v34 = vpop.f32.mrf.mxu3  ;;  %4778 = vmatmul.msk.bf16.gmra.mxu2 %vm685_vm4, %v4943_v33  ;;  %v2696_v1 = vpop.f32.mrf.mxu1 }
 0x25d   : > { %v4194_v51 = vmax.f32 %v4162_v36, 0.0  ;;  %v3693_v13 = vadd.f32 %v3632_v34, %v3039_v60  ;;  %v2754_v6 = vadd.f32 %v2696_v1, %v6503_v29 }
 0x25f   : > { %4226 = vst [vmem:[%s6148_s22 + $0x60] sm:$0xff] %v4194_v51  ;;  %v4091_v48 = vadd.f32 %v4030_v57, %v3693_v13  ;;  %v2981_v0 = vpop.f32.mrf.mxu2 }
 0x260   : > { %v3040_v18 = vadd.f32 %v2981_v0, %v2753_v25 }
 0x261   : > { %v4127_v39 = vmul.f32 %v6115_v7, %v4091_v48  ;;  %4843 = vmatmul.msk.bf16.gmra.mxu3 %vm685_vm4, %v3539_v11 }
 0x263   : > { %v4163_v31 = vadd.f32 %v6131_v59, %v4127_v39  ;;  %v4033_v38 = vpop.f32.mrf.mxu0 }
 0x264   : > { %v3635_v14 = vpop.f32.mrf.mxu3  ;;  %v2699_v43 = vpop.f32.mrf.mxu1 }
 0x265   : > { %v4195_v27 = vmax.f32 %v4163_v31, 0.0  ;;  %v3694_v28 = vadd.f32 %v3635_v14, %v3040_v18  ;;  %v2755_v3 = vadd.f32 %v2699_v43, %v5793_v5 }
 0x266   : > { %4892 = vmatmul.msk.bf16.gmra.mxu0 %vm685_vm4, %v3937_v44 }
 0x267   : > { %4227 = vst [vmem:[%s6148_s22 + $0x68] sm:$0xff] %v4195_v27  ;;  %v4092_v20 = vadd.f32 %v4033_v38, %v3694_v28  ;;  %v2983_v55 = vpop.f32.mrf.mxu2 }
 0x268   : > { %v3041_v15 = vadd.f32 %v2983_v55, %v2754_v6 }
 0x269   : > { %v4128_v16 = vmul.f32 %v6115_v7, %v4092_v20 }
 0x26b   : > { %v4164_v52 = vadd.f32 %v6131_v59, %v4128_v16  ;;  %v4035_v10 = vpop.f32.mrf.mxu0 }
 0x26c   : > { %v3637_v54 = vpop.f32.mrf.mxu3  ;;  %v2701_v4 = vpop.f32.mrf.mxu1 }
 0x26d   : > { %v4196_v12 = vmax.f32 %v4164_v52, 0.0  ;;  %v3695_v63 = vadd.f32 %v3637_v54, %v3041_v15  ;;  %v2756_v36 = vadd.f32 %v2701_v4, %v5817_v22 }
 0x26f   : > { %4228 = vst [vmem:[%s6148_s22 + $0x70] sm:$0xff] %v4196_v12  ;;  %v4093_v35 = vadd.f32 %v4035_v10, %v3695_v63  ;;  %v2986_v23 = vpop.f32.mrf.mxu2  ;;  %v6436_v12 = vld [vmem:[%s6493_s3] ss:$0 sm:$0xff] }
 0x270   : > { %v3042_v62 = vadd.f32 %v2986_v23, %v2755_v3 }
 0x271   : > { %v4129_v47 = vmul.f32 %v6115_v7, %v4093_v35 }
 0x273   : > { %v4165_v24 = vadd.f32 %v6131_v59, %v4129_v47  ;;  %v4038_v49 = vpop.f32.mrf.mxu0 }
 0x274   : > { %v3640_v33 = vpop.f32.mrf.mxu3  ;;  %v2704_v26 = vpop.f32.mrf.mxu1 }
 0x275   : > { %v4197_v60 = vmax.f32 %v4165_v24, 0.0  ;;  %v3696_v61 = vadd.f32 %v3640_v33, %v3042_v62  ;;  %v2757_v30 = vadd.f32 %v2704_v26, %v5836_v19  ;;  %v6426_v19 = vld [vmem:[%s6492_s2] ss:$0 sm:$0xff] }
 0x277   : > { %4229 = vst [vmem:[%s6148_s22 + $0x78] sm:$0xff] %v4197_v60  ;;  %v4094_v56 = vadd.f32 %v4038_v49, %v3696_v61  ;;  %v2988_v57 = vpop.f32.mrf.mxu2 }
 0x278   : > { %v3043_v5 = vadd.f32 %v2988_v57, %v2756_v36 }
 0x279   : > { %v4130_v42 = vmul.f32 %v6115_v7, %v4094_v56 }
 0x27b   : > { %v4166_v21 = vadd.f32 %v6131_v59, %v4130_v42  ;;  %v4040_v34 = vpop.f32.mrf.mxu0 }
 0x27c   : > { %v3642_v1 = vpop.f32.mrf.mxu3  ;;  %v2706_v51 = vpop.f32.mrf.mxu1 }
 0x27d   : > { %v4198_v13 = vmax.f32 %v4166_v21, 0.0  ;;  %v3697_v11 = vadd.f32 %v3642_v1, %v3043_v5  ;;  %v2758_v43 = vadd.f32 %v2706_v51, %v5860_v53 }
 0x27f   : > { %4230 = vst [vmem:[%s6148_s22 + $0x80] sm:$0xff] %v4198_v13  ;;  %v4095_v41 = vadd.f32 %v4040_v34, %v3697_v11  ;;  %v2991_v48 = vpop.f32.mrf.mxu2 }
 0x280   : > { %v3044_v22 = vadd.f32 %v2991_v48, %v2757_v30 }
 0x281   : > { %v4131_v25 = vmul.f32 %v6115_v7, %v4095_v41 }
 0x283   : > { %v4167_v0 = vadd.f32 %v6131_v59, %v4131_v25  ;;  %v4043_v39 = vpop.f32.mrf.mxu0  ;;  %v6504_v25 = vld [vmem:[#allocation4_spill] sm:$0xff] }
 0x284   : > { %v3645_v18 = vpop.f32.mrf.mxu3  ;;  %v2709_v44 = vpop.f32.mrf.mxu1 }
 0x285   : > { %v4199_v31 = vmax.f32 %v4167_v0, 0.0  ;;  %v3698_v38 = vadd.f32 %v3645_v18, %v3044_v22  ;;  %v2759_v53 = vadd.f32 %v2709_v44, %v5879_v2 }
 0x287   : > { %4231 = vst [vmem:[%s6148_s22 + $0x88] sm:$0xff] %v4199_v31  ;;  %v4096_v14 = vadd.f32 %v4043_v39, %v3698_v38  ;;  %v2993_v27 = vpop.f32.mrf.mxu2 }
 0x288   : > { %v3045_v28 = vadd.f32 %v2993_v27, %v2758_v43 }
 0x289   : > { %v4132_v7 = vmul.f32 %v6426_v19, %v4096_v14 }
 0x28b   : > { %v4168_v20 = vadd.f32 %v6131_v59, %v4132_v7  ;;  %v4045_v29 = vpop.f32.mrf.mxu0 }
 0x28c   : > { %v3647_v6 = vpop.f32.mrf.mxu3  ;;  %v2711_v55 = vpop.f32.mrf.mxu1 }
 0x28d   : > { %v4200_v16 = vmax.f32 %v4168_v20, 0.0  ;;  %v3699_v15 = vadd.f32 %v3647_v6, %v3045_v28  ;;  %v2760_v2 = vadd.f32 %v2711_v55, %v5903_v40 }
 0x28f   : > { %4232 = vst [vmem:[%s6148_s22 + $0x90] sm:$0xff] %v4200_v16  ;;  %v4097_v52 = vadd.f32 %v4045_v29, %v3699_v15  ;;  %v2996_v10 = vpop.f32.mrf.mxu2 }
 0x290   : > { %v3046_v4 = vadd.f32 %v2996_v10, %v2759_v53 }
 0x291   : > { %v4133_v54 = vmul.f32 %v6426_v19, %v4097_v52 }
 0x293   : > { %v4169_v59 = vadd.f32 %v6436_v12, %v4133_v54  ;;  %v4048_v63 = vpop.f32.mrf.mxu0 }
 0x294   : > { %v3650_v35 = vpop.f32.mrf.mxu3  ;;  %v2714_v3 = vpop.f32.mrf.mxu1 }
 0x295   : > { %v4201_v23 = vmax.f32 %v4169_v59, 0.0  ;;  %v3700_v47 = vadd.f32 %v3650_v35, %v3046_v4  ;;  %v2761_v5 = vadd.f32 %v2714_v3, %v5922_v8 }
 0x297   : > { %4233 = vst [vmem:[%s6148_s22 + $0x98] sm:$0xff] %v4201_v23  ;;  %v4098_v62 = vadd.f32 %v4048_v63, %v3700_v47  ;;  %v2998_v24 = vpop.f32.mrf.mxu2 }
 0x298   : > { %v3047_v33 = vadd.f32 %v2998_v24, %v2760_v2 }
 0x299   : > { %v4134_v49 = vmul.f32 %v6426_v19, %v4098_v62 }
 0x29b   : > { %v4170_v26 = vadd.f32 %v6436_v12, %v4134_v49  ;;  %v4050_v60 = vpop.f32.mrf.mxu0 }
 0x29c   : > { %v3652_v61 = vpop.f32.mrf.mxu3  ;;  %v2716_v56 = vpop.f32.mrf.mxu1 }
 0x29d   : > { %v4202_v36 = vmax.f32 %v4170_v26, 0.0  ;;  %v3701_v57 = vadd.f32 %v3652_v61, %v3047_v33  ;;  %v2762_v22 = vadd.f32 %v2716_v56, %v6504_v25 }
 0x29f   : > { %4234 = vst [vmem:[%s6148_s22 + $0xa0] sm:$0xff] %v4202_v36  ;;  %v4099_v42 = vadd.f32 %v4050_v60, %v3701_v57  ;;  %v3001_v21 = vpop.f32.mrf.mxu2 }
 0x2a0   : > { %v3048_v40 = vadd.f32 %v3001_v21, %v2761_v5 }
 0x2a1   : > { %v4135_v34 = vmul.f32 %v6426_v19, %v4099_v42 }
 0x2a3   : > { %v4171_v1 = vadd.f32 %v6436_v12, %v4135_v34  ;;  %v4053_v51 = vpop.f32.mrf.mxu0 }
 0x2a4   : > { %v3655_v13 = vpop.f32.mrf.mxu3  ;;  %v2719_v11 = vpop.f32.mrf.mxu1 }
 0x2a5   : > { %v4203_v41 = vmax.f32 %v4171_v1, 0.0  ;;  %v3702_v30 = vadd.f32 %v3655_v13, %v3048_v40  ;;  %v2763_v7 = vadd.f32 %v2719_v11, %v5963_v17 }
 0x2a7   : > { %4235 = vst [vmem:[%s6148_s22 + $0xa8] sm:$0xff] %v4203_v41  ;;  %v4100_v48 = vadd.f32 %v4053_v51, %v3702_v30  ;;  %v3003_v0 = vpop.f32.mrf.mxu2 }
 0x2a8   : > { %v3049_v8 = vadd.f32 %v3003_v0, %v2762_v22 }
 0x2a9   : > { %v4136_v39 = vmul.f32 %v6426_v19, %v4100_v48 }
 0x2ab   : > { %v4172_v18 = vadd.f32 %v6436_v12, %v4136_v39  ;;  %v4055_v44 = vpop.f32.mrf.mxu0 }
 0x2ac   : > { %v3657_v31 = vpop.f32.mrf.mxu3  ;;  %v2721_v38 = vpop.f32.mrf.mxu1 }
 0x2ad   : > { %v4204_v14 = vmax.f32 %v4172_v18, 0.0  ;;  %v3703_v43 = vadd.f32 %v3657_v31, %v3049_v8  ;;  %v2764_v54 = vadd.f32 %v2721_v38, %v5984_v50 }
 0x2af   : > { %4236 = vst [vmem:[%s6148_s22 + $0xb0] sm:$0xff] %v4204_v14  ;;  %v4101_v27 = vadd.f32 %v4055_v44, %v3703_v43  ;;  %v3006_v28 = vpop.f32.mrf.mxu2 }
 0x2b0   : > { %v3050_v29 = vadd.f32 %v3006_v28, %v2763_v7 }
 0x2b1   : > { %v4137_v20 = vmul.f32 %v6426_v19, %v4101_v27 }
 0x2b3   : > { %v4173_v6 = vadd.f32 %v6436_v12, %v4137_v20  ;;  %v4058_v55 = vpop.f32.mrf.mxu0 }
 0x2b4   : > { %v3660_v16 = vpop.f32.mrf.mxu3  ;;  %v2724_v15 = vpop.f32.mrf.mxu1 }
 0x2b5   : > { %v4205_v52 = vmax.f32 %v4173_v6, 0.0  ;;  %v3704_v53 = vadd.f32 %v3660_v16, %v3050_v29  ;;  %v2765_v24 = vadd.f32 %v2724_v15, %v6002_v9 }
 0x2b7   : > { %4237 = vst [vmem:[%s6148_s22 + $0xb8] sm:$0xff] %v4205_v52  ;;  %v4102_v10 = vadd.f32 %v4058_v55, %v3704_v53  ;;  %v3008_v4 = vpop.f32.mrf.mxu2 }
 0x2b8   : > { %v3051_v17 = vadd.f32 %v3008_v4, %v2764_v54 }
 0x2b9   : > { %v4138_v59 = vmul.f32 %v6426_v19, %v4102_v10 }
 0x2bb   : > { %v4174_v63 = vadd.f32 %v6436_v12, %v4138_v59  ;;  %v4060_v35 = vpop.f32.mrf.mxu0 }
 0x2bc   : > { %v3662_v3 = vpop.f32.mrf.mxu3  ;;  %v2726_v23 = vpop.f32.mrf.mxu1 }
 0x2bd   : > { %v4206_v47 = vmax.f32 %v4174_v63, 0.0  ;;  %v3705_v62 = vadd.f32 %v3662_v3, %v3051_v17  ;;  %v2766_v5 = vadd.f32 %v2726_v23, %v6025_v45 }
 0x2bf   : > { %4238 = vst [vmem:[%s6148_s22 + $0xc0] sm:$0xff] %v4206_v47  ;;  %v4103_v2 = vadd.f32 %v4060_v35, %v3705_v62  ;;  %v3011_v49 = vpop.f32.mrf.mxu2 }
 0x2c0   : > { %v3052_v50 = vadd.f32 %v3011_v49, %v2765_v24 }
 0x2c1   : > { %v4139_v33 = vmul.f32 %v6426_v19, %v4103_v2 }
 0x2c3   : > { %v4175_v26 = vadd.f32 %v6436_v12, %v4139_v33  ;;  %v4063_v60 = vpop.f32.mrf.mxu0 }
 0x2c4   : > { %v3665_v61 = vpop.f32.mrf.mxu3  ;;  %v2729_v57 = vpop.f32.mrf.mxu1 }
 0x2c5   : > { %v4207_v56 = vmax.f32 %v4175_v26, 0.0  ;;  %v3706_v36 = vadd.f32 %v3665_v61, %v3052_v50  ;;  %v2767_v30 = vadd.f32 %v2729_v57, %v6045_v37 }
 0x2c7   : > { %4239 = vst [vmem:[%s6148_s22 + $0xc8] sm:$0xff] %v4207_v56  ;;  %v4104_v42 = vadd.f32 %v4063_v60, %v3706_v36  ;;  %v3013_v21 = vpop.f32.mrf.mxu2 }
 0x2c8   : > { %v3053_v9 = vadd.f32 %v3013_v21, %v2766_v5 }
 0x2c9   : > { %v4140_v34 = vmul.f32 %v6426_v19, %v4104_v42 }
 0x2cb   : > { %v4176_v40 = vadd.f32 %v6436_v12, %v4140_v34  ;;  %v4065_v1 = vpop.f32.mrf.mxu0 }
 0x2cc   : > { %v3667_v51 = vpop.f32.mrf.mxu3  ;;  %v2731_v25 = vpop.f32.mrf.mxu1 }
 0x2cd   : > { %v4208_v13 = vmax.f32 %v4176_v40, 0.0  ;;  %v3707_v11 = vadd.f32 %v3667_v51, %v3053_v9  ;;  %v2768_v38 = vadd.f32 %v2731_v25, %v6068_v58 }
 0x2cf   : > { %4240 = vst [vmem:[%s6148_s22 + $0xd0] sm:$0xff] %v4208_v13  ;;  %v4105_v41 = vadd.f32 %v4065_v1, %v3707_v11  ;;  %v3016_v48 = vpop.f32.mrf.mxu2 }
 0x2d0   : > { %v3054_v45 = vadd.f32 %v3016_v48, %v2767_v30 }
 0x2d1   : > { %v4141_v22 = vmul.f32 %v6426_v19, %v4105_v41 }
 0x2d3   : > { %v4177_v0 = vadd.f32 %v6436_v12, %v4141_v22  ;;  %v4068_v39 = vpop.f32.mrf.mxu0 }
 0x2d4   : > { %v3670_v8 = vpop.f32.mrf.mxu3  ;;  %v2734_v27 = vpop.f32.mrf.mxu1 }
 0x2d5   : > { %v4209_v18 = vmax.f32 %v4177_v0, 0.0  ;;  %v3708_v44 = vadd.f32 %v3670_v8, %v3054_v45  ;;  %v2769_v16 = vadd.f32 %v2734_v27, %v6086_v32 }
 0x2d7   : > { %4241 = vst [vmem:[%s6148_s22 + $0xd8] sm:$0xff] %v4209_v18  ;;  %v4106_v31 = vadd.f32 %v4068_v39, %v3708_v44  ;;  %v3018_v14 = vpop.f32.mrf.mxu2 }
 0x2d8   : > { %v3055_v37 = vadd.f32 %v3018_v14, %v2768_v38 }
 0x2d9   : > { %v4142_v43 = vmul.f32 %v6426_v19, %v4106_v31 }
 0x2db   : > { %v4178_v7 = vadd.f32 %v6436_v12, %v4142_v43  ;;  %v4070_v28 = vpop.f32.mrf.mxu0 }
 0x2dc   : > { %v3672_v20 = vpop.f32.mrf.mxu3  ;;  %v2736_v10 = vpop.f32.mrf.mxu1 }
 0x2dd   : > { %v4210_v29 = vmax.f32 %v4178_v7, 0.0  ;;  %v3709_v6 = vadd.f32 %v3672_v20, %v3055_v37  ;;  %v2770_v35 = vadd.f32 %v2736_v10, %v6107_v46 }
 0x2df   : > { %4242 = vst [vmem:[%s6148_s22 + $0xe0] sm:$0xff] %v4210_v29  ;;  %v4107_v55 = vadd.f32 %v4070_v28, %v3709_v6  ;;  %v3021_v15 = vpop.f32.mrf.mxu2 }
 0x2e0   : > { %v3056_v58 = vadd.f32 %v3021_v15, %v2769_v16 }
 0x2e1   : > { %v4143_v52 = vmul.f32 %v6426_v19, %v4107_v55 }
 0x2e3   : > { %v4179_v53 = vadd.f32 %v6436_v12, %v4143_v52  ;;  %v4073_v54 = vpop.f32.mrf.mxu0 }
 0x2e4   : > { %v3675_v4 = vpop.f32.mrf.mxu3 }
 0x2e5   : > { %v4211_v59 = vmax.f32 %v4179_v53, 0.0  ;;  %v3710_v17 = vadd.f32 %v3675_v4, %v3056_v58 }
 0x2e7   : > { %4243 = vst [vmem:[%s6148_s22 + $0xe8] sm:$0xff] %v4211_v59  ;;  %v4108_v63 = vadd.f32 %v4073_v54, %v3710_v17  ;;  %v3023_v3 = vpop.f32.mrf.mxu2 }
 0x2e8   : > { %v3057_v23 = vadd.f32 %v3023_v3, %v2770_v35 }
 0x2e9   : > { %v4144_v32 = vmul.f32 %v6426_v19, %v4108_v63 }
 0x2eb   : > { %v4180_v47 = vadd.f32 %v6436_v12, %v4144_v32  ;;  %v4075_v49 = vpop.f32.mrf.mxu0 }
 0x2ec   : > { %v3677_v62 = vpop.f32.mrf.mxu3 }
 0x2ed   : > { %v4212_v2 = vmax.f32 %v4180_v47, 0.0  ;;  %v3711_v24 = vadd.f32 %v3677_v62, %v3057_v23 }
 0x2ef   : > { %4244 = vst [vmem:[%s6148_s22 + $0xf0] sm:$0xff] %v4212_v2  ;;  %v4109_v33 = vadd.f32 %v4075_v49, %v3711_v24 }
 0x2f1   : > { %v4145_v50 = vmul.f32 %v6426_v19, %v4109_v33 }
 0x2f3   : > { %v4181_v26 = vadd.f32 %v6436_v12, %v4145_v50 }
 0x2f5   : > { %v4213_v60 = vmax.f32 %v4181_v26, 0.0 }
 0x2f7   : > { %4245 = vst [vmem:[%s6148_s22 + $0xf8] sm:$0xff] %v4213_v60 }
 0x2f8 PF: > { %s14_s15 = sadd.s32 1, %s5016_s15  }
 0x2f9   : > { %p11_p4 = scmp.ge.s32.totalorder %s14_s15, 4  }
 0x2fb   :  { %13 = sbr.rel (!%p11_p4) target bundleno = 1 (0x1), region = 76 }

// kernel: double_conv.2
= control target key start
LH: loop header
LB: loop body
LE: loop exit
PB: predicated region body
PF: predicated region fallthrough
CT: control target
= control target key end

     0   :  { %s5170_s15 = smov 0   ;;  %s6597_s0 = inlined_call_operand.vmem [shape: bf16[2,18,18,4], index: 0, kind: input, shape index: {}]   ;;  %s6598_s1 = inlined_call_operand.vmem [shape: bf16[9,4,128], index: 1, kind: input, shape index: {}]   ;;  %s6599_s2 = inlined_call_operand.vmem [shape: f32[1,128], index: 2, kind: input, shape index: {}]   ;;  %s6600_s3 = inlined_call_operand.vmem [shape: f32[1,128], index: 3, kind: input, shape index: {}]   ;;  %s6601_s4 = inlined_call_operand.vmem [shape: bf16[2,16,16,128], index: 4, kind: output, shape index: {}]  }
   0x1 LB: > { %s4333_s16 = sadd.s32 4294967295, %s5143_s15   ;;  %p4337_p0 = scmp.ge.s32.totalorder %s5143_s15, 1  ;;  %s5143_s15 = sphi %s5170_s15, %s14_s15  }
   0x2   : > { %p162_p1 = scmp.lt.s32.totalorder %s5143_s15, 3 }
   0x4   : > { %p163_p2 = pnand %p4337_p0, %p162_p1 }
   0x6   : > { %166 = sbr.rel (%p163_p2) target bundleno = 762 (0x2fa), region = 36 }
   0xb   : > { %v4341_v0 = vld [vmem:[%s6598_s1 + $0x2] sm:$0x3]  ;;  %vm734_vm0 = vcmask 1041408   ;;  %p188_p3 = scmp.lt.s32.totalorder %s4333_s16, 1  ;;  %v4454_v2 = vld [vmem:[%s6598_s1 + $0x4] sm:$0x3] }
   0xc   : > { %v736_v1 = vsel %vm734_vm0, %v4341_v0, 0  ;;  %v1309_v3 = vsel %vm734_vm0, %v4454_v2, 0  ;;  %v4503_v4 = vld [vmem:[%s6598_s1 + $0x6] sm:$0x3]  ;;  %v231_v5 = vld [vmem:[%s6598_s1] sm:$0x3] }
   0xd   : > { %5071 = vmatpush.bf16.msra.mxu1 %v736_v1  ;;  %5072 = vmatpush.bf16.msra.mxu2 %v736_v1  ;;  %s6611_s16 = smov (!%p188_p3, %s4333_s16), 1  ;;  %v4632_v6 = vld [vmem:[%s6598_s1 + $0x8] sm:$0x3]  ;;  %v1596_v7 = vsel %vm734_vm0, %v4503_v4, 0  ;;  %v956_v8 = vsel %vm734_vm0, %v231_v5, 0  ;;  %vm685_vm4 = vcmask 31744  }
   0xe   : > { %5073 = vmatpush.bf16.msra.mxu3 %v736_v1  ;;  %745 = vmatpush.bf16.msra.mxu0 %v736_v1  ;;  %s5074_s27 = smul.u32 216, %s6611_s16  ;;  %v2250_v9 = vsel %vm734_vm0, %v4632_v6, 0  ;;  %vm248_vm1 = vsmask.f32 3328  ;;  %vm249_vm2 = vsmask.f32 7440 }
   0xf   : > { %vm5216_vm3 = vmor %vm248_vm1, %vm249_vm2  ;;  %vm1095_vm5 = vcmask 1042432   ;;  %vm1096_vm6 = vcmask 1046532   ;;  %s4927_s19 = sshll.u32 %s6611_s16, 7 }
  0x10   : > { %s5204_s30 = scalar_lea.vmem %s6597_s0, %s5074_s27  ;;  %vm5390_vm7 = vmor %vm1095_vm5, %vm1096_vm6  ;;  %s6296_s21 = scalar_lea.vmem %s6601_s4, %s4927_s19 }
  0x11   : > { %1318 = vmatpush.bf16.msrb.mxu2 %v1309_v3  ;;  %965 = vmatpush.bf16.msrb.mxu1 %v956_v8  ;;  %v207_v10 = vld [vmem:[%s5204_s30 + $0x30] sm:$0xf]  ;;  %v208_v11 = vld [vmem:[%s5204_s30 + $0x34] sm:$0xf]  ;;  %v236_v12 = vld [vmem:[%s5204_s30 + $0x38] sm:$0x1] }
  0x12   : > { %1605 = vmatpush.bf16.msrb.mxu3 %v1596_v7  ;;  %2259 = vmatpush.bf16.msrb.mxu0 %v2250_v9  ;;  %v348_v13 = vshrl.u32 %v207_v10, 16  ;;  %v351_v14 = vshll.u32 %v207_v10, 16  ;;  %v357_v15 = vshll.u32 %v208_v11, 16  ;;  %v361_v16 = vshrl.u32 %v208_v11, 16  ;;  %v215_v17 = vld [vmem:[%s5204_s30 + $0x60] sm:$0xf] }
  0x13   : > { %v367_v18 = vshll.u32 %v236_v12, 16  ;;  %v216_v19 = vld [vmem:[%s5204_s30 + $0x64] sm:$0xf]  ;;  %v240_v20 = vld [vmem:[%s5204_s30 + $0x68] sm:$0x1]  ;;  %v444_v21 = vshrl.u32 %v215_v17, 16 }
  0x14   : > { %v350_v22 = vrot.slane %v348_v13, 4  ;;  %v353_v23 = vrot.slane %v351_v14, 5  ;;  %v359_v24 = vrot.slane %v357_v15, 5  ;;  %v363_v25 = vrot.slane %v361_v16, 4  ;;  %v223_v26 = vld [vmem:[%s5204_s30 + $0x90] sm:$0xf] }
  0x15   : > { %v369_v27 = vrot.slane %v367_v18, 5  ;;  %v446_v28 = vrot.slane %v444_v21, 4  ;;  %v447_v29 = vshll.u32 %v215_v17, 16  ;;  %v453_v30 = vshll.u32 %v216_v19, 16  ;;  %v224_v35 = vld [vmem:[%s5204_s30 + $0x94] sm:$0xf] }
  0x16   : > { %v354_v31 = vor.u32 %v353_v23, %v350_v22  ;;  %v364_v32 = vor.u32 %v363_v25, %v359_v24  ;;  %v457_v33 = vshrl.u32 %v216_v19, 16  ;;  %v463_v34 = vshll.u32 %v240_v20, 16  ;;  %v244_v45 = vld [vmem:[%s5204_s30 + $0x98] sm:$0x1]  ;;  %v199_v61 = vld [vmem:[%s5204_s30] sm:$0xf] }
  0x17   : > { %v449_v37 = vrot.slane %v447_v29, 5  ;;  %v455_v38 = vrot.slane %v453_v30, 5  ;;  %v540_v39 = vshrl.u32 %v223_v26, 16  ;;  %v543_v47 = vshll.u32 %v223_v26, 16  ;;  %v5229_v1 = vld [vmem:[%s5204_s30 + $0x4] sm:$0xf] }
  0x18   : > { %v355_v40 = vrot.slane %v354_v31, 4  ;;  %v365_v41 = vrot.slane %v364_v32, 4  ;;  %v459_v42 = vrot.slane %v457_v33, 4  ;;  %v465_v43 = vrot.slane %v463_v34, 5  ;;  %v5232_v2 = vld [vmem:[%s5204_s30 + $0x8] sm:$0x1] }
  0x19   : > { %v450_v44 = vor.u32 %v449_v37, %v446_v28  ;;  %v542_v46 = vrot.slane %v540_v39, 4  ;;  %v549_v48 = vshll.u32 %v224_v35, 16  ;;  %v553_v52 = vshrl.u32 %v224_v35, 16  ;;  %v209_v19 = vld [vmem:[%s5204_s30 + $0x3c] sm:$0xf] }
  0x1a   : > { %v360_v49 = vsel %vm5216_vm3, %v355_v40, %v359_v24  ;;  %v370_v50 = vsel %vm5216_vm3, %v365_v41, %v369_v27  ;;  %v460_v51 = vor.u32 %v459_v42, %v455_v38  ;;  %v545_v56 = vrot.slane %v543_v47, 5  ;;  %v5244_v20 = vld [vmem:[%s5204_s30 + $0x40] sm:$0xf]  ;;  %v5249_v25 = vld [vmem:[%s5204_s30 + $0x44] sm:$0x1] }
  0x1b   : > { %v645_v53 = vunpack.c.l.b16 %v360_v49  ;;  %v646_v54 = vunpack.c.l.b16 %v370_v50  ;;  %v451_v55 = vrot.slane %v450_v44, 4  ;;  %v551_v58 = vrot.slane %v549_v48, 5  ;;  %v217_v33 = vld [vmem:[%s5204_s30 + $0x6c] sm:$0xf]  ;;  %v241_v47 = vld [vmem:[%s5204_s30 + $0x74] sm:$0x1] }
  0x1c   : > { %v461_v57 = vrot.slane %v460_v51, 4  ;;  %v555_v59 = vrot.slane %v553_v52, 4  ;;  %v559_v60 = vshll.u32 %v244_v45, 16  ;;  %v546_v0 = vor.u32 %v545_v56, %v542_v46 }
  0x1d   : > { %v673_v62 = vpack.c.b16 %v646_v54, %v645_v53  ;;  %v456_v63 = vsel %vm5216_vm3, %v451_v55, %v455_v38  ;;  %v252_v9 = vshrl.u32 %v199_v61, 16  ;;  %v255_v10 = vshll.u32 %v199_v61, 16  ;;  %v225_v61 = vld [vmem:[%s5204_s30 + $0x9c] sm:$0xf] }
  0x1e   : > { %v466_v3 = vsel %vm5216_vm3, %v461_v57, %v465_v43  ;;  %v653_v4 = vunpack.c.l.b16 %v456_v63  ;;  %v556_v5 = vor.u32 %v555_v59, %v551_v58  ;;  %v561_v6 = vrot.slane %v559_v60, 5  ;;  %v218_v43 = vld [vmem:[%s5204_s30 + $0x70] sm:$0xf] }
  0x1f   : > { %4346 = vmatmul.msk.bf16.vlgmr.msra.gmra.mxu1 %vm685_vm4, %v673_v62  ;;  %v654_v7 = vunpack.c.l.b16 %v466_v3  ;;  %v547_v8 = vrot.slane %v546_v0, 4  ;;  %v261_v12 = vshll.u32 %v5229_v1, 16  ;;  %v265_v13 = vshrl.u32 %v5229_v1, 16  ;;  %v226_v3 = vld [vmem:[%s5204_s30 + $0xa0] sm:$0xf] }
  0x20   : > { %v557_v11 = vrot.slane %v556_v5, 4  ;;  %v271_v14 = vshll.u32 %v5232_v2, 16  ;;  %v254_v17 = vrot.slane %v252_v9, 4  ;;  %v257_v18 = vrot.slane %v255_v10, 5 }
  0x21   : > { %v677_v15 = vpack.c.b16 %v654_v7, %v653_v4  ;;  %v552_v16 = vsel %vm5216_vm3, %v547_v8, %v551_v58  ;;  %v263_v23 = vrot.slane %v261_v12, 5  ;;  %v267_v24 = vrot.slane %v265_v13, 4  ;;  %v245_v8 = vld [vmem:[%s5204_s30 + $0xa4] sm:$0x1] }
  0x22   : > { %v562_v21 = vsel %vm5216_vm3, %v557_v11, %v561_v6  ;;  %v661_v22 = vunpack.c.l.b16 %v552_v16  ;;  %v258_v27 = vor.u32 %v257_v18, %v254_v17  ;;  %v273_v28 = vrot.slane %v271_v14, 5 }
  0x23   : > { %4350 = vmatmul.msk.bf16.vlgmr.msra.gmra.mxu2 %vm685_vm4, %v677_v15  ;;  %v662_v26 = vunpack.c.l.b16 %v562_v21  ;;  %v268_v29 = vor.u32 %v267_v24, %v263_v23  ;;  %v372_v30 = vshrl.u32 %v209_v19, 16  ;;  %v375_v31 = vshll.u32 %v209_v19, 16 }
  0x24   : > { %v381_v32 = vshll.u32 %v5244_v20, 16  ;;  %v259_v35 = vrot.slane %v258_v27, 4  ;;  %v385_v37 = vshrl.u32 %v5244_v20, 16  ;;  %v391_v38 = vshll.u32 %v5249_v25, 16 }
  0x25   : > { %v681_v34 = vpack.c.b16 %v662_v26, %v661_v22  ;;  %v269_v39 = vrot.slane %v268_v29, 4  ;;  %v374_v40 = vrot.slane %v372_v30, 4  ;;  %v377_v41 = vrot.slane %v375_v31, 5  ;;  %v201_v22 = vld [vmem:[%s5204_s30 + $0xc] sm:$0xf] }
  0x26   : > { %v383_v42 = vrot.slane %v381_v32, 5  ;;  %v264_v44 = vsel %vm5216_vm3, %v259_v35, %v263_v23  ;;  %v387_v45 = vrot.slane %v385_v37, 4  ;;  %v393_v46 = vrot.slane %v391_v38, 5  ;;  %v5278_v32 = vld [vmem:[%s5204_s30 + $0x14] sm:$0x1] }
  0x27   : > { %4354 = vmatmul.msk.bf16.vlgmr.msra.gmra.mxu3 %vm685_vm4, %v681_v34  ;;  %v468_v48 = vshrl.u32 %v217_v33, 16  ;;  %v274_v49 = vsel %vm5216_vm3, %v269_v39, %v273_v28  ;;  %v637_v50 = vunpack.c.l.b16 %v264_v44  ;;  %v378_v51 = vor.u32 %v377_v41, %v374_v40  ;;  %v5275_v28 = vld [vmem:[%s5204_s30 + $0x10] sm:$0xf] }
  0x28   : > { %v471_v52 = vshll.u32 %v217_v33, 16  ;;  %v638_v53 = vunpack.c.l.b16 %v274_v49  ;;  %v388_v54 = vor.u32 %v387_v45, %v383_v42  ;;  %v477_v56 = vshll.u32 %v218_v43, 16 }
  0x29   : > { %v470_v55 = vrot.slane %v468_v48, 4  ;;  %v379_v57 = vrot.slane %v378_v51, 4  ;;  %v481_v59 = vshrl.u32 %v218_v43, 16  ;;  %v487_v60 = vshll.u32 %v241_v47, 16  ;;  %v5288_v47 = vld [vmem:[%s5204_s30 + $0x4c] sm:$0xf] }
  0x2a   : > { %v473_v58 = vrot.slane %v471_v52, 5  ;;  %v669_v62 = vpack.c.b16 %v638_v53, %v637_v50  ;;  %v389_v63 = vrot.slane %v388_v54, 4  ;;  %v479_v0 = vrot.slane %v477_v56, 5  ;;  %v5293_v56 = vld [vmem:[%s5204_s30 + $0x50] sm:$0x1] }
  0x2b   : > { %v384_v4 = vsel %vm5216_vm3, %v379_v57, %v383_v42  ;;  %v483_v6 = vrot.slane %v481_v59, 4  ;;  %v489_v7 = vrot.slane %v487_v60, 5  ;;  %v564_v11 = vshrl.u32 %v225_v61, 16  ;;  %v211_v42 = vld [vmem:[%s5204_s30 + $0x48] sm:$0xf] }
  0x2c   : > { %v474_v5 = vor.u32 %v473_v58, %v470_v55  ;;  %4342 = vmatmul.msk.bf16.vlgmr.msra.gmra.mxu0 %vm685_vm4, %v669_v62  ;;  %v394_v9 = vsel %vm5216_vm3, %v389_v63, %v393_v46  ;;  %v647_v10 = vunpack.c.l.b16 %v384_v4  ;;  %v567_v12 = vshll.u32 %v225_v61, 16 }
  0x2d   : > { %v648_v13 = vunpack.c.l.b16 %v394_v9  ;;  %v484_v15 = vor.u32 %v483_v6, %v479_v0  ;;  %v573_v16 = vshll.u32 %v226_v3, 16  ;;  %v566_v17 = vrot.slane %v564_v11, 4 }
  0x2e   : > { %v475_v14 = vrot.slane %v474_v5, 4  ;;  %v569_v18 = vrot.slane %v567_v12, 5  ;;  %v577_v19 = vshrl.u32 %v226_v3, 16  ;;  %v583_v21 = vshll.u32 %v245_v8, 16  ;;  %v219_v3 = vld [vmem:[%s5204_s30 + $0x78] sm:$0xf] }
  0x2f   : > { %v674_v23 = vpack.c.b16 %v648_v13, %v647_v10  ;;  %v485_v26 = vrot.slane %v484_v15, 4  ;;  %v575_v27 = vrot.slane %v573_v16, 5  ;;  %v276_v35 = vshrl.u32 %v201_v22, 16  ;;  %v220_v8 = vld [vmem:[%s5204_s30 + $0x7c] sm:$0xf] }
  0x30   : > { %v480_v24 = vsel %vm5216_vm3, %v475_v14, %v479_v0  ;;  %v570_v30 = vor.u32 %v569_v18, %v566_v17  ;;  %v579_v31 = vrot.slane %v577_v19, 4  ;;  %v585_v34 = vrot.slane %v583_v21, 5  ;;  %v242_v16 = vld [vmem:[%s5204_s30 + $0x80] sm:$0x1] }
  0x31   : > { %v655_v29 = vunpack.c.l.b16 %v480_v24  ;;  %4347 = vmatmul.msk.bf16.gmra.mxu1 %vm685_vm4, %v674_v23  ;;  %v490_v33 = vsel %vm5216_vm3, %v485_v26, %v489_v7  ;;  %v279_v37 = vshll.u32 %v201_v22, 16  ;;  %v285_v41 = vshll.u32 %v5275_v28, 16 }
  0x32   : > { %v656_v38 = vunpack.c.l.b16 %v490_v33  ;;  %v571_v39 = vrot.slane %v570_v30, 4  ;;  %v580_v40 = vor.u32 %v579_v31, %v575_v27  ;;  %v278_v43 = vrot.slane %v276_v35, 4 }
  0x33   : > { %v281_v44 = vrot.slane %v279_v37, 5  ;;  %v289_v45 = vshrl.u32 %v5275_v28, 16  ;;  %v295_v46 = vshll.u32 %v5278_v32, 16  ;;  %v287_v51 = vrot.slane %v285_v41, 5 }
  0x34   : > { %v678_v48 = vpack.c.b16 %v656_v38, %v655_v29  ;;  %v576_v49 = vsel %vm5216_vm3, %v571_v39, %v575_v27  ;;  %v581_v50 = vrot.slane %v580_v40, 4  ;;  %v396_v58 = vshrl.u32 %v211_v42, 16  ;;  %v228_v39 = vld [vmem:[%s5204_s30 + $0xac] sm:$0xf]  ;;  %v246_v40 = vld [vmem:[%s5204_s30 + $0xb0] sm:$0x1] }
  0x35   : > { %v663_v52 = vunpack.c.l.b16 %v576_v49  ;;  %v282_v53 = vor.u32 %v281_v44, %v278_v43  ;;  %v291_v54 = vrot.slane %v289_v45, 4  ;;  %v297_v55 = vrot.slane %v295_v46, 5 }
  0x36   : > { %4351 = vmatmul.msk.bf16.gmra.mxu2 %vm685_vm4, %v678_v48  ;;  %v586_v57 = vsel %vm5216_vm3, %v581_v50, %v585_v34  ;;  %v399_v59 = vshll.u32 %v211_v42, 16  ;;  %v405_v60 = vshll.u32 %v5288_v47, 16  ;;  %v409_v0 = vshrl.u32 %v5288_v47, 16  ;;  %v227_v34 = vld [vmem:[%s5204_s30 + $0xa8] sm:$0xf] }
  0x37   : > { %v664_v61 = vunpack.c.l.b16 %v586_v57  ;;  %v283_v62 = vrot.slane %v282_v53, 4  ;;  %v292_v63 = vor.u32 %v291_v54, %v287_v51  ;;  %v398_v4 = vrot.slane %v396_v58, 4 }
  0x38   : > { %v401_v5 = vrot.slane %v399_v59, 5  ;;  %v407_v6 = vrot.slane %v405_v60, 5  ;;  %v415_v7 = vshll.u32 %v5293_v56, 16  ;;  %v411_v12 = vrot.slane %v409_v0, 4  ;;  %v203_v59 = vld [vmem:[%s5204_s30 + $0x18] sm:$0xf] }
  0x39   : > { %v682_v9 = vpack.c.b16 %v664_v61, %v663_v52  ;;  %v288_v10 = vsel %vm5216_vm3, %v283_v62, %v287_v51  ;;  %v293_v11 = vrot.slane %v292_v63, 4  ;;  %v492_v17 = vshrl.u32 %v219_v3, 16  ;;  %v5321_v63 = vld [vmem:[%s5204_s30 + $0x1c] sm:$0xf]  ;;  %v5324_v0 = vld [vmem:[%s5204_s30 + $0x20] sm:$0x1] }
  0x3a   : > { %v639_v13 = vunpack.c.l.b16 %v288_v10  ;;  %v402_v14 = vor.u32 %v401_v5, %v398_v4  ;;  %v417_v15 = vrot.slane %v415_v7, 5  ;;  %v412_v19 = vor.u32 %v411_v12, %v407_v6 }
  0x3b   : > { %4355 = vmatmul.msk.bf16.gmra.mxu3 %vm685_vm4, %v682_v9  ;;  %v298_v18 = vsel %vm5216_vm3, %v293_v11, %v297_v55  ;;  %v495_v21 = vshll.u32 %v219_v3, 16  ;;  %v501_v22 = vshll.u32 %v220_v8, 16  ;;  %v494_v26 = vrot.slane %v492_v17, 4 }
  0x3c   : > { %v640_v23 = vunpack.c.l.b16 %v298_v18  ;;  %v403_v24 = vrot.slane %v402_v14, 4  ;;  %v505_v27 = vshrl.u32 %v220_v8, 16  ;;  %v413_v29 = vrot.slane %v412_v19, 4 }
  0x3d   : > { %v497_v30 = vrot.slane %v495_v21, 5  ;;  %v503_v31 = vrot.slane %v501_v22, 5  ;;  %v511_v33 = vshll.u32 %v242_v16, 16  ;;  %v588_v48 = vshrl.u32 %v227_v34, 16  ;;  %v5334_v21 = vld [vmem:[%s5204_s30 + $0x58] sm:$0xf] }
  0x3e   : > { %v670_v35 = vpack.c.b16 %v640_v23, %v639_v13  ;;  %v408_v37 = vsel %vm5216_vm3, %v403_v24, %v407_v6  ;;  %v507_v38 = vrot.slane %v505_v27, 4  ;;  %v418_v41 = vsel %vm5216_vm3, %v413_v29, %v417_v15  ;;  %v213_v15 = vld [vmem:[%s5204_s30 + $0x54] sm:$0xf]  ;;  %v5339_v27 = vld [vmem:[%s5204_s30 + $0x5c] sm:$0x1] }
  0x3f   : > { %v649_v42 = vunpack.c.l.b16 %v408_v37  ;;  %v498_v43 = vor.u32 %v497_v30, %v494_v26  ;;  %v513_v44 = vrot.slane %v511_v33, 5  ;;  %v650_v45 = vunpack.c.l.b16 %v418_v41 }
  0x40   : > { %4343 = vmatmul.msk.bf16.gmra.mxu0 %vm685_vm4, %v670_v35  ;;  %v508_v46 = vor.u32 %v507_v38, %v503_v31  ;;  %v591_v49 = vshll.u32 %v227_v34, 16  ;;  %v597_v51 = vshll.u32 %v228_v39, 16  ;;  %v601_v52 = vshrl.u32 %v228_v39, 16  ;;  %v221_v39 = vld [vmem:[%s5204_s30 + $0x84] sm:$0xf] }
  0x41   : > { %v499_v50 = vrot.slane %v498_v43, 4  ;;  %v607_v53 = vshll.u32 %v246_v40, 16  ;;  %v675_v54 = vpack.c.b16 %v650_v45, %v649_v42  ;;  %v590_v57 = vrot.slane %v588_v48, 4 }
  0x42   : > { %v509_v55 = vrot.slane %v508_v46, 4  ;;  %v593_v58 = vrot.slane %v591_v49, 5  ;;  %v599_v61 = vrot.slane %v597_v51, 5  ;;  %v603_v62 = vrot.slane %v601_v52, 4  ;;  %v222_v49 = vld [vmem:[%s5204_s30 + $0x88] sm:$0xf] }
  0x43   : > { %v504_v60 = vsel %vm5216_vm3, %v499_v50, %v503_v31  ;;  %4348 = vmatmul.msk.bf16.gmra.mxu1 %vm685_vm4, %v675_v54  ;;  %v609_v6 = vrot.slane %v607_v53, 5  ;;  %v300_v9 = vshrl.u32 %v203_v59, 16  ;;  %v303_v10 = vshll.u32 %v203_v59, 16  ;;  %v243_v53 = vld [vmem:[%s5204_s30 + $0x8c] sm:$0x1] }
  0x44   : > { %v514_v3 = vsel %vm5216_vm3, %v509_v55, %v513_v44  ;;  %v657_v4 = vunpack.c.l.b16 %v504_v60  ;;  %v594_v5 = vor.u32 %v593_v58, %v590_v57  ;;  %v604_v8 = vor.u32 %v603_v62, %v599_v61 }
  0x45   : > { %v658_v7 = vunpack.c.l.b16 %v514_v3  ;;  %v309_v12 = vshll.u32 %v5321_v63, 16  ;;  %v313_v13 = vshrl.u32 %v5321_v63, 16  ;;  %v319_v14 = vshll.u32 %v5324_v0, 16 }
  0x46   : > { %v595_v11 = vrot.slane %v594_v5, 4  ;;  %v605_v17 = vrot.slane %v604_v8, 4  ;;  %v302_v18 = vrot.slane %v300_v9, 4  ;;  %v305_v19 = vrot.slane %v303_v10, 5  ;;  %v229_v8 = vld [vmem:[%s5204_s30 + $0xb4] sm:$0xf] }
  0x47   : > { %v679_v16 = vpack.c.b16 %v658_v7, %v657_v4  ;;  %v311_v23 = vrot.slane %v309_v12, 5  ;;  %v315_v24 = vrot.slane %v313_v13, 4  ;;  %v321_v26 = vrot.slane %v319_v14, 5  ;;  %v230_v12 = vld [vmem:[%s5204_s30 + $0xb8] sm:$0xf] }
  0x48   : > { %v600_v22 = vsel %vm5216_vm3, %v595_v11, %v599_v61  ;;  %v610_v29 = vsel %vm5216_vm3, %v605_v17, %v609_v6  ;;  %v306_v31 = vor.u32 %v305_v19, %v302_v18  ;;  %v420_v33 = vshrl.u32 %v213_v15, 16  ;;  %v247_v17 = vld [vmem:[%s5204_s30 + $0xbc] sm:$0x1] }
  0x49   : > { %4352 = vmatmul.msk.bf16.gmra.mxu2 %vm685_vm4, %v679_v16  ;;  %v665_v30 = vunpack.c.l.b16 %v600_v22  ;;  %v666_v34 = vunpack.c.l.b16 %v610_v29  ;;  %v316_v35 = vor.u32 %v315_v24, %v311_v23  ;;  %v423_v37 = vshll.u32 %v213_v15, 16 }
  0x4a   : > { %v429_v38 = vshll.u32 %v5334_v21, 16  ;;  %v307_v40 = vrot.slane %v306_v31, 4  ;;  %v422_v41 = vrot.slane %v420_v33, 4  ;;  %v433_v42 = vshrl.u32 %v5334_v21, 16 }
  0x4b   : > { %v439_v43 = vshll.u32 %v5339_v27, 16  ;;  %v683_v44 = vpack.c.b16 %v666_v34, %v665_v30  ;;  %v317_v45 = vrot.slane %v316_v35, 4  ;;  %v425_v46 = vrot.slane %v423_v37, 5  ;;  %v205_v37 = vld [vmem:[%s5204_s30 + $0x24] sm:$0xf] }
  0x4c   : > { %v431_v48 = vrot.slane %v429_v38, 5  ;;  %v312_v50 = vsel %vm5216_vm3, %v307_v40, %v311_v23  ;;  %v435_v51 = vrot.slane %v433_v42, 4  ;;  %v516_v54 = vshrl.u32 %v221_v39, 16  ;;  %v5367_v42 = vld [vmem:[%s5204_s30 + $0x28] sm:$0xf] }
  0x4d   : > { %v441_v52 = vrot.slane %v439_v43, 5  ;;  %4356 = vmatmul.msk.bf16.gmra.mxu3 %vm685_vm4, %v683_v44  ;;  %v322_v55 = vsel %vm5216_vm3, %v317_v45, %v321_v26  ;;  %v641_v57 = vunpack.c.l.b16 %v312_v50  ;;  %v426_v58 = vor.u32 %v425_v46, %v422_v41 }
  0x4e   : > { %v519_v59 = vshll.u32 %v221_v39, 16  ;;  %v642_v60 = vunpack.c.l.b16 %v322_v55  ;;  %v436_v61 = vor.u32 %v435_v51, %v431_v48  ;;  %v518_v62 = vrot.slane %v516_v54, 4 }
  0x4f   : > { %v525_v3 = vshll.u32 %v222_v49, 16  ;;  %v427_v4 = vrot.slane %v426_v58, 4  ;;  %v529_v6 = vshrl.u32 %v222_v49, 16  ;;  %v535_v7 = vshll.u32 %v243_v53, 16 }
  0x50   : > { %v521_v5 = vrot.slane %v519_v59, 5  ;;  %v671_v9 = vpack.c.b16 %v642_v60, %v641_v57  ;;  %v437_v10 = vrot.slane %v436_v61, 4  ;;  %v612_v22 = vshrl.u32 %v229_v8, 16  ;;  %v1047_v61 = vld [vmem:[%s5204_s30] sm:$0xe] }
  0x51   : > { %v527_v11 = vrot.slane %v525_v3, 5  ;;  %v432_v13 = vsel %vm5216_vm3, %v427_v4, %v431_v48  ;;  %v531_v15 = vrot.slane %v529_v6, 4  ;;  %v537_v16 = vrot.slane %v535_v7, 5  ;;  %v5371_v48 = vld [vmem:[%s5204_s30 + $0x2c] sm:$0x1] }
  0x52   : > { %v522_v14 = vor.u32 %v521_v5, %v518_v62  ;;  %4344 = vmatmul.msk.bf16.gmra.mxu0 %vm685_vm4, %v671_v9  ;;  %v442_v18 = vsel %vm5216_vm3, %v437_v10, %v441_v52  ;;  %v651_v19 = vunpack.c.l.b16 %v432_v13  ;;  %v615_v23 = vshll.u32 %v229_v8, 16  ;;  %v4584_v6 = vld [vmem:[%s5204_s30 + $0xc] sm:$0xf] }
  0x53   : > { %v652_v24 = vunpack.c.l.b16 %v442_v18  ;;  %v532_v29 = vor.u32 %v531_v15, %v527_v11  ;;  %v621_v30 = vshll.u32 %v230_v12, 16  ;;  %v614_v31 = vrot.slane %v612_v22, 4 }
  0x54   : > { %v523_v26 = vrot.slane %v522_v14, 4  ;;  %v617_v33 = vrot.slane %v615_v23, 5  ;;  %v625_v34 = vshrl.u32 %v230_v12, 16  ;;  %v631_v35 = vshll.u32 %v247_v17, 16  ;;  %v4585_v12 = vld [vmem:[%s5204_s30 + $0x10] sm:$0xf] }
  0x55   : > { %v676_v38 = vpack.c.b16 %v652_v24, %v651_v19  ;;  %v533_v40 = vrot.slane %v532_v29, 4  ;;  %v623_v41 = vrot.slane %v621_v30, 5  ;;  %v1103_v43 = vrot.slane %v5232_v2, 5 }
  0x56   : > { %v528_v39 = vsel %vm5216_vm3, %v523_v26, %v527_v11  ;;  %v618_v45 = vor.u32 %v617_v33, %v614_v31  ;;  %v627_v46 = vrot.slane %v625_v34, 4  ;;  %v633_v50 = vrot.slane %v631_v35, 5  ;;  %v4730_v11 = vld [vmem:[%s6598_s1 + $0xc] sm:$0x3] }
  0x57   : > { %v659_v44 = vunpack.c.l.b16 %v528_v39  ;;  %4349 = vmatmul.msk.bf16.gmra.mxu1 %vm685_vm4, %v676_v38  ;;  %v538_v49 = vsel %vm5216_vm3, %v533_v40, %v537_v16  ;;  %v324_v51 = vshrl.u32 %v205_v37, 16  ;;  %v327_v52 = vshll.u32 %v205_v37, 16  ;;  %v4586_v38 = vld [vmem:[%s5204_s30 + $0x14] sm:$0x1] }
  0x58   : > { %v660_v53 = vunpack.c.l.b16 %v538_v49  ;;  %v619_v54 = vrot.slane %v618_v45, 4  ;;  %v628_v55 = vor.u32 %v627_v46, %v623_v41  ;;  %v333_v2 = vshll.u32 %v5367_v42, 16  ;;  %v4859_v45 = vld [vmem:[%s6598_s1 + $0xe] sm:$0x3] }
  0x59   : > { %v326_v57 = vrot.slane %v324_v51, 4  ;;  %v329_v58 = vrot.slane %v327_v52, 5  ;;  %v337_v59 = vshrl.u32 %v5367_v42, 16  ;;  %v343_v60 = vshll.u32 %v5371_v48, 16  ;;  %v4928_v51 = vld [vmem:[%s5204_s30] sm:$0xff] }
  0x5a   : > { %v680_v62 = vpack.c.b16 %v660_v53, %v659_v44  ;;  %v624_v3 = vsel %vm5216_vm3, %v619_v54, %v623_v41  ;;  %v629_v4 = vrot.slane %v628_v55, 4  ;;  %v335_v5 = vrot.slane %v333_v2, 5  ;;  %v4908_v2 = vld [vmem:[%s6598_s1 + $0x10] sm:$0x3] }
  0x5b   : > { %v667_v7 = vunpack.c.l.b16 %v624_v3  ;;  %v330_v8 = vor.u32 %v329_v58, %v326_v57  ;;  %v339_v9 = vrot.slane %v337_v59, 4  ;;  %v345_v10 = vrot.slane %v343_v60, 5 }
  0x5c   : > { %4353 = vmatmul.msk.bf16.gmra.mxu2 %vm685_vm4, %v680_v62  ;;  %v634_v13 = vsel %vm5216_vm3, %v629_v4, %v633_v50  ;;  %v4438_v14 = vrot.slane %v1047_v61, 9  ;;  %v1100_v19 = vrot.slane %v5229_v1, 5  ;;  %v2935_v22 = vsel %vm734_vm0, %v4730_v11, 0  ;;  %v4681_v50 = vld [vmem:[%s6598_s1 + $0xa] sm:$0x3] }
  0x5d   : > { %v668_v15 = vunpack.c.l.b16 %v634_v13  ;;  %v331_v16 = vrot.slane %v330_v8, 4  ;;  %v340_v17 = vor.u32 %v339_v9, %v335_v5  ;;  %v1768_v23 = vshrl.u32 %v4584_v6, 16  ;;  %2944 = vmatpush.bf16.msra.mxu2 %v2935_v22  ;;  %v1048_v8 = vld [vmem:[%s5204_s30 + $0xc] sm:$0xe] }
  0x5e   : > { %v1771_v24 = vshll.u32 %v4584_v6, 16  ;;  %v1777_v26 = vshll.u32 %v4585_v12, 16  ;;  %v1101_v33 = vsel %vm5390_vm7, %v4438_v14, %v1100_v19  ;;  %v1102_v35 = vrot.slane %v1100_v19, 4  ;;  %v4588_v6 = vld [vmem:[%s5204_s30 + $0x1c] sm:$0xf] }
  0x5f   : > { %v684_v29 = vpack.c.b16 %v668_v15, %v667_v7  ;;  %v336_v30 = vsel %vm5216_vm3, %v331_v16, %v335_v5  ;;  %v341_v31 = vrot.slane %v340_v17, 4  ;;  %v1212_v37 = vunpack.c.l.b16 %v1101_v33  ;;  %v4587_v5 = vld [vmem:[%s5204_s30 + $0x18] sm:$0xf]  ;;  %v4944_v15 = vld [vmem:[%s5204_s30 + $0xc] sm:$0xff] }
  0x60   : > { %v643_v34 = vunpack.c.l.b16 %v336_v30  ;;  %v1770_v1 = vrot.slane %v1768_v23, 4  ;;  %v1773_v40 = vrot.slane %v1771_v24, 5  ;;  %v1779_v41 = vrot.slane %v1777_v26, 5  ;;  %v4589_v30 = vld [vmem:[%s5204_s30 + $0x20] sm:$0x1] }
  0x61   : > { %4357 = vmatmul.msk.bf16.gmra.mxu3 %vm685_vm4, %v684_v29  ;;  %v346_v39 = vsel %vm5216_vm3, %v341_v31, %v345_v10  ;;  %v1781_v44 = vshrl.u32 %v4585_v12, 16  ;;  %v1104_v49 = vsel %vm5390_vm7, %v1102_v35, %v1103_v43  ;;  %v1787_v55 = vshll.u32 %v4586_v38, 16  ;;  %v4929_v35 = vld [vmem:[%s5204_s30 + $0xc] sm:$0xff] }
  0x62   : > { %v644_v46 = vunpack.c.l.b16 %v346_v39  ;;  %v1213_v52 = vunpack.c.l.b16 %v1104_v49  ;;  %v1774_v53 = vor.u32 %v1773_v40, %v1770_v1  ;;  %v3589_v58 = vsel %vm734_vm0, %v4859_v45, 0 }
  0x63   : > { %v1783_v54 = vrot.slane %v1781_v44, 4  ;;  %3598 = vmatpush.bf16.msra.mxu3 %v3589_v58  ;;  %v2648_v60 = vsel %vm734_vm0, %v4681_v50, 0  ;;  %v3987_v61 = vsel %vm734_vm0, %v4908_v2, 0  ;;  %v1789_v4 = vrot.slane %v1787_v55, 5  ;;  %v1049_v50 = vld [vmem:[%s5204_s30 + $0x18] sm:$0xe] }
  0x64   : > { %v672_v57 = vpack.c.b16 %v644_v46, %v643_v34  ;;  %v1244_v43 = vpack.c.b16 %v1213_v52, %v1212_v37  ;;  %2657 = vmatpush.bf16.msra.mxu1 %v2648_v60  ;;  %v1775_v62 = vrot.slane %v1774_v53, 4  ;;  %3996 = vmatpush.bf16.msra.mxu0 %v3987_v61  ;;  %v1107_v7 = vrot.slane %v5275_v28, 5  ;;  %v4591_v46 = vld [vmem:[%s5204_s30 + $0x28] sm:$0xf] }
  0x65   : > { %v1784_v59 = vor.u32 %v1783_v54, %v1779_v41  ;;  %v1792_v9 = vshrl.u32 %v4587_v5, 16  ;;  %v1795_v10 = vshll.u32 %v4587_v5, 16  ;;  %v1801_v13 = vshll.u32 %v4588_v6, 16 }
  0x66   : > { %4345 = vmatmul.msk.bf16.gmra.mxu0 %vm685_vm4, %v672_v57  ;;  %v1780_v11 = vsel %vm5216_vm3, %v1775_v62, %v1779_v41  ;;  %v1805_v14 = vshrl.u32 %v4588_v6, 16  ;;  %v4439_v16 = vrot.slane %v1048_v8, 9  ;;  %v1109_v17 = vrot.slane %v1107_v7, 4  ;;  %v4590_v41 = vld [vmem:[%s5204_s30 + $0x24] sm:$0xf] }
  0x67   : > { %4422 = vmatmul.msk.bf16.vlgmr.msrb.gmra.mxu1 %vm685_vm4, %v4928_v51  ;;  %v1785_v3 = vrot.slane %v1784_v59, 4  ;;  %v1110_v28 = vrot.slane %v5278_v32, 5  ;;  %v2153_v19 = vunpack.c.l.b16 %v1780_v11  ;;  %v1794_v23 = vrot.slane %v1792_v9, 4  ;;  %v4592_v6 = vld [vmem:[%s5204_s30 + $0x2c] sm:$0x1] }
  0x68   : > { %v1797_v24 = vrot.slane %v1795_v10, 5  ;;  %v1803_v26 = vrot.slane %v1801_v13, 5  ;;  %v1807_v29 = vrot.slane %v1805_v14, 4  ;;  %v1108_v31 = vsel %vm5390_vm7, %v4439_v16, %v1107_v7 }
  0x69   : > { %v1790_v12 = vsel %vm5216_vm3, %v1785_v3, %v1789_v4  ;;  %v1111_v33 = vsel %vm5390_vm7, %v1109_v17, %v1110_v28  ;;  %v1811_v38 = vshll.u32 %v4589_v30, 16  ;;  %v1214_v1 = vunpack.c.l.b16 %v1108_v31 }
  0x6a   : > { %v2154_v22 = vunpack.c.l.b16 %v1790_v12  ;;  %v1798_v32 = vor.u32 %v1797_v24, %v1794_v23  ;;  %v1808_v37 = vor.u32 %v1807_v29, %v1803_v26  ;;  %v1215_v39 = vunpack.c.l.b16 %v1111_v33  ;;  %v4930_v12 = vld [vmem:[%s5204_s30 + $0x18] sm:$0xff]  ;;  %v1050_v29 = vld [vmem:[%s5204_s30 + $0x24] sm:$0xe] }
  0x6b   : > { %v1813_v45 = vrot.slane %v1811_v38, 5  ;;  %v1114_v51 = vrot.slane %v5321_v63, 5  ;;  %v1816_v52 = vshrl.u32 %v4590_v41, 16  ;;  %v1819_v54 = vshll.u32 %v4590_v41, 16 }
  0x6c   : > { %4455 = vmatmul.msk.bf16.vlgmr.msrb.gmra.mxu2 %vm685_vm4, %v1244_v43  ;;  %v2185_v34 = vpack.c.b16 %v2154_v22, %v2153_v19  ;;  %v1799_v40 = vrot.slane %v1798_v32, 4  ;;  %v1809_v44 = vrot.slane %v1808_v37, 4  ;;  %v1245_v49 = vpack.c.b16 %v1215_v39, %v1214_v1  ;;  %v4945_v43 = vld [vmem:[%s5204_s30 + $0x18] sm:$0xff]  ;;  %v4593_v19 = vld [vmem:[%s5204_s30 + $0x30] sm:$0xf]  ;;  %v4946_v32 = vld [vmem:[%s5204_s30 + $0x24] sm:$0xff] }
  0x6d   : > { %v1825_v55 = vshll.u32 %v4591_v46, 16  ;;  %v1829_v2 = vshrl.u32 %v4591_v46, 16  ;;  %v4440_v58 = vrot.slane %v1049_v50, 9  ;;  %v1116_v60 = vrot.slane %v1114_v51, 4  ;;  %v4594_v22 = vld [vmem:[%s5204_s30 + $0x34] sm:$0xf] }
  0x6e   : > { %v1804_v53 = vsel %vm5216_vm3, %v1799_v40, %v1803_v26  ;;  %v1814_v57 = vsel %vm5216_vm3, %v1809_v44, %v1813_v45  ;;  %v1117_v63 = vrot.slane %v5324_v0, 5  ;;  %v1818_v61 = vrot.slane %v1816_v52, 4  ;;  %v4595_v45 = vld [vmem:[%s5204_s30 + $0x38] sm:$0x1] }
  0x6f   : > { %v2155_v59 = vunpack.c.l.b16 %v1804_v53  ;;  %v2156_v62 = vunpack.c.l.b16 %v1814_v57  ;;  %v1821_v3 = vrot.slane %v1819_v54, 5  ;;  %v1827_v4 = vrot.slane %v1825_v55, 5  ;;  %v4597_v57 = vld [vmem:[%s5204_s30 + $0x40] sm:$0xf] }
  0x70   : > { %v1831_v5 = vrot.slane %v1829_v2, 4  ;;  %v1115_v7 = vsel %vm5390_vm7, %v4440_v58, %v1114_v51  ;;  %v1118_v8 = vsel %vm5390_vm7, %v1116_v60, %v1117_v63  ;;  %v1835_v0 = vshll.u32 %v4592_v6, 16  ;;  %v4596_v2 = vld [vmem:[%s5204_s30 + $0x3c] sm:$0xf]  ;;  %v5085_v63 = vld [vmem:[%s5204_s30 + $0x34] sm:$0xf] }
  0x71   : > { %4568 = vmatmul.msk.bf16.vlgmr.msrb.gmra.mxu3 %vm685_vm4, %v4944_v15  ;;  %v2186_v9 = vpack.c.b16 %v2156_v62, %v2155_v59  ;;  %v1822_v10 = vor.u32 %v1821_v3, %v1818_v61  ;;  %v1216_v13 = vunpack.c.l.b16 %v1115_v7  ;;  %v1217_v14 = vunpack.c.l.b16 %v1118_v8  ;;  %v1051_v62 = vld [vmem:[%s5204_s30 + $0x30] sm:$0xe] }
  0x72   : > { %v1832_v11 = vor.u32 %v1831_v5, %v1827_v4  ;;  %v1837_v17 = vrot.slane %v1835_v0, 5  ;;  %v1121_v23 = vrot.slane %v5367_v42, 5  ;;  %v1840_v30 = vshrl.u32 %v4593_v19, 16  ;;  %v5086_v0 = vld [vmem:[%s5204_s30 + $0x38] sm:$0x1] }
  0x73   : > { %v1823_v15 = vrot.slane %v1822_v10, 4  ;;  %v1246_v28 = vpack.c.b16 %v1217_v14, %v1216_v13  ;;  %v1843_v31 = vshll.u32 %v4593_v19, 16  ;;  %v1849_v33 = vshll.u32 %v4594_v22, 16  ;;  %v4947_v13 = vld [vmem:[%s5204_s30 + $0x30] sm:$0xff] }
  0x74   : > { %v1833_v16 = vrot.slane %v1832_v11, 4  ;;  %v1123_v37 = vrot.slane %v1121_v23, 4  ;;  %v1124_v42 = vrot.slane %v5371_v48, 5  ;;  %v1842_v39 = vrot.slane %v1840_v30, 4  ;;  %v4931_v48 = vld [vmem:[%s5204_s30 + $0x24] sm:$0xff] }
  0x75   : > { %v1828_v24 = vsel %vm5216_vm3, %v1823_v15, %v1827_v4  ;;  %v1845_v40 = vrot.slane %v1843_v31, 5  ;;  %v1851_v41 = vrot.slane %v1849_v33, 5  ;;  %v1859_v53 = vshll.u32 %v4595_v45, 16  ;;  %v4932_v33 = vld [vmem:[%s5204_s30 + $0x30] sm:$0xff] }
  0x76   : > { %4633 = vmatmul.msk.bf16.vlgmr.msrb.gmra.mxu0 %vm685_vm4, %v2185_v34  ;;  %v1838_v26 = vsel %vm5216_vm3, %v1833_v16, %v1837_v17  ;;  %v1853_v34 = vshrl.u32 %v4594_v22, 16  ;;  %v2157_v38 = vunpack.c.l.b16 %v1828_v24  ;;  %v1128_v61 = vrot.slane %v5085_v63, 5  ;;  %v4598_v22 = vld [vmem:[%s5204_s30 + $0x44] sm:$0x1] }
  0x77   : > { %4423 = vmatmul.msk.bf16.gmra.mxu1 %vm685_vm4, %v4929_v35  ;;  %v4441_v35 = vrot.slane %v1050_v29, 9  ;;  %v2158_v1 = vunpack.c.l.b16 %v1838_v26  ;;  %v1846_v51 = vor.u32 %v1845_v40, %v1842_v39  ;;  %v1861_v59 = vrot.slane %v1859_v53, 5  ;;  %v4599_v39 = vld [vmem:[%s5204_s30 + $0x48] sm:$0xf]  ;;  %v4600_v40 = vld [vmem:[%s5204_s30 + $0x4c] sm:$0xf] }
  0x78   : > { %v1855_v44 = vrot.slane %v1853_v34, 4  ;;  %v1864_v3 = vshrl.u32 %v4596_v2, 16  ;;  %v1867_v4 = vshll.u32 %v4596_v2, 16  ;;  %v1873_v5 = vshll.u32 %v4597_v57, 16  ;;  %v4948_v2 = vld [vmem:[%s5204_s30 + $0x3c] sm:$0xff] }
  0x79   : > { %v1122_v46 = vsel %vm5390_vm7, %v4441_v35, %v1121_v23  ;;  %v2187_v50 = vpack.c.b16 %v2158_v1, %v2157_v38  ;;  %v1847_v58 = vrot.slane %v1846_v51, 4  ;;  %v1877_v6 = vshrl.u32 %v4597_v57, 16 }
  0x7a   : > { %v1856_v52 = vor.u32 %v1855_v44, %v1851_v41  ;;  %v1218_v54 = vunpack.c.l.b16 %v1122_v46  ;;  %v4442_v10 = vrot.slane %v1051_v62, 9  ;;  %v1130_v11 = vrot.slane %v1128_v61, 4 }
  0x7b   : > { %v1852_v8 = vsel %vm5216_vm3, %v1847_v58, %v1851_v41  ;;  %v1866_v14 = vrot.slane %v1864_v3, 4  ;;  %v1869_v15 = vrot.slane %v1867_v4, 5  ;;  %v1875_v16 = vrot.slane %v1873_v5, 5  ;;  %v4601_v4 = vld [vmem:[%s5204_s30 + $0x50] sm:$0x1] }
  0x7c   : > { %4456 = vmatmul.msk.bf16.gmra.mxu2 %vm685_vm4, %v1245_v49  ;;  %v1125_v49 = vsel %vm5390_vm7, %v1123_v37, %v1124_v42  ;;  %v1879_v17 = vrot.slane %v1877_v6, 4  ;;  %v1129_v23 = vsel %vm5390_vm7, %v4442_v10, %v1128_v61  ;;  %v1883_v30 = vshll.u32 %v4598_v22, 16 }
  0x7d   : > { %v1219_v55 = vunpack.c.l.b16 %v1125_v49  ;;  %v1870_v26 = vor.u32 %v1869_v15, %v1866_v14  ;;  %v1888_v51 = vshrl.u32 %v4599_v39, 16  ;;  %v1897_v53 = vshll.u32 %v4600_v40, 16 }
  0x7e   : > { %v1880_v29 = vor.u32 %v1879_v17, %v1875_v16  ;;  %v1885_v1 = vrot.slane %v1883_v30, 5 }
  0x7f   : > { %v1247_v60 = vpack.c.b16 %v1219_v55, %v1218_v54  ;;  %v1871_v42 = vrot.slane %v1870_v26, 4  ;;  %v1901_v54 = vshrl.u32 %v4600_v40, 16  ;;  %v1899_v62 = vrot.slane %v1897_v53, 5 }
  0x80   : > { %v1881_v38 = vrot.slane %v1880_v29, 4  ;;  %v1142_v26 = vrot.slane %v5288_v47, 5 }
  0x81   : > { %4569 = vmatmul.msk.bf16.gmra.mxu3 %vm685_vm4, %v4945_v43  ;;  %v1857_v43 = vrot.slane %v1856_v52, 4  ;;  %v1876_v45 = vsel %vm5216_vm3, %v1871_v42, %v1875_v16  ;;  %v1891_v52 = vshll.u32 %v4599_v39, 16  ;;  %v1903_v3 = vrot.slane %v1901_v54, 4  ;;  %v4604_v54 = vld [vmem:[%s5204_s30 + $0x5c] sm:$0x1] }
  0x82   : > { %v1886_v46 = vsel %vm5216_vm3, %v1881_v38, %v1885_v1  ;;  %v2161_v55 = vunpack.c.l.b16 %v1876_v45  ;;  %v4949_v1 = vld [vmem:[%s5204_s30 + $0x48] sm:$0xff]  ;;  %v1144_v40 = vrot.slane %v1142_v26, 4 }
  0x83   : > { %v2162_v57 = vunpack.c.l.b16 %v1886_v46  ;;  %v1893_v61 = vrot.slane %v1891_v52, 5  ;;  %v1904_v10 = vor.u32 %v1903_v3, %v1899_v62 }
  0x85   : > { %v1905_v16 = vrot.slane %v1904_v10, 4 }
  0x86   : > { %4634 = vmatmul.msk.bf16.gmra.mxu0 %vm685_vm4, %v2186_v9  ;;  %v1862_v9 = vsel %vm5216_vm3, %v1857_v43, %v1861_v59 }
  0x87   : > { %4424 = vmatmul.msk.bf16.gmra.mxu1 %vm685_vm4, %v4930_v12  ;;  %v1131_v12 = vrot.slane %v5086_v0, 5  ;;  %v2160_v19 = vunpack.c.l.b16 %v1862_v9 }
  0x89   : > { %v1132_v24 = vsel %vm5390_vm7, %v1130_v11, %v1131_v12  ;;  %v1907_v11 = vshll.u32 %v4601_v4, 16  ;;  %v4933_v12 = vld [vmem:[%s5204_s30 + $0x3c] sm:$0xff] }
  0x8a   : > { %v1221_v35 = vunpack.c.l.b16 %v1132_v24  ;;  %v4603_v24 = vld [vmem:[%s5204_s30 + $0x58] sm:$0xf]  ;;  %v4605_v4 = vld [vmem:[%s5204_s30 + $0x60] sm:$0xf] }
  0x8b   : > { %v1909_v17 = vrot.slane %v1907_v11, 5  ;;  %v1925_v42 = vshrl.u32 %v4603_v24, 16 }
  0x8c   : > { %4457 = vmatmul.msk.bf16.gmra.mxu2 %vm685_vm4, %v1246_v28  ;;  %v2159_v28 = vunpack.c.l.b16 %v1852_v8  ;;  %v2189_v8 = vpack.c.b16 %v2162_v57, %v2161_v55 }
  0x8d   : > { %v1910_v30 = vsel %vm5216_vm3, %v1905_v16, %v1909_v17  ;;  %v1927_v52 = vrot.slane %v1925_v42, 4 }
  0x8e   : > { %v2188_v31 = vpack.c.b16 %v2160_v19, %v2159_v28  ;;  %v2164_v46 = vunpack.c.l.b16 %v1910_v30 }
  0x91   : > { %4570 = vmatmul.msk.bf16.gmra.mxu3 %vm685_vm4, %v4946_v32  ;;  %v1220_v32 = vunpack.c.l.b16 %v1129_v23  ;;  %v4602_v23 = vld [vmem:[%s5204_s30 + $0x54] sm:$0xf] }
  0x93   : > { %v1248_v44 = vpack.c.b16 %v1221_v35, %v1220_v32  ;;  %v1915_v32 = vshll.u32 %v4602_v23, 16  ;;  %v1921_v35 = vshll.u32 %v4603_v24, 16 }
  0x96   : > { %4635 = vmatmul.msk.bf16.gmra.mxu0 %vm685_vm4, %v2187_v50  ;;  %v1135_v50 = vrot.slane %v5244_v20, 5  ;;  %v1890_v20 = vrot.slane %v1888_v51, 4  ;;  %v1923_v51 = vrot.slane %v1921_v35, 5  ;;  %v1152_v35 = vrot.slane %v5339_v27, 5 }
  0x97   : > { %4425 = vmatmul.msk.bf16.gmra.mxu1 %vm685_vm4, %v4931_v48  ;;  %v1052_v48 = vld [vmem:[%s5204_s30 + $0x3c] sm:$0xe] }
  0x98   : > { %v4443_v43 = vrot.slane %v1052_v48, 9  ;;  %v1137_v59 = vrot.slane %v1135_v50, 4  ;;  %v1917_v48 = vrot.slane %v1915_v32, 5 }
  0x9a   : > { %v1136_v5 = vsel %vm5390_vm7, %v4443_v43, %v1135_v50  ;;  %v4934_v43 = vld [vmem:[%s5204_s30 + $0x48] sm:$0xff] }
  0x9c   : > { %v5485_v7 = vpop.f32.mrf.mxu1  ;;  %4458 = vmatmul.msk.bf16.gmra.mxu2 %vm685_vm4, %v1247_v60  ;;  %v1138_v60 = vrot.slane %v5249_v25, 5  ;;  %v1894_v25 = vor.u32 %v1893_v61, %v1890_v20  ;;  %v1931_v20 = vshll.u32 %v4604_v54, 16  ;;  %v4935_v54 = vld [vmem:[%s5204_s30 + $0x54] sm:$0xff] }
  0x9e   : > { %v1139_v6 = vsel %vm5390_vm7, %v1137_v59, %v1138_v60  ;;  %v1895_v15 = vrot.slane %v1894_v25, 4  ;;  %v1928_v60 = vor.u32 %v1927_v52, %v1923_v51  ;;  %v1933_v10 = vrot.slane %v1931_v20, 5 }
  0x9f   : > { %v1223_v14 = vunpack.c.l.b16 %v1139_v6 }
  0xa0   : > { %v1900_v29 = vsel %vm5216_vm3, %v1895_v15, %v1899_v62  ;;  %v1929_v25 = vrot.slane %v1928_v60, 4  ;;  %v1149_v15 = vrot.slane %v5334_v21, 5 }
  0xa1   : > { %4571 = vmatmul.msk.bf16.gmra.mxu3 %vm685_vm4, %v4947_v13  ;;  %v1222_v13 = vunpack.c.l.b16 %v1136_v5  ;;  %v2163_v45 = vunpack.c.l.b16 %v1900_v29  ;;  %v4606_v5 = vld [vmem:[%s5204_s30 + $0x64] sm:$0xf] }
  0xa2   : > { %v1949_v16 = vshrl.u32 %v4606_v5, 16  ;;  %v1934_v24 = vsel %vm5216_vm3, %v1929_v25, %v1933_v10  ;;  %v1151_v32 = vrot.slane %v1149_v15, 4  ;;  %v5087_v10 = vld [vmem:[%s5204_s30 + $0x64] sm:$0xf] }
  0xa3   : > { %v1249_v19 = vpack.c.b16 %v1223_v14, %v1222_v13  ;;  %v2190_v57 = vpack.c.b16 %v2164_v46, %v2163_v45  ;;  %v1939_v13 = vshll.u32 %v4605_v4, 16  ;;  %v1945_v14 = vshll.u32 %v4606_v5, 16 }
  0xa4   : > { %v5501_v34 = vpop.f32.mrf.mxu1  ;;  %v1951_v42 = vrot.slane %v1949_v16, 4 }
  0xa5   : > { %v1941_v30 = vrot.slane %v1939_v13, 5  ;;  %v1055_v13 = vld [vmem:[%s5204_s30 + $0x60] sm:$0xe] }
  0xa6   : > { %v5503_v37 = vpop.f32.mrf.mxu2  ;;  %4636 = vmatmul.msk.bf16.gmra.mxu0 %vm685_vm4, %v2188_v31  ;;  %v1053_v31 = vld [vmem:[%s5204_s30 + $0x48] sm:$0xe] }
  0xa7   : > { %4426 = vmatmul.msk.bf16.gmra.mxu1 %vm685_vm4, %v4932_v33  ;;  %v1912_v33 = vshrl.u32 %v4602_v23, 16  ;;  %v4444_v47 = vrot.slane %v1053_v31, 9  ;;  %v1947_v31 = vrot.slane %v1945_v14, 5 }
  0xa9   : > { %v5509_v41 = vpop.f32.mrf.mxu0  ;;  %v1914_v50 = vrot.slane %v1912_v33, 4  ;;  %v4950_v33 = vld [vmem:[%s5204_s30 + $0x54] sm:$0xff]  ;;  %v1952_v27 = vor.u32 %v1951_v42, %v1947_v31 }
  0xaa   : > { %v5515_v49 = vpop.f32.mrf.mxu3 }
  0xab   : > { %v1918_v59 = vor.u32 %v1917_v48, %v1914_v50  ;;  %v1153_v48 = vsel %vm5390_vm7, %v1151_v32, %v1152_v35  ;;  %v1953_v60 = vrot.slane %v1952_v27, 4 }
  0xac   : > { %4459 = vmatmul.msk.bf16.gmra.mxu2 %vm685_vm4, %v1248_v44  ;;  %v1145_v44 = vrot.slane %v5293_v56, 5 }
  0xae   : > { %v5521_v58 = vpop.f32.mrf.mxu1  ;;  %v5524_v63 = vpop.f32.mrf.mxu2  ;;  %v1146_v56 = vsel %vm5390_vm7, %v1144_v40, %v1145_v44  ;;  %v4607_v40 = vld [vmem:[%s5204_s30 + $0x68] sm:$0x1] }
  0xaf   : > { %v1225_v62 = vunpack.c.l.b16 %v1146_v56 }
  0xb1   : > { %4572 = vmatmul.msk.bf16.gmra.mxu3 %vm685_vm4, %v4948_v2  ;;  %v5532_v9 = vpop.f32.mrf.mxu0  ;;  %v1143_v2 = vsel %vm5390_vm7, %v4444_v47, %v1142_v26  ;;  %v2166_v47 = vunpack.c.l.b16 %v1934_v24 }
  0xb2   : > { %v5534_v0 = vpop.f32.mrf.mxu3  ;;  %v1224_v61 = vunpack.c.l.b16 %v1143_v2 }
  0xb4   : > { %v1250_v11 = vpack.c.b16 %v1225_v62, %v1224_v61  ;;  %v4608_v61 = vld [vmem:[%s5204_s30 + $0x6c] sm:$0xf]  ;;  %v4609_v62 = vld [vmem:[%s5204_s30 + $0x70] sm:$0xf] }
  0xb5   : > { %v1960_v14 = vshrl.u32 %v4608_v61, 16  ;;  %v1969_v16 = vshll.u32 %v4609_v62, 16 }
  0xb6   : > { %4637 = vmatmul.msk.bf16.gmra.mxu0 %vm685_vm4, %v2189_v8  ;;  %v5538_v28 = vpop.f32.mrf.mxu1  ;;  %v1919_v8 = vrot.slane %v1918_v59, 4 }
  0xb7   : > { %4427 = vmatmul.msk.bf16.gmra.mxu1 %vm685_vm4, %v4933_v12  ;;  %v1936_v12 = vshrl.u32 %v4605_v4, 16  ;;  %v1962_v35 = vrot.slane %v1960_v14, 4  ;;  %v4612_v14 = vld [vmem:[%s5204_s30 + $0x7c] sm:$0xf] }
  0xb8   : > { %v1924_v23 = vsel %vm5216_vm3, %v1919_v8, %v1923_v51  ;;  %v1955_v51 = vshll.u32 %v4607_v40, 16 }
  0xb9   : > { %v5541_v22 = vpop.f32.mrf.mxu2  ;;  %v1938_v29 = vrot.slane %v1936_v12, 4 }
  0xba   : > { %v1957_v20 = vrot.slane %v1955_v51, 5 }
  0xbb   : > { %v1942_v46 = vor.u32 %v1941_v30, %v1938_v29  ;;  %v4951_v30 = vld [vmem:[%s5204_s30 + $0x60] sm:$0xff] }
  0xbc   : > { %4460 = vmatmul.msk.bf16.gmra.mxu2 %vm685_vm4, %v1249_v19  ;;  %v1054_v19 = vld [vmem:[%s5204_s30 + $0x54] sm:$0xe]  ;;  %v1958_v25 = vsel %vm5216_vm3, %v1953_v60, %v1957_v20 }
  0xbd   : > { %v5551_v38 = vpop.f32.mrf.mxu0  ;;  %v4445_v21 = vrot.slane %v1054_v19, 9  ;;  %v1943_v59 = vrot.slane %v1942_v46, 4  ;;  %v1973_v19 = vshrl.u32 %v4609_v62, 16  ;;  %v4610_v46 = vld [vmem:[%s5204_s30 + $0x74] sm:$0x1] }
  0xbe   : > { %v5555_v39 = vpop.f32.mrf.mxu3 }
  0xbf   : > { %v1150_v50 = vsel %vm5390_vm7, %v4445_v21, %v1149_v15  ;;  %v1948_v8 = vsel %vm5216_vm3, %v1943_v59, %v1947_v31  ;;  %v1963_v15 = vshll.u32 %v4608_v61, 16  ;;  %v4446_v21 = vrot.slane %v1055_v13, 9  ;;  %v4611_v13 = vld [vmem:[%s5204_s30 + $0x78] sm:$0xf] }
  0xc0   : > { %v5558_v53 = vpop.f32.mrf.mxu1  ;;  %v1226_v56 = vunpack.c.l.b16 %v1150_v50  ;;  %v2167_v31 = vunpack.c.l.b16 %v1948_v8 }
  0xc1   : > { %4573 = vmatmul.msk.bf16.gmra.mxu3 %vm685_vm4, %v4949_v1  ;;  %v5562_v55 = vpop.f32.mrf.mxu2  ;;  %v2165_v1 = vunpack.c.l.b16 %v1924_v23  ;;  %v5088_v23 = vld [vmem:[%s5204_s30 + $0x68] sm:$0x1]  ;;  %v1965_v42 = vrot.slane %v1963_v15, 5  ;;  %v5089_v15 = vld [vmem:[%s5204_s30 + $0x70] sm:$0xf] }
  0xc2   : > { %v1159_v24 = vrot.slane %v5088_v23, 5  ;;  %v1056_v23 = vld [vmem:[%s5204_s30 + $0x6c] sm:$0xe] }
  0xc3   : > { %v2191_v52 = vpack.c.b16 %v2166_v47, %v2165_v1  ;;  %v1971_v1 = vrot.slane %v1969_v16, 5  ;;  %v1975_v47 = vrot.slane %v1973_v19, 4  ;;  %v1966_v51 = vor.u32 %v1965_v42, %v1962_v35  ;;  %v5090_v42 = vld [vmem:[%s5204_s30 + $0x74] sm:$0x1] }
  0xc4   : > { %v1163_v16 = vrot.slane %v5089_v15, 5 }
  0xc5   : > { %v5569_v3 = vpop.f32.mrf.mxu0 }
  0xc6   : > { %4638 = vmatmul.msk.bf16.gmra.mxu0 %vm685_vm4, %v2190_v57  ;;  %v5574_v6 = vpop.f32.mrf.mxu3  ;;  %v1227_v57 = vunpack.c.l.b16 %v1153_v48 }
  0xc7   : > { %4428 = vmatmul.msk.bf16.gmra.mxu1 %vm685_vm4, %v4934_v43 }
  0xc8   : > { %v5578_v17 = vpop.f32.mrf.mxu1  ;;  %v1251_v4 = vpack.c.b16 %v1227_v57, %v1226_v56  ;;  %v4936_v57 = vld [vmem:[%s5204_s30 + $0x60] sm:$0xff] }
  0xcc   : > { %v5585_v26 = vpop.f32.mrf.mxu2  ;;  %4461 = vmatmul.msk.bf16.gmra.mxu2 %vm685_vm4, %v1250_v11  ;;  %v1156_v11 = vrot.slane %v5087_v10, 5 }
  0xce   : > { %v1158_v32 = vrot.slane %v1156_v11, 4  ;;  %v1157_v50 = vsel %vm5390_vm7, %v4446_v21, %v1156_v11  ;;  %v1997_v21 = vshrl.u32 %v4612_v14, 16 }
  0xcf   : > { %v5591_v44 = vpop.f32.mrf.mxu0  ;;  %v1228_v20 = vunpack.c.l.b16 %v1157_v50  ;;  %v4447_v50 = vrot.slane %v1056_v23, 9 }
  0xd0   : > { %v5593_v45 = vpop.f32.mrf.mxu3  ;;  %v1160_v48 = vsel %vm5390_vm7, %v1158_v32, %v1159_v24 }
  0xd1   : > { %4574 = vmatmul.msk.bf16.gmra.mxu3 %vm685_vm4, %v4950_v33  ;;  %v2168_v33 = vunpack.c.l.b16 %v1958_v25  ;;  %v1229_v61 = vunpack.c.l.b16 %v1160_v48  ;;  %v1165_v48 = vrot.slane %v1163_v16, 4 }
  0xd3   : > { %v2192_v27 = vpack.c.b16 %v2168_v33, %v2167_v31  ;;  %v1252_v11 = vpack.c.b16 %v1229_v61, %v1228_v20  ;;  %v1987_v31 = vshll.u32 %v4611_v13, 16  ;;  %v1993_v33 = vshll.u32 %v4612_v14, 16 }
  0xd4   : > { %v5601_v2 = vpop.f32.mrf.mxu1  ;;  %v5603_v43 = vpop.f32.mrf.mxu2  ;;  %v1999_v20 = vrot.slane %v1997_v21, 4 }
  0xd6   : > { %4639 = vmatmul.msk.bf16.gmra.mxu0 %vm685_vm4, %v2191_v52  ;;  %v1976_v52 = vor.u32 %v1975_v47, %v1971_v1  ;;  %v1166_v47 = vrot.slane %v5090_v42, 5 }
  0xd7   : > { %4429 = vmatmul.msk.bf16.gmra.mxu1 %vm685_vm4, %v4935_v54  ;;  %v5609_v5 = vpop.f32.mrf.mxu0  ;;  %v1979_v54 = vshll.u32 %v4610_v46, 16  ;;  %v4952_v46 = vld [vmem:[%s5204_s30 + $0x6c] sm:$0xff] }
  0xd8   : > { %v5616_v12 = vpop.f32.mrf.mxu3  ;;  %v1977_v8 = vrot.slane %v1976_v52, 4 }
  0xd9   : > { %v1981_v25 = vrot.slane %v1979_v54, 5 }
  0xdc   : > { %4462 = vmatmul.msk.bf16.gmra.mxu2 %vm685_vm4, %v1251_v4  ;;  %v5621_v29 = vpop.f32.mrf.mxu1  ;;  %v1967_v4 = vrot.slane %v1966_v51, 4 }
  0xde   : > { %v1972_v19 = vsel %vm5216_vm3, %v1967_v4, %v1971_v1  ;;  %v4613_v4 = vld [vmem:[%s5204_s30 + $0x80] sm:$0x1] }
  0xdf   : > { %v5624_v40 = vpop.f32.mrf.mxu2 }
  0xe1   : > { %4575 = vmatmul.msk.bf16.gmra.mxu3 %vm685_vm4, %v4951_v30  ;;  %v1984_v30 = vshrl.u32 %v4611_v13, 16  ;;  %v4937_v13 = vld [vmem:[%s5204_s30 + $0x6c] sm:$0xff] }
  0xe3   : > { %v5632_v56 = vpop.f32.mrf.mxu0  ;;  %v1986_v54 = vrot.slane %v1984_v30, 4 }
  0xe4   : > { %v5635_v59 = vpop.f32.mrf.mxu3  ;;  %v967_v60 = vpop.f32.mrf.mxu1 }
  0xe5   : > { %v968_v62 = vadd.f32 %v967_v60, %v5509_v41  ;;  %v1982_v41 = vsel %vm5216_vm3, %v1977_v8, %v1981_v25  ;;  %v1995_v60 = vrot.slane %v1993_v33, 5  ;;  %v1164_v8 = vsel %vm5390_vm7, %v4447_v50, %v1163_v16 }
  0xe6   : > { %4640 = vmatmul.msk.bf16.gmra.mxu0 %vm685_vm4, %v2192_v27  ;;  %v2169_v27 = vunpack.c.l.b16 %v1972_v19  ;;  %v2170_v51 = vunpack.c.l.b16 %v1982_v41  ;;  %v2003_v19 = vshll.u32 %v4613_v4, 16 }
  0xe7   : > { %v5639_v10 = vpop.f32.mrf.mxu2  ;;  %4430 = vmatmul.msk.bf16.gmra.mxu1 %vm685_vm4, %v4936_v57  ;;  %v1989_v57 = vrot.slane %v1987_v31, 5  ;;  %v2000_v15 = vor.u32 %v1999_v20, %v1995_v60 }
  0xe8   : > { %v2193_v25 = vpack.c.b16 %v2170_v51, %v2169_v27  ;;  %v2005_v42 = vrot.slane %v2003_v19, 5  ;;  %v4615_v27 = vld [vmem:[%s5204_s30 + $0x88] sm:$0xf]  ;;  %v5091_v51 = vld [vmem:[%s5204_s30 + $0x7c] sm:$0xf] }
  0xe9   : > { %v1990_v14 = vor.u32 %v1989_v57, %v1986_v54  ;;  %v1057_v54 = vld [vmem:[%s5204_s30 + $0x78] sm:$0xe] }
  0xeb   : > { %v5650_v24 = vpop.f32.mrf.mxu0  ;;  %v1991_v21 = vrot.slane %v1990_v14, 4 }
  0xec   : > { %v5652_v32 = vpop.f32.mrf.mxu3  ;;  %4463 = vmatmul.msk.bf16.gmra.mxu2 %vm685_vm4, %v1252_v11  ;;  %v969_v35 = vpop.f32.mrf.mxu1 }
  0xed   : > { %v970_v1 = vadd.f32 %v969_v35, %v5532_v9  ;;  %v1167_v9 = vsel %vm5390_vm7, %v1165_v48, %v1166_v47  ;;  %v2001_v35 = vrot.slane %v2000_v15, 4  ;;  %v4614_v47 = vld [vmem:[%s5204_s30 + $0x84] sm:$0xf]  ;;  %v4953_v15 = vld [vmem:[%s5204_s30 + $0x78] sm:$0xff] }
  0xee   : > { %v1231_v30 = vunpack.c.l.b16 %v1167_v9  ;;  %v2011_v57 = vshll.u32 %v4614_v47, 16  ;;  %v2021_v9 = vshrl.u32 %v4615_v27, 16 }
  0xef   : > { %v1320_v52 = vpop.f32.mrf.mxu2  ;;  %v2006_v4 = vsel %vm5216_vm3, %v2001_v35, %v2005_v42 }
  0xf0   : > { %v1400_v61 = vadd.f32 %v1320_v52, %v968_v62  ;;  %v1230_v62 = vunpack.c.l.b16 %v1164_v8  ;;  %v1170_v52 = vrot.slane %v5091_v51, 5  ;;  %v2017_v8 = vshll.u32 %v4615_v27, 16 }
  0xf1   : > { %4576 = vmatmul.msk.bf16.gmra.mxu3 %vm685_vm4, %v4952_v46  ;;  %v2023_v35 = vrot.slane %v2021_v9, 4 }
  0xf2   : > { %v1253_v48 = vpack.c.b16 %v1231_v30, %v1230_v62 }
  0xf3   : > { %v2261_v11 = vpop.f32.mrf.mxu0 }
  0xf4   : > { %v1607_v41 = vpop.f32.mrf.mxu3  ;;  %v972_v23 = vpop.f32.mrf.mxu1 }
  0xf5   : > { %v1687_v31 = vadd.f32 %v1607_v41, %v1400_v61  ;;  %v973_v16 = vadd.f32 %v972_v23, %v5551_v38  ;;  %v2008_v38 = vshrl.u32 %v4614_v47, 16  ;;  %v1996_v61 = vsel %vm5216_vm3, %v1991_v21, %v1995_v60 }
  0xf6   : > { %4641 = vmatmul.msk.bf16.gmra.mxu0 %vm685_vm4, %v2193_v25  ;;  %v5092_v25 = vld [vmem:[%s5204_s30 + $0x80] sm:$0x1]  ;;  %v4448_v41 = vrot.slane %v1057_v54, 9  ;;  %v1172_v23 = vrot.slane %v1170_v52, 4  ;;  %v2171_v62 = vunpack.c.l.b16 %v1996_v61  ;;  %v2172_v60 = vunpack.c.l.b16 %v2006_v4 }
  0xf7   : > { %v1322_v33 = vpop.f32.mrf.mxu2  ;;  %4431 = vmatmul.msk.bf16.gmra.mxu1 %vm685_vm4, %v4937_v13  ;;  %v5669_v46 = vadd.f32 %v2261_v11, %v1687_v31  ;;  %v1173_v11 = vrot.slane %v5092_v25, 5  ;;  %v2010_v30 = vrot.slane %v2008_v38, 4  ;;  %v2013_v31 = vrot.slane %v2011_v57, 5  ;;  %v4938_v38 = vld [vmem:[%s5204_s30 + $0x78] sm:$0xff] }
  0xf8   : > { %v1401_v50 = vadd.f32 %v1322_v33, %v970_v1  ;;  %v2019_v21 = vrot.slane %v2017_v8, 5  ;;  %v2194_v27 = vpack.c.b16 %v2172_v60, %v2171_v62  ;;  %v4618_v62 = vld [vmem:[%s5204_s30 + $0x94] sm:$0xf]  ;;  %v5093_v60 = vld [vmem:[%s5204_s30 + $0x88] sm:$0xf] }
  0xf9   : > { %v2014_v51 = vor.u32 %v2013_v31, %v2010_v30  ;;  %v1177_v30 = vrot.slane %v5093_v60, 5  ;;  %v1058_v31 = vld [vmem:[%s5204_s30 + $0x84] sm:$0xe] }
  0xfa   : > { %v2024_v57 = vor.u32 %v2023_v35, %v2019_v21 }
  0xfb   : > { %v2263_v20 = vpop.f32.mrf.mxu0  ;;  %v2015_v25 = vrot.slane %v2014_v51, 4 }
  0xfc   : > { %v1609_v1 = vpop.f32.mrf.mxu3  ;;  %4464 = vmatmul.msk.bf16.gmra.mxu2 %vm685_vm4, %v1253_v48  ;;  %v974_v13 = vpop.f32.mrf.mxu1  ;;  %v4616_v48 = vld [vmem:[%s5204_s30 + $0x8c] sm:$0x1] }
  0xfd   : > { %v1688_v14 = vadd.f32 %v1609_v1, %v1401_v50  ;;  %v975_v19 = vadd.f32 %v974_v13, %v5569_v3  ;;  %v1171_v50 = vsel %vm5390_vm7, %v4448_v41, %v1170_v52  ;;  %v1174_v3 = vsel %vm5390_vm7, %v1172_v23, %v1173_v11 }
  0xfe   : > { %v2027_v61 = vshll.u32 %v4616_v48, 16  ;;  %v1233_v8 = vunpack.c.l.b16 %v1174_v3  ;;  %v2025_v1 = vrot.slane %v2024_v57, 4  ;;  %v2045_v3 = vshrl.u32 %v4618_v62, 16  ;;  %v4954_v57 = vld [vmem:[%s5204_s30 + $0x84] sm:$0xff] }
  0xff   : > { %v1325_v33 = vpop.f32.mrf.mxu2  ;;  %v5682_v42 = vadd.f32 %v2263_v20, %v1688_v14  ;;  %v4617_v14 = vld [vmem:[%s5204_s30 + $0x90] sm:$0xf] }
 0x100   : > { %v1402_v47 = vadd.f32 %v1325_v33, %v973_v16  ;;  %v1232_v16 = vunpack.c.l.b16 %v1171_v50  ;;  %v2029_v13 = vrot.slane %v2027_v61, 5  ;;  %v2032_v33 = vshrl.u32 %v4617_v14, 16 }
 0x101   : > { %4577 = vmatmul.msk.bf16.gmra.mxu3 %vm685_vm4, %v4953_v15  ;;  %v2035_v48 = vshll.u32 %v4617_v14, 16  ;;  %v2041_v50 = vshll.u32 %v4618_v62, 16  ;;  %v4449_v61 = vrot.slane %v1058_v31, 9 }
 0x102   : > { %v1254_v23 = vpack.c.b16 %v1233_v8, %v1232_v16  ;;  %v2034_v8 = vrot.slane %v2032_v33, 4 }
 0x103   : > { %v2266_v54 = vpop.f32.mrf.mxu0 }
 0x104   : > { %v1612_v4 = vpop.f32.mrf.mxu3  ;;  %v977_v20 = vpop.f32.mrf.mxu1 }
 0x105   : > { %v1689_v9 = vadd.f32 %v1612_v4, %v1402_v47  ;;  %v978_v52 = vadd.f32 %v977_v20, %v5591_v44  ;;  %v2020_v44 = vsel %vm5216_vm3, %v2015_v25, %v2019_v21  ;;  %v2030_v47 = vsel %vm5216_vm3, %v2025_v1, %v2029_v13 }
 0x106   : > { %4642 = vmatmul.msk.bf16.gmra.mxu0 %vm685_vm4, %v2194_v27  ;;  %v5094_v27 = vld [vmem:[%s5204_s30 + $0x8c] sm:$0x1]  ;;  %v1179_v4 = vrot.slane %v1177_v30, 4  ;;  %v2173_v20 = vunpack.c.l.b16 %v2020_v44  ;;  %v2174_v16 = vunpack.c.l.b16 %v2030_v47  ;;  %v2037_v25 = vrot.slane %v2035_v48, 5  ;;  %v4939_v44 = vld [vmem:[%s5204_s30 + $0x84] sm:$0xff] }
 0x107   : > { %v1327_v11 = vpop.f32.mrf.mxu2  ;;  %4432 = vmatmul.msk.bf16.gmra.mxu1 %vm685_vm4, %v4938_v38  ;;  %v5695_v15 = vadd.f32 %v2266_v54, %v1689_v9  ;;  %v1180_v51 = vrot.slane %v5094_v27, 5  ;;  %v2047_v1 = vrot.slane %v2045_v3, 4 }
 0x108   : > { %v1403_v41 = vadd.f32 %v1327_v11, %v975_v19  ;;  %v2043_v11 = vrot.slane %v2041_v50, 5  ;;  %v2195_v62 = vpack.c.b16 %v2174_v16, %v2173_v20  ;;  %v2038_v31 = vor.u32 %v2037_v25, %v2034_v8  ;;  %v4621_v20 = vld [vmem:[%s5204_s30 + $0xa0] sm:$0xf]  ;;  %v5095_v16 = vld [vmem:[%s5204_s30 + $0x94] sm:$0xf] }
 0x109   : > { %v1184_v8 = vrot.slane %v5095_v16, 5 }
 0x10a   : > { %v2048_v33 = vor.u32 %v2047_v1, %v2043_v11 }
 0x10b   : > { %v2268_v35 = vpop.f32.mrf.mxu0 }
 0x10c   : > { %v1614_v19 = vpop.f32.mrf.mxu3  ;;  %4465 = vmatmul.msk.bf16.gmra.mxu2 %vm685_vm4, %v1254_v23  ;;  %v979_v54 = vpop.f32.mrf.mxu1  ;;  %v4619_v23 = vld [vmem:[%s5204_s30 + $0x98] sm:$0x1] }
 0x10d   : > { %v1690_v38 = vadd.f32 %v1614_v19, %v1403_v41  ;;  %v980_v21 = vadd.f32 %v979_v54, %v5609_v5  ;;  %v1178_v41 = vsel %vm5390_vm7, %v4449_v61, %v1177_v30  ;;  %v1181_v5 = vsel %vm5390_vm7, %v1179_v4, %v1180_v51 }
 0x10e   : > { %v2051_v47 = vshll.u32 %v4619_v23, 16  ;;  %v1235_v50 = vunpack.c.l.b16 %v1181_v5  ;;  %v2039_v51 = vrot.slane %v2038_v31, 4  ;;  %v2049_v19 = vrot.slane %v2048_v33, 4  ;;  %v4955_v33 = vld [vmem:[%s5204_s30 + $0x90] sm:$0xff] }
 0x10f   : > { %v1330_v9 = vpop.f32.mrf.mxu2  ;;  %v5708_v13 = vadd.f32 %v2268_v35, %v1690_v38  ;;  %v4620_v38 = vld [vmem:[%s5204_s30 + $0x9c] sm:$0xf]  ;;  %v2069_v5 = vshrl.u32 %v4621_v20, 16 }
 0x110   : > { %v1404_v14 = vadd.f32 %v1330_v9, %v978_v52  ;;  %v1234_v52 = vunpack.c.l.b16 %v1178_v41  ;;  %v2053_v54 = vrot.slane %v2051_v47, 5  ;;  %v1059_v9 = vld [vmem:[%s5204_s30 + $0x90] sm:$0xe]  ;;  %v2059_v25 = vshll.u32 %v4620_v38, 16 }
 0x111   : > { %4578 = vmatmul.msk.bf16.gmra.mxu3 %vm685_vm4, %v4954_v57  ;;  %v2065_v41 = vshll.u32 %v4621_v20, 16 }
 0x112   : > { %v1255_v4 = vpack.c.b16 %v1235_v50, %v1234_v52  ;;  %v2054_v23 = vsel %vm5216_vm3, %v2049_v19, %v2053_v54  ;;  %v2071_v19 = vrot.slane %v2069_v5, 4 }
 0x113   : > { %v2271_v60 = vpop.f32.mrf.mxu0 }
 0x114   : > { %v1617_v48 = vpop.f32.mrf.mxu3  ;;  %v982_v35 = vpop.f32.mrf.mxu1 }
 0x115   : > { %v1691_v3 = vadd.f32 %v1617_v48, %v1404_v14  ;;  %v983_v30 = vadd.f32 %v982_v35, %v5632_v56  ;;  %v2056_v56 = vshrl.u32 %v4620_v38, 16  ;;  %v2044_v14 = vsel %vm5216_vm3, %v2039_v51, %v2043_v11 }
 0x116   : > { %4643 = vmatmul.msk.bf16.gmra.mxu0 %vm685_vm4, %v2195_v62  ;;  %v5096_v62 = vld [vmem:[%s5204_s30 + $0x98] sm:$0x1]  ;;  %v4450_v48 = vrot.slane %v1059_v9, 9  ;;  %v1186_v35 = vrot.slane %v1184_v8, 4  ;;  %v2175_v52 = vunpack.c.l.b16 %v2044_v14  ;;  %v2176_v11 = vunpack.c.l.b16 %v2054_v23 }
 0x117   : > { %v1332_v27 = vpop.f32.mrf.mxu2  ;;  %4433 = vmatmul.msk.bf16.gmra.mxu1 %vm685_vm4, %v4939_v44  ;;  %v5721_v57 = vadd.f32 %v2271_v60, %v1691_v3  ;;  %v1187_v60 = vrot.slane %v5096_v62, 5  ;;  %v2058_v50 = vrot.slane %v2056_v56, 4  ;;  %v2061_v3 = vrot.slane %v2059_v25, 5  ;;  %v4940_v56 = vld [vmem:[%s5204_s30 + $0x90] sm:$0xff] }
 0x118   : > { %v1405_v61 = vadd.f32 %v1332_v27, %v980_v21  ;;  %v2067_v51 = vrot.slane %v2065_v41, 5  ;;  %v2196_v20 = vpack.c.b16 %v2176_v11, %v2175_v52  ;;  %v4624_v11 = vld [vmem:[%s5204_s30 + $0xac] sm:$0xf] }
 0x119   : > { %v2062_v16 = vor.u32 %v2061_v3, %v2058_v50  ;;  %v1060_v50 = vld [vmem:[%s5204_s30 + $0x9c] sm:$0xe] }
 0x11a   : > { %v2072_v25 = vor.u32 %v2071_v19, %v2067_v51 }
 0x11b   : > { %v2273_v1 = vpop.f32.mrf.mxu0 }
 0x11c   : > { %v1619_v21 = vpop.f32.mrf.mxu3  ;;  %4466 = vmatmul.msk.bf16.gmra.mxu2 %vm685_vm4, %v1255_v4  ;;  %v984_v44 = vpop.f32.mrf.mxu1  ;;  %v4622_v4 = vld [vmem:[%s5204_s30 + $0xa4] sm:$0x1] }
 0x11d   : > { %v1692_v31 = vadd.f32 %v1619_v21, %v1405_v61  ;;  %v985_v47 = vadd.f32 %v984_v44, %v5650_v24  ;;  %v1185_v61 = vsel %vm5390_vm7, %v4450_v48, %v1184_v8  ;;  %v1188_v24 = vsel %vm5390_vm7, %v1186_v35, %v1187_v60  ;;  %v4623_v44 = vld [vmem:[%s5204_s30 + $0xa8] sm:$0xf]  ;;  %v5097_v35 = vld [vmem:[%s5204_s30 + $0xa0] sm:$0xf] }
 0x11e   : > { %v2075_v14 = vshll.u32 %v4622_v4, 16  ;;  %v1237_v41 = vunpack.c.l.b16 %v1188_v24  ;;  %v2063_v8 = vrot.slane %v2062_v16, 4  ;;  %v2073_v60 = vrot.slane %v2072_v25, 4 }
 0x11f   : > { %v1335_v27 = vpop.f32.mrf.mxu2  ;;  %v5734_v54 = vadd.f32 %v2273_v1, %v1692_v31  ;;  %v1191_v52 = vrot.slane %v5097_v35, 5  ;;  %v2083_v19 = vshll.u32 %v4623_v44, 16  ;;  %v2093_v24 = vshrl.u32 %v4624_v11, 16 }
 0x120   : > { %v1406_v38 = vadd.f32 %v1335_v27, %v983_v30  ;;  %v1236_v30 = vunpack.c.l.b16 %v1185_v61  ;;  %v2077_v21 = vrot.slane %v2075_v14, 5  ;;  %v2068_v3 = vsel %vm5216_vm3, %v2063_v8, %v2067_v51 }
 0x121   : > { %4579 = vmatmul.msk.bf16.gmra.mxu3 %vm685_vm4, %v4955_v33  ;;  %v2080_v27 = vshrl.u32 %v4623_v44, 16  ;;  %v2089_v61 = vshll.u32 %v4624_v11, 16  ;;  %v1193_v25 = vrot.slane %v1191_v52, 4  ;;  %v2177_v51 = vunpack.c.l.b16 %v2068_v3  ;;  %v4625_v11 = vld [vmem:[%s5204_s30 + $0xb0] sm:$0x1]  ;;  %v4941_v3 = vld [vmem:[%s5204_s30 + $0x9c] sm:$0xff] }
 0x122   : > { %v1256_v48 = vpack.c.b16 %v1237_v41, %v1236_v30  ;;  %v2078_v4 = vsel %vm5216_vm3, %v2073_v60, %v2077_v21  ;;  %v2085_v8 = vrot.slane %v2083_v19, 5  ;;  %v2095_v21 = vrot.slane %v2093_v24, 4 }
 0x123   : > { %v2276_v9 = vpop.f32.mrf.mxu0  ;;  %v2178_v41 = vunpack.c.l.b16 %v2078_v4  ;;  %v2091_v60 = vrot.slane %v2089_v61, 5  ;;  %v2099_v4 = vshll.u32 %v4625_v11, 16 }
 0x124   : > { %v1622_v1 = vpop.f32.mrf.mxu3  ;;  %v987_v23 = vpop.f32.mrf.mxu1 }
 0x125   : > { %v1693_v5 = vadd.f32 %v1622_v1, %v1406_v38  ;;  %v4956_v1 = vld [vmem:[%s5204_s30 + $0x9c] sm:$0xff]  ;;  %v988_v30 = vadd.f32 %v987_v23, %v5485_v7  ;;  %v2197_v7 = vpack.c.b16 %v2178_v41, %v2177_v51  ;;  %v2101_v51 = vrot.slane %v2099_v4, 5 }
 0x126   : > { %4644 = vmatmul.msk.bf16.gmra.mxu0 %vm685_vm4, %v2196_v20  ;;  %v5098_v20 = vld [vmem:[%s5204_s30 + $0xa4] sm:$0x1] }
 0x127   : > { %v1337_v62 = vpop.f32.mrf.mxu2  ;;  %4434 = vmatmul.msk.bf16.gmra.mxu1 %vm685_vm4, %v4940_v56  ;;  %v5746_v31 = vadd.f32 %v2276_v9, %v1693_v5  ;;  %v1194_v16 = vrot.slane %v5098_v20, 5  ;;  %v4451_v56 = vrot.slane %v1060_v50, 9  ;;  %v2082_v5 = vrot.slane %v2080_v27, 4 }
 0x128   : > { %v1407_v33 = vadd.f32 %v1337_v62, %v985_v47 }
 0x129   : > { %v2086_v23 = vor.u32 %v2085_v8, %v2082_v5 }
 0x12b   : > { %v2278_v38 = vpop.f32.mrf.mxu0 }
 0x12c   : > { %v1624_v47 = vpop.f32.mrf.mxu3  ;;  %4467 = vmatmul.msk.bf16.gmra.mxu2 %vm685_vm4, %v1256_v48  ;;  %v989_v9 = vpop.f32.mrf.mxu1  ;;  %v1192_v48 = vsel %vm5390_vm7, %v4451_v56, %v1191_v52  ;;  %v4626_v52 = vld [vmem:[%s5204_s30 + $0xb4] sm:$0xf]  ;;  %v2087_v56 = vrot.slane %v2086_v23, 4 }
 0x12d   : > { %v1694_v14 = vadd.f32 %v1624_v47, %v1407_v33  ;;  %v1195_v33 = vsel %vm5390_vm7, %v1193_v25, %v1194_v16  ;;  %v1238_v27 = vunpack.c.l.b16 %v1192_v48  ;;  %v4627_v47 = vld [vmem:[%s5204_s30 + $0xb8] sm:$0xf]  ;;  %v990_v16 = vadd.f32 %v989_v9, %v5501_v34 }
 0x12e   : > { %v1239_v19 = vunpack.c.l.b16 %v1195_v33  ;;  %v2104_v5 = vshrl.u32 %v4626_v52, 16  ;;  %v2107_v8 = vshll.u32 %v4626_v52, 16  ;;  %v2117_v48 = vshrl.u32 %v4627_v47, 16  ;;  %v1061_v33 = vld [vmem:[%s5204_s30 + $0xa8] sm:$0xe] }
 0x12f   : > { %v1340_v62 = vpop.f32.mrf.mxu2  ;;  %v5759_v44 = vadd.f32 %v2278_v38, %v1694_v14  ;;  %v2096_v38 = vor.u32 %v2095_v21, %v2091_v60  ;;  %v5099_v21 = vld [vmem:[%s5204_s30 + $0xac] sm:$0xf]  ;;  %v2092_v9 = vsel %vm5216_vm3, %v2087_v56, %v2091_v60 }
 0x130   : > { %v1408_v35 = vadd.f32 %v1340_v62, %v988_v30  ;;  %v1257_v14 = vpack.c.b16 %v1239_v19, %v1238_v27  ;;  %v2113_v62 = vshll.u32 %v4627_v47, 16  ;;  %v2106_v27 = vrot.slane %v2104_v5, 4 }
 0x131   : > { %4580 = vmatmul.msk.bf16.gmra.mxu3 %vm685_vm4, %v4956_v1  ;;  %v2097_v1 = vrot.slane %v2096_v38, 4  ;;  %v2109_v19 = vrot.slane %v2107_v8, 5  ;;  %v2119_v47 = vrot.slane %v2117_v48, 4  ;;  %v4942_v48 = vld [vmem:[%s5204_s30 + $0xa8] sm:$0xff] }
 0x132   : > { %v2115_v38 = vrot.slane %v2113_v62, 5 }
 0x133   : > { %v2281_v50 = vpop.f32.mrf.mxu0  ;;  %v2102_v11 = vsel %vm5216_vm3, %v2097_v1, %v2101_v51 }
 0x134   : > { %v1627_v61 = vpop.f32.mrf.mxu3  ;;  %v992_v24 = vpop.f32.mrf.mxu1  ;;  %v2180_v56 = vunpack.c.l.b16 %v2102_v11  ;;  %v2120_v8 = vor.u32 %v2119_v47, %v2115_v38 }
 0x135   : > { %v1695_v20 = vadd.f32 %v1627_v61, %v1408_v35  ;;  %v1198_v35 = vrot.slane %v5099_v21, 5  ;;  %v4957_v61 = vld [vmem:[%s5204_s30 + $0xa8] sm:$0xff]  ;;  %v993_v60 = vadd.f32 %v992_v24, %v5521_v58 }
 0x136   : > { %4645 = vmatmul.msk.bf16.gmra.mxu0 %vm685_vm4, %v2197_v7  ;;  %v5100_v7 = vld [vmem:[%s5204_s30 + $0xb0] sm:$0x1] }
 0x137   : > { %v1342_v25 = vpop.f32.mrf.mxu2  ;;  %4435 = vmatmul.msk.bf16.gmra.mxu1 %vm685_vm4, %v4941_v3  ;;  %v5773_v30 = vadd.f32 %v2281_v50, %v1695_v20  ;;  %v1201_v23 = vrot.slane %v5100_v7, 5  ;;  %v4452_v20 = vrot.slane %v1061_v33, 9  ;;  %v1200_v52 = vrot.slane %v1198_v35, 4 }
 0x138   : > { %v1409_v41 = vadd.f32 %v1342_v25, %v990_v16  ;;  %v2179_v16 = vunpack.c.l.b16 %v2092_v9  ;;  %v4628_v25 = vld [vmem:[%s5204_s30 + $0xbc] sm:$0x1] }
 0x139   : > { %v1202_v5 = vsel %vm5390_vm7, %v1200_v52, %v1201_v23  ;;  %v2123_v58 = vshll.u32 %v4628_v25, 16  ;;  %v4630_v52 = vld [vmem:[%s5204_s30 + $0xc4] sm:$0xf] }
 0x13a   : > { %v2198_v24 = vpack.c.b16 %v2180_v56, %v2179_v16  ;;  %v1241_v11 = vunpack.c.l.b16 %v1202_v5  ;;  %v1062_v16 = vld [vmem:[%s5204_s30 + $0xb4] sm:$0xe]  ;;  %v5102_v56 = vld [vmem:[%s5204_s30 + $0xb8] sm:$0xf]  ;;  %v2141_v5 = vshrl.u32 %v4630_v52, 16 }
 0x13b   : > { %v2283_v34 = vpop.f32.mrf.mxu0  ;;  %v1205_v25 = vrot.slane %v5102_v56, 5 }
 0x13c   : > { %v1629_v50 = vpop.f32.mrf.mxu3  ;;  %4468 = vmatmul.msk.bf16.gmra.mxu2 %vm685_vm4, %v1257_v14  ;;  %v994_v3 = vpop.f32.mrf.mxu1  ;;  %v2110_v14 = vor.u32 %v2109_v19, %v2106_v27  ;;  %v2125_v27 = vrot.slane %v2123_v58, 5  ;;  %v4629_v19 = vld [vmem:[%s5204_s30 + $0xc0] sm:$0xf]  ;;  %v5103_v58 = vld [vmem:[%s5204_s30 + $0x14] sm:$0x1] }
 0x13d   : > { %v1696_v4 = vadd.f32 %v1629_v50, %v1409_v41  ;;  %v1199_v41 = vsel %vm5390_vm7, %v4452_v20, %v1198_v35  ;;  %v2121_v35 = vrot.slane %v2120_v8, 4  ;;  %v995_v23 = vadd.f32 %v994_v3, %v5538_v28 }
 0x13e   : > { %v1240_v9 = vunpack.c.l.b16 %v1199_v41  ;;  %v2111_v50 = vrot.slane %v2110_v14, 4  ;;  %v2128_v3 = vshrl.u32 %v4629_v19, 16  ;;  %v2131_v14 = vshll.u32 %v4629_v19, 16  ;;  %v4958_v19 = vld [vmem:[%s5204_s30 + $0xb4] sm:$0xff] }
 0x13f   : > { %v1345_v1 = vpop.f32.mrf.mxu2  ;;  %v5786_v51 = vadd.f32 %v2283_v34, %v1696_v4  ;;  %v5101_v4 = vld [vmem:[%s5204_s30 + $0x10] sm:$0xf]  ;;  %v2126_v28 = vsel %vm5216_vm3, %v2121_v35, %v2125_v27  ;;  %v2137_v41 = vshll.u32 %v4630_v52, 16  ;;  %v1207_v35 = vrot.slane %v1205_v25, 4  ;;  %v4649_v27 = vld [vmem:[%s5204_s30 + $0xc] sm:$0xe] }
 0x140   : > { %v1410_v21 = vadd.f32 %v1345_v1, %v993_v60  ;;  %v1258_v60 = vpack.c.b16 %v1241_v11, %v1240_v9  ;;  %v5104_v9 = vld [vmem:[%s5204_s30 + $0xbc] sm:$0x1]  ;;  %v4665_v52 = vrot.slane %v4649_v27, 9 }
 0x141   : > { %4581 = vmatmul.msk.bf16.gmra.mxu3 %vm685_vm4, %v4957_v61  ;;  %v2439_v61 = vrot.slane %v5101_v4, 5  ;;  %v2130_v4 = vrot.slane %v2128_v3, 4 }
 0x143   : > { %v2286_v62 = vpop.f32.mrf.mxu0  ;;  %v2441_v8 = vrot.slane %v2439_v61, 4 }
 0x144   : > { %v1632_v33 = vpop.f32.mrf.mxu3  ;;  %v997_v34 = vpop.f32.mrf.mxu1 }
 0x145   : > { %v1697_v7 = vadd.f32 %v1632_v33, %v1410_v21  ;;  %v2116_v21 = vsel %vm5216_vm3, %v2111_v50, %v2115_v38  ;;  %v4453_v33 = vrot.slane %v1062_v16, 9  ;;  %v998_v56 = vadd.f32 %v997_v34, %v5558_v53 }
 0x146   : > { %4646 = vmatmul.msk.bf16.gmra.mxu0 %vm685_vm4, %v2198_v24  ;;  %v2442_v24 = vrot.slane %v5103_v58, 5  ;;  %v2181_v38 = vunpack.c.l.b16 %v2116_v21  ;;  %v2139_v16 = vrot.slane %v2137_v41, 5  ;;  %v2143_v58 = vrot.slane %v2141_v5, 4  ;;  %v4631_v21 = vld [vmem:[%s5204_s30 + $0xc8] sm:$0x1] }
 0x147   : > { %v1347_v20 = vpop.f32.mrf.mxu2  ;;  %4436 = vmatmul.msk.bf16.gmra.mxu1 %vm685_vm4, %v4942_v48  ;;  %v5802_v1 = vadd.f32 %v2286_v62, %v1697_v7  ;;  %v1208_v62 = vrot.slane %v5104_v9, 5  ;;  %v2182_v7 = vunpack.c.l.b16 %v2126_v28  ;;  %v2440_v28 = vsel %vm5390_vm7, %v4665_v52, %v2439_v61  ;;  %v4811_v41 = vld [vmem:[%s5204_s30 + $0x18] sm:$0xf] }
 0x148   : > { %v1411_v47 = vadd.f32 %v1347_v20, %v995_v23  ;;  %v2133_v20 = vrot.slane %v2131_v14, 5  ;;  %v2551_v53 = vunpack.c.l.b16 %v2440_v28  ;;  %v2147_v27 = vshll.u32 %v4631_v21, 16 }
 0x149   : > { %v1209_v14 = vsel %vm5390_vm7, %v1207_v35, %v1208_v62  ;;  %v2199_v5 = vpack.c.b16 %v2182_v7, %v2181_v38  ;;  %v3107_v62 = vshrl.u32 %v4811_v41, 16  ;;  %v3110_v35 = vshll.u32 %v4811_v41, 16 }
 0x14b   : > { %v2288_v48 = vpop.f32.mrf.mxu0  ;;  %v3109_v21 = vrot.slane %v3107_v62, 4 }
 0x14c   : > { %v1634_v11 = vpop.f32.mrf.mxu3  ;;  %4469 = vmatmul.msk.bf16.gmra.mxu2 %vm685_vm4, %v1258_v60  ;;  %v999_v50 = vpop.f32.mrf.mxu1  ;;  %v1206_v60 = vsel %vm5390_vm7, %v4453_v33, %v1205_v25  ;;  %v5826_v25 = vld [vmem:[%s5204_s30 + $0x1c] sm:$0xf]  ;;  %v2144_v33 = vor.u32 %v2143_v58, %v2139_v16 }
 0x14d   : > { %v1698_v23 = vadd.f32 %v1634_v11, %v1411_v47  ;;  %v2443_v47 = vsel %vm5390_vm7, %v2441_v8, %v2442_v24  ;;  %v2134_v11 = vor.u32 %v2133_v20, %v2130_v4  ;;  %v4943_v24 = vld [vmem:[%s5204_s30 + $0xb4] sm:$0xff]  ;;  %v3120_v38 = vshrl.u32 %v5826_v25, 16 }
 0x14e   : > { %v2552_v34 = vunpack.c.l.b16 %v2443_v47  ;;  %v1000_v4 = vadd.f32 %v999_v50, %v5578_v17 }
 0x14f   : > { %v1350_v9 = vpop.f32.mrf.mxu2  ;;  %v5830_v52 = vadd.f32 %v2288_v48, %v1698_v23  ;;  %v2135_v48 = vrot.slane %v2134_v11, 4  ;;  %v2145_v23 = vrot.slane %v2144_v33, 4  ;;  %v3122_v41 = vrot.slane %v3120_v38, 4 }
 0x150   : > { %v1412_v3 = vadd.f32 %v1350_v9, %v998_v56  ;;  %v5828_v61 = vpack.c.b16 %v2552_v34, %v2551_v53  ;;  %v1242_v56 = vunpack.c.l.b16 %v1206_v60  ;;  %v1243_v9 = vunpack.c.l.b16 %v1209_v14 }
 0x151   : > { %4582 = vmatmul.msk.bf16.gmra.mxu3 %vm685_vm4, %v4958_v19  ;;  %6606 = vst [vmem:[#allocation2_spill] sm:$0xff] %v5830_v52  ;;  %v3116_v19 = vshll.u32 %v5826_v25, 16  ;;  %v2149_v60 = vrot.slane %v2147_v27, 5  ;;  %v3112_v14 = vrot.slane %v3110_v35, 5  ;;  %v2140_v17 = vsel %vm5216_vm3, %v2135_v48, %v2139_v16  ;;  %v4876_v48 = vld [vmem:[%s5204_s30 + $0x18] sm:$0xe] }
 0x152   : > { %v1259_v58 = vpack.c.b16 %v1243_v9, %v1242_v56  ;;  %v4959_v9 = vld [vmem:[%s5204_s30 + $0xc0] sm:$0xff]  ;;  %v2183_v16 = vunpack.c.l.b16 %v2140_v17 }
 0x153   : > { %v2291_v8 = vpop.f32.mrf.mxu0  ;;  %v3118_v34 = vrot.slane %v3116_v19, 5  ;;  %v2150_v50 = vsel %vm5216_vm3, %v2145_v23, %v2149_v60  ;;  %v3113_v27 = vor.u32 %v3112_v14, %v3109_v21  ;;  %v4814_v23 = vld [vmem:[%s5204_s30 + $0x24] sm:$0xf]  ;;  %v5856_v60 = vld [vmem:[%s5204_s30 + $0x28] sm:$0xf] }
 0x154   : > { %v1637_v28 = vpop.f32.mrf.mxu3  ;;  %v1002_v47 = vpop.f32.mrf.mxu1  ;;  %v2184_v35 = vunpack.c.l.b16 %v2150_v50 }
 0x155   : > { %v1699_v7 = vadd.f32 %v1637_v28, %v1412_v3  ;;  %v5841_v3 = vld [vmem:[%s5204_s30 + $0x20] sm:$0x1]  ;;  %v1003_v62 = vadd.f32 %v1002_v47, %v5601_v2  ;;  %v3114_v38 = vrot.slane %v3113_v27, 4  ;;  %v5105_v47 = vld [vmem:[%s5204_s30 + $0x1c] sm:$0xf] }
 0x156   : > { %4647 = vmatmul.msk.bf16.gmra.mxu0 %vm685_vm4, %v2199_v5  ;;  %v2446_v14 = vrot.slane %v5105_v47, 5  ;;  %v4650_v27 = vld [vmem:[%s5204_s30 + $0x18] sm:$0xe] }
 0x157   : > { %v1352_v20 = vpop.f32.mrf.mxu2  ;;  %4437 = vmatmul.msk.bf16.gmra.mxu1 %vm685_vm4, %v4943_v24  ;;  %v5838_v52 = vadd.f32 %v2291_v8, %v1699_v7  ;;  %v3123_v24 = vor.u32 %v3122_v41, %v3118_v34  ;;  %v3126_v8 = vshll.u32 %v5841_v3, 16  ;;  %v3119_v17 = vsel %vm5216_vm3, %v3114_v38, %v3118_v34 }
 0x158   : > { %v1413_v53 = vadd.f32 %v1352_v20, %v1000_v4  ;;  %v2200_v20 = vpack.c.b16 %v2184_v35, %v2183_v16  ;;  %v3781_v34 = vrot.slane %v5841_v3, 5  ;;  %v5106_v16 = vld [vmem:[%s5204_s30 + $0x20] sm:$0x1]  ;;  %v4666_v38 = vrot.slane %v4650_v27, 9 }
 0x159   : > { %v3124_v7 = vrot.slane %v3123_v24, 4  ;;  %v3128_v4 = vrot.slane %v3126_v8, 5  ;;  %v3131_v24 = vshrl.u32 %v4814_v23, 16  ;;  %v3134_v8 = vshll.u32 %v4814_v23, 16 }
 0x15a   : > { %v2449_v35 = vrot.slane %v5106_v16, 5  ;;  %v2447_v27 = vsel %vm5390_vm7, %v4666_v38, %v2446_v14  ;;  %v4817_v38 = vld [vmem:[%s5204_s30 + $0x30] sm:$0xf] }
 0x15b   : > { %v2293_v5 = vpop.f32.mrf.mxu0  ;;  %v3129_v50 = vsel %vm5216_vm3, %v3124_v7, %v3128_v4  ;;  %v2448_v7 = vrot.slane %v2446_v14, 4  ;;  %v3136_v3 = vrot.slane %v3134_v8, 5 }
 0x15c   : > { %v1639_v11 = vpop.f32.mrf.mxu3  ;;  %4470 = vmatmul.msk.bf16.gmra.mxu2 %vm685_vm4, %v1259_v58  ;;  %v1004_v33 = vpop.f32.mrf.mxu1  ;;  %v3778_v58 = vrot.slane %v5826_v25, 5  ;;  %v3493_v23 = vunpack.c.l.b16 %v3129_v50 }
 0x15d   : > { %v1700_v56 = vadd.f32 %v1639_v11, %v1413_v53  ;;  %v4892_v11 = vrot.slane %v4876_v48, 9  ;;  %v4960_v48 = vld [vmem:[%s5204_s30 + $0x18] sm:$0xff]  ;;  %v2450_v50 = vsel %vm5390_vm7, %v2448_v7, %v2449_v35  ;;  %v5896_v7 = vld [vmem:[%s5204_s30 + $0x34] sm:$0xf] }
 0x15f   : > { %v1355_v28 = vpop.f32.mrf.mxu2  ;;  %v5858_v21 = vadd.f32 %v2293_v5, %v1700_v56  ;;  %v3140_v5 = vshll.u32 %v5856_v60, 16  ;;  %v3144_v56 = vshrl.u32 %v5856_v60, 16 }
 0x160   : > { %v1414_v19 = vadd.f32 %v1355_v28, %v1003_v62  ;;  %v3780_v62 = vrot.slane %v3778_v58, 4 }
 0x161   : > { %4583 = vmatmul.msk.bf16.gmra.mxu3 %vm685_vm4, %v4959_v9  ;;  %v1005_v9 = vadd.f32 %v1004_v33, %v5621_v29  ;;  %v3133_v33 = vrot.slane %v3131_v24, 4  ;;  %v5879_v47 = vrot.slane %v3140_v5, 5 }
 0x163   : > { %v2296_v2 = vpop.f32.mrf.mxu0  ;;  %v3137_v5 = vor.u32 %v3136_v3, %v3133_v33  ;;  %v4877_v33 = vld [vmem:[%s5204_s30 + $0x24] sm:$0xe] }
 0x164   : > { %v1642_v53 = vpop.f32.mrf.mxu3  ;;  %v1007_v41 = vpop.f32.mrf.mxu1 }
 0x165   : > { %v1701_v25 = vadd.f32 %v1642_v53, %v1414_v19  ;;  %v3492_v19 = vunpack.c.l.b16 %v3119_v17  ;;  %v3146_v53 = vrot.slane %v3144_v56, 4  ;;  %v1008_v14 = vadd.f32 %v1007_v41, %v5503_v37 }
 0x166   : > { %4648 = vmatmul.msk.bf16.gmra.mxu0 %vm685_vm4, %v2200_v20  ;;  %v3779_v20 = vsel %vm5390_vm7, %v4892_v11, %v3778_v58  ;;  %v3785_v37 = vrot.slane %v5856_v60, 5 }
 0x167   : > { %v1357_v28 = vpop.f32.mrf.mxu2  ;;  %4682 = vmatmul.msk.bf16.vlgmr.msra.gmra.mxu1 %vm685_vm4, %v5828_v61  ;;  %v5877_v29 = vadd.f32 %v2296_v2, %v1701_v25  ;;  %v3782_v61 = vsel %vm5390_vm7, %v3780_v62, %v3781_v34  ;;  %v3524_v2 = vpack.c.b16 %v3493_v23, %v3492_v19  ;;  %v3890_v11 = vunpack.c.l.b16 %v3779_v20 }
 0x168   : > { %v1415_v4 = vadd.f32 %v1357_v28, %v1005_v9  ;;  %v5888_v9 = vld [vmem:[%s5204_s30 + $0x2c] sm:$0x1]  ;;  %v3891_v8 = vunpack.c.l.b16 %v3782_v61  ;;  %v3147_v56 = vor.u32 %v3146_v53, %v5879_v47  ;;  %v2553_v62 = vunpack.c.l.b16 %v2447_v27 }
 0x169   : > { %v2554_v34 = vunpack.c.l.b16 %v2450_v50  ;;  %v3150_v16 = vshll.u32 %v5888_v9, 16  ;;  %v3155_v53 = vshrl.u32 %v4817_v38, 16  ;;  %v3158_v61 = vshll.u32 %v4817_v38, 16 }
 0x16a   : > { %v3922_v19 = vpack.c.b16 %v3891_v8, %v3890_v11  ;;  %v3164_v27 = vshll.u32 %v5896_v7, 16  ;;  %v3168_v50 = vshrl.u32 %v5896_v7, 16  ;;  %v5107_v11 = vld [vmem:[%s5204_s30 + $0x28] sm:$0xf]  ;;  %v3788_v60 = vrot.slane %v5888_v9, 5 }
 0x16b   : > { %v2298_v17 = vpop.f32.mrf.mxu0  ;;  %v2584_v23 = vpack.c.b16 %v2554_v34, %v2553_v62  ;;  %v3152_v20 = vrot.slane %v3150_v16, 5  ;;  %v2453_v8 = vrot.slane %v5107_v11, 5  ;;  %v4893_v62 = vrot.slane %v4877_v33, 9  ;;  %v4961_v11 = vld [vmem:[%s5204_s30 + $0x24] sm:$0xff] }
 0x16c   : > { %v1644_v58 = vpop.f32.mrf.mxu3  ;;  %4795 = vmatmul.msk.bf16.vlgmr.msra.gmra.mxu2 %vm685_vm4, %v4960_v48  ;;  %v1009_v24 = vpop.f32.mrf.mxu1  ;;  %v3148_v48 = vrot.slane %v3147_v56, 4  ;;  %v3160_v33 = vrot.slane %v3158_v61, 5  ;;  %v5917_v9 = vrot.slane %v3164_v27, 5 }
 0x16d   : > { %v1702_v25 = vadd.f32 %v1644_v58, %v1415_v4  ;;  %v3138_v4 = vrot.slane %v3137_v5, 4  ;;  %v5108_v5 = vld [vmem:[%s5204_s30 + $0x2c] sm:$0x1] }
 0x16e   : > { %v2456_v56 = vrot.slane %v5108_v5, 5  ;;  %v3153_v16 = vsel %vm5216_vm3, %v3148_v48, %v3152_v20  ;;  %v3786_v20 = vsel %vm5390_vm7, %v4893_v62, %v3785_v37 }
 0x16f   : > { %v1360_v35 = vpop.f32.mrf.mxu2  ;;  %v5901_v41 = vadd.f32 %v2298_v17, %v1702_v25  ;;  %v4651_v17 = vld [vmem:[%s5204_s30 + $0x24] sm:$0xe]  ;;  %v1010_v25 = vadd.f32 %v1009_v24, %v5524_v63  ;;  %v3143_v34 = vsel %vm5216_vm3, %v3138_v4, %v5879_v47  ;;  %v2455_v24 = vrot.slane %v2453_v8, 4 }
 0x170   : > { %v1416_v28 = vadd.f32 %v1360_v35, %v1008_v14  ;;  %v3787_v35 = vrot.slane %v3785_v37, 4  ;;  %v4667_v63 = vrot.slane %v4651_v17, 9  ;;  %v3494_v47 = vunpack.c.l.b16 %v3143_v34 }
 0x171   : > { %4860 = vmatmul.msk.bf16.vlgmr.msra.gmra.mxu3 %vm685_vm4, %v3524_v2  ;;  %6607 = vst [vmem:[#allocation3_spill] sm:$0xff] %v5901_v41  ;;  %v3495_v4 = vunpack.c.l.b16 %v3153_v16  ;;  %v5923_v41 = vld [vmem:[%s5204_s30 + $0x38] sm:$0x1] }
 0x172   : > { %v3174_v37 = vshll.u32 %v5923_v41, 16 }
 0x173   : > { %v2301_v3 = vpop.f32.mrf.mxu0  ;;  %v3525_v17 = vpack.c.b16 %v3495_v4, %v3494_v47  ;;  %v5109_v4 = vld [vmem:[%s5204_s30 + $0x34] sm:$0xf] }
 0x174   : > { %v1647_v58 = vpop.f32.mrf.mxu3  ;;  %v1012_v2 = vpop.f32.mrf.mxu1 }
 0x175   : > { %v1703_v14 = vadd.f32 %v1647_v58, %v1416_v28  ;;  %v3157_v28 = vrot.slane %v3155_v53, 4  ;;  %v3170_v58 = vrot.slane %v3168_v50, 4  ;;  %v2457_v50 = vsel %vm5390_vm7, %v2455_v24, %v2456_v56  ;;  %v5942_v24 = vld [vmem:[%s5204_s30 + $0x40] sm:$0xf] }
 0x176   : > { %4909 = vmatmul.msk.bf16.vlgmr.msra.gmra.mxu0 %vm685_vm4, %v3922_v19 }
 0x177   : > { %v1362_v38 = vpop.f32.mrf.mxu2  ;;  %4683 = vmatmul.msk.bf16.gmra.mxu1 %vm685_vm4, %v2584_v23  ;;  %v5920_v5 = vadd.f32 %v2301_v3, %v1703_v14  ;;  %v3789_v23 = vsel %vm5390_vm7, %v3787_v35, %v3788_v60  ;;  %v3161_v53 = vor.u32 %v3160_v33, %v3157_v28  ;;  %v2454_v3 = vsel %vm5390_vm7, %v4667_v63, %v2453_v8 }
 0x178   : > { %v1417_v19 = vadd.f32 %v1362_v38, %v1010_v25  ;;  %v3171_v14 = vor.u32 %v3170_v58, %v5917_v9  ;;  %v1013_v60 = vadd.f32 %v1012_v2, %v5541_v22  ;;  %v3892_v25 = vunpack.c.l.b16 %v3786_v20  ;;  %v4878_v58 = vld [vmem:[%s5204_s30 + $0x30] sm:$0xe] }
 0x179   : > { %v3893_v34 = vunpack.c.l.b16 %v3789_v23  ;;  %v2555_v35 = vunpack.c.l.b16 %v2454_v3  ;;  %v2556_v8 = vunpack.c.l.b16 %v2457_v50  ;;  %v3162_v28 = vrot.slane %v3161_v53, 4 }
 0x17a   : > { %v3172_v56 = vrot.slane %v3171_v14, 4  ;;  %v3176_v33 = vrot.slane %v3174_v37, 5  ;;  %v3792_v63 = vrot.slane %v5896_v7, 5  ;;  %v2460_v20 = vrot.slane %v5109_v4, 5  ;;  %v4652_v7 = vld [vmem:[%s5204_s30 + $0x30] sm:$0xe] }
 0x17b   : > { %v2303_v48 = vpop.f32.mrf.mxu0  ;;  %v2585_v47 = vpack.c.b16 %v2556_v8, %v2555_v35  ;;  %v4894_v50 = vrot.slane %v4878_v58, 9 }
 0x17c   : > { %v1649_v61 = vpop.f32.mrf.mxu3  ;;  %4796 = vmatmul.msk.bf16.gmra.mxu2 %vm685_vm4, %v4961_v11  ;;  %v1014_v27 = vpop.f32.mrf.mxu1  ;;  %v4820_v11 = vld [vmem:[%s5204_s30 + $0x3c] sm:$0xf]  ;;  %v3177_v3 = vsel %vm5216_vm3, %v3172_v56, %v3176_v33  ;;  %v4962_v33 = vld [vmem:[%s5204_s30 + $0x30] sm:$0xff] }
 0x17d   : > { %v1704_v62 = vadd.f32 %v1649_v61, %v1417_v19  ;;  %v3923_v19 = vpack.c.b16 %v3893_v34, %v3892_v25  ;;  %v3167_v61 = vsel %vm5216_vm3, %v3162_v28, %v5917_v9  ;;  %v3179_v14 = vshrl.u32 %v4820_v11, 16  ;;  %v5110_v34 = vld [vmem:[%s5204_s30 + $0x38] sm:$0x1] }
 0x17e   : > { %v3794_v25 = vrot.slane %v3792_v63, 4  ;;  %v3795_v9 = vrot.slane %v5923_v41, 5  ;;  %v3496_v8 = vunpack.c.l.b16 %v3167_v61  ;;  %v2462_v28 = vrot.slane %v2460_v20, 4 }
 0x17f   : > { %v1365_v16 = vpop.f32.mrf.mxu2  ;;  %v5944_v22 = vadd.f32 %v2303_v48, %v1704_v62  ;;  %v3182_v48 = vshll.u32 %v4820_v11, 16  ;;  %v3188_v62 = vshll.u32 %v5942_v24, 16  ;;  %v3497_v58 = vunpack.c.l.b16 %v3177_v3 }
 0x180   : > { %v1418_v38 = vadd.f32 %v1365_v16, %v1013_v60  ;;  %v1015_v60 = vadd.f32 %v1014_v27, %v5562_v55  ;;  %v2463_v16 = vrot.slane %v5110_v34, 5  ;;  %v3793_v11 = vsel %vm5390_vm7, %v4894_v50, %v3792_v63 }
 0x181   : > { %4861 = vmatmul.msk.bf16.gmra.mxu3 %vm685_vm4, %v3525_v17  ;;  %v3192_v17 = vshrl.u32 %v5942_v24, 16  ;;  %v3181_v55 = vrot.slane %v3179_v14, 4  ;;  %v3184_v27 = vrot.slane %v3182_v48, 5  ;;  %v5965_v41 = vrot.slane %v3188_v62, 5 }
 0x182   : > { %v2464_v3 = vsel %vm5390_vm7, %v2462_v28, %v2463_v16  ;;  %v3894_v50 = vunpack.c.l.b16 %v3793_v11  ;;  %v4879_v11 = vld [vmem:[%s5204_s30 + $0x3c] sm:$0xe] }
 0x183   : > { %v2306_v2 = vpop.f32.mrf.mxu0  ;;  %v3194_v4 = vrot.slane %v3192_v17, 4  ;;  %v3185_v62 = vor.u32 %v3184_v27, %v3181_v55 }
 0x184   : > { %v1652_v23 = vpop.f32.mrf.mxu3  ;;  %v1017_v53 = vpop.f32.mrf.mxu1 }
 0x185   : > { %v1705_v37 = vadd.f32 %v1652_v23, %v1418_v38  ;;  %v4668_v38 = vrot.slane %v4652_v7, 9  ;;  %v5974_v7 = vld [vmem:[%s5204_s30 + $0x44] sm:$0x1]  ;;  %v3195_v17 = vor.u32 %v3194_v4, %v5965_v41  ;;  %v3186_v28 = vrot.slane %v3185_v62, 4 }
 0x186   : > { %4910 = vmatmul.msk.bf16.gmra.mxu0 %vm685_vm4, %v3923_v19 }
 0x187   : > { %v1367_v35 = vpop.f32.mrf.mxu2  ;;  %4684 = vmatmul.msk.bf16.gmra.mxu1 %vm685_vm4, %v2585_v47  ;;  %v5963_v19 = vadd.f32 %v2306_v2, %v1705_v37  ;;  %v3796_v47 = vsel %vm5390_vm7, %v3794_v25, %v3795_v9  ;;  %v2461_v61 = vsel %vm5390_vm7, %v4668_v38, %v2460_v20  ;;  %v3526_v2 = vpack.c.b16 %v3497_v58, %v3496_v8  ;;  %v5982_v38 = vld [vmem:[%s5204_s30 + $0x4c] sm:$0xf] }
 0x188   : > { %v1419_v56 = vadd.f32 %v1367_v35, %v1015_v60  ;;  %v3895_v48 = vunpack.c.l.b16 %v3796_v47  ;;  %v1018_v20 = vadd.f32 %v1017_v53, %v5585_v26  ;;  %v2557_v60 = vunpack.c.l.b16 %v2461_v61  ;;  %v4823_v35 = vld [vmem:[%s5204_s30 + $0x48] sm:$0xf] }
 0x189   : > { %v2558_v25 = vunpack.c.l.b16 %v2464_v3  ;;  %v3198_v9 = vshll.u32 %v5974_v7, 16  ;;  %v3799_v26 = vrot.slane %v5942_v24, 5  ;;  %v3203_v27 = vshrl.u32 %v4823_v35, 16 }
 0x18a   : > { %v3924_v8 = vpack.c.b16 %v3895_v48, %v3894_v50  ;;  %v3206_v4 = vshll.u32 %v4823_v35, 16  ;;  %v3212_v47 = vshll.u32 %v5982_v38, 16  ;;  %v3216_v61 = vshrl.u32 %v5982_v38, 16  ;;  %v5112_v48 = vld [vmem:[%s5204_s30 + $0x44] sm:$0x1] }
 0x18b   : > { %v2308_v23 = vpop.f32.mrf.mxu0  ;;  %v3200_v58 = vrot.slane %v3198_v9, 5  ;;  %v2470_v62 = vrot.slane %v5112_v48, 5  ;;  %v3802_v24 = vrot.slane %v5974_v7, 5  ;;  %v3801_v9 = vrot.slane %v3799_v26, 4  ;;  %v6009_v48 = vld [vmem:[%s5204_s30 + $0x50] sm:$0x1] }
 0x18c   : > { %v1654_v63 = vpop.f32.mrf.mxu3  ;;  %4797 = vmatmul.msk.bf16.gmra.mxu2 %vm685_vm4, %v4962_v33  ;;  %v1019_v14 = vpop.f32.mrf.mxu1  ;;  %v2586_v33 = vpack.c.b16 %v2558_v25, %v2557_v60  ;;  %v3191_v60 = vsel %vm5216_vm3, %v3186_v28, %v5965_v41  ;;  %v3208_v35 = vrot.slane %v3206_v4, 5  ;;  %v6003_v7 = vrot.slane %v3212_v47, 5 }
 0x18d   : > { %v1706_v37 = vadd.f32 %v1654_v63, %v1419_v56  ;;  %v3196_v56 = vrot.slane %v3195_v17, 4  ;;  %v3498_v41 = vunpack.c.l.b16 %v3191_v60 }
 0x18f   : > { %v1370_v34 = vpop.f32.mrf.mxu2  ;;  %v5987_v53 = vadd.f32 %v2308_v23, %v1706_v37  ;;  %v4653_v23 = vld [vmem:[%s5204_s30 + $0x3c] sm:$0xe]  ;;  %v1020_v37 = vadd.f32 %v1019_v14, %v5603_v43  ;;  %v3201_v25 = vsel %vm5216_vm3, %v3196_v56, %v3200_v58 }
 0x190   : > { %v1420_v16 = vadd.f32 %v1370_v34, %v1018_v20  ;;  %v4895_v20 = vrot.slane %v4879_v11, 9  ;;  %v3218_v11 = vrot.slane %v3216_v61, 4  ;;  %v4669_v43 = vrot.slane %v4653_v23, 9 }
 0x191   : > { %4862 = vmatmul.msk.bf16.gmra.mxu3 %vm685_vm4, %v3526_v2  ;;  %v5111_v2 = vld [vmem:[%s5204_s30 + $0x40] sm:$0xf]  ;;  %v3499_v28 = vunpack.c.l.b16 %v3201_v25 }
 0x192   : > { %v2467_v50 = vrot.slane %v5111_v2, 5  ;;  %v3800_v58 = vsel %vm5390_vm7, %v4895_v20, %v3799_v26  ;;  %v3222_v26 = vshll.u32 %v6009_v48, 16 }
 0x193   : > { %v2311_v55 = vpop.f32.mrf.mxu0  ;;  %v3527_v23 = vpack.c.b16 %v3499_v28, %v3498_v41  ;;  %v5113_v28 = vld [vmem:[%s5204_s30 + $0x4c] sm:$0xf] }
 0x194   : > { %v1657_v3 = vpop.f32.mrf.mxu3  ;;  %v1022_v63 = vpop.f32.mrf.mxu1  ;;  %v2469_v14 = vrot.slane %v2467_v50, 4 }
 0x195   : > { %v1707_v17 = vadd.f32 %v1657_v3, %v1420_v16  ;;  %v3205_v16 = vrot.slane %v3203_v27, 4  ;;  %v4963_v3 = vld [vmem:[%s5204_s30 + $0x3c] sm:$0xff] }
 0x196   : > { %4911 = vmatmul.msk.bf16.gmra.mxu0 %vm685_vm4, %v3924_v8  ;;  %v2471_v61 = vsel %vm5390_vm7, %v2469_v14, %v2470_v62  ;;  %v6028_v14 = vld [vmem:[%s5204_s30 + $0x58] sm:$0xf] }
 0x197   : > { %v1372_v34 = vpop.f32.mrf.mxu2  ;;  %4685 = vmatmul.msk.bf16.gmra.mxu1 %vm685_vm4, %v2586_v33  ;;  %v6006_v2 = vadd.f32 %v2311_v55, %v1707_v17  ;;  %v3803_v33 = vsel %vm5390_vm7, %v3801_v9, %v3802_v24  ;;  %v3209_v27 = vor.u32 %v3208_v35, %v3205_v16  ;;  %v2468_v55 = vsel %vm5390_vm7, %v4669_v43, %v2467_v50 }
 0x198   : > { %v1421_v8 = vadd.f32 %v1372_v34, %v1020_v37  ;;  %v3219_v17 = vor.u32 %v3218_v11, %v6003_v7  ;;  %v1023_v24 = vadd.f32 %v1022_v63, %v5624_v40  ;;  %v3896_v37 = vunpack.c.l.b16 %v3800_v58  ;;  %v4880_v11 = vld [vmem:[%s5204_s30 + $0x48] sm:$0xe] }
 0x199   : > { %v3897_v60 = vunpack.c.l.b16 %v3803_v33  ;;  %v2559_v9 = vunpack.c.l.b16 %v2468_v55  ;;  %v2560_v50 = vunpack.c.l.b16 %v2471_v61  ;;  %v3210_v16 = vrot.slane %v3209_v27, 4 }
 0x19a   : > { %v3220_v62 = vrot.slane %v3219_v17, 4  ;;  %v3224_v35 = vrot.slane %v3222_v26, 5  ;;  %v3806_v43 = vrot.slane %v5982_v38, 5  ;;  %v2474_v58 = vrot.slane %v5113_v28, 5  ;;  %v4654_v38 = vld [vmem:[%s5204_s30 + $0x48] sm:$0xe] }
 0x19b   : > { %v2313_v56 = vpop.f32.mrf.mxu0  ;;  %v2587_v41 = vpack.c.b16 %v2560_v50, %v2559_v9  ;;  %v4896_v61 = vrot.slane %v4880_v11, 9 }
 0x19c   : > { %v1659_v4 = vpop.f32.mrf.mxu3  ;;  %4798 = vmatmul.msk.bf16.gmra.mxu2 %vm685_vm4, %v4963_v3  ;;  %v1024_v47 = vpop.f32.mrf.mxu1  ;;  %v4826_v3 = vld [vmem:[%s5204_s30 + $0x54] sm:$0xf]  ;;  %v3225_v55 = vsel %vm5216_vm3, %v3220_v62, %v3224_v35  ;;  %v4964_v35 = vld [vmem:[%s5204_s30 + $0x48] sm:$0xff] }
 0x19d   : > { %v1708_v20 = vadd.f32 %v1659_v4, %v1421_v8  ;;  %v3925_v8 = vpack.c.b16 %v3897_v60, %v3896_v37  ;;  %v3215_v4 = vsel %vm5216_vm3, %v3210_v16, %v6003_v7  ;;  %v3227_v17 = vshrl.u32 %v4826_v3, 16  ;;  %v5114_v60 = vld [vmem:[%s5204_s30 + $0x50] sm:$0x1] }
 0x19e   : > { %v3808_v37 = vrot.slane %v3806_v43, 4  ;;  %v3809_v7 = vrot.slane %v6009_v48, 5  ;;  %v3500_v50 = vunpack.c.l.b16 %v3215_v4  ;;  %v2476_v16 = vrot.slane %v2474_v58, 4 }
 0x19f   : > { %v1375_v25 = vpop.f32.mrf.mxu2  ;;  %v6030_v40 = vadd.f32 %v2313_v56, %v1708_v20  ;;  %v3230_v56 = vshll.u32 %v4826_v3, 16  ;;  %v3236_v20 = vshll.u32 %v6028_v14, 16  ;;  %v3501_v11 = vunpack.c.l.b16 %v3225_v55 }
 0x1a0   : > { %v1422_v34 = vadd.f32 %v1375_v25, %v1023_v24  ;;  %v1025_v24 = vadd.f32 %v1024_v47, %v5639_v10  ;;  %v2477_v25 = vrot.slane %v5114_v60, 5  ;;  %v3807_v3 = vsel %vm5390_vm7, %v4896_v61, %v3806_v43 }
 0x1a1   : > { %4863 = vmatmul.msk.bf16.gmra.mxu3 %vm685_vm4, %v3527_v23  ;;  %v3240_v23 = vshrl.u32 %v6028_v14, 16  ;;  %v3229_v10 = vrot.slane %v3227_v17, 4  ;;  %v3232_v47 = vrot.slane %v3230_v56, 5  ;;  %v6051_v48 = vrot.slane %v3236_v20, 5 }
 0x1a2   : > { %v2478_v55 = vsel %vm5390_vm7, %v2476_v16, %v2477_v25  ;;  %v3898_v61 = vunpack.c.l.b16 %v3807_v3  ;;  %v4881_v3 = vld [vmem:[%s5204_s30 + $0x54] sm:$0xe] }
 0x1a3   : > { %v2316_v63 = vpop.f32.mrf.mxu0  ;;  %v3242_v28 = vrot.slane %v3240_v23, 4  ;;  %v3233_v20 = vor.u32 %v3232_v47, %v3229_v10 }
 0x1a4   : > { %v1662_v33 = vpop.f32.mrf.mxu3  ;;  %v1027_v27 = vpop.f32.mrf.mxu1 }
 0x1a5   : > { %v1709_v26 = vadd.f32 %v1662_v33, %v1422_v34  ;;  %v4670_v34 = vrot.slane %v4654_v38, 9  ;;  %v6060_v38 = vld [vmem:[%s5204_s30 + $0x5c] sm:$0x1]  ;;  %v3243_v23 = vor.u32 %v3242_v28, %v6051_v48  ;;  %v3234_v16 = vrot.slane %v3233_v20, 4 }
 0x1a6   : > { %4912 = vmatmul.msk.bf16.gmra.mxu0 %vm685_vm4, %v3925_v8 }
 0x1a7   : > { %v1377_v9 = vpop.f32.mrf.mxu2  ;;  %4686 = vmatmul.msk.bf16.gmra.mxu1 %vm685_vm4, %v2587_v41  ;;  %v6049_v8 = vadd.f32 %v2316_v63, %v1709_v26  ;;  %v3810_v41 = vsel %vm5390_vm7, %v3808_v37, %v3809_v7  ;;  %v2475_v4 = vsel %vm5390_vm7, %v4670_v34, %v2474_v58  ;;  %v3528_v63 = vpack.c.b16 %v3501_v11, %v3500_v50  ;;  %v6068_v34 = vld [vmem:[%s5204_s30 + $0x64] sm:$0xf] }
 0x1a8   : > { %v1423_v62 = vadd.f32 %v1377_v9, %v1025_v24  ;;  %v3899_v56 = vunpack.c.l.b16 %v3810_v41  ;;  %v1028_v58 = vadd.f32 %v1027_v27, %v5515_v49  ;;  %v2561_v24 = vunpack.c.l.b16 %v2475_v4  ;;  %v4829_v9 = vld [vmem:[%s5204_s30 + $0x60] sm:$0xf] }
 0x1a9   : > { %v2562_v37 = vunpack.c.l.b16 %v2478_v55  ;;  %v3246_v7 = vshll.u32 %v6060_v38, 16  ;;  %v3813_v49 = vrot.slane %v6028_v14, 5  ;;  %v3251_v47 = vshrl.u32 %v4829_v9, 16 }
 0x1aa   : > { %v3926_v50 = vpack.c.b16 %v3899_v56, %v3898_v61  ;;  %v3254_v28 = vshll.u32 %v4829_v9, 16  ;;  %v3260_v41 = vshll.u32 %v6068_v34, 16  ;;  %v3264_v4 = vshrl.u32 %v6068_v34, 16  ;;  %v5116_v56 = vld [vmem:[%s5204_s30 + $0x5c] sm:$0x1] }
 0x1ab   : > { %v2318_v33 = vpop.f32.mrf.mxu0  ;;  %v3248_v11 = vrot.slane %v3246_v7, 5  ;;  %v2484_v20 = vrot.slane %v5116_v56, 5  ;;  %v3816_v14 = vrot.slane %v6060_v38, 5  ;;  %v3815_v7 = vrot.slane %v3813_v49, 4  ;;  %v6095_v56 = vld [vmem:[%s5204_s30 + $0x68] sm:$0x1] }
 0x1ac   : > { %v1664_v43 = vpop.f32.mrf.mxu3  ;;  %4799 = vmatmul.msk.bf16.gmra.mxu2 %vm685_vm4, %v4964_v35  ;;  %v1029_v17 = vpop.f32.mrf.mxu1  ;;  %v2588_v35 = vpack.c.b16 %v2562_v37, %v2561_v24  ;;  %v3239_v24 = vsel %vm5216_vm3, %v3234_v16, %v6051_v48  ;;  %v3256_v9 = vrot.slane %v3254_v28, 5  ;;  %v6089_v38 = vrot.slane %v3260_v41, 5 }
 0x1ad   : > { %v1710_v26 = vadd.f32 %v1664_v43, %v1423_v62  ;;  %v3244_v62 = vrot.slane %v3243_v23, 4  ;;  %v3502_v48 = vunpack.c.l.b16 %v3239_v24 }
 0x1af   : > { %v1380_v60 = vpop.f32.mrf.mxu2  ;;  %v6073_v27 = vadd.f32 %v2318_v33, %v1710_v26  ;;  %v4655_v33 = vld [vmem:[%s5204_s30 + $0x54] sm:$0xe]  ;;  %v1030_v26 = vadd.f32 %v1029_v17, %v5534_v0  ;;  %v3249_v37 = vsel %vm5216_vm3, %v3244_v62, %v3248_v11 }
 0x1b0   : > { %v1424_v25 = vadd.f32 %v1380_v60, %v1028_v58  ;;  %v4897_v58 = vrot.slane %v4881_v3, 9  ;;  %v3266_v3 = vrot.slane %v3264_v4, 4  ;;  %v4671_v0 = vrot.slane %v4655_v33, 9 }
 0x1b1   : > { %4864 = vmatmul.msk.bf16.gmra.mxu3 %vm685_vm4, %v3528_v63  ;;  %v5115_v63 = vld [vmem:[%s5204_s30 + $0x58] sm:$0xf]  ;;  %v3503_v16 = vunpack.c.l.b16 %v3249_v37 }
 0x1b2   : > { %v2481_v61 = vrot.slane %v5115_v63, 5  ;;  %v3814_v11 = vsel %vm5390_vm7, %v4897_v58, %v3813_v49  ;;  %v3270_v49 = vshll.u32 %v6095_v56, 16 }
 0x1b3   : > { %v2321_v10 = vpop.f32.mrf.mxu0  ;;  %v3529_v33 = vpack.c.b16 %v3503_v16, %v3502_v48 }
 0x1b4   : > { %v1667_v55 = vpop.f32.mrf.mxu3  ;;  %v1032_v43 = vpop.f32.mrf.mxu1  ;;  %v2483_v17 = vrot.slane %v2481_v61, 4 }
 0x1b5   : > { %v1711_v23 = vadd.f32 %v1667_v55, %v1424_v25  ;;  %v3253_v25 = vrot.slane %v3251_v47, 4  ;;  %v4965_v55 = vld [vmem:[%s5204_s30 + $0x54] sm:$0xff] }
 0x1b6   : > { %4913 = vmatmul.msk.bf16.gmra.mxu0 %vm685_vm4, %v3926_v50  ;;  %v2485_v4 = vsel %vm5390_vm7, %v2483_v17, %v2484_v20  ;;  %v3272_v20 = vrot.slane %v3270_v49, 5  ;;  %v6114_v17 = vld [vmem:[%s5204_s30 + $0x70] sm:$0xf]  ;;  %v4656_v49 = vld [vmem:[%s5204_s30 + $0x60] sm:$0xe] }
 0x1b7   : > { %v1382_v60 = vpop.f32.mrf.mxu2  ;;  %4687 = vmatmul.msk.bf16.gmra.mxu1 %vm685_vm4, %v2588_v35  ;;  %v6092_v63 = vadd.f32 %v2321_v10, %v1711_v23  ;;  %v3817_v35 = vsel %vm5390_vm7, %v3815_v7, %v3816_v14  ;;  %v3257_v47 = vor.u32 %v3256_v9, %v3253_v25  ;;  %v2482_v10 = vsel %vm5390_vm7, %v4671_v0, %v2481_v61 }
 0x1b8   : > { %v1425_v50 = vadd.f32 %v1382_v60, %v1030_v26  ;;  %v3267_v23 = vor.u32 %v3266_v3, %v6089_v38  ;;  %v1033_v14 = vadd.f32 %v1032_v43, %v5555_v39  ;;  %v3900_v26 = vunpack.c.l.b16 %v3814_v11  ;;  %v4832_v3 = vld [vmem:[%s5204_s30 + $0x6c] sm:$0xf] }
 0x1b9   : > { %v3901_v24 = vunpack.c.l.b16 %v3817_v35  ;;  %v2563_v7 = vunpack.c.l.b16 %v2482_v10  ;;  %v2564_v60 = vunpack.c.l.b16 %v2485_v4  ;;  %v3258_v25 = vrot.slane %v3257_v47, 4  ;;  %v5117_v10 = vld [vmem:[%s5204_s30 + $0x64] sm:$0xf] }
 0x1ba   : > { %v3268_v9 = vrot.slane %v3267_v23, 4  ;;  %v3820_v0 = vrot.slane %v6068_v34, 5  ;;  %v2488_v4 = vrot.slane %v5117_v10, 5  ;;  %v3275_v34 = vshrl.u32 %v4832_v3, 16 }
 0x1bb   : > { %v2323_v62 = vpop.f32.mrf.mxu0  ;;  %v2589_v48 = vpack.c.b16 %v2564_v60, %v2563_v7  ;;  %v3263_v47 = vsel %vm5216_vm3, %v3258_v25, %v6089_v38  ;;  %v3823_v38 = vrot.slane %v6095_v56, 5 }
 0x1bc   : > { %v1669_v28 = vpop.f32.mrf.mxu3  ;;  %4800 = vmatmul.msk.bf16.gmra.mxu2 %vm685_vm4, %v4965_v55  ;;  %v1034_v41 = vpop.f32.mrf.mxu1  ;;  %v4882_v55 = vld [vmem:[%s5204_s30 + $0x60] sm:$0xe]  ;;  %v3504_v60 = vunpack.c.l.b16 %v3263_v47  ;;  %v6142_v47 = vld [vmem:[%s5204_s30 + $0x74] sm:$0x1] }
 0x1bd   : > { %v1712_v58 = vadd.f32 %v1669_v28, %v1425_v50  ;;  %v3927_v50 = vpack.c.b16 %v3901_v24, %v3900_v26  ;;  %v4898_v16 = vrot.slane %v4882_v55, 9  ;;  %v3273_v28 = vsel %vm5216_vm3, %v3268_v9, %v3272_v20  ;;  %v5118_v24 = vld [vmem:[%s5204_s30 + $0x68] sm:$0x1]  ;;  %v4966_v20 = vld [vmem:[%s5204_s30 + $0x60] sm:$0xff] }
 0x1be   : > { %v3822_v26 = vrot.slane %v3820_v0, 4  ;;  %v4672_v55 = vrot.slane %v4656_v49, 9 }
 0x1bf   : > { %v1385_v37 = vpop.f32.mrf.mxu2  ;;  %v6116_v39 = vadd.f32 %v2323_v62, %v1712_v58  ;;  %v3278_v62 = vshll.u32 %v4832_v3, 16  ;;  %v3284_v58 = vshll.u32 %v6114_v17, 16  ;;  %v3821_v25 = vsel %vm5390_vm7, %v4898_v16, %v3820_v0 }
 0x1c0   : > { %v1426_v61 = vadd.f32 %v1385_v37, %v1033_v14  ;;  %v1035_v14 = vadd.f32 %v1034_v41, %v5574_v6  ;;  %v2491_v37 = vrot.slane %v5118_v24, 5  ;;  %v2490_v3 = vrot.slane %v2488_v4, 4 }
 0x1c1   : > { %4865 = vmatmul.msk.bf16.gmra.mxu3 %vm685_vm4, %v3529_v33  ;;  %v3288_v33 = vshrl.u32 %v6114_v17, 16  ;;  %v3277_v6 = vrot.slane %v3275_v34, 4  ;;  %v3280_v41 = vrot.slane %v3278_v62, 5  ;;  %v6137_v56 = vrot.slane %v3284_v58, 5 }
 0x1c2   : > { %v3824_v10 = vsel %vm5390_vm7, %v3822_v26, %v3823_v38  ;;  %v3902_v16 = vunpack.c.l.b16 %v3821_v25  ;;  %v2489_v34 = vsel %vm5390_vm7, %v4672_v55, %v2488_v4  ;;  %v3294_v26 = vshll.u32 %v6142_v47, 16  ;;  %v6154_v25 = vld [vmem:[%s5204_s30 + $0x7c] sm:$0xf]  ;;  %v4883_v55 = vld [vmem:[%s5204_s30 + $0x6c] sm:$0xe] }
 0x1c3   : > { %v2326_v43 = vpop.f32.mrf.mxu0  ;;  %v3903_v62 = vunpack.c.l.b16 %v3824_v10  ;;  %v3281_v58 = vor.u32 %v3280_v41, %v3277_v6  ;;  %v2565_v24 = vunpack.c.l.b16 %v2489_v34  ;;  %v3308_v10 = vshll.u32 %v6154_v25, 16 }
 0x1c4   : > { %v1672_v11 = vpop.f32.mrf.mxu3  ;;  %v1037_v35 = vpop.f32.mrf.mxu1 }
 0x1c5   : > { %v1713_v23 = vadd.f32 %v1672_v11, %v1426_v61  ;;  %v3505_v61 = vunpack.c.l.b16 %v3273_v28  ;;  %v3290_v11 = vrot.slane %v3288_v33, 4  ;;  %v3928_v4 = vpack.c.b16 %v3903_v62, %v3902_v16  ;;  %v4657_v16 = vld [vmem:[%s5204_s30 + $0x6c] sm:$0xe] }
 0x1c6   : > { %4914 = vmatmul.msk.bf16.gmra.mxu0 %vm685_vm4, %v3927_v50 }
 0x1c7   : > { %v1387_v7 = vpop.f32.mrf.mxu2  ;;  %4688 = vmatmul.msk.bf16.gmra.mxu1 %vm685_vm4, %v2589_v48  ;;  %v6135_v50 = vadd.f32 %v2326_v43, %v1713_v23  ;;  %v3530_v0 = vpack.c.b16 %v3505_v61, %v3504_v60  ;;  %v2492_v23 = vsel %vm5390_vm7, %v2490_v3, %v2491_v37  ;;  %v3291_v33 = vor.u32 %v3290_v11, %v6137_v56  ;;  %v4835_v60 = vld [vmem:[%s5204_s30 + $0x78] sm:$0xf] }
 0x1c8   : > { %v1427_v9 = vadd.f32 %v1387_v7, %v1035_v14  ;;  %v1038_v14 = vadd.f32 %v1037_v35, %v5593_v45  ;;  %v2566_v7 = vunpack.c.l.b16 %v2492_v23  ;;  %v3282_v37 = vrot.slane %v3281_v58, 4  ;;  %v5119_v23 = vld [vmem:[%s5204_s30 + $0x70] sm:$0xf] }
 0x1c9   : > { %v3827_v45 = vrot.slane %v6114_v17, 5  ;;  %v3299_v35 = vshrl.u32 %v4835_v60, 16  ;;  %v3302_v11 = vshll.u32 %v4835_v60, 16  ;;  %v2495_v62 = vrot.slane %v5119_v23, 5 }
 0x1ca   : > { %v2590_v41 = vpack.c.b16 %v2566_v7, %v2565_v24  ;;  %v3287_v17 = vsel %vm5216_vm3, %v3282_v37, %v6137_v56  ;;  %v4673_v7 = vrot.slane %v4657_v16, 9  ;;  %v3310_v56 = vrot.slane %v3308_v10, 5 }
 0x1cb   : > { %v2328_v48 = vpop.f32.mrf.mxu0  ;;  %v3304_v60 = vrot.slane %v3302_v11, 5 }
 0x1cc   : > { %v1674_v28 = vpop.f32.mrf.mxu3  ;;  %4801 = vmatmul.msk.bf16.gmra.mxu2 %vm685_vm4, %v4966_v20  ;;  %v1039_v43 = vpop.f32.mrf.mxu1  ;;  %v3296_v20 = vrot.slane %v3294_v26, 5  ;;  %v3829_v26 = vrot.slane %v3827_v45, 4 }
 0x1cd   : > { %v1714_v49 = vadd.f32 %v1674_v28, %v1427_v9  ;;  %v3292_v9 = vrot.slane %v3291_v33, 4  ;;  %v3312_v28 = vshrl.u32 %v6154_v25, 16  ;;  %v1040_v33 = vadd.f32 %v1039_v43, %v5616_v12 }
 0x1ce   : > { %v3506_v12 = vunpack.c.l.b16 %v3287_v17 }
 0x1cf   : > { %v1390_v38 = vpop.f32.mrf.mxu2  ;;  %v6159_v3 = vadd.f32 %v2328_v48, %v1714_v49  ;;  %v4899_v48 = vrot.slane %v4883_v55, 9  ;;  %v3830_v49 = vrot.slane %v6142_v47, 5  ;;  %v4967_v55 = vld [vmem:[%s5204_s30 + $0x6c] sm:$0xff]  ;;  %v2497_v47 = vrot.slane %v2495_v62, 4 }
 0x1d0   : > { %v1428_v61 = vadd.f32 %v1390_v38, %v1038_v14  ;;  %v3297_v14 = vsel %vm5216_vm3, %v3292_v9, %v3296_v20  ;;  %v3301_v38 = vrot.slane %v3299_v35, 4  ;;  %v4837_v9 = vld [vmem:[%s5204_s30 + $0x80] sm:$0x1] }
 0x1d1   : > { %4866 = vmatmul.msk.bf16.gmra.mxu3 %vm685_vm4, %v3530_v0  ;;  %v3507_v43 = vunpack.c.l.b16 %v3297_v14  ;;  %v3828_v35 = vsel %vm5390_vm7, %v4899_v48, %v3827_v45  ;;  %v3318_v17 = vshll.u32 %v4837_v9, 16 }
 0x1d2   : > { %v3305_v11 = vor.u32 %v3304_v60, %v3301_v38 }
 0x1d3   : > { %v2331_v6 = vpop.f32.mrf.mxu0  ;;  %v3531_v45 = vpack.c.b16 %v3507_v43, %v3506_v12 }
 0x1d4   : > { %v1677_v0 = vpop.f32.mrf.mxu3  ;;  %v1042_v34 = vpop.f32.mrf.mxu1  ;;  %v3306_v60 = vrot.slane %v3305_v11, 4 }
 0x1d5   : > { %v1715_v58 = vadd.f32 %v1677_v0, %v1428_v61  ;;  %v3314_v61 = vrot.slane %v3312_v28, 4  ;;  %v5120_v0 = vld [vmem:[%s5204_s30 + $0x74] sm:$0x1]  ;;  %v1043_v48 = vadd.f32 %v1042_v34, %v5635_v59  ;;  %v6194_v34 = vld [vmem:[%s5204_s30 + $0x88] sm:$0xf] }
 0x1d6   : > { %4915 = vmatmul.msk.bf16.gmra.mxu0 %vm685_vm4, %v3928_v4  ;;  %v2498_v4 = vrot.slane %v5120_v0, 5 }
 0x1d7   : > { %v1392_v24 = vpop.f32.mrf.mxu2  ;;  %4689 = vmatmul.msk.bf16.gmra.mxu1 %vm685_vm4, %v2590_v41  ;;  %v6176_v23 = vadd.f32 %v2331_v6, %v1715_v58  ;;  %v3831_v41 = vsel %vm5390_vm7, %v3829_v26, %v3830_v49  ;;  %v2496_v6 = vsel %vm5390_vm7, %v4673_v7, %v2495_v62  ;;  %v3315_v58 = vor.u32 %v3314_v61, %v3310_v56 }
 0x1d8   : > { %v1429_v37 = vadd.f32 %v1392_v24, %v1040_v33  ;;  %v2499_v16 = vsel %vm5390_vm7, %v2497_v47, %v2498_v4  ;;  %v3904_v49 = vunpack.c.l.b16 %v3828_v35  ;;  %v3905_v14 = vunpack.c.l.b16 %v3831_v41 }
 0x1d9   : > { %v2567_v38 = vunpack.c.l.b16 %v2496_v6  ;;  %v2568_v24 = vunpack.c.l.b16 %v2499_v16  ;;  %v3834_v62 = vrot.slane %v6154_v25, 5  ;;  %v3316_v0 = vrot.slane %v3315_v58, 4  ;;  %v4658_v16 = vld [vmem:[%s5204_s30 + $0x78] sm:$0xe]  ;;  %v5121_v58 = vld [vmem:[%s5204_s30 + $0x7c] sm:$0xf] }
 0x1da   : > { %v3320_v61 = vrot.slane %v3318_v17, 5  ;;  %v3929_v47 = vpack.c.b16 %v3905_v14, %v3904_v49  ;;  %v3311_v35 = vsel %vm5216_vm3, %v3306_v60, %v3310_v56  ;;  %v3837_v41 = vrot.slane %v4837_v9, 5 }
 0x1db   : > { %v2333_v20 = vpop.f32.mrf.mxu0  ;;  %v2591_v43 = vpack.c.b16 %v2568_v24, %v2567_v38  ;;  %v3836_v25 = vrot.slane %v3834_v62, 4  ;;  %v2502_v17 = vrot.slane %v5121_v58, 5  ;;  %v3336_v49 = vshrl.u32 %v6194_v34, 16 }
 0x1dc   : > { %v1679_v10 = vpop.f32.mrf.mxu3  ;;  %4802 = vmatmul.msk.bf16.gmra.mxu2 %vm685_vm4, %v4967_v55  ;;  %v1044_v28 = vpop.f32.mrf.mxu1  ;;  %v4884_v55 = vld [vmem:[%s5204_s30 + $0x78] sm:$0xe]  ;;  %v3321_v6 = vsel %vm5216_vm3, %v3316_v0, %v3320_v61  ;;  %v3508_v9 = vunpack.c.l.b16 %v3311_v35  ;;  %v4674_v60 = vrot.slane %v4658_v16, 9  ;;  %v5122_v61 = vld [vmem:[%s5204_s30 + $0x80] sm:$0x1] }
 0x1dd   : > { %v1716_v33 = vadd.f32 %v1679_v10, %v1429_v37  ;;  %v4838_v37 = vld [vmem:[%s5204_s30 + $0x84] sm:$0xf]  ;;  %v4900_v59 = vrot.slane %v4884_v55, 9  ;;  %v1045_v56 = vadd.f32 %v1044_v28, %v5652_v32  ;;  %v3838_v24 = vsel %vm5390_vm7, %v3836_v25, %v3837_v41 }
 0x1de   : > { %v2504_v0 = vrot.slane %v2502_v17, 4  ;;  %v3907_v25 = vunpack.c.l.b16 %v3838_v24 }
 0x1df   : > { %v1395_v26 = vpop.f32.mrf.mxu2  ;;  %v6196_v4 = vadd.f32 %v2333_v20, %v1716_v33  ;;  %v3326_v20 = vshll.u32 %v4838_v37, 16  ;;  %v3332_v33 = vshll.u32 %v6194_v34, 16  ;;  %v3835_v38 = vsel %vm5390_vm7, %v4900_v59, %v3834_v62 }
 0x1e0   : > { %v1430_v7 = vadd.f32 %v1395_v26, %v1043_v48  ;;  %v3509_v26 = vunpack.c.l.b16 %v3321_v6  ;;  %v3906_v58 = vunpack.c.l.b16 %v3835_v38  ;;  %v4885_v38 = vld [vmem:[%s5204_s30 + $0x84] sm:$0xe] }
 0x1e1   : > { %4867 = vmatmul.msk.bf16.gmra.mxu3 %vm685_vm4, %v3531_v45  ;;  %v3323_v45 = vshrl.u32 %v4838_v37, 16  ;;  %v2505_v37 = vrot.slane %v5122_v61, 5  ;;  %v3328_v28 = vrot.slane %v3326_v20, 5  ;;  %v6217_v35 = vrot.slane %v3332_v33, 5  ;;  %v6231_v61 = vld [vmem:[%s5204_s30 + $0x94] sm:$0xf] }
 0x1e2   : > { %v3532_v59 = vpack.c.b16 %v3509_v26, %v3508_v9  ;;  %v3930_v24 = vpack.c.b16 %v3907_v25, %v3906_v58 }
 0x1e3   : > { %v2336_v12 = vpop.f32.mrf.mxu0  ;;  %v3325_v32 = vrot.slane %v3323_v45, 4  ;;  %v2506_v16 = vsel %vm5390_vm7, %v2504_v0, %v2505_v37  ;;  %v4901_v37 = vrot.slane %v4885_v38, 9 }
 0x1e4   : > { %v1682_v11 = vpop.f32.mrf.mxu3  ;;  %v2659_v10 = vpop.f32.mrf.mxu1  ;;  %v2570_v26 = vunpack.c.l.b16 %v2506_v16 }
 0x1e5   : > { %v1717_v48 = vadd.f32 %v1682_v11, %v1430_v7  ;;  %v4968_v7 = vld [vmem:[%s5204_s30 + $0x78] sm:$0xff]  ;;  %v4840_v11 = vld [vmem:[%s5204_s30 + $0x8c] sm:$0x1] }
 0x1e6   : > { %4916 = vmatmul.msk.bf16.gmra.mxu0 %vm685_vm4, %v3929_v47  ;;  %v3342_v33 = vshll.u32 %v4840_v11, 16 }
 0x1e7   : > { %v1397_v14 = vpop.f32.mrf.mxu2  ;;  %4690 = vmatmul.msk.bf16.gmra.mxu1 %vm685_vm4, %v2591_v43  ;;  %v6215_v47 = vadd.f32 %v2336_v12, %v1717_v48  ;;  %v3338_v43 = vrot.slane %v3336_v49, 4  ;;  %v2503_v12 = vsel %vm5390_vm7, %v4674_v60, %v2502_v17  ;;  %v3329_v48 = vor.u32 %v3328_v28, %v3325_v32 }
 0x1e8   : > { %v1431_v55 = vadd.f32 %v1397_v14, %v1045_v56  ;;  %v3841_v49 = vrot.slane %v6194_v34, 5  ;;  %v2739_v56 = vadd.f32 %v2659_v10, %v5669_v46  ;;  %v2569_v14 = vunpack.c.l.b16 %v2503_v12 }
 0x1e9   : > { %v3339_v20 = vor.u32 %v3338_v43, %v6217_v35  ;;  %v3330_v60 = vrot.slane %v3329_v48, 4  ;;  %v3344_v0 = vrot.slane %v3342_v33, 5  ;;  %v3844_v32 = vrot.slane %v4840_v11, 5  ;;  %v4659_v33 = vld [vmem:[%s5204_s30 + $0x84] sm:$0xe] }
 0x1ea   : > { %v3843_v34 = vrot.slane %v3841_v49, 4  ;;  %v2592_v28 = vpack.c.b16 %v2570_v26, %v2569_v14  ;;  %v3360_v48 = vshrl.u32 %v6231_v61, 16 }
 0x1eb   : > { %v2338_v6 = vpop.f32.mrf.mxu0  ;;  %v3335_v11 = vsel %vm5216_vm3, %v3330_v60, %v6217_v35  ;;  %v4969_v35 = vld [vmem:[%s5204_s30 + $0x84] sm:$0xff]  ;;  %v5124_v60 = vld [vmem:[%s5204_s30 + $0x8c] sm:$0x1] }
 0x1ec   : > { %v1684_v62 = vpop.f32.mrf.mxu3  ;;  %4803 = vmatmul.msk.bf16.gmra.mxu2 %vm685_vm4, %v4968_v7  ;;  %v2661_v41 = vpop.f32.mrf.mxu1  ;;  %v4841_v7 = vld [vmem:[%s5204_s30 + $0x90] sm:$0xf] }
 0x1ed   : > { %v1718_v45 = vadd.f32 %v1684_v62, %v1431_v55  ;;  %v3340_v55 = vrot.slane %v3339_v20, 4  ;;  %v3347_v43 = vshrl.u32 %v4841_v7, 16  ;;  %v3350_v58 = vshll.u32 %v4841_v7, 16 }
 0x1ee   : > { %v3356_v62 = vshll.u32 %v6231_v61, 16  ;;  %v4675_v7 = vrot.slane %v4659_v33, 9 }
 0x1ef   : > { %v2946_v9 = vpop.f32.mrf.mxu2  ;;  %v6234_v46 = vadd.f32 %v2338_v6, %v1718_v45  ;;  %v3345_v6 = vsel %vm5216_vm3, %v3340_v55, %v3344_v0  ;;  %v3842_v45 = vsel %vm5390_vm7, %v4901_v37, %v3841_v49  ;;  %v3349_v26 = vrot.slane %v3347_v43, 4  ;;  %v6259_v37 = vld [vmem:[%s6599_s2] ss:$0 sm:$0xff] }
 0x1f0   : > { %v3026_v17 = vadd.f32 %v2946_v9, %v2739_v56  ;;  %v3845_v56 = vsel %vm5390_vm7, %v3843_v34, %v3844_v32  ;;  %v2740_v9 = vadd.f32 %v2661_v41, %v5682_v42  ;;  %v3352_v38 = vrot.slane %v3350_v58, 5  ;;  %v4843_v32 = vld [vmem:[%s5204_s30 + $0x98] sm:$0x1] }
 0x1f1   : > { %4868 = vmatmul.msk.bf16.gmra.mxu3 %vm685_vm4, %v3532_v59  ;;  %v5123_v59 = vld [vmem:[%s5204_s30 + $0x88] sm:$0xf]  ;;  %v2512_v55 = vrot.slane %v5124_v60, 5  ;;  %v3362_v0 = vrot.slane %v3360_v48, 4  ;;  %v3510_v41 = vunpack.c.l.b16 %v3335_v11  ;;  %v3511_v34 = vunpack.c.l.b16 %v3345_v6  ;;  %v6272_v11 = vld [vmem:[%s6600_s3] ss:$0 sm:$0xff] }
 0x1f2   : > { %v2509_v16 = vrot.slane %v5123_v59, 5  ;;  %v3908_v43 = vunpack.c.l.b16 %v3842_v45  ;;  %v3909_v58 = vunpack.c.l.b16 %v3845_v56  ;;  %v3353_v48 = vor.u32 %v3352_v38, %v3349_v26 }
 0x1f3   : > { %v3998_v10 = vpop.f32.mrf.mxu0  ;;  %v3533_v45 = vpack.c.b16 %v3511_v34, %v3510_v41  ;;  %v3366_v56 = vshll.u32 %v4843_v32, 16 }
 0x1f4   : > { %v3600_v25 = vpop.f32.mrf.mxu3  ;;  %v2664_v12 = vpop.f32.mrf.mxu1  ;;  %v3931_v60 = vpack.c.b16 %v3909_v58, %v3908_v43 }
 0x1f5   : > { %v3680_v20 = vadd.f32 %v3600_v25, %v3026_v17  ;;  %v2511_v17 = vrot.slane %v2509_v16, 4 }
 0x1f6   : > { %4917 = vmatmul.msk.bf16.gmra.mxu0 %vm685_vm4, %v3930_v24  ;;  %v6252_v24 = vrot.slane %v3356_v62, 5 }
 0x1f7   : > { %v2948_v14 = vpop.f32.mrf.mxu2  ;;  %4691 = vmatmul.msk.bf16.gmra.mxu1 %vm685_vm4, %v2592_v28  ;;  %v4078_v49 = vadd.f32 %v3998_v10, %v3680_v20  ;;  %v2510_v10 = vsel %vm5390_vm7, %v4675_v7, %v2509_v16  ;;  %v2513_v59 = vsel %vm5390_vm7, %v2511_v17, %v2512_v55  ;;  %v3848_v16 = vrot.slane %v6231_v61, 5  ;;  %v4886_v7 = vld [vmem:[%s5204_s30 + $0x90] sm:$0xe]  ;;  %v4844_v17 = vld [vmem:[%s5204_s30 + $0x9c] sm:$0xf] }
 0x1f8   : > { %v3027_v42 = vadd.f32 %v2948_v14, %v2740_v9  ;;  %v3363_v20 = vor.u32 %v3362_v0, %v6252_v24  ;;  %v2741_v14 = vadd.f32 %v2664_v12, %v5695_v15  ;;  %v2571_v26 = vunpack.c.l.b16 %v2510_v10 }
 0x1f9   : > { %v4114_v33 = vmul.f32 %v6259_v37, %v4078_v49  ;;  %v2572_v38 = vunpack.c.l.b16 %v2513_v59  ;;  %v3354_v55 = vrot.slane %v3353_v48, 4  ;;  %v6279_v49 = vld [vmem:[%s5204_s30 + $0xa0] sm:$0xf]  ;;  %v3368_v15 = vrot.slane %v3366_v56, 5 }
 0x1fa   : > { %v3364_v0 = vrot.slane %v3363_v20, 4  ;;  %v4902_v12 = vrot.slane %v4886_v7, 9  ;;  %v3850_v34 = vrot.slane %v3848_v16, 4  ;;  %v3374_v59 = vshll.u32 %v4844_v17, 16  ;;  %v4660_v7 = vld [vmem:[%s5204_s30 + $0x90] sm:$0xe] }
 0x1fb   : > { %v4000_v28 = vpop.f32.mrf.mxu0  ;;  %v2593_v10 = vpack.c.b16 %v2572_v38, %v2571_v26  ;;  %v3380_v48 = vshll.u32 %v6279_v49, 16 }
 0x1fc   : > { %v3602_v62 = vpop.f32.mrf.mxu3  ;;  %4804 = vmatmul.msk.bf16.gmra.mxu2 %vm685_vm4, %v4969_v35  ;;  %v2666_v25 = vpop.f32.mrf.mxu1  ;;  %v3369_v26 = vsel %vm5216_vm3, %v3364_v0, %v3368_v15  ;;  %v3849_v38 = vsel %vm5390_vm7, %v4902_v12, %v3848_v16  ;;  %v4676_v0 = vrot.slane %v4660_v7, 9 }
 0x1fd   : > { %v3681_v6 = vadd.f32 %v3602_v62, %v3027_v42  ;;  %v4150_v42 = vadd.f32 %v6272_v11, %v4114_v33  ;;  %v3371_v62 = vshrl.u32 %v4844_v17, 16 }
 0x1ff   : > { %v4079_v9 = vadd.f32 %v4000_v28, %v3681_v6  ;;  %v2951_v35 = vpop.f32.mrf.mxu2  ;;  %v3851_v28 = vrot.slane %v4843_v32, 5  ;;  %v5125_v6 = vld [vmem:[%s5204_s30 + $0x94] sm:$0xf]  ;;  %v4182_v56 = vmax.f32 %v4150_v42, 0.0  ;;  %v2742_v42 = vadd.f32 %v2666_v25, %v5708_v13 }
 0x200   : > { %v3028_v61 = vadd.f32 %v2951_v35, %v2741_v14  ;;  %v3359_v35 = vsel %vm5216_vm3, %v3354_v55, %v6252_v24  ;;  %v3373_v24 = vrot.slane %v3371_v62, 4  ;;  %v3513_v62 = vunpack.c.l.b16 %v3369_v26 }
 0x201   : > { %v4115_v41 = vmul.f32 %v6259_v37, %v4079_v9  ;;  %4869 = vmatmul.msk.bf16.gmra.mxu3 %vm685_vm4, %v3533_v45  ;;  %v2516_v9 = vrot.slane %v5125_v6, 5  ;;  %v3384_v45 = vshrl.u32 %v6279_v49, 16  ;;  %v3852_v17 = vsel %vm5390_vm7, %v3850_v34, %v3851_v28 }
 0x202   : > { %v3512_v28 = vunpack.c.l.b16 %v3359_v35  ;;  %v3910_v25 = vunpack.c.l.b16 %v3849_v38 }
 0x203   : > { %v4151_v43 = vadd.f32 %v6272_v11, %v4115_v41  ;;  %v4003_v58 = vpop.f32.mrf.mxu0  ;;  %v2518_v15 = vrot.slane %v2516_v9, 4  ;;  %v3386_v16 = vrot.slane %v3384_v45, 4 }
 0x204   : > { %v3605_v20 = vpop.f32.mrf.mxu3  ;;  %v2669_v33 = vpop.f32.mrf.mxu1  ;;  %v3534_v26 = vpack.c.b16 %v3513_v62, %v3512_v28 }
 0x205   : > { %v4183_v14 = vmax.f32 %v4151_v43, 0.0  ;;  %v3682_v32 = vadd.f32 %v3605_v20, %v3028_v61  ;;  %v3376_v61 = vrot.slane %v3374_v59, 5  ;;  %v4970_v43 = vld [vmem:[%s5204_s30 + $0x90] sm:$0xff]  ;;  %v5126_v20 = vld [vmem:[%s5204_s30 + $0x98] sm:$0x1] }
 0x206   : > { %4918 = vmatmul.msk.bf16.gmra.mxu0 %vm685_vm4, %v3931_v60  ;;  %v6307_v60 = vrot.slane %v3380_v48, 5  ;;  %v2519_v6 = vrot.slane %v5126_v20, 5  ;;  %v2517_v48 = vsel %vm5390_vm7, %v4676_v0, %v2516_v9  ;;  %v4847_v9 = vld [vmem:[%s5204_s30 + $0xa8] sm:$0xf]  ;;  %v6326_v0 = vld [vmem:[%s5204_s30 + $0xac] sm:$0xf] }
 0x207   : > { %v4979_v55 = vpack.c.bf16 %v4183_v14, %v4182_v56  ;;  %v2953_v41 = vpop.f32.mrf.mxu2  ;;  %4692 = vmatmul.msk.bf16.gmra.mxu1 %vm685_vm4, %v2593_v10  ;;  %v4080_v12 = vadd.f32 %v4003_v58, %v3682_v32  ;;  %v6313_v56 = vld [vmem:[%s5204_s30 + $0xa4] sm:$0x1]  ;;  %v3911_v14 = vunpack.c.l.b16 %v3852_v17  ;;  %v3377_v45 = vor.u32 %v3376_v61, %v3373_v24 }
 0x208   : > { %v3029_v34 = vadd.f32 %v2953_v41, %v2742_v42  ;;  %v2520_v58 = vsel %vm5390_vm7, %v2518_v15, %v2519_v6  ;;  %v3387_v32 = vor.u32 %v3386_v16, %v6307_v60  ;;  %v3390_v38 = vshll.u32 %v6313_v56, 16 }
 0x209   : > { %4980 = vst [vmem:[%s6296_s21] sm:$0xff] %v4979_v55   ;;  %v4116_v35 = vmul.f32 %v6259_v37, %v4080_v12  ;;  %v2743_v55 = vadd.f32 %v2669_v33, %v5721_v57  ;;  %v2573_v41 = vunpack.c.l.b16 %v2517_v48  ;;  %v3932_v15 = vpack.c.b16 %v3911_v14, %v3910_v25 }
 0x20a   : > { %v3378_v24 = vrot.slane %v3377_v45, 4  ;;  %v3388_v61 = vrot.slane %v3387_v32, 4  ;;  %v3392_v12 = vrot.slane %v3390_v38, 5  ;;  %v3395_v57 = vshrl.u32 %v4847_v9, 16 }
 0x20b   : > { %v4005_v13 = vpop.f32.mrf.mxu0  ;;  %v4152_v20 = vadd.f32 %v6272_v11, %v4116_v35  ;;  %v3398_v33 = vshll.u32 %v4847_v9, 16  ;;  %v3404_v28 = vshll.u32 %v6326_v0, 16  ;;  %v3408_v62 = vshrl.u32 %v6326_v0, 16  ;;  %v5127_v35 = vld [vmem:[%s5204_s30 + $0xa0] sm:$0xf] }
 0x20c   : > { %v3607_v10 = vpop.f32.mrf.mxu3  ;;  %4805 = vmatmul.msk.bf16.gmra.mxu2 %vm685_vm4, %v4970_v43  ;;  %v2671_v59 = vpop.f32.mrf.mxu1  ;;  %v2574_v43 = vunpack.c.l.b16 %v2520_v58  ;;  %v3383_v45 = vsel %vm5216_vm3, %v3378_v24, %v6307_v60 }
 0x20d   : > { %v3683_v7 = vadd.f32 %v3607_v10, %v3029_v34  ;;  %v4887_v34 = vld [vmem:[%s5204_s30 + $0x9c] sm:$0xe]  ;;  %v3855_v10 = vrot.slane %v6279_v49, 5  ;;  %v3397_v49 = vrot.slane %v3395_v57, 4  ;;  %v3410_v60 = vrot.slane %v3408_v62, 4 }
 0x20e   : > { %v2594_v14 = vpack.c.b16 %v2574_v43, %v2573_v41  ;;  %v4903_v32 = vrot.slane %v4887_v34, 9  ;;  %v3400_v41 = vrot.slane %v3398_v33, 5  ;;  %v6344_v43 = vrot.slane %v3404_v28, 5  ;;  %v5128_v57 = vld [vmem:[%s5204_s30 + $0xa4] sm:$0x1] }
 0x20f   : > { %v4081_v17 = vadd.f32 %v4005_v13, %v3683_v7  ;;  %v2956_v42 = vpop.f32.mrf.mxu2  ;;  %v2523_v7 = vrot.slane %v5127_v35, 5  ;;  %v2744_v24 = vadd.f32 %v2671_v59, %v5734_v54  ;;  %v3514_v62 = vunpack.c.l.b16 %v3383_v45 }
 0x210   : > { %v3030_v16 = vadd.f32 %v2956_v42, %v2743_v55  ;;  %v3393_v55 = vsel %vm5216_vm3, %v3388_v61, %v3392_v12  ;;  %v4661_v42 = vld [vmem:[%s5204_s30 + $0x9c] sm:$0xe]  ;;  %v6350_v61 = vld [vmem:[%s5204_s30 + $0xb0] sm:$0x1]  ;;  %v3856_v54 = vsel %vm5390_vm7, %v4903_v32, %v3855_v10  ;;  %v3401_v59 = vor.u32 %v3400_v41, %v3397_v49 }
 0x211   : > { %v4117_v6 = vmul.f32 %v6259_v37, %v4081_v17  ;;  %4870 = vmatmul.msk.bf16.gmra.mxu3 %vm685_vm4, %v3534_v26  ;;  %v4184_v26 = vmax.f32 %v4152_v20, 0.0  ;;  %v4971_v12 = vld [vmem:[%s5204_s30 + $0x9c] sm:$0xff]  ;;  %v4677_v34 = vrot.slane %v4661_v42, 9 }
 0x212   : > { %v3402_v41 = vrot.slane %v3401_v59, 4  ;;  %v6381_v59 = vld [vmem:[%s5204_s30 + $0xb8] sm:$0xf] }
 0x213   : > { %v4153_v13 = vadd.f32 %v6272_v11, %v4117_v6  ;;  %v4008_v25 = vpop.f32.mrf.mxu0  ;;  %v3857_v6 = vrot.slane %v3855_v10, 4 }
 0x214   : > { %v3610_v48 = vpop.f32.mrf.mxu3  ;;  %v2674_v58 = vpop.f32.mrf.mxu1 }
 0x215   : > { %v4185_v38 = vmax.f32 %v4153_v13, 0.0  ;;  %v3684_v17 = vadd.f32 %v3610_v48, %v3030_v16  ;;  %v3858_v16 = vrot.slane %v6313_v56, 5  ;;  %v2526_v13 = vrot.slane %v5128_v57, 5 }
 0x216   : > { %4919 = vmatmul.msk.bf16.gmra.mxu0 %vm685_vm4, %v3932_v15  ;;  %v2525_v15 = vrot.slane %v2523_v7, 4  ;;  %v3515_v48 = vunpack.c.l.b16 %v3393_v55  ;;  %v3414_v56 = vshll.u32 %v6350_v61, 16  ;;  %v3912_v55 = vunpack.c.l.b16 %v3856_v54 }
 0x217   : > { %v4984_v9 = vpack.c.bf16 %v4185_v38, %v4184_v26  ;;  %v2958_v20 = vpop.f32.mrf.mxu2  ;;  %4693 = vmatmul.msk.bf16.gmra.mxu1 %vm685_vm4, %v2594_v14  ;;  %v4082_v33 = vadd.f32 %v4008_v25, %v3684_v17  ;;  %v3411_v14 = vor.u32 %v3410_v60, %v6344_v43  ;;  %v3859_v26 = vsel %vm5390_vm7, %v3857_v6, %v3858_v16 }
 0x218   : > { %v3031_v28 = vadd.f32 %v2958_v20, %v2744_v24  ;;  %v2524_v25 = vsel %vm5390_vm7, %v4677_v34, %v2523_v7  ;;  %v2527_v10 = vsel %vm5390_vm7, %v2525_v15, %v2526_v13  ;;  %v3535_v17 = vpack.c.b16 %v3515_v48, %v3514_v62 }
 0x219   : > { %5056 = vst [vmem:[%s6296_s21 + $0x8] sm:$0xff] %v4984_v9   ;;  %v4118_v45 = vmul.f32 %v6259_v37, %v4082_v33  ;;  %v3913_v49 = vunpack.c.l.b16 %v3859_v26  ;;  %v3412_v60 = vrot.slane %v3411_v14, 4  ;;  %v3416_v9 = vrot.slane %v3414_v56, 5  ;;  %v4850_v33 = vld [vmem:[%s5204_s30 + $0xb4] sm:$0xf] }
 0x21a   : > { %v2745_v20 = vadd.f32 %v2674_v58, %v5746_v31  ;;  %v2575_v16 = vunpack.c.l.b16 %v2524_v25  ;;  %v2576_v7 = vunpack.c.l.b16 %v2527_v10  ;;  %v3862_v34 = vrot.slane %v6326_v0, 5 }
 0x21b   : > { %v4010_v35 = vpop.f32.mrf.mxu0  ;;  %v4154_v15 = vadd.f32 %v6272_v11, %v4118_v45  ;;  %v3407_v0 = vsel %vm5216_vm3, %v3402_v41, %v6344_v43  ;;  %v3417_v54 = vsel %vm5216_vm3, %v3412_v60, %v3416_v9  ;;  %v3865_v26 = vrot.slane %v6350_v61, 5 }
 0x21c   : > { %v3612_v38 = vpop.f32.mrf.mxu3  ;;  %4806 = vmatmul.msk.bf16.gmra.mxu2 %vm685_vm4, %v4971_v12  ;;  %v2676_v42 = vpop.f32.mrf.mxu1  ;;  %v4888_v12 = vld [vmem:[%s5204_s30 + $0xa8] sm:$0xe]  ;;  %v2595_v48 = vpack.c.b16 %v2576_v7, %v2575_v16  ;;  %v3419_v10 = vshrl.u32 %v4850_v33, 16  ;;  %v3422_v43 = vshll.u32 %v4850_v33, 16  ;;  %v3428_v41 = vshll.u32 %v6381_v59, 16 }
 0x21d   : > { %v3685_v32 = vadd.f32 %v3612_v38, %v3031_v28  ;;  %v3933_v28 = vpack.c.b16 %v3913_v49, %v3912_v55  ;;  %v4904_v62 = vrot.slane %v4888_v12, 9  ;;  %v5129_v38 = vld [vmem:[%s5204_s30 + $0xac] sm:$0xf]  ;;  %v4186_v45 = vmax.f32 %v4154_v15, 0.0  ;;  %v4662_v55 = vld [vmem:[%s5204_s30 + $0xa8] sm:$0xe] }
 0x21e   : > { %v2530_v25 = vrot.slane %v5129_v38, 5  ;;  %v3516_v49 = vunpack.c.l.b16 %v3407_v0  ;;  %v3432_v60 = vshrl.u32 %v6381_v59, 16  ;;  %v2746_v61 = vadd.f32 %v2676_v42, %v5759_v44  ;;  %v4972_v16 = vld [vmem:[%s5204_s30 + $0xa8] sm:$0xff] }
 0x21f   : > { %v4083_v24 = vadd.f32 %v4010_v35, %v3685_v32  ;;  %v2961_v6 = vpop.f32.mrf.mxu2  ;;  %v3864_v35 = vrot.slane %v3862_v34, 4  ;;  %v4678_v12 = vrot.slane %v4662_v55, 9  ;;  %v3421_v44 = vrot.slane %v3419_v10, 4 }
 0x220   : > { %v3032_v13 = vadd.f32 %v2961_v6, %v2745_v20  ;;  %v3517_v20 = vunpack.c.l.b16 %v3417_v54  ;;  %v3863_v6 = vsel %vm5390_vm7, %v4904_v62, %v3862_v34  ;;  %v2532_v15 = vrot.slane %v2530_v25, 4  ;;  %v6401_v54 = vld [vmem:[%s5204_s30 + $0xbc] sm:$0x1] }
 0x221   : > { %v4119_v57 = vmul.f32 %v6259_v37, %v4083_v24  ;;  %4871 = vmatmul.msk.bf16.gmra.mxu3 %vm685_vm4, %v3535_v17  ;;  %v3866_v7 = vsel %vm5390_vm7, %v3864_v35, %v3865_v26  ;;  %v3424_v42 = vrot.slane %v3422_v43, 5  ;;  %v3914_v62 = vunpack.c.l.b16 %v3863_v6  ;;  %v6414_v6 = vld [vmem:[%s5204_s30 + $0xc4] sm:$0xf] }
 0x222   : > { %v3438_v55 = vshll.u32 %v6401_v54, 16 }
 0x223   : > { %v4155_v31 = vadd.f32 %v6272_v11, %v4119_v57  ;;  %v4013_v58 = vpop.f32.mrf.mxu0  ;;  %v5130_v57 = vld [vmem:[%s5204_s30 + $0xb0] sm:$0x1] }
 0x224   : > { %v3615_v14 = vpop.f32.mrf.mxu3  ;;  %v2679_v56 = vpop.f32.mrf.mxu1 }
 0x225   : > { %v4187_v32 = vmax.f32 %v4155_v31, 0.0  ;;  %v3686_v17 = vadd.f32 %v3615_v14, %v3032_v13  ;;  %v2533_v13 = vrot.slane %v5130_v57, 5  ;;  %v6398_v31 = vrot.slane %v3428_v41, 5 }
 0x226   : > { %4920 = vmatmul.msk.bf16.gmra.mxu0 %vm685_vm4, %v3933_v28  ;;  %v3915_v14 = vunpack.c.l.b16 %v3866_v7  ;;  %v2747_v41 = vadd.f32 %v2679_v56, %v5773_v30  ;;  %v3440_v57 = vrot.slane %v3438_v55, 5  ;;  %v3869_v30 = vrot.slane %v6381_v59, 5 }
 0x227   : > { %v4989_v9 = vpack.c.bf16 %v4187_v32, %v4186_v45  ;;  %v2963_v24 = vpop.f32.mrf.mxu2  ;;  %4694 = vmatmul.msk.bf16.gmra.mxu1 %vm685_vm4, %v2595_v48  ;;  %v4084_v33 = vadd.f32 %v4013_v58, %v3686_v17  ;;  %v3434_v48 = vrot.slane %v3432_v60, 4  ;;  %v2531_v58 = vsel %vm5390_vm7, %v4678_v12, %v2530_v25  ;;  %v4853_v25 = vld [vmem:[%s5204_s30 + $0xc0] sm:$0xf]  ;;  %v4889_v12 = vld [vmem:[%s5204_s30 + $0xb4] sm:$0xe] }
 0x228   : > { %v3033_v28 = vadd.f32 %v2963_v24, %v2746_v61  ;;  %v2534_v26 = vsel %vm5390_vm7, %v2532_v15, %v2533_v13  ;;  %v3536_v45 = vpack.c.b16 %v3517_v20, %v3516_v49  ;;  %v3425_v32 = vor.u32 %v3424_v42, %v3421_v44 }
 0x229   : > { %5057 = vst [vmem:[%s6296_s21 + $0x10] sm:$0xff] %v4989_v9   ;;  %v4120_v38 = vmul.f32 %v6259_v37, %v4084_v33  ;;  %v3435_v17 = vor.u32 %v3434_v48, %v6398_v31  ;;  %v2577_v9 = vunpack.c.l.b16 %v2531_v58  ;;  %v2578_v61 = vunpack.c.l.b16 %v2534_v26 }
 0x22a   : > { %v3934_v24 = vpack.c.b16 %v3915_v14, %v3914_v62  ;;  %v3426_v7 = vrot.slane %v3425_v32, 4  ;;  %v3443_v56 = vshrl.u32 %v4853_v25, 16  ;;  %v3446_v44 = vshll.u32 %v4853_v25, 16  ;;  %v5131_v62 = vld [vmem:[%s5204_s30 + $0xb8] sm:$0xf] }
 0x22b   : > { %v4015_v0 = vpop.f32.mrf.mxu0  ;;  %v3436_v15 = vrot.slane %v3435_v17, 4  ;;  %v3452_v42 = vshll.u32 %v6414_v6, 16  ;;  %v2537_v14 = vrot.slane %v5131_v62, 5  ;;  %v3456_v58 = vshrl.u32 %v6414_v6, 16  ;;  %v4973_v25 = vld [vmem:[%s5204_s30 + $0xb4] sm:$0xff] }
 0x22c   : > { %v3617_v34 = vpop.f32.mrf.mxu3  ;;  %4807 = vmatmul.msk.bf16.gmra.mxu2 %vm685_vm4, %v4972_v16  ;;  %v2681_v35 = vpop.f32.mrf.mxu1  ;;  %v4156_v16 = vadd.f32 %v6272_v11, %v4120_v38  ;;  %v3871_v17 = vrot.slane %v3869_v30, 4  ;;  %v3872_v55 = vrot.slane %v6401_v54, 5 }
 0x22d   : > { %v3687_v10 = vadd.f32 %v3617_v34, %v3033_v28  ;;  %v2596_v28 = vpack.c.b16 %v2578_v61, %v2577_v9  ;;  %v4905_v34 = vrot.slane %v4889_v12, 9  ;;  %v3441_v32 = vsel %vm5216_vm3, %v3436_v15, %v3440_v57 }
 0x22e   : > { %v4188_v26 = vmax.f32 %v4156_v16, 0.0  ;;  %v6435_v61 = vrot.slane %v3452_v42, 5  ;;  %v2539_v16 = vrot.slane %v2537_v14, 4  ;;  %v3519_v57 = vunpack.c.l.b16 %v3441_v32 }
 0x22f   : > { %v4085_v43 = vadd.f32 %v4015_v0, %v3687_v10  ;;  %v2966_v60 = vpop.f32.mrf.mxu2  ;;  %v3431_v10 = vsel %vm5216_vm3, %v3426_v7, %v6398_v31  ;;  %v3448_v31 = vrot.slane %v3446_v44, 5  ;;  %v3458_v7 = vrot.slane %v3456_v58, 4 }
 0x230   : > { %v3034_v20 = vadd.f32 %v2966_v60, %v2747_v41  ;;  %v2748_v60 = vadd.f32 %v2681_v35, %v5786_v51  ;;  %v3518_v15 = vunpack.c.l.b16 %v3431_v10  ;;  %v3870_v35 = vsel %vm5390_vm7, %v4905_v34, %v3869_v30 }
 0x231   : > { %v4121_v49 = vmul.f32 %v6259_v37, %v4085_v43  ;;  %4872 = vmatmul.msk.bf16.gmra.mxu3 %vm685_vm4, %v3536_v45  ;;  %v4663_v45 = vld [vmem:[%s5204_s30 + $0xb4] sm:$0xe]  ;;  %v3445_v43 = vrot.slane %v3443_v56, 4  ;;  %v6441_v56 = vld [vmem:[%s5204_s30 + $0xc8] sm:$0x1]  ;;  %v3459_v62 = vor.u32 %v3458_v7, %v6435_v61 }
 0x232   : > { %v3537_v30 = vpack.c.b16 %v3519_v57, %v3518_v15  ;;  %v3462_v34 = vshll.u32 %v6441_v56, 16  ;;  %v6464_v7 = vld [vmem:[%s5204_s30 + $0xd0] sm:$0xf] }
 0x233   : > { %v4157_v13 = vadd.f32 %v6272_v11, %v4121_v49  ;;  %v4018_v33 = vpop.f32.mrf.mxu0  ;;  %v5132_v49 = vld [vmem:[%s5204_s30 + $0xbc] sm:$0x1] }
 0x234   : > { %v3620_v48 = vpop.f32.mrf.mxu3  ;;  %v2684_v0 = vpop.f32.mrf.mxu1 }
 0x235   : > { %v4189_v38 = vmax.f32 %v4157_v13, 0.0  ;;  %v3688_v59 = vadd.f32 %v3620_v48, %v3034_v20  ;;  %v2540_v20 = vrot.slane %v5132_v49, 5  ;;  %v3873_v13 = vsel %vm5390_vm7, %v3871_v17, %v3872_v55 }
 0x236   : > { %4921 = vmatmul.msk.bf16.gmra.mxu0 %vm685_vm4, %v3934_v24  ;;  %v4679_v24 = vrot.slane %v4663_v45, 9  ;;  %v3449_v48 = vor.u32 %v3448_v31, %v3445_v43  ;;  %v2749_v45 = vadd.f32 %v2684_v0, %v5802_v1  ;;  %v3460_v43 = vrot.slane %v3459_v62, 4 }
 0x237   : > { %v4994_v41 = vpack.c.bf16 %v4189_v38, %v4188_v26  ;;  %v2968_v9 = vpop.f32.mrf.mxu2  ;;  %4695 = vmatmul.msk.bf16.gmra.mxu1 %vm685_vm4, %v2596_v28  ;;  %v4086_v12 = vadd.f32 %v4018_v33, %v3688_v59  ;;  %v2541_v33 = vsel %vm5390_vm7, %v2539_v16, %v2540_v20  ;;  %v3916_v38 = vunpack.c.l.b16 %v3870_v35  ;;  %v4856_v20 = vld [vmem:[%s5204_s30 + $0xcc] sm:$0xf] }
 0x238   : > { %v3035_v54 = vadd.f32 %v2968_v9, %v2748_v60  ;;  %v2538_v42 = vsel %vm5390_vm7, %v4679_v24, %v2537_v14  ;;  %v3917_v59 = vunpack.c.l.b16 %v3873_v13  ;;  %v2580_v17 = vunpack.c.l.b16 %v2541_v33 }
 0x239   : > { %5058 = vst [vmem:[%s6296_s21 + $0x18] sm:$0xff] %v4994_v41   ;;  %v4122_v58 = vmul.f32 %v6259_v37, %v4086_v12  ;;  %v2579_v14 = vunpack.c.l.b16 %v2538_v42  ;;  %v3450_v55 = vrot.slane %v3449_v48, 4  ;;  %v3464_v31 = vrot.slane %v3462_v34, 5 }
 0x23a   : > { %v3935_v24 = vpack.c.b16 %v3917_v59, %v3916_v38  ;;  %v3876_v49 = vrot.slane %v6414_v6, 5  ;;  %v4664_v6 = vld [vmem:[%s5204_s30 + $0xc0] sm:$0xe]  ;;  %v3467_v48 = vshrl.u32 %v4856_v20, 16  ;;  %v3470_v62 = vshll.u32 %v4856_v20, 16 }
 0x23b   : > { %v4020_v51 = vpop.f32.mrf.mxu0  ;;  %v4158_v41 = vadd.f32 %v6272_v11, %v4122_v58  ;;  %v2597_v16 = vpack.c.b16 %v2580_v17, %v2579_v14  ;;  %v3455_v15 = vsel %vm5216_vm3, %v3450_v55, %v6435_v61  ;;  %v3465_v33 = vsel %vm5216_vm3, %v3460_v43, %v3464_v31  ;;  %v5134_v55 = vld [vmem:[%s5204_s30 + $0xc8] sm:$0x1]  ;;  %v4858_v20 = vld [vmem:[%s5204_s30 + $0xd4] sm:$0x1] }
 0x23c   : > { %v3622_v28 = vpop.f32.mrf.mxu3  ;;  %4808 = vmatmul.msk.bf16.gmra.mxu2 %vm685_vm4, %v4973_v25  ;;  %v2686_v44 = vpop.f32.mrf.mxu1  ;;  %v4890_v25 = vld [vmem:[%s5204_s30 + $0xc0] sm:$0xe]  ;;  %v3476_v58 = vshll.u32 %v6464_v7, 16  ;;  %v3480_v61 = vshrl.u32 %v6464_v7, 16  ;;  %v3878_v59 = vrot.slane %v3876_v49, 4  ;;  %v4680_v14 = vrot.slane %v4664_v6, 9 }
 0x23d   : > { %v3689_v26 = vadd.f32 %v3622_v28, %v3035_v54  ;;  %v4906_v57 = vrot.slane %v4890_v25, 9  ;;  %v4190_v13 = vmax.f32 %v4158_v41, 0.0  ;;  %v2547_v43 = vrot.slane %v5134_v55, 5 }
 0x23e   : > { %v3469_v31 = vrot.slane %v3467_v48, 4  ;;  %v3472_v25 = vrot.slane %v3470_v62, 5  ;;  %v3486_v48 = vshll.u32 %v4858_v20, 16 }
 0x23f   : > { %v4087_v10 = vadd.f32 %v4020_v51, %v3689_v26  ;;  %v2971_v32 = vpop.f32.mrf.mxu2  ;;  %v5133_v51 = vld [vmem:[%s5204_s30 + $0xc4] sm:$0xf] }
 0x240   : > { %v3036_v9 = vadd.f32 %v2971_v32, %v2749_v45  ;;  %v2544_v35 = vrot.slane %v5133_v51, 5  ;;  %v4974_v45 = vld [vmem:[%s5204_s30 + $0xc0] sm:$0xff]  ;;  %v3520_v32 = vunpack.c.l.b16 %v3455_v15 }
 0x241   : > { %v4123_v60 = vmul.f32 %v6259_v37, %v4087_v10  ;;  %4873 = vmatmul.msk.bf16.gmra.mxu3 %vm685_vm4, %v3537_v30  ;;  %v6608_v30 = vld [vmem:[#allocation2_spill] sm:$0xff]  ;;  %v3879_v10 = vrot.slane %v6441_v56, 5 }
 0x242   : > { %v2750_v34 = vadd.f32 %v2686_v44, %v6608_v30  ;;  %v2546_v17 = vrot.slane %v2544_v35, 4  ;;  %v3877_v44 = vsel %vm5390_vm7, %v4906_v57, %v3876_v49 }
 0x243   : > { %v4159_v1 = vadd.f32 %v6272_v11, %v4123_v60  ;;  %v4023_v0 = vpop.f32.mrf.mxu0  ;;  %v3880_v56 = vsel %vm5390_vm7, %v3878_v59, %v3879_v10 }
 0x244   : > { %v3625_v12 = vpop.f32.mrf.mxu3  ;;  %v2689_v54 = vpop.f32.mrf.mxu1  ;;  %v2548_v51 = vsel %vm5390_vm7, %v2546_v17, %v2547_v43  ;;  %v4891_v43 = vld [vmem:[%s5204_s30 + $0xcc] sm:$0xe] }
 0x245   : > { %v4191_v28 = vmax.f32 %v4159_v1, 0.0  ;;  %v3690_v42 = vadd.f32 %v3625_v12, %v3036_v9  ;;  %v3521_v9 = vunpack.c.l.b16 %v3465_v33  ;;  %v3482_v1 = vrot.slane %v3480_v61, 4 }
 0x246   : > { %4922 = vmatmul.msk.bf16.gmra.mxu0 %vm685_vm4, %v3935_v24  ;;  %v3478_v24 = vrot.slane %v3476_v58, 5  ;;  %v3473_v33 = vor.u32 %v3472_v25, %v3469_v31  ;;  %v2751_v58 = vadd.f32 %v2689_v54, %v5838_v52  ;;  %v2582_v30 = vunpack.c.l.b16 %v2548_v51  ;;  %v4975_v51 = vld [vmem:[%s5204_s30 + $0xcc] sm:$0xff] }
 0x247   : > { %v4999_v26 = vpack.c.bf16 %v4191_v28, %v4190_v13  ;;  %v2973_v38 = vpop.f32.mrf.mxu2  ;;  %4696 = vmatmul.msk.bf16.gmra.mxu1 %vm685_vm4, %v2597_v16  ;;  %v4088_v41 = vadd.f32 %v4023_v0, %v3690_v42  ;;  %v2545_v0 = vsel %vm5390_vm7, %v4680_v14, %v2544_v35  ;;  %v3538_v13 = vpack.c.b16 %v3521_v9, %v3520_v32 }
 0x248   : > { %v3037_v60 = vadd.f32 %v2973_v38, %v2750_v34  ;;  %v3918_v28 = vunpack.c.l.b16 %v3877_v44  ;;  %v3919_v42 = vunpack.c.l.b16 %v3880_v56  ;;  %v3483_v6 = vor.u32 %v3482_v1, %v3478_v24 }
 0x249   : > { %5059 = vst [vmem:[%s6296_s21 + $0x20] sm:$0xff] %v4999_v26   ;;  %v4124_v49 = vmul.f32 %v6259_v37, %v4088_v41  ;;  %v2581_v26 = vunpack.c.l.b16 %v2545_v0  ;;  %v3474_v10 = vrot.slane %v3473_v33, 4  ;;  %v3488_v32 = vrot.slane %v3486_v48, 5 }
 0x24a   : > { %v3936_v59 = vpack.c.b16 %v3919_v42, %v3918_v28  ;;  %v3883_v52 = vrot.slane %v6464_v7, 5  ;;  %v4907_v1 = vrot.slane %v4891_v43, 9  ;;  %v3886_v0 = vrot.slane %v4858_v20, 5 }
 0x24b   : > { %v4025_v16 = vpop.f32.mrf.mxu0  ;;  %v4160_v35 = vadd.f32 %v6272_v11, %v4124_v49  ;;  %v2598_v55 = vpack.c.b16 %v2582_v30, %v2581_v26  ;;  %v3479_v31 = vsel %vm5216_vm3, %v3474_v10, %v3478_v24 }
 0x24c   : > { %v3627_v12 = vpop.f32.mrf.mxu3  ;;  %4809 = vmatmul.msk.bf16.gmra.mxu2 %vm685_vm4, %v4974_v45  ;;  %v2691_v15 = vpop.f32.mrf.mxu1  ;;  %v3484_v45 = vrot.slane %v3483_v6, 4  ;;  %v3884_v36 = vsel %vm5390_vm7, %v4907_v1, %v3883_v52 }
 0x24d   : > { %v3691_v57 = vadd.f32 %v3627_v12, %v3037_v60  ;;  %v4192_v60 = vmax.f32 %v4160_v35, 0.0  ;;  %v2752_v56 = vadd.f32 %v2691_v15, %v5858_v21  ;;  %v3885_v12 = vrot.slane %v3883_v52, 4 }
 0x24e   : > { %v3489_v25 = vsel %vm5216_vm3, %v3484_v45, %v3488_v32  ;;  %v3920_v48 = vunpack.c.l.b16 %v3884_v36 }
 0x24f   : > { %v4089_v62 = vadd.f32 %v4025_v16, %v3691_v57  ;;  %v2976_v61 = vpop.f32.mrf.mxu2  ;;  %v3523_v28 = vunpack.c.l.b16 %v3489_v25  ;;  %v3887_v24 = vsel %vm5390_vm7, %v3885_v12, %v3886_v0 }
 0x250   : > { %v3038_v38 = vadd.f32 %v2976_v61, %v2751_v58 }
 0x251   : > { %v4125_v34 = vmul.f32 %v6259_v37, %v4089_v62  ;;  %4874 = vmatmul.msk.bf16.gmra.mxu3 %vm685_vm4, %v3538_v13  ;;  %v3522_v13 = vunpack.c.l.b16 %v3479_v31  ;;  %v3921_v62 = vunpack.c.l.b16 %v3887_v24 }
 0x253   : > { %v4161_v14 = vadd.f32 %v6272_v11, %v4125_v34  ;;  %v4028_v17 = vpop.f32.mrf.mxu0  ;;  %v3539_v6 = vpack.c.b16 %v3523_v28, %v3522_v13  ;;  %v3937_v34 = vpack.c.b16 %v3921_v62, %v3920_v48 }
 0x254   : > { %v3630_v54 = vpop.f32.mrf.mxu3  ;;  %v2694_v41 = vpop.f32.mrf.mxu1 }
 0x255   : > { %v4193_v9 = vmax.f32 %v4161_v14, 0.0  ;;  %v3692_v44 = vadd.f32 %v3630_v54, %v3038_v38  ;;  %v2753_v61 = vadd.f32 %v2694_v41, %v5877_v29 }
 0x256   : > { %4923 = vmatmul.msk.bf16.gmra.mxu0 %vm685_vm4, %v3936_v59 }
 0x257   : > { %v5004_v16 = vpack.c.bf16 %v4193_v9, %v4192_v60  ;;  %v2978_v7 = vpop.f32.mrf.mxu2  ;;  %4697 = vmatmul.msk.bf16.gmra.mxu1 %vm685_vm4, %v2598_v55  ;;  %v4090_v49 = vadd.f32 %v4028_v17, %v3692_v44  ;;  %v6609_v55 = vld [vmem:[#allocation3_spill] sm:$0xff] }
 0x258   : > { %v3039_v57 = vadd.f32 %v2978_v7, %v2752_v56 }
 0x259   : > { %5060 = vst [vmem:[%s6296_s21 + $0x28] sm:$0xff] %v5004_v16   ;;  %v4126_v15 = vmul.f32 %v6259_v37, %v4090_v49 }
 0x25b   : > { %v4030_v42 = vpop.f32.mrf.mxu0  ;;  %v4162_v30 = vadd.f32 %v6272_v11, %v4126_v15 }
 0x25c   : > { %v3632_v33 = vpop.f32.mrf.mxu3  ;;  %4810 = vmatmul.msk.bf16.gmra.mxu2 %vm685_vm4, %v4975_v51  ;;  %v2696_v21 = vpop.f32.mrf.mxu1 }
 0x25d   : > { %v3693_v20 = vadd.f32 %v3632_v33, %v3039_v57  ;;  %v4194_v32 = vmax.f32 %v4162_v30, 0.0  ;;  %v2754_v43 = vadd.f32 %v2696_v21, %v6609_v55 }
 0x25f   : > { %v4091_v58 = vadd.f32 %v4030_v42, %v3693_v20  ;;  %v2981_v26 = vpop.f32.mrf.mxu2 }
 0x260   : > { %v3040_v35 = vadd.f32 %v2981_v26, %v2753_v61 }
 0x261   : > { %v4127_v18 = vmul.f32 %v6259_v37, %v4091_v58  ;;  %4875 = vmatmul.msk.bf16.gmra.mxu3 %vm685_vm4, %v3539_v6 }
 0x263   : > { %v4163_v38 = vadd.f32 %v6272_v11, %v4127_v18  ;;  %v4033_v59 = vpop.f32.mrf.mxu0 }
 0x264   : > { %v3635_v10 = vpop.f32.mrf.mxu3  ;;  %v2699_v45 = vpop.f32.mrf.mxu1 }
 0x265   : > { %v4195_v14 = vmax.f32 %v4163_v38, 0.0  ;;  %v3694_v17 = vadd.f32 %v3635_v10, %v3040_v35  ;;  %v2755_v16 = vadd.f32 %v2699_v45, %v5920_v5 }
 0x266   : > { %4924 = vmatmul.msk.bf16.gmra.mxu0 %vm685_vm4, %v3937_v34 }
 0x267   : > { %v5009_v29 = vpack.c.bf16 %v4195_v14, %v4194_v32  ;;  %v2983_v52 = vpop.f32.mrf.mxu2  ;;  %v4092_v54 = vadd.f32 %v4033_v59, %v3694_v17 }
 0x268   : > { %v3041_v41 = vadd.f32 %v2983_v52, %v2754_v43 }
 0x269   : > { %5061 = vst [vmem:[%s6296_s21 + $0x30] sm:$0xff] %v5009_v29   ;;  %v4128_v31 = vmul.f32 %v6259_v37, %v4092_v54 }
 0x26b   : > { %v4035_v60 = vpop.f32.mrf.mxu0  ;;  %v4164_v7 = vadd.f32 %v6272_v11, %v4128_v31 }
 0x26c   : > { %v3637_v9 = vpop.f32.mrf.mxu3  ;;  %v2701_v44 = vpop.f32.mrf.mxu1 }
 0x26d   : > { %v3695_v25 = vadd.f32 %v3637_v9, %v3041_v41  ;;  %v4196_v28 = vmax.f32 %v4164_v7, 0.0  ;;  %v2756_v33 = vadd.f32 %v2701_v44, %v5944_v22 }
 0x26f   : > { %v4093_v1 = vadd.f32 %v4035_v60, %v3695_v25  ;;  %v2986_v56 = vpop.f32.mrf.mxu2 }
 0x270   : > { %v3042_v0 = vadd.f32 %v2986_v56, %v2755_v16 }
 0x271   : > { %v4129_v12 = vmul.f32 %v6259_v37, %v4093_v1 }
 0x273   : > { %v4165_v51 = vadd.f32 %v6272_v11, %v4129_v12  ;;  %v4038_v49 = vpop.f32.mrf.mxu0 }
 0x274   : > { %v3640_v57 = vpop.f32.mrf.mxu3  ;;  %v2704_v13 = vpop.f32.mrf.mxu1 }
 0x275   : > { %v4197_v42 = vmax.f32 %v4165_v51, 0.0  ;;  %v3696_v36 = vadd.f32 %v3640_v57, %v3042_v0  ;;  %v2757_v26 = vadd.f32 %v2704_v13, %v5963_v19 }
 0x277   : > { %v5014_v24 = vpack.c.bf16 %v4197_v42, %v4196_v28  ;;  %v2988_v21 = vpop.f32.mrf.mxu2  ;;  %v4094_v5 = vadd.f32 %v4038_v49, %v3696_v36 }
 0x278   : > { %v3043_v15 = vadd.f32 %v2988_v21, %v2756_v33 }
 0x279   : > { %5062 = vst [vmem:[%s6296_s21 + $0x38] sm:$0xff] %v5014_v24   ;;  %v4130_v62 = vmul.f32 %v6259_v37, %v4094_v5 }
 0x27b   : > { %v4040_v20 = vpop.f32.mrf.mxu0  ;;  %v4166_v18 = vadd.f32 %v6272_v11, %v4130_v62 }
 0x27c   : > { %v3642_v6 = vpop.f32.mrf.mxu3  ;;  %v2706_v48 = vpop.f32.mrf.mxu1 }
 0x27d   : > { %v3697_v58 = vadd.f32 %v3642_v6, %v3043_v15  ;;  %v4198_v45 = vmax.f32 %v4166_v18, 0.0  ;;  %v2758_v29 = vadd.f32 %v2706_v48, %v5987_v53  ;;  %v6554_v6 = vld [vmem:[%s6600_s3] ss:$0 sm:$0xff] }
 0x27f   : > { %v4095_v61 = vadd.f32 %v4040_v20, %v3697_v58  ;;  %v2991_v30 = vpop.f32.mrf.mxu2 }
 0x280   : > { %v3044_v22 = vadd.f32 %v2991_v30, %v2757_v26 }
 0x281   : > { %v4131_v35 = vmul.f32 %v6259_v37, %v4095_v61 }
 0x283   : > { %v4167_v34 = vadd.f32 %v6272_v11, %v4131_v35  ;;  %v4043_v38 = vpop.f32.mrf.mxu0 }
 0x284   : > { %v3645_v59 = vpop.f32.mrf.mxu3  ;;  %v2709_v10 = vpop.f32.mrf.mxu1 }
 0x285   : > { %v4199_v32 = vmax.f32 %v4167_v34, 0.0  ;;  %v3698_v14 = vadd.f32 %v3645_v59, %v3044_v22  ;;  %v2759_v31 = vadd.f32 %v2709_v10, %v6006_v2 }
 0x287   : > { %v5019_v17 = vpack.c.bf16 %v4199_v32, %v4198_v45  ;;  %v2993_v55 = vpop.f32.mrf.mxu2  ;;  %v4096_v19 = vadd.f32 %v4043_v38, %v3698_v14 }
 0x288   : > { %v3045_v43 = vadd.f32 %v2993_v55, %v2758_v29 }
 0x289   : > { %5063 = vst [vmem:[%s6296_s21 + $0x40] sm:$0xff] %v5019_v17   ;;  %v4132_v60 = vmul.f32 %v6259_v37, %v4096_v19 }
 0x28b   : > { %v4045_v52 = vpop.f32.mrf.mxu0  ;;  %v4168_v1 = vadd.f32 %v6272_v11, %v4132_v60 }
 0x28c   : > { %v3647_v54 = vpop.f32.mrf.mxu3  ;;  %v2711_v41 = vpop.f32.mrf.mxu1 }
 0x28d   : > { %v3699_v9 = vadd.f32 %v3647_v54, %v3045_v43  ;;  %v4200_v51 = vmax.f32 %v4168_v1, 0.0  ;;  %v2760_v28 = vadd.f32 %v2711_v41, %v6030_v40 }
 0x28f   : > { %v4097_v44 = vadd.f32 %v4045_v52, %v3699_v9  ;;  %v2996_v25 = vpop.f32.mrf.mxu2 }
 0x290   : > { %v3046_v53 = vadd.f32 %v2996_v25, %v2759_v31 }
 0x291   : > { %v4133_v16 = vmul.f32 %v6259_v37, %v4097_v44  ;;  %v6547_v37 = vld [vmem:[%s6599_s2] ss:$0 sm:$0xff] }
 0x293   : > { %v4169_v56 = vadd.f32 %v6272_v11, %v4133_v16  ;;  %v4048_v7 = vpop.f32.mrf.mxu0 }
 0x294   : > { %v3650_v12 = vpop.f32.mrf.mxu3  ;;  %v2714_v0 = vpop.f32.mrf.mxu1 }
 0x295   : > { %v4201_v49 = vmax.f32 %v4169_v56, 0.0  ;;  %v3700_v57 = vadd.f32 %v3650_v12, %v3046_v53  ;;  %v2761_v20 = vadd.f32 %v2714_v0, %v6049_v8 }
 0x297   : > { %v5024_v13 = vpack.c.bf16 %v4201_v49, %v4200_v51  ;;  %v2998_v42 = vpop.f32.mrf.mxu2  ;;  %v4098_v2 = vadd.f32 %v4048_v7, %v3700_v57 }
 0x298   : > { %v3047_v36 = vadd.f32 %v2998_v42, %v2760_v28 }
 0x299   : > { %5064 = vst [vmem:[%s6296_s21 + $0x48] sm:$0xff] %v5024_v13   ;;  %v4134_v11 = vmul.f32 %v6547_v37, %v4098_v2 }
 0x29b   : > { %v4050_v24 = vpop.f32.mrf.mxu0  ;;  %v4170_v48 = vadd.f32 %v6554_v6, %v4134_v11 }
 0x29c   : > { %v3652_v33 = vpop.f32.mrf.mxu3  ;;  %v2716_v21 = vpop.f32.mrf.mxu1 }
 0x29d   : > { %v3701_v5 = vadd.f32 %v3652_v33, %v3047_v36  ;;  %v4202_v35 = vmax.f32 %v4170_v48, 0.0  ;;  %v2762_v38 = vadd.f32 %v2716_v21, %v6073_v27 }
 0x29f   : > { %v4099_v15 = vadd.f32 %v4050_v24, %v3701_v5  ;;  %v3001_v40 = vpop.f32.mrf.mxu2 }
 0x2a0   : > { %v3048_v58 = vadd.f32 %v3001_v40, %v2761_v20 }
 0x2a1   : > { %v4135_v62 = vmul.f32 %v6547_v37, %v4099_v15 }
 0x2a3   : > { %v4171_v61 = vadd.f32 %v6554_v6, %v4135_v62  ;;  %v4053_v26 = vpop.f32.mrf.mxu0 }
 0x2a4   : > { %v3655_v30 = vpop.f32.mrf.mxu3  ;;  %v2719_v18 = vpop.f32.mrf.mxu1 }
 0x2a5   : > { %v4203_v22 = vmax.f32 %v4171_v61, 0.0  ;;  %v3702_v8 = vadd.f32 %v3655_v30, %v3048_v58  ;;  %v2763_v43 = vadd.f32 %v2719_v18, %v6092_v63 }
 0x2a7   : > { %v5029_v34 = vpack.c.bf16 %v4203_v22, %v4202_v35  ;;  %v3003_v59 = vpop.f32.mrf.mxu2  ;;  %v4100_v10 = vadd.f32 %v4053_v26, %v3702_v8 }
 0x2a8   : > { %v3049_v45 = vadd.f32 %v3003_v59, %v2762_v38 }
 0x2a9   : > { %5065 = vst [vmem:[%s6296_s21 + $0x50] sm:$0xff] %v5029_v34   ;;  %v4136_v29 = vmul.f32 %v6547_v37, %v4100_v10 }
 0x2ab   : > { %v4055_v32 = vpop.f32.mrf.mxu0  ;;  %v4172_v54 = vadd.f32 %v6554_v6, %v4136_v29 }
 0x2ac   : > { %v3657_v14 = vpop.f32.mrf.mxu3  ;;  %v2721_v17 = vpop.f32.mrf.mxu1 }
 0x2ad   : > { %v3703_v55 = vadd.f32 %v3657_v14, %v3049_v45  ;;  %v4204_v25 = vmax.f32 %v4172_v54, 0.0  ;;  %v2764_v56 = vadd.f32 %v2721_v17, %v6116_v39 }
 0x2af   : > { %v4101_v19 = vadd.f32 %v4055_v32, %v3703_v55  ;;  %v3006_v52 = vpop.f32.mrf.mxu2 }
 0x2b0   : > { %v3050_v27 = vadd.f32 %v3006_v52, %v2763_v43 }
 0x2b1   : > { %v4137_v41 = vmul.f32 %v6547_v37, %v4101_v19 }
 0x2b3   : > { %v4173_v60 = vadd.f32 %v6554_v6, %v4137_v41  ;;  %v4058_v9 = vpop.f32.mrf.mxu0 }
 0x2b4   : > { %v3660_v44 = vpop.f32.mrf.mxu3  ;;  %v2724_v31 = vpop.f32.mrf.mxu1 }
 0x2b5   : > { %v4205_v1 = vmax.f32 %v4173_v60, 0.0  ;;  %v3704_v16 = vadd.f32 %v3660_v44, %v3050_v27  ;;  %v2765_v42 = vadd.f32 %v2724_v31, %v6135_v50 }
 0x2b7   : > { %v5034_v53 = vpack.c.bf16 %v4205_v1, %v4204_v25  ;;  %v3008_v7 = vpop.f32.mrf.mxu2  ;;  %v4102_v63 = vadd.f32 %v4058_v9, %v3704_v16 }
 0x2b8   : > { %v3051_v12 = vadd.f32 %v3008_v7, %v2764_v56 }
 0x2b9   : > { %5066 = vst [vmem:[%s6296_s21 + $0x58] sm:$0xff] %v5034_v53   ;;  %v4138_v57 = vmul.f32 %v6547_v37, %v4102_v63 }
 0x2bb   : > { %v4060_v0 = vpop.f32.mrf.mxu0  ;;  %v4174_v36 = vadd.f32 %v6554_v6, %v4138_v57 }
 0x2bc   : > { %v3662_v51 = vpop.f32.mrf.mxu3  ;;  %v2726_v49 = vpop.f32.mrf.mxu1 }
 0x2bd   : > { %v3705_v13 = vadd.f32 %v3662_v51, %v3051_v12  ;;  %v4206_v5 = vmax.f32 %v4174_v36, 0.0  ;;  %v2766_v62 = vadd.f32 %v2726_v49, %v6159_v3 }
 0x2bf   : > { %v4103_v28 = vadd.f32 %v4060_v0, %v3705_v13  ;;  %v3011_v2 = vpop.f32.mrf.mxu2 }
 0x2c0   : > { %v3052_v39 = vadd.f32 %v3011_v2, %v2765_v42 }
 0x2c1   : > { %v4139_v24 = vmul.f32 %v6547_v37, %v4103_v28 }
 0x2c3   : > { %v4175_v33 = vadd.f32 %v6554_v6, %v4139_v24  ;;  %v4063_v21 = vpop.f32.mrf.mxu0 }
 0x2c4   : > { %v3665_v11 = vpop.f32.mrf.mxu3  ;;  %v2729_v40 = vpop.f32.mrf.mxu1 }
 0x2c5   : > { %v4207_v15 = vmax.f32 %v4175_v33, 0.0  ;;  %v3706_v20 = vadd.f32 %v3665_v11, %v3052_v39  ;;  %v2767_v8 = vadd.f32 %v2729_v40, %v6176_v23 }
 0x2c7   : > { %v5039_v48 = vpack.c.bf16 %v4207_v15, %v4206_v5  ;;  %v3013_v58 = vpop.f32.mrf.mxu2  ;;  %v4104_v50 = vadd.f32 %v4063_v21, %v3706_v20 }
 0x2c8   : > { %v3053_v61 = vadd.f32 %v3013_v58, %v2766_v62 }
 0x2c9   : > { %5067 = vst [vmem:[%s6296_s21 + $0x60] sm:$0xff] %v5039_v48   ;;  %v4140_v18 = vmul.f32 %v6547_v37, %v4104_v50 }
 0x2cb   : > { %v4065_v26 = vpop.f32.mrf.mxu0  ;;  %v4176_v59 = vadd.f32 %v6554_v6, %v4140_v18 }
 0x2cc   : > { %v3667_v30 = vpop.f32.mrf.mxu3  ;;  %v2731_v38 = vpop.f32.mrf.mxu1 }
 0x2cd   : > { %v3707_v35 = vadd.f32 %v3667_v30, %v3053_v61  ;;  %v4208_v17 = vmax.f32 %v4176_v59, 0.0  ;;  %v2768_v43 = vadd.f32 %v2731_v38, %v6196_v4 }
 0x2cf   : > { %v4105_v22 = vadd.f32 %v4065_v26, %v3707_v35  ;;  %v3016_v34 = vpop.f32.mrf.mxu2 }
 0x2d0   : > { %v3054_v3 = vadd.f32 %v3016_v34, %v2767_v8 }
 0x2d1   : > { %v4141_v10 = vmul.f32 %v6547_v37, %v4105_v22 }
 0x2d3   : > { %v4177_v45 = vadd.f32 %v6554_v6, %v4141_v10  ;;  %v4068_v32 = vpop.f32.mrf.mxu0 }
 0x2d4   : > { %v3670_v14 = vpop.f32.mrf.mxu3  ;;  %v2734_v41 = vpop.f32.mrf.mxu1 }
 0x2d5   : > { %v4209_v29 = vmax.f32 %v4177_v45, 0.0  ;;  %v3708_v55 = vadd.f32 %v3670_v14, %v3054_v3  ;;  %v2769_v25 = vadd.f32 %v2734_v41, %v6215_v47 }
 0x2d7   : > { %v5044_v19 = vpack.c.bf16 %v4209_v29, %v4208_v17  ;;  %v3018_v52 = vpop.f32.mrf.mxu2  ;;  %v4106_v23 = vadd.f32 %v4068_v32, %v3708_v55 }
 0x2d8   : > { %v3055_v54 = vadd.f32 %v3018_v52, %v2768_v43 }
 0x2d9   : > { %5068 = vst [vmem:[%s6296_s21 + $0x68] sm:$0xff] %v5044_v19   ;;  %v4142_v9 = vmul.f32 %v6547_v37, %v4106_v23 }
 0x2db   : > { %v4070_v27 = vpop.f32.mrf.mxu0  ;;  %v4178_v16 = vadd.f32 %v6554_v6, %v4142_v9 }
 0x2dc   : > { %v3672_v60 = vpop.f32.mrf.mxu3  ;;  %v2736_v7 = vpop.f32.mrf.mxu1 }
 0x2dd   : > { %v3709_v44 = vadd.f32 %v3672_v60, %v3055_v54  ;;  %v4210_v0 = vmax.f32 %v4178_v16, 0.0  ;;  %v2770_v13 = vadd.f32 %v2736_v7, %v6234_v46 }
 0x2df   : > { %v4107_v31 = vadd.f32 %v4070_v27, %v3709_v44  ;;  %v3021_v1 = vpop.f32.mrf.mxu2 }
 0x2e0   : > { %v3056_v4 = vadd.f32 %v3021_v1, %v2769_v25 }
 0x2e1   : > { %v4143_v53 = vmul.f32 %v6547_v37, %v4107_v31 }
 0x2e3   : > { %v4179_v56 = vadd.f32 %v6554_v6, %v4143_v53  ;;  %v4073_v63 = vpop.f32.mrf.mxu0 }
 0x2e4   : > { %v3675_v12 = vpop.f32.mrf.mxu3 }
 0x2e5   : > { %v4211_v51 = vmax.f32 %v4179_v56, 0.0  ;;  %v3710_v49 = vadd.f32 %v3675_v12, %v3056_v4 }
 0x2e7   : > { %v5049_v57 = vpack.c.bf16 %v4211_v51, %v4210_v0  ;;  %v3023_v28 = vpop.f32.mrf.mxu2  ;;  %v4108_v47 = vadd.f32 %v4073_v63, %v3710_v49 }
 0x2e8   : > { %v3057_v42 = vadd.f32 %v3023_v28, %v2770_v13 }
 0x2e9   : > { %5069 = vst [vmem:[%s6296_s21 + $0x70] sm:$0xff] %v5049_v57   ;;  %v4144_v36 = vmul.f32 %v6547_v37, %v4108_v47 }
 0x2eb   : > { %v4075_v39 = vpop.f32.mrf.mxu0  ;;  %v4180_v21 = vadd.f32 %v6554_v6, %v4144_v36 }
 0x2ec   : > { %v3677_v2 = vpop.f32.mrf.mxu3 }
 0x2ed   : > { %v3711_v24 = vadd.f32 %v3677_v2, %v3057_v42  ;;  %v4212_v15 = vmax.f32 %v4180_v21, 0.0 }
 0x2ef   : > { %v4109_v33 = vadd.f32 %v4075_v39, %v3711_v24 }
 0x2f1   : > { %v4145_v11 = vmul.f32 %v6547_v37, %v4109_v33 }
 0x2f3   : > { %v4181_v5 = vadd.f32 %v6554_v6, %v4145_v11 }
 0x2f5   : > { %v4213_v20 = vmax.f32 %v4181_v5, 0.0 }
 0x2f7   : > { %v5054_v46 = vpack.c.bf16 %v4213_v20, %v4212_v15 }
 0x2f9   : > { %5070 = vst [vmem:[%s6296_s21 + $0x78] sm:$0xff] %v5054_v46  }
 0x2fa PF: > { %s14_s15 = sadd.s32 1, %s5143_s15  }
 0x2fb   : > { %p11_p4 = scmp.ge.s32.totalorder %s14_s15, 4  }
 0x2fd   :  { %13 = sbr.rel (!%p11_p4) target bundleno = 1 (0x1), region = 76 }

</bundles_post_ra>
